<compile_context>
chip_gen: v6e
topology: v6e:2x2x1
jax: 0.10.0
libtpu: 0.0.40
codegen_flags: <defaults>
</compile_context>

<pallas_src>
import functools

import jax
import jax.numpy as jnp
import numpy as np
from jax.experimental import pallas as pl
from jax.experimental.pallas import tpu as pltpu


# ----------------------------------------------------------------------------
# Exact entmax15 (sort-based) applied to the tiny [k, d_in] mask weights
# (host-side parameter folding, not part of the kernel).
# ----------------------------------------------------------------------------
def entmax15(z, axis=-1):
    z = z - jnp.max(z, axis=axis, keepdims=True)
    z = z / 2.0
    z_srt = jnp.flip(jnp.sort(z, axis=axis), axis=axis)  # descending
    n = z.shape[axis]
    rho = jnp.arange(1, n + 1, dtype=z.dtype)
    mean = jnp.cumsum(z_srt, axis=axis) / rho
    mean_sq = jnp.cumsum(z_srt**2, axis=axis) / rho
    ss = rho * (mean_sq - mean**2)
    delta = (1.0 - ss) / rho
    tau = mean - jnp.sqrt(jnp.clip(delta, 0.0, None))
    support = jnp.sum((tau <= z_srt).astype(jnp.int32), axis=axis, keepdims=True)
    tau_star = jnp.take_along_axis(tau, support - 1, axis=axis)
    return jnp.clip(z - tau_star, 0.0, None) ** 2


# ----------------------------------------------------------------------------
# Fused kernel: per block only 4 bf16 GEMMs (f32 accumulation) + VPU/XLU branch sum.
# ----------------------------------------------------------------------------
def backbone_kernel(x_ref, *args, n_layers, neg_slope, d2):
    # args = [8 * n_layers folded param refs] + [o_ref]
    n_param = 8 * n_layers
    params = args[:n_param]
    o_ref = args[n_param]

    x = x_ref[...]                              # [tb, D]  f32
    x_bf = x.astype(jnp.bfloat16)
    h = x_bf                                    # block-0 c1 input (init block: pre_out = x)
    y = None
    for li in range(n_layers):                  # small static unroll over blocks
        (wa1, wg1, sha1, shg1, waT, wgT, shaT, shgT) = params[8 * li: 8 * (li + 1)]

        # --- c1 GLU; its k-branch sum is folded into the tail weights (row tiling),
        #     so p1 stays [tb, k*d1] and feeds the tail GEMM with K = k*d1.
        a1 = jnp.dot(h, wa1[...], preferred_element_type=jnp.float32) + sha1[...]
        g1 = jnp.dot(h, wg1[...], preferred_element_type=jnp.float32) + shg1[...]
        p1 = jnp.maximum(a1, 0.0) * jax.nn.sigmoid(g1)          # f32 [tb, k*d1]

        # --- fused c2 + downsample tail: block-diagonal weights on [P1 | x].
        ht = jnp.concatenate([p1, x], axis=1).astype(jnp.bfloat16)   # [tb, k*d1 + D]
        at = jnp.dot(ht, waT[...], preferred_element_type=jnp.float32) + shaT[...]
        gt = jnp.dot(ht, wgT[...], preferred_element_type=jnp.float32) + shgT[...]
        pt = jnp.maximum(at, 0.0) * jax.nn.sigmoid(gt)          # f32 [tb, 2*k*d2]

        # --- branch sum over 2k groups of width d2 (== o2 + idn), no MXU:
        #     128-lane-aligned vreg adds, then lane-roll fold down to d2.
        width = pt.shape[1]
        s = pt[:, 0:128]
        for c in range(1, width // 128):
            s = s + pt[:, c * 128:(c + 1) * 128]
        shift = 64
        while shift >= d2:
            s = s + pltpu.roll(s, shift=shift, axis=1)
            shift //= 2
        # s[:, :d2] holds the full sum (duplicated across the 128 lanes).
        y = jnp.where(s >= 0.0, s, neg_slope * s)               # LeakyReLU, [tb, 128]
        h = y.astype(jnp.bfloat16)                              # next block's c1 input
    o_ref[...] = y                                              # lane-dense 128-wide store


def _pick_tb(B):
    """Single grid step on 1-TensorCore chips (v5e/v6e); 2 steps on v7x (2 TCs)."""
    try:
        kind = jax.devices()[0].device_kind.lower()
    except Exception:
        kind = ""
    two_core = ("v7" in kind) or ("7x" in kind)
    if two_core and B % 2 == 0 and (B // 2) % 8 == 0:
        return B // 2
    return B


def danet_backbone(x, kernel_params, *, k, d1, d2, neg_slope=0.01, tb=None):
    B, D = x.shape
    n_layers = len(kernel_params)
    assert B % 8 == 0
    assert (2 * k * d2) % 128 == 0 and 128 % d2 == 0 and d2 <= 128
    if tb is None:
        tb = _pick_tb(B)
    grid = (B // tb,)

    flat = []
    for bp in kernel_params:
        flat += [bp["wa1"], bp["wg1"], bp["sha1"], bp["shg1"],
                 bp["waT"], bp["wgT"], bp["shaT"], bp["shgT"]]

    def full_spec(a):
        nd = a.ndim
        return pl.BlockSpec(a.shape, lambda i: (0,) * nd)

    in_specs = ([pl.BlockSpec((tb, D), lambda i: (i, 0))]       # x (batch tiled)
                + [full_spec(a) for a in flat])                 # folded weights, VMEM-resident

    kernel = functools.partial(backbone_kernel, n_layers=n_layers,
                               neg_slope=neg_slope, d2=d2)

    out = pl.pallas_call(
        kernel,
        out_shape=jax.ShapeDtypeStruct((B, 128), jnp.float32),  # lane-dense output slab
        grid_spec=pltpu.PrefetchScalarGridSpec(
            num_scalar_prefetch=0,
            grid=grid,
            in_specs=in_specs,
            out_specs=pl.BlockSpec((tb, 128), lambda i: (i, 0)),
        ),
        compiler_params=pltpu.CompilerParams(
            dimension_semantics=("parallel",)),
    )(x, *flat)
    return out[:, :d2]


# ----------------------------------------------------------------------------
# Deterministic parameter construction (shapes per AbstractLayer.__init__),
# with offline folding of the entmax15 locality mask and eval-mode GBN, and
# column permutation into [a_0..a_{k-1} | g_0..g_{k-1}] halves.
# ----------------------------------------------------------------------------
def make_abstract_layer_params(key, d_in, d_out, k):
    C = 2 * k * d_out
    ks = jax.random.split(key, 6)
    mask_w = jax.random.uniform(ks[0], (k, d_in), jnp.float32)                  # LearnableLocality.weight
    conv_w = jax.random.normal(ks[1], (C, d_in), jnp.float32) / jnp.sqrt(d_in)  # grouped conv weight [C, d_in, 1]
    conv_b = jax.random.uniform(ks[2], (C,), jnp.float32, -1.0, 1.0) / jnp.sqrt(d_in)
    gamma = jax.random.uniform(ks[3], (C,), jnp.float32, 0.5, 1.5)              # GBN affine + running stats
    beta = 0.1 * jax.random.normal(ks[4], (C,), jnp.float32)
    rmean = 0.1 * jax.random.normal(ks[5], (C,), jnp.float32)
    rvar = jnp.ones((C,), jnp.float32)
    eps = 1e-5

    mask = entmax15(mask_w)                                       # [k, d_in]
    w_eff = (conv_w * jnp.repeat(mask, 2 * d_out, axis=0)).T      # fold mask -> [d_in, C]
    scale = gamma / jnp.sqrt(rvar + eps)                          # [C]
    shift = beta - rmean * scale                                  # [C]

    # Fold eval-mode GBN:  (x@w + b)*scale + shift == x@(w*scale) + (b*scale + shift)
    w_fold = w_eff * scale[None, :]                               # [d_in, C]
    sh_fold = conv_b * scale + shift                              # [C]

    # Column permutation: all "a" halves, then all "g" halves (lane-aligned groups).
    a_cols = np.concatenate([np.arange(j * 2 * d_out, j * 2 * d_out + d_out)
                             for j in range(k)])
    g_cols = np.concatenate([np.arange(j * 2 * d_out + d_out, (j + 1) * 2 * d_out)
                             for j in range(k)])

    return dict(
        # folded + permuted (f32; cast / fused further in build_block_kernel_params)
        wa=w_fold[:, a_cols], wg=w_fold[:, g_cols],
        sha=sh_fold[a_cols].reshape(1, -1), shg=sh_fold[g_cols].reshape(1, -1),
        # unfolded copies for the pure-JAX reference
        w_raw=w_eff, b=conv_b.reshape(1, C),
        scale=scale.reshape(1, C), shift=shift.reshape(1, C),
    )


def _pad_rows(w, rows):
    pad = rows - w.shape[0]
    if pad <= 0:
        return w
    return jnp.concatenate([w, jnp.zeros((pad, w.shape[1]), w.dtype)], axis=0)


def build_block_kernel_params(c1, c2, ds, *, k, d1, d2, c1_rows):
    """Kernel-ready per-block params: bf16 weights, c1 branch-sum folded into the
    row-tiled c2 weights, c2+downsample fused into one block-diagonal GEMM pair."""
    wa1 = _pad_rows(c1["wa"], c1_rows).astype(jnp.bfloat16)       # [c1_rows, k*d1]
    wg1 = _pad_rows(c1["wg"], c1_rows).astype(jnp.bfloat16)

    kd1, kd2 = k * d1, k * d2
    D = ds["wa"].shape[0]
    wa2_t = jnp.tile(c2["wa"], (k, 1))                            # S1 @ W2  (branch-sum fold)
    wg2_t = jnp.tile(c2["wg"], (k, 1))
    waT = jnp.zeros((kd1 + D, 2 * kd2), jnp.float32)
    waT = waT.at[:kd1, :kd2].set(wa2_t).at[kd1:, kd2:].set(ds["wa"])
    wgT = jnp.zeros((kd1 + D, 2 * kd2), jnp.float32)
    wgT = wgT.at[:kd1, :kd2].set(wg2_t).at[kd1:, kd2:].set(ds["wg"])
    shaT = jnp.concatenate([c2["sha"], ds["sha"]], axis=1)        # [1, 2*k*d2] f32
    shgT = jnp.concatenate([c2["shg"], ds["shg"]], axis=1)

    return dict(wa1=wa1, wg1=wg1,
                sha1=c1["sha"], shg1=c1["shg"],
                waT=waT.astype(jnp.bfloat16), wgT=wgT.astype(jnp.bfloat16),
                shaT=shaT, shgT=shgT)


# ----------------------------------------------------------------------------
# Pure-JAX reference (original, unfolded / unpermuted math) for correctness.
# ----------------------------------------------------------------------------
def _abstract_layer_ref(x, p, k, d_out):
    t = x @ p["w_raw"] + p["b"]
    t = t * p["scale"] + p["shift"]
    acc = jnp.zeros((x.shape[0], d_out), jnp.float32)
    for j in range(k):
        a = t[:, j * 2 * d_out: j * 2 * d_out + d_out]
        g = t[:, j * 2 * d_out + d_out: (j + 1) * 2 * d_out]
        acc = acc + jax.nn.relu(a) * jax.nn.sigmoid(g)
    return acc


def basic_block_ref(x, pre, bp, k, d1, d2, neg_slope=0.01):
    o = _abstract_layer_ref(pre, bp["c1"], k, d1)
    o = _abstract_layer_ref(o, bp["c2"], k, d2)
    idn = _abstract_layer_ref(x, bp["ds"], k, d2)
    y = o + idn
    return jnp.where(y >= 0, y, neg_slope * y)


# ----------------------------------------------------------------------------
if __name__ == "__main__":
    # DANetBackbone config (small, consistent with the module):
    n_continuous_features = 16
    cat_embedding_dims = [(3, 4), (5, 4), (10, 8)]       # sum emb = 16
    D = n_continuous_features + sum(d for _, d in cat_embedding_dims)  # input_dim = 32
    n_layers = 2
    abstlay_dim_1, abstlay_dim_2 = 32, 64
    k = 5
    B = 128                                              # batch

    key = jax.random.PRNGKey(0)
    keys = jax.random.split(key, 1 + 3 * n_layers)
    x = jax.random.normal(keys[0], (B, D), jnp.float32)  # backbone input (already embedded)

    blocks, kparams = [], []
    idx = 1
    for li in range(n_layers):
        conv1_in = D if li == 0 else abstlay_dim_2       # init layer vs subsequent layers
        c1 = make_abstract_layer_params(keys[idx + 0], conv1_in, abstlay_dim_1, k)
        c2 = make_abstract_layer_params(keys[idx + 1], abstlay_dim_1, abstlay_dim_2, k)
        ds = make_abstract_layer_params(keys[idx + 2], D, abstlay_dim_2, k)  # downsample path
        blocks.append(dict(c1=c1, c2=c2, ds=ds))
        # Blocks after the first consume the kernel's 128-wide duplicated output slab,
        # so zero-pad their c1 rows to 128 (only rows [0:d2] carry weight).
        c1_rows = D if li == 0 else 128
        kparams.append(build_block_kernel_params(c1, c2, ds, k=k,
                                                 d1=abstlay_dim_1, d2=abstlay_dim_2,
                                                 c1_rows=c1_rows))
        idx += 3

    # Fused backbone forward in ONE pallas_call:
    # out = init_layer(x); for layer in layers: out = layer(x, pre_out=out)
    out = danet_backbone(x, kparams, k=k, d1=abstlay_dim_1, d2=abstlay_dim_2)
    out = jax.block_until_ready(out)

    # Reference (unfused, unfolded, all-f32)
    ref = basic_block_ref(x, x, blocks[0], k, abstlay_dim_1, abstlay_dim_2)
    for bp in blocks[1:]:
        ref = basic_block_ref(x, ref, bp, k, abstlay_dim_1, abstlay_dim_2)

    assert out.shape == (B, abstlay_dim_2)
    # Tolerance accounts for bf16 GEMM operands (f32 accumulation) through 2 blocks.
    np.testing.assert_allclose(np.asarray(out), np.asarray(ref), rtol=3e-2, atol=3e-2)
    print("KERNEL_OK")
</pallas_src>

<mosaic_0001>
module attributes {stable_mosaic.version = 11 : i64} {
  func.func @backbone_kernel(%arg0: i32, %arg1: memref<128x32xf32, #tpu.memory_space<vmem>>, %arg2: memref<32x160xbf16, #tpu.memory_space<vmem>>, %arg3: memref<32x160xbf16, #tpu.memory_space<vmem>>, %arg4: memref<1x160xf32, #tpu.memory_space<vmem>>, %arg5: memref<1x160xf32, #tpu.memory_space<vmem>>, %arg6: memref<192x640xbf16, #tpu.memory_space<vmem>>, %arg7: memref<192x640xbf16, #tpu.memory_space<vmem>>, %arg8: memref<1x640xf32, #tpu.memory_space<vmem>>, %arg9: memref<1x640xf32, #tpu.memory_space<vmem>>, %arg10: memref<128x160xbf16, #tpu.memory_space<vmem>>, %arg11: memref<128x160xbf16, #tpu.memory_space<vmem>>, %arg12: memref<1x160xf32, #tpu.memory_space<vmem>>, %arg13: memref<1x160xf32, #tpu.memory_space<vmem>>, %arg14: memref<192x640xbf16, #tpu.memory_space<vmem>>, %arg15: memref<192x640xbf16, #tpu.memory_space<vmem>>, %arg16: memref<1x640xf32, #tpu.memory_space<vmem>>, %arg17: memref<1x640xf32, #tpu.memory_space<vmem>>, %arg18: memref<128x128xf32, #tpu.memory_space<vmem>>) attributes {dimension_semantics = [#tpu.dimension_semantics<parallel>], iteration_bounds = array<i64: 1>, scalar_prefetch = 0 : i64, scratch_operands = 0 : i64, tpu.core_type = #tpu.core_type<tc>, window_params = [{transform_indices = @transform_0, window_bounds = array<i64: 128, 32>}, {pipeline_mode = #tpu.pipeline_mode<synchronous>, transform_indices = @transform_1, window_bounds = array<i64: 32, 160>}, {pipeline_mode = #tpu.pipeline_mode<synchronous>, transform_indices = @transform_2, window_bounds = array<i64: 32, 160>}, {pipeline_mode = #tpu.pipeline_mode<synchronous>, transform_indices = @transform_3, window_bounds = array<i64: 1, 160>}, {pipeline_mode = #tpu.pipeline_mode<synchronous>, transform_indices = @transform_4, window_bounds = array<i64: 1, 160>}, {pipeline_mode = #tpu.pipeline_mode<synchronous>, transform_indices = @transform_5, window_bounds = array<i64: 192, 640>}, {pipeline_mode = #tpu.pipeline_mode<synchronous>, transform_indices = @transform_6, window_bounds = array<i64: 192, 640>}, {pipeline_mode = #tpu.pipeline_mode<synchronous>, transform_indices = @transform_7, window_bounds = array<i64: 1, 640>}, {pipeline_mode = #tpu.pipeline_mode<synchronous>, transform_indices = @transform_8, window_bounds = array<i64: 1, 640>}, {pipeline_mode = #tpu.pipeline_mode<synchronous>, transform_indices = @transform_9, window_bounds = array<i64: 128, 160>}, {pipeline_mode = #tpu.pipeline_mode<synchronous>, transform_indices = @transform_10, window_bounds = array<i64: 128, 160>}, {pipeline_mode = #tpu.pipeline_mode<synchronous>, transform_indices = @transform_11, window_bounds = array<i64: 1, 160>}, {pipeline_mode = #tpu.pipeline_mode<synchronous>, transform_indices = @transform_12, window_bounds = array<i64: 1, 160>}, {pipeline_mode = #tpu.pipeline_mode<synchronous>, transform_indices = @transform_13, window_bounds = array<i64: 192, 640>}, {pipeline_mode = #tpu.pipeline_mode<synchronous>, transform_indices = @transform_14, window_bounds = array<i64: 192, 640>}, {pipeline_mode = #tpu.pipeline_mode<synchronous>, transform_indices = @transform_15, window_bounds = array<i64: 1, 640>}, {pipeline_mode = #tpu.pipeline_mode<synchronous>, transform_indices = @transform_16, window_bounds = array<i64: 1, 640>}, {transform_indices = @transform_17, window_bounds = array<i64: 128, 128>}]} {
    %c0 = arith.constant 0 : index
    %c0_0 = arith.constant 0 : index
    %0 = vector.load %arg1[%c0, %c0_0] : memref<128x32xf32, #tpu.memory_space<vmem>>, vector<128x32xf32>
    %1 = arith.truncf %0 : vector<128x32xf32> to vector<128x32xbf16>
    %c0_1 = arith.constant 0 : index
    %c0_2 = arith.constant 0 : index
    %2 = vector.load %arg2[%c0_1, %c0_2] : memref<32x160xbf16, #tpu.memory_space<vmem>>, vector<32x160xbf16>
    %cst = arith.constant dense<0.000000e+00> : vector<128x160xf32>
    %3 = tpu.matmul %1, %2, %cst {dimension_numbers = #tpu.dot_dimension_numbers<[1], [0], [0], [1], [0, 0, 1, 1], [], []>} : vector<128x32xbf16>, vector<32x160xbf16>, vector<128x160xf32> -> vector<128x160xf32>
    %c0_3 = arith.constant 0 : index
    %c0_4 = arith.constant 0 : index
    %4 = vector.load %arg4[%c0_3, %c0_4] : memref<1x160xf32, #tpu.memory_space<vmem>>, vector<1x160xf32>
    %5 = vector.broadcast %4 : vector<1x160xf32> to vector<128x160xf32>
    %6 = arith.addf %3, %5 : vector<128x160xf32>
    %c0_5 = arith.constant 0 : index
    %c0_6 = arith.constant 0 : index
    %7 = vector.load %arg3[%c0_5, %c0_6] : memref<32x160xbf16, #tpu.memory_space<vmem>>, vector<32x160xbf16>
    %cst_7 = arith.constant dense<0.000000e+00> : vector<128x160xf32>
    %8 = tpu.matmul %1, %7, %cst_7 {dimension_numbers = #tpu.dot_dimension_numbers<[1], [0], [0], [1], [0, 0, 1, 1], [], []>} : vector<128x32xbf16>, vector<32x160xbf16>, vector<128x160xf32> -> vector<128x160xf32>
    %c0_8 = arith.constant 0 : index
    %c0_9 = arith.constant 0 : index
    %9 = vector.load %arg5[%c0_8, %c0_9] : memref<1x160xf32, #tpu.memory_space<vmem>>, vector<1x160xf32>
    %10 = vector.broadcast %9 : vector<1x160xf32> to vector<128x160xf32>
    %11 = arith.addf %8, %10 : vector<128x160xf32>
    %cst_10 = arith.constant 0.000000e+00 : f32
    %12 = vector.broadcast %cst_10 : f32 to vector<128x160xf32>
    %13 = arith.maximumf %6, %12 : vector<128x160xf32>
    %14 = arith.negf %11 : vector<128x160xf32>
    %15 = math.exp %14 : vector<128x160xf32>
    %cst_11 = arith.constant 1.000000e+00 : f32
    %16 = vector.broadcast %cst_11 : f32 to vector<128x160xf32>
    %17 = arith.addf %16, %15 : vector<128x160xf32>
    %18 = arith.divf %16, %17 : vector<128x160xf32>
    %19 = arith.mulf %13, %18 : vector<128x160xf32>
    %20 = tpu.concatenate %19, %0 in 1 : vector<128x160xf32>, vector<128x32xf32> -> vector<128x192xf32>
    %21 = arith.truncf %20 : vector<128x192xf32> to vector<128x192xbf16>
    %c0_12 = arith.constant 0 : index
    %c0_13 = arith.constant 0 : index
    %22 = vector.load %arg6[%c0_12, %c0_13] : memref<192x640xbf16, #tpu.memory_space<vmem>>, vector<192x640xbf16>
    %cst_14 = arith.constant dense<0.000000e+00> : vector<128x640xf32>
    %23 = tpu.matmul %21, %22, %cst_14 {dimension_numbers = #tpu.dot_dimension_numbers<[1], [0], [0], [1], [0, 0, 1, 1], [], []>} : vector<128x192xbf16>, vector<192x640xbf16>, vector<128x640xf32> -> vector<128x640xf32>
    %c0_15 = arith.constant 0 : index
    %c0_16 = arith.constant 0 : index
    %24 = vector.load %arg8[%c0_15, %c0_16] : memref<1x640xf32, #tpu.memory_space<vmem>>, vector<1x640xf32>
    %25 = vector.broadcast %24 : vector<1x640xf32> to vector<128x640xf32>
    %26 = arith.addf %23, %25 : vector<128x640xf32>
    %c0_17 = arith.constant 0 : index
    %c0_18 = arith.constant 0 : index
    %27 = vector.load %arg7[%c0_17, %c0_18] : memref<192x640xbf16, #tpu.memory_space<vmem>>, vector<192x640xbf16>
    %cst_19 = arith.constant dense<0.000000e+00> : vector<128x640xf32>
    %28 = tpu.matmul %21, %27, %cst_19 {dimension_numbers = #tpu.dot_dimension_numbers<[1], [0], [0], [1], [0, 0, 1, 1], [], []>} : vector<128x192xbf16>, vector<192x640xbf16>, vector<128x640xf32> -> vector<128x640xf32>
    %c0_20 = arith.constant 0 : index
    %c0_21 = arith.constant 0 : index
    %29 = vector.load %arg9[%c0_20, %c0_21] : memref<1x640xf32, #tpu.memory_space<vmem>>, vector<1x640xf32>
    %30 = vector.broadcast %29 : vector<1x640xf32> to vector<128x640xf32>
    %31 = arith.addf %28, %30 : vector<128x640xf32>
    %cst_22 = arith.constant 0.000000e+00 : f32
    %32 = vector.broadcast %cst_22 : f32 to vector<128x640xf32>
    %33 = arith.maximumf %26, %32 : vector<128x640xf32>
    %34 = arith.negf %31 : vector<128x640xf32>
    %35 = math.exp %34 : vector<128x640xf32>
    %cst_23 = arith.constant 1.000000e+00 : f32
    %36 = vector.broadcast %cst_23 : f32 to vector<128x640xf32>
    %37 = arith.addf %36, %35 : vector<128x640xf32>
    %38 = arith.divf %36, %37 : vector<128x640xf32>
    %39 = arith.mulf %33, %38 : vector<128x640xf32>
    %40 = vector.extract_strided_slice %39 {offsets = [0, 0], sizes = [128, 128], strides = [1, 1]} : vector<128x640xf32> to vector<128x128xf32>
    %41 = vector.extract_strided_slice %39 {offsets = [0, 128], sizes = [128, 128], strides = [1, 1]} : vector<128x640xf32> to vector<128x128xf32>
    %42 = arith.addf %40, %41 : vector<128x128xf32>
    %43 = vector.extract_strided_slice %39 {offsets = [0, 256], sizes = [128, 128], strides = [1, 1]} : vector<128x640xf32> to vector<128x128xf32>
    %44 = arith.addf %42, %43 : vector<128x128xf32>
    %45 = vector.extract_strided_slice %39 {offsets = [0, 384], sizes = [128, 128], strides = [1, 1]} : vector<128x640xf32> to vector<128x128xf32>
    %46 = arith.addf %44, %45 : vector<128x128xf32>
    %47 = vector.extract_strided_slice %39 {offsets = [0, 512], sizes = [128, 128], strides = [1, 1]} : vector<128x640xf32> to vector<128x128xf32>
    %48 = arith.addf %46, %47 : vector<128x128xf32>
    %c64_i32 = arith.constant 64 : i32
    %49 = tpu.dynamic_rotate %48 by %c64_i32 dim 1 : vector<128x128xf32>, i32 -> vector<128x128xf32>
    %50 = arith.addf %48, %49 : vector<128x128xf32>
    %cst_24 = arith.constant 0.000000e+00 : f32
    %51 = vector.broadcast %cst_24 : f32 to vector<128x128xf32>
    %52 = arith.cmpf oge, %50, %51 : vector<128x128xf32>
    %cst_25 = arith.constant 0.00999999977 : f32
    %53 = vector.broadcast %cst_25 : f32 to vector<128x128xf32>
    %54 = arith.mulf %53, %50 : vector<128x128xf32>
    %55 = arith.select %52, %50, %54 : vector<128x128xi1>, vector<128x128xf32>
    %56 = arith.truncf %55 : vector<128x128xf32> to vector<128x128xbf16>
    %c0_26 = arith.constant 0 : index
    %c0_27 = arith.constant 0 : index
    %57 = vector.load %arg10[%c0_26, %c0_27] : memref<128x160xbf16, #tpu.memory_space<vmem>>, vector<128x160xbf16>
    %cst_28 = arith.constant dense<0.000000e+00> : vector<128x160xf32>
    %58 = tpu.matmul %56, %57, %cst_28 {dimension_numbers = #tpu.dot_dimension_numbers<[1], [0], [0], [1], [0, 0, 1, 1], [], []>} : vector<128x128xbf16>, vector<128x160xbf16>, vector<128x160xf32> -> vector<128x160xf32>
    %c0_29 = arith.constant 0 : index
    %c0_30 = arith.constant 0 : index
    %59 = vector.load %arg12[%c0_29, %c0_30] : memref<1x160xf32, #tpu.memory_space<vmem>>, vector<1x160xf32>
    %60 = vector.broadcast %59 : vector<1x160xf32> to vector<128x160xf32>
    %61 = arith.addf %58, %60 : vector<128x160xf32>
    %c0_31 = arith.constant 0 : index
    %c0_32 = arith.constant 0 : index
    %62 = vector.load %arg11[%c0_31, %c0_32] : memref<128x160xbf16, #tpu.memory_space<vmem>>, vector<128x160xbf16>
    %cst_33 = arith.constant dense<0.000000e+00> : vector<128x160xf32>
    %63 = tpu.matmul %56, %62, %cst_33 {dimension_numbers = #tpu.dot_dimension_numbers<[1], [0], [0], [1], [0, 0, 1, 1], [], []>} : vector<128x128xbf16>, vector<128x160xbf16>, vector<128x160xf32> -> vector<128x160xf32>
    %c0_34 = arith.constant 0 : index
    %c0_35 = arith.constant 0 : index
    %64 = vector.load %arg13[%c0_34, %c0_35] : memref<1x160xf32, #tpu.memory_space<vmem>>, vector<1x160xf32>
    %65 = vector.broadcast %64 : vector<1x160xf32> to vector<128x160xf32>
    %66 = arith.addf %63, %65 : vector<128x160xf32>
    %cst_36 = arith.constant 0.000000e+00 : f32
    %67 = vector.broadcast %cst_36 : f32 to vector<128x160xf32>
    %68 = arith.maximumf %61, %67 : vector<128x160xf32>
    %69 = arith.negf %66 : vector<128x160xf32>
    %70 = math.exp %69 : vector<128x160xf32>
    %cst_37 = arith.constant 1.000000e+00 : f32
    %71 = vector.broadcast %cst_37 : f32 to vector<128x160xf32>
    %72 = arith.addf %71, %70 : vector<128x160xf32>
    %73 = arith.divf %71, %72 : vector<128x160xf32>
    %74 = arith.mulf %68, %73 : vector<128x160xf32>
    %75 = tpu.concatenate %74, %0 in 1 : vector<128x160xf32>, vector<128x32xf32> -> vector<128x192xf32>
    %76 = arith.truncf %75 : vector<128x192xf32> to vector<128x192xbf16>
    %c0_38 = arith.constant 0 : index
    %c0_39 = arith.constant 0 : index
    %77 = vector.load %arg14[%c0_38, %c0_39] : memref<192x640xbf16, #tpu.memory_space<vmem>>, vector<192x640xbf16>
    %cst_40 = arith.constant dense<0.000000e+00> : vector<128x640xf32>
    %78 = tpu.matmul %76, %77, %cst_40 {dimension_numbers = #tpu.dot_dimension_numbers<[1], [0], [0], [1], [0, 0, 1, 1], [], []>} : vector<128x192xbf16>, vector<192x640xbf16>, vector<128x640xf32> -> vector<128x640xf32>
    %c0_41 = arith.constant 0 : index
    %c0_42 = arith.constant 0 : index
    %79 = vector.load %arg16[%c0_41, %c0_42] : memref<1x640xf32, #tpu.memory_space<vmem>>, vector<1x640xf32>
    %80 = vector.broadcast %79 : vector<1x640xf32> to vector<128x640xf32>
    %81 = arith.addf %78, %80 : vector<128x640xf32>
    %c0_43 = arith.constant 0 : index
    %c0_44 = arith.constant 0 : index
    %82 = vector.load %arg15[%c0_43, %c0_44] : memref<192x640xbf16, #tpu.memory_space<vmem>>, vector<192x640xbf16>
    %cst_45 = arith.constant dense<0.000000e+00> : vector<128x640xf32>
    %83 = tpu.matmul %76, %82, %cst_45 {dimension_numbers = #tpu.dot_dimension_numbers<[1], [0], [0], [1], [0, 0, 1, 1], [], []>} : vector<128x192xbf16>, vector<192x640xbf16>, vector<128x640xf32> -> vector<128x640xf32>
    %c0_46 = arith.constant 0 : index
    %c0_47 = arith.constant 0 : index
    %84 = vector.load %arg17[%c0_46, %c0_47] : memref<1x640xf32, #tpu.memory_space<vmem>>, vector<1x640xf32>
    %85 = vector.broadcast %84 : vector<1x640xf32> to vector<128x640xf32>
    %86 = arith.addf %83, %85 : vector<128x640xf32>
    %cst_48 = arith.constant 0.000000e+00 : f32
    %87 = vector.broadcast %cst_48 : f32 to vector<128x640xf32>
    %88 = arith.maximumf %81, %87 : vector<128x640xf32>
    %89 = arith.negf %86 : vector<128x640xf32>
    %90 = math.exp %89 : vector<128x640xf32>
    %cst_49 = arith.constant 1.000000e+00 : f32
    %91 = vector.broadcast %cst_49 : f32 to vector<128x640xf32>
    %92 = arith.addf %91, %90 : vector<128x640xf32>
    %93 = arith.divf %91, %92 : vector<128x640xf32>
    %94 = arith.mulf %88, %93 : vector<128x640xf32>
    %95 = vector.extract_strided_slice %94 {offsets = [0, 0], sizes = [128, 128], strides = [1, 1]} : vector<128x640xf32> to vector<128x128xf32>
    %96 = vector.extract_strided_slice %94 {offsets = [0, 128], sizes = [128, 128], strides = [1, 1]} : vector<128x640xf32> to vector<128x128xf32>
    %97 = arith.addf %95, %96 : vector<128x128xf32>
    %98 = vector.extract_strided_slice %94 {offsets = [0, 256], sizes = [128, 128], strides = [1, 1]} : vector<128x640xf32> to vector<128x128xf32>
    %99 = arith.addf %97, %98 : vector<128x128xf32>
    %100 = vector.extract_strided_slice %94 {offsets = [0, 384], sizes = [128, 128], strides = [1, 1]} : vector<128x640xf32> to vector<128x128xf32>
    %101 = arith.addf %99, %100 : vector<128x128xf32>
    %102 = vector.extract_strided_slice %94 {offsets = [0, 512], sizes = [128, 128], strides = [1, 1]} : vector<128x640xf32> to vector<128x128xf32>
    %103 = arith.addf %101, %102 : vector<128x128xf32>
    %c64_i32_50 = arith.constant 64 : i32
    %104 = tpu.dynamic_rotate %103 by %c64_i32_50 dim 1 : vector<128x128xf32>, i32 -> vector<128x128xf32>
    %105 = arith.addf %103, %104 : vector<128x128xf32>
    %cst_51 = arith.constant 0.000000e+00 : f32
    %106 = vector.broadcast %cst_51 : f32 to vector<128x128xf32>
    %107 = arith.cmpf oge, %105, %106 : vector<128x128xf32>
    %cst_52 = arith.constant 0.00999999977 : f32
    %108 = vector.broadcast %cst_52 : f32 to vector<128x128xf32>
    %109 = arith.mulf %108, %105 : vector<128x128xf32>
    %110 = arith.select %107, %105, %109 : vector<128x128xi1>, vector<128x128xf32>
    %c0_53 = arith.constant 0 : index
    %c0_54 = arith.constant 0 : index
    %111 = vector.load %arg18[%c0_53, %c0_54] : memref<128x128xf32, #tpu.memory_space<vmem>>, vector<128x128xf32>
    tpu.vector_store %arg18[%c0_53, %c0_54], %110 {strides = array<i32>} : memref<128x128xf32, #tpu.memory_space<vmem>>, vector<128x128xf32>,
    return
  }
  func.func @transform_0(%arg0: i32) -> (i32, i32) {
    %c0_i32 = arith.constant 0 : i32
    %c0_i32_0 = arith.constant 0 : i32
    return %arg0, %c0_i32 : i32, i32
  }
  func.func @transform_1(%arg0: i32) -> (i32, i32) {
    %c0_i32 = arith.constant 0 : i32
    %c0_i32_0 = arith.constant 0 : i32
    %c0_i32_1 = arith.constant 0 : i32
    return %c0_i32, %c0_i32_0 : i32, i32
  }
  func.func @transform_2(%arg0: i32) -> (i32, i32) {
    %c0_i32 = arith.constant 0 : i32
    %c0_i32_0 = arith.constant 0 : i32
    %c0_i32_1 = arith.constant 0 : i32
    return %c0_i32, %c0_i32_0 : i32, i32
  }
  func.func @transform_3(%arg0: i32) -> (i32, i32) {
    %c0_i32 = arith.constant 0 : i32
    %c0_i32_0 = arith.constant 0 : i32
    %c0_i32_1 = arith.constant 0 : i32
    return %c0_i32, %c0_i32_0 : i32, i32
  }
  func.func @transform_4(%arg0: i32) -> (i32, i32) {
    %c0_i32 = arith.constant 0 : i32
    %c0_i32_0 = arith.constant 0 : i32
    %c0_i32_1 = arith.constant 0 : i32
    return %c0_i32, %c0_i32_0 : i32, i32
  }
  func.func @transform_5(%arg0: i32) -> (i32, i32) {
    %c0_i32 = arith.constant 0 : i32
    %c0_i32_0 = arith.constant 0 : i32
    %c0_i32_1 = arith.constant 0 : i32
    return %c0_i32, %c0_i32_0 : i32, i32
  }
  func.func @transform_6(%arg0: i32) -> (i32, i32) {
    %c0_i32 = arith.constant 0 : i32
    %c0_i32_0 = arith.constant 0 : i32
    %c0_i32_1 = arith.constant 0 : i32
    return %c0_i32, %c0_i32_0 : i32, i32
  }
  func.func @transform_7(%arg0: i32) -> (i32, i32) {
    %c0_i32 = arith.constant 0 : i32
    %c0_i32_0 = arith.constant 0 : i32
    %c0_i32_1 = arith.constant 0 : i32
    return %c0_i32, %c0_i32_0 : i32, i32
  }
  func.func @transform_8(%arg0: i32) -> (i32, i32) {
    %c0_i32 = arith.constant 0 : i32
    %c0_i32_0 = arith.constant 0 : i32
    %c0_i32_1 = arith.constant 0 : i32
    return %c0_i32, %c0_i32_0 : i32, i32
  }
  func.func @transform_9(%arg0: i32) -> (i32, i32) {
    %c0_i32 = arith.constant 0 : i32
    %c0_i32_0 = arith.constant 0 : i32
    %c0_i32_1 = arith.constant 0 : i32
    return %c0_i32, %c0_i32_0 : i32, i32
  }
  func.func @transform_10(%arg0: i32) -> (i32, i32) {
    %c0_i32 = arith.constant 0 : i32
    %c0_i32_0 = arith.constant 0 : i32
    %c0_i32_1 = arith.constant 0 : i32
    return %c0_i32, %c0_i32_0 : i32, i32
  }
  func.func @transform_11(%arg0: i32) -> (i32, i32) {
    %c0_i32 = arith.constant 0 : i32
    %c0_i32_0 = arith.constant 0 : i32
    %c0_i32_1 = arith.constant 0 : i32
    return %c0_i32, %c0_i32_0 : i32, i32
  }
  func.func @transform_12(%arg0: i32) -> (i32, i32) {
    %c0_i32 = arith.constant 0 : i32
    %c0_i32_0 = arith.constant 0 : i32
    %c0_i32_1 = arith.constant 0 : i32
    return %c0_i32, %c0_i32_0 : i32, i32
  }
  func.func @transform_13(%arg0: i32) -> (i32, i32) {
    %c0_i32 = arith.constant 0 : i32
    %c0_i32_0 = arith.constant 0 : i32
    %c0_i32_1 = arith.constant 0 : i32
    return %c0_i32, %c0_i32_0 : i32, i32
  }
  func.func @transform_14(%arg0: i32) -> (i32, i32) {
    %c0_i32 = arith.constant 0 : i32
    %c0_i32_0 = arith.constant 0 : i32
    %c0_i32_1 = arith.constant 0 : i32
    return %c0_i32, %c0_i32_0 : i32, i32
  }
  func.func @transform_15(%arg0: i32) -> (i32, i32) {
    %c0_i32 = arith.constant 0 : i32
    %c0_i32_0 = arith.constant 0 : i32
    %c0_i32_1 = arith.constant 0 : i32
    return %c0_i32, %c0_i32_0 : i32, i32
  }
  func.func @transform_16(%arg0: i32) -> (i32, i32) {
    %c0_i32 = arith.constant 0 : i32
    %c0_i32_0 = arith.constant 0 : i32
    %c0_i32_1 = arith.constant 0 : i32
    return %c0_i32, %c0_i32_0 : i32, i32
  }
  func.func @transform_17(%arg0: i32) -> (i32, i32) {
    %c0_i32 = arith.constant 0 : i32
    %c0_i32_0 = arith.constant 0 : i32
    return %arg0, %c0_i32 : i32, i32
  }
}

</mosaic_0001>

<bundles_post_ra>
// kernel: tpu_custom_call.1
= control target key start
LH: loop header
LB: loop body
LE: loop exit
PB: predicated region body
PF: predicated region fallthrough
CT: control target
= control target key end

     0   :  { %s11517_s0 = inlined_call_operand.vmem [shape: f32[128,32], index: 0, kind: input, shape index: {}]   ;;  %s11518_s1 = inlined_call_operand.hbm [shape: bf16[32,160], index: 1, kind: input, shape index: {}]   ;;  %s11519_s2 = inlined_call_operand.hbm [shape: bf16[32,160], index: 2, kind: input, shape index: {}]   ;;  %s11520_s3 = inlined_call_operand.vmem [shape: f32[1,160], index: 3, kind: input, shape index: {}]   ;;  %s11521_s4 = inlined_call_operand.vmem [shape: f32[1,160], index: 4, kind: input, shape index: {}]   ;;  %s11522_s5 = inlined_call_operand.vmem [shape: bf16[192,640], index: 5, kind: input, shape index: {}]   ;;  %s11523_s6 = inlined_call_operand.hbm [shape: bf16[192,640], index: 6, kind: input, shape index: {}]   ;;  %s11524_s7 = inlined_call_operand.vmem [shape: f32[1,640], index: 7, kind: input, shape index: {}]   ;;  %s11525_s8 = inlined_call_operand.vmem [shape: f32[1,640], index: 8, kind: input, shape index: {}]   ;;  %s11526_s9 = inlined_call_operand.vmem [shape: bf16[128,160], index: 9, kind: input, shape index: {}]   ;;  %s11527_s10 = inlined_call_operand.vmem [shape: bf16[128,160], index: 10, kind: input, shape index: {}]   ;;  %s11528_s11 = inlined_call_operand.vmem [shape: f32[1,160], index: 11, kind: input, shape index: {}]   ;;  %s11529_s12 = inlined_call_operand.vmem [shape: f32[1,160], index: 12, kind: input, shape index: {}]   ;;  %s11530_s13 = inlined_call_operand.hbm [shape: bf16[192,640], index: 13, kind: input, shape index: {}]   ;;  %s11531_s14 = inlined_call_operand.hbm [shape: bf16[192,640], index: 14, kind: input, shape index: {}]   ;;  %s11532_s15 = inlined_call_operand.vmem [shape: f32[1,640], index: 15, kind: input, shape index: {}]   ;;  %s11533_s16 = inlined_call_operand.vmem [shape: f32[1,640], index: 16, kind: input, shape index: {}]   ;;  %s11534_s17 = inlined_call_operand.hbm [shape: f32[128,128], index: 17, kind: output, shape index: {}]  }
   0x1   :  { %11600 = sst [smem:[#allocation83_spill]] %s11517_s0 }
   0x2   :  { %11601 = sst [smem:[#allocation84_spill]] %s11518_s1 }
   0x3   :  { %22 = vsyncpa [#allocation3], 0 }
   0x4   :  { %23 = vsyncpa [#allocation6], 0 }
   0x5   :  { %24 = vsyncpa [#allocation9], 0 }
   0x6   :  { %25 = vsyncpa [#allocation4], 0  ;;  %s8272_s24 = smov [#allocation5]  }
   0x7   :  { %s45_s25 = sshll.u32 %s8272_s24, 4  ;;  %s46_s25 = int_to_ptr.vmem [resolvable:$true] %s45_s25 }
   0x8   :  { %s8152_s26 = scalar_lea.vmem %s46_s25, 512  ;;  %p8157_p1 = scmp.lt.s32.totalorder %s46_s25, %s46_s25 }
   0x9   :  { %p8153_p0 = scmp.ne.s32.totalorder %s46_s25, %s8152_s26  ;;  %p8158_p2 = scmp.lt.s32.totalorder %s8152_s26, %s8152_s26 }
   0xb   :  { %p8159_p3 = por %p8158_p2, %p8157_p1 }
   0xd   :  { %p8160_p4 = pnand %p8159_p3, %p8153_p0 }
   0xf   :  { %8163 = shalt.err (!%p8160_p4)
}
  0x10   :  { %s8273_s27 = smov 128   ;;  %s8274_s28 = smov 8  }
  0x11   :  { %51 = dma.hbm_to_vmem [thread:$0]  %s11519_s2, 512, %s46_s25, [#allocation6], %s8273_s27, %s8273_s27, %s8274_s28  }
  0x12   :  { %s8275_s30 = smov [#allocation8]   ;;  %s8276_s19 = smov [#allocation2]  }
  0x13   :  { %s87_s18 = sshll.u32 %s8275_s30, 4  ;;  %s33_s1 = sshll.u32 %s8276_s19, 4  ;;  %s88_s18 = int_to_ptr.vmem [resolvable:$true] %s87_s18  ;;  %s34_s1 = int_to_ptr.vmem [resolvable:$true] %s33_s1 }
  0x14   :  { %s8172_s20 = scalar_lea.vmem %s88_s18, 7680  ;;  %p8177_p6 = scmp.lt.s32.totalorder %s88_s18, %s88_s18 }
  0x15   :  { %p8173_p5 = scmp.ne.s32.totalorder %s88_s18, %s8172_s20  ;;  %p8178_p7 = scmp.lt.s32.totalorder %s8172_s20, %s8172_s20 }
  0x17   :  { %p8179_p8 = por %p8178_p7, %p8177_p6 }
  0x19   :  { %p8180_p9 = pnand %p8179_p8, %p8173_p5 }
  0x1b   :  { %8183 = shalt.err (!%p8180_p9)
}
  0x1c   :  { %s8277_s21 = smov 320   ;;  %s8278_s22 = smov 20  }
  0x1d   :  { %93 = dma.hbm_to_vmem [thread:$0]  %s11530_s13, 7680, %s88_s18, [#allocation9], %s8277_s21, %s8277_s21, %s8278_s22  }
  0x1e   :  { %s8192_s2 = scalar_lea.vmem %s34_s1, 512  ;;  %p8197_p11 = scmp.lt.s32.totalorder %s34_s1, %s34_s1 }
  0x1f   :  { %p8193_p10 = scmp.ne.s32.totalorder %s34_s1, %s8192_s2  ;;  %p8198_p12 = scmp.lt.s32.totalorder %s8192_s2, %s8192_s2 }
  0x21   :  { %p8199_p13 = por %p8198_p12, %p8197_p11 }
  0x23   :  { %p8200_p0 = pnand %p8199_p13, %p8193_p10 }
  0x25   :  { %8203 = shalt.err (!%p8200_p0)
}
  0x26   :  { %s11602_s29 = sld [smem:[#allocation84_spill]]  ;;  %s8279_s0 = smov [#allocation7]  }
  0x27   :  { %s63_s30 = sshll.u32 %s8279_s0, 4  ;;  %s8280_s19 = smov [#allocation10]   ;;  %s64_s30 = int_to_ptr.vmem [resolvable:$true] %s63_s30 }
  0x28   :  { %s99_s13 = sshll.u32 %s8280_s19, 4  ;;  %s8212_s18 = scalar_lea.vmem %s64_s30, 7680  ;;  %s100_s13 = int_to_ptr.vmem [resolvable:$true] %s99_s13 }
  0x29   :  { %p8213_p1 = scmp.ne.s32.totalorder %s64_s30, %s8212_s18  ;;  %p8217_p2 = scmp.lt.s32.totalorder %s64_s30, %s64_s30 }
  0x2a   :  { %p8218_p3 = scmp.lt.s32.totalorder %s8212_s18, %s8212_s18 }
  0x2c   :  { %39 = dma.hbm_to_vmem [thread:$0]  %s11602_s29, 512, %s34_s1, [#allocation3], %s8273_s27, %s8273_s27, %s8274_s28  }
  0x2d   :  { %p8219_p4 = por %p8218_p3, %p8217_p2 }
  0x2f   :  { %p8220_p5 = pnand %p8219_p4, %p8213_p1 }
  0x31   :  { %8223 = shalt.err (!%p8220_p5)
}
  0x32   :  { %69 = dma.hbm_to_vmem [thread:$0]  %s11523_s6, 7680, %s64_s30, [#allocation6], %s8277_s21, %s8277_s21, %s8278_s22  }
  0x33   :  { %s8232_s1 = scalar_lea.vmem %s100_s13, 7680  ;;  %p8237_p7 = scmp.lt.s32.totalorder %s100_s13, %s100_s13 }
  0x34   :  { %p8233_p6 = scmp.ne.s32.totalorder %s100_s13, %s8232_s1  ;;  %p8238_p8 = scmp.lt.s32.totalorder %s8232_s1, %s8232_s1 }
  0x36   :  { %p8239_p9 = por %p8238_p8, %p8237_p7 }
  0x38   :  { %p8240_p10 = pnand %p8239_p9, %p8233_p6 }
  0x3a   :  { %8243 = shalt.err (!%p8240_p10)
}
  0x3b   :  { %105 = dma.hbm_to_vmem [thread:$0]  %s11531_s14, 7680, %s100_s13, [#allocation9], %s8277_s21, %s8277_s21, %s8278_s22  }
  0x3c   :  { %8264 = dma.done.wait [#allocation3], 512  }
  0x3d   :  { %8265 = vsyncadd [#allocation3], 4294966784 }
  0x3e   :  { %8266 = dma.done.wait [#allocation6], 8192  }
  0x3f   :  { %8267 = vsyncadd [#allocation6], 4294959104 }
  0x40   :  { %8268 = dma.done.wait [#allocation9], 15360  }
  0x41   :  { %8269 = vsyncadd [#allocation9], 4294951936  ;;  %v11552_v0 = vmov 0   ;;  %v6852_v1 = vld [vmem:[#allocation5 + $0x14] ss:$8 sps:$4 sm:$0xff]   ;;  %s11603_s26 = sld [smem:[#allocation83_spill]] }
  0x42   :  { %392 = vmatprep.mubr.bf16.mxu1 %v11552_v0  ;;  %243 = vmatprep.mubr.bf16.mxu0 %v11552_v0  ;;  %v6854_v2 = vld [vmem:[#allocation5 + $0x10] ss:$8 sps:$4 sm:$0xff]   ;;  %v6855_v3 = vld [vmem:[#allocation5 + $0x4] ss:$8 sps:$4 sm:$0xff]   ;;  %v6857_v4 = vld [vmem:[#allocation5] ss:$8 sps:$4 sm:$0xff]  }
  0x43   :  { %372 = vmatprep.subr.bf16.mxu1 %v6852_v1  ;;  %v6858_v9 = vld [vmem:[#allocation2 + $0x14] ss:$8 sps:$4 sm:$0xff]   ;;  %v6860_v13 = vld [vmem:[#allocation2 + $0x10] ss:$8 sps:$4 sm:$0xff]   ;;  %v6861_v15 = vld [vmem:[#allocation2 + $0x4] ss:$8 sps:$4 sm:$0xff]  }
  0x44   :  { %373 = vmatpush1.bf16.msra.mxu1 %v6854_v2  ;;  %223 = vmatprep.subr.bf16.mxu0 %v6858_v9  ;;  %s8282_s23 = smov 32   ;;  %vm186_vm0 = vcmask 261120   ;;  %v6863_v18 = vld [vmem:[#allocation2] ss:$8 sps:$4 sm:$0xff]   ;;  %v6864_v29 = vld [vmem:[%s11522_s5 + $0x118] ss:$20 sps:$4 sm:$0xff]  }
  0x45   :  { %374 = vmatprep.subr.bf16.mxu1 %v6855_v3  ;;  %224 = vmatpush1.bf16.msra.mxu0 %v6860_v13  ;;  %v6866_v30 = vld [vmem:[%s11522_s5 + $0x11c] ss:$20 sps:$4 sm:$0xff]   ;;  %v6867_v32 = vld [vmem:[%s11522_s5 + $0x120] ss:$20 sps:$4 sm:$0xff]   ;;  %v6869_v34 = vld [vmem:[%s11522_s5 + $0x124] ss:$20 sps:$4 sm:$0xff]  }
  0x46   :  { %225 = vmatprep.subr.bf16.mxu0 %v6861_v15  ;;  %v6872_v38 = vld [vmem:[%s11522_s5 + $0xf4] ss:$20 sps:$4 sm:$0xff]   ;;  %v6870_v39 = vld [vmem:[%s11522_s5 + $0xf0] ss:$20 sps:$4 sm:$0xff]   ;;  %v6873_v40 = vld [vmem:[%s11522_s5 + $0xf8] ss:$20 sps:$4 sm:$0xff]  }
  0x47   :  { %v126_v5 = vld [vmem:[%s11603_s26] sm:$0xff]  ;;  %v127_v6 = vld [vmem:[%s11603_s26 + $0x8] sm:$0xff]  ;;  %v128_v7 = vld [vmem:[%s11603_s26 + $0x10] sm:$0xff]  ;;  %vm1236_vm1 = vcmask 523264   ;;  %s8283_s22 = smov 64  }
  0x48   :  { %v129_v8 = vld [vmem:[%s11603_s26 + $0x18] sm:$0xff]  ;;  %v6812_v10 = vpack.i.bf16 %v127_v6, %v126_v5  ;;  %v8422_v11 = vld [vmem:[%s11603_s26 + $0x20] sm:$0xff]  ;;  %v8427_v12 = vld [vmem:[%s11603_s26 + $0x28] sm:$0xff]  ;;  %v142_v14 = vpack.c.bf16 %v127_v6, %v126_v5  ;;  %375 = vmatpush1.bf16.msra.mxu1 %v6857_v4 }
  0x49   :  { %v6817_v16 = vpack.i.bf16 %v129_v8, %v128_v7  ;;  %v6822_v17 = vpack.i.bf16 %v8427_v12, %v8422_v11  ;;  %v8435_v19 = vld [vmem:[%s11603_s26 + $0x30] sm:$0xff]  ;;  %v8440_v20 = vld [vmem:[%s11603_s26 + $0x38] sm:$0xff]  ;;  %v8448_v22 = vld [vmem:[%s11603_s26 + $0x40] sm:$0xff]  ;;  %226 = vmatpush1.bf16.msra.mxu0 %v6863_v18  ;;  %v143_v35 = vpack.c.bf16 %v129_v8, %v128_v7  ;;  %1374 = vmatprep.subr.bf16.mxu1 %v6869_v34 }
  0x4a   :  { %6813 = vrot.lane.b32.xlu0 %v6812_v10, %s8282_s23  ;;  %v6827_v21 = vpack.i.bf16 %v8440_v20, %v8435_v19  ;;  %v8453_v23 = vld [vmem:[%s11603_s26 + $0x48] sm:$0xff]  ;;  %v8459_v24 = vld [vmem:[%s11603_s26 + $0x50] sm:$0xff]  ;;  %v8464_v25 = vld [vmem:[%s11603_s26 + $0x58] sm:$0xff]  ;;  %1261 = vmatprep.subr.bf16.mxu0 %v6866_v30  ;;  %v144_v49 = vpack.c.bf16 %v8427_v12, %v8422_v11  ;;  %v145_v50 = vpack.c.bf16 %v8440_v20, %v8435_v19 }
  0x4b   :  { %6823 = vrot.lane.b32.xlu1 %v6822_v17, %s8282_s23  ;;  %6199 = vmatmul.mubr.msk.bf16.vlgmr.msra.gmra.mxu1 %vm186_vm0, %v142_v14  ;;  %v6832_v26 = vpack.i.bf16 %v8453_v23, %v8448_v22  ;;  %v8473_v27 = vld [vmem:[%s11603_s26 + $0x60] sm:$0xff]  ;;  %v8478_v28 = vld [vmem:[%s11603_s26 + $0x68] sm:$0xff]  ;;  %v6837_v31 = vpack.i.bf16 %v8464_v25, %v8459_v24  ;;  %v8495_v33 = vld [vmem:[%s11603_s26 + $0x70] sm:$0xff]  ;;  %v146_v51 = vpack.c.bf16 %v8453_v23, %v8448_v22 }
  0x4c   :  { %402 = vmatprep.mubr.bf16.mxu1 %v11552_v0  ;;  %6187 = vmatmul.mubr.msk.bf16.vlgmr.msra.gmra.mxu0 %vm186_vm0, %v142_v14  ;;  %v141_v36 = vld [vmem:[%s11603_s26 + $0x78] sm:$0xff]  ;;  %v6842_v37 = vpack.i.bf16 %v8478_v28, %v8473_v27  ;;  %v6878_v43 = vld [vmem:[%s11522_s5 + $0xcc] ss:$20 sps:$4 sm:$0xff]   ;;  %v6881_v44 = vld [vmem:[%s11522_s5 + $0xd4] ss:$20 sps:$4 sm:$0xff]   ;;  %v147_v52 = vpack.c.bf16 %v8464_v25, %v8459_v24  ;;  %v148_v53 = vpack.c.bf16 %v8478_v28, %v8473_v27  ;;  %v156_v27 = vlaneseq }
  0x4d   :  { %253 = vmatprep.mubr.bf16.mxu0 %v11552_v0  ;;  %1262 = vmatpush1.bf16.msra.mxu0 %v6864_v29  ;;  %v6847_v41 = vpack.i.bf16 %v141_v36, %v8495_v33  ;;  %v6875_v42 = vld [vmem:[%s11522_s5 + $0xfc] ss:$20 sps:$4 sm:$0xff]   ;;  %v6884_v47 = vld [vmem:[%s11522_s5 + $0xa4] ss:$20 sps:$4 sm:$0xff]   ;;  %v6882_v48 = vld [vmem:[%s11522_s5 + $0xa0] ss:$20 sps:$4 sm:$0xff]   ;;  %v149_v54 = vpack.c.bf16 %v141_v36, %v8495_v33 }
  0x4e   :  { %6818 = vrot.lane.b32.xlu0 %v6817_v16, %s8282_s23  ;;  %1375 = vmatpush1.bf16.msra.mxu1 %v6867_v32  ;;  %v6876_v45 = vld [vmem:[%s11522_s5 + $0xc8] ss:$20 sps:$4 sm:$0xff]   ;;  %v6879_v46 = vld [vmem:[%s11522_s5 + $0xd0] ss:$20 sps:$4 sm:$0xff]   ;;  %v6887_v55 = vld [vmem:[%s11522_s5 + $0xac] ss:$20 sps:$4 sm:$0xff]  }
  0x4f   :  { %6828 = vrot.lane.b32.xlu1 %v6827_v21, %s8282_s23  ;;  %1263 = vmatprep.subr.bf16.mxu0 %v6872_v38  ;;  %v6885_v56 = vld [vmem:[%s11522_s5 + $0xa8] ss:$20 sps:$4 sm:$0xff]   ;;  %v6893_v58 = vld [vmem:[%s11522_s5 + $0x84] ss:$20 sps:$4 sm:$0xff]   ;;  %v6891_v60 = vld [vmem:[%s11522_s5 + $0x80] ss:$20 sps:$4 sm:$0xff]  }
  0x50   :  { %1376 = vmatprep.subr.bf16.mxu1 %v6875_v42  ;;  %v6890_v57 = vld [vmem:[%s11522_s5 + $0x7c] ss:$20 sps:$4 sm:$0xff]   ;;  %v6888_v59 = vld [vmem:[%s11522_s5 + $0x78] ss:$20 sps:$4 sm:$0xff]   ;;  %v6896_v61 = vld [vmem:[%s11522_s5 + $0x54] ss:$20 sps:$4 sm:$0xff]  }
  0x51   :  { %1264 = vmatpush1.bf16.msra.mxu0 %v6870_v39  ;;  %v6899_v62 = vld [vmem:[%s11522_s5 + $0x5c] ss:$20 sps:$4 sm:$0xff]   ;;  %v6897_v1 = vld [vmem:[%s11522_s5 + $0x58] ss:$20 sps:$4 sm:$0xff]   ;;  %v6905_v4 = vld [vmem:[%s11522_s5 + $0x34] ss:$20 sps:$4 sm:$0xff]  }
  0x52   :  { %6833 = vrot.lane.b32.xlu0 %v6832_v26, %s8282_s23  ;;  %1265 = vmatprep.subr.bf16.mxu0 %v6878_v43  ;;  %v6894_v63 = vld [vmem:[%s11522_s5 + $0x50] ss:$20 sps:$4 sm:$0xff]   ;;  %v6902_v2 = vld [vmem:[%s11522_s5 + $0x2c] ss:$20 sps:$4 sm:$0xff]   ;;  %v6900_v3 = vld [vmem:[%s11522_s5 + $0x28] ss:$20 sps:$4 sm:$0xff]  }
  0x53   :  { %6838 = vrot.lane.b32.xlu1 %v6837_v31, %s8282_s23  ;;  %6200 = vmatmul.mubr.msk.bf16.gmra.mxu1 %vm186_vm0, %v143_v35  ;;  %v6903_v5 = vld [vmem:[%s11522_s5 + $0x30] ss:$20 sps:$4 sm:$0xff]   ;;  %v6911_v7 = vld [vmem:[%s11522_s5 + $0xc] ss:$20 sps:$4 sm:$0xff]   ;;  %v6909_v9 = vld [vmem:[%s11522_s5 + $0x8] ss:$20 sps:$4 sm:$0xff]  }
  0x54   :  { %412 = vmatprep.mubr.bf16.mxu1 %v11552_v0  ;;  %1377 = vmatpush1.bf16.msra.mxu1 %v6873_v40  ;;  %v6908_v6 = vld [vmem:[%s11522_s5 + $0x4] ss:$20 sps:$4 sm:$0xff]   ;;  %v6906_v8 = vld [vmem:[%s11522_s5] ss:$20 sps:$4 sm:$0xff]   ;;  %v6914_v10 = vld [vmem:[%s11522_s5 + $0x1bc] ss:$20 sps:$4 sm:$0xff]  }
  0x55   :  { %6188 = vmatmul.mubr.msk.bf16.gmra.mxu0 %vm186_vm0, %v143_v35  ;;  %1378 = vmatprep.subr.bf16.mxu1 %v6881_v44  ;;  %v6917_v11 = vld [vmem:[%s11522_s5 + $0x1c4] ss:$20 sps:$4 sm:$0xff]   ;;  %v6915_v13 = vld [vmem:[%s11522_s5 + $0x1c0] ss:$20 sps:$4 sm:$0xff]   ;;  %v6923_v15 = vld [vmem:[%s11522_s5 + $0x19c] ss:$20 sps:$4 sm:$0xff]  }
  0x56   :  { %6843 = vrot.lane.b32.xlu0 %v6842_v37, %s8282_s23  ;;  %263 = vmatprep.mubr.bf16.mxu0 %v11552_v0  ;;  %v6912_v12 = vld [vmem:[%s11522_s5 + $0x1b8] ss:$20 sps:$4 sm:$0xff]   ;;  %v6920_v14 = vld [vmem:[%s11522_s5 + $0x194] ss:$20 sps:$4 sm:$0xff]   ;;  %v6918_v16 = vld [vmem:[%s11522_s5 + $0x190] ss:$20 sps:$4 sm:$0xff]  }
  0x57   :  { %6848 = vrot.lane.b32.xlu1 %v6847_v41, %s8282_s23  ;;  %1266 = vmatpush1.bf16.msra.mxu0 %v6876_v45  ;;  %v6921_v17 = vld [vmem:[%s11522_s5 + $0x198] ss:$20 sps:$4 sm:$0xff]   ;;  %v6924_v19 = vld [vmem:[%s11522_s5 + $0x168] ss:$20 sps:$4 sm:$0xff]   ;;  %v6927_v21 = vld [vmem:[%s11522_s5 + $0x170] ss:$20 sps:$4 sm:$0xff]  }
  0x58   :  { %1267 = vmatprep.subr.bf16.mxu0 %v6884_v47  ;;  %1379 = vmatpush1.bf16.msra.mxu1 %v6879_v46  ;;  %v6926_v18 = vld [vmem:[%s11522_s5 + $0x16c] ss:$20 sps:$4 sm:$0xff]   ;;  %v6929_v20 = vld [vmem:[%s11522_s5 + $0x174] ss:$20 sps:$4 sm:$0xff]   ;;  %v6932_v22 = vld [vmem:[%s11522_s5 + $0x144] ss:$20 sps:$4 sm:$0xff]  }
  0x59   :  { %1380 = vmatprep.subr.bf16.mxu1 %v6887_v55  ;;  %v6935_v23 = vld [vmem:[%s11522_s5 + $0x14c] ss:$20 sps:$4 sm:$0xff]   ;;  %v6933_v25 = vld [vmem:[%s11522_s5 + $0x148] ss:$20 sps:$4 sm:$0xff]   ;;  %v8682_v28 = vshrl.u32 %v156_v27, 7 }
  0x5a   :  { %v6930_v24 = vld [vmem:[%s11522_s5 + $0x140] ss:$20 sps:$4 sm:$0xff]   ;;  %v6939_v26 = vld [vmem:[#allocation7 + $0x11c] ss:$20 sps:$4 sm:$0xff]  }
  0x5b   :  { %6201 = vmatmul.mubr.msk.bf16.gmra.mxu1 %vm186_vm0, %v144_v49  ;;  %1268 = vmatpush1.bf16.msra.mxu0 %v6882_v48  ;;  %v8685_v29 = vsub.s32 0, %v8682_v28  ;;  %v328_v30 = vld [vmem:[%s11521_s4] sm:$0x3]  ;;  %v8691_v31 = vsub.s32 1, %v8682_v28 }
  0x5c   :  { %422 = vmatprep.mubr.bf16.mxu1 %v11552_v0  ;;  %1381 = vmatpush1.bf16.msra.mxu1 %v6885_v56 }
  0x5d   :  { %6189 = vmatmul.mubr.msk.bf16.gmra.mxu0 %vm186_vm0, %v144_v49  ;;  %1269 = vmatprep.subr.bf16.mxu0 %v6890_v57  ;;  %11604 = vst [vmem:[#allocation16_spill] sm:$0xff] %v8685_v29  ;;  %11605 = vst [vmem:[#allocation17_spill] sm:$0xff] %v8691_v31  ;;  %v8694_v32 = vrot.slane %v328_v30, %v8685_v29  ;;  %v8697_v33 = vrot.slane %v328_v30, %v8691_v31 }
  0x5e   :  { %273 = vmatprep.mubr.bf16.mxu0 %v11552_v0  ;;  %1382 = vmatprep.subr.bf16.mxu1 %v6893_v58 }
  0x5f   :  { %1270 = vmatpush1.bf16.msra.mxu0 %v6888_v59 }
  0x60   :  { %1383 = vmatpush1.bf16.msra.mxu1 %v6891_v60  ;;  %1271 = vmatprep.subr.bf16.mxu0 %v6896_v61 }
  0x61   :  { %1384 = vmatprep.subr.bf16.mxu1 %v6899_v62 }
  0x63   :  { %6202 = vmatmul.mubr.msk.bf16.gmra.mxu1 %vm186_vm0, %v145_v50  ;;  %1272 = vmatpush1.bf16.msra.mxu0 %v6894_v63 }
  0x64   :  { %432 = vmatprep.mubr.bf16.mxu1 %v11552_v0  ;;  %1385 = vmatpush1.bf16.msra.mxu1 %v6897_v1 }
  0x65   :  { %6190 = vmatmul.mubr.msk.bf16.gmra.mxu0 %vm186_vm0, %v145_v50  ;;  %1273 = vmatprep.subr.bf16.mxu0 %v6902_v2 }
  0x66   :  { %283 = vmatprep.mubr.bf16.mxu0 %v11552_v0  ;;  %1386 = vmatprep.subr.bf16.mxu1 %v6905_v4 }
  0x67   :  { %1274 = vmatpush1.bf16.msra.mxu0 %v6900_v3 }
  0x68   :  { %1387 = vmatpush1.bf16.msra.mxu1 %v6903_v5  ;;  %1275 = vmatprep.subr.bf16.mxu0 %v6908_v6 }
  0x69   :  { %1388 = vmatprep.subr.bf16.mxu1 %v6911_v7 }
  0x6b   :  { %6203 = vmatmul.mubr.msk.bf16.gmra.mxu1 %vm186_vm0, %v146_v51  ;;  %1276 = vmatpush1.bf16.msra.mxu0 %v6906_v8 }
  0x6c   :  { %442 = vmatprep.mubr.bf16.mxu1 %v11552_v0  ;;  %1389 = vmatpush1.bf16.msra.mxu1 %v6909_v9 }
  0x6d   :  { %6191 = vmatmul.mubr.msk.bf16.gmra.mxu0 %vm186_vm0, %v146_v51  ;;  %1285 = vmatprep.subr.bf16.mxu0 %v6914_v10 }
  0x6e   :  { %293 = vmatprep.mubr.bf16.mxu0 %v11552_v0  ;;  %1398 = vmatprep.subr.bf16.mxu1 %v6917_v11 }
  0x6f   :  { %1286 = vmatpush2.bf16.msra.mxu0 %v6912_v12 }
  0x70   :  { %1399 = vmatpush2.bf16.msra.mxu1 %v6915_v13  ;;  %1287 = vmatprep.subr.bf16.mxu0 %v6920_v14 }
  0x71   :  { %1400 = vmatprep.subr.bf16.mxu1 %v6923_v15 }
  0x73   :  { %6204 = vmatmul.mubr.msk.bf16.gmra.mxu1 %vm186_vm0, %v147_v52  ;;  %1288 = vmatpush2.bf16.msra.mxu0 %v6918_v16 }
  0x74   :  { %452 = vmatprep.mubr.bf16.mxu1 %v11552_v0  ;;  %1401 = vmatpush2.bf16.msra.mxu1 %v6921_v17  ;;  %v154_v17 = vld [vmem:[%s11520_s3] sm:$0x3] }
  0x75   :  { %6192 = vmatmul.mubr.msk.bf16.gmra.mxu0 %vm186_vm0, %v147_v52  ;;  %1289 = vmatprep.subr.bf16.mxu0 %v6926_v18  ;;  %v8741_v27 = vrot.slane %v154_v17, %v8685_v29 }
  0x76   :  { %303 = vmatprep.mubr.bf16.mxu0 %v11552_v0  ;;  %1402 = vmatprep.subr.bf16.mxu1 %v6929_v20 }
  0x77   :  { %1290 = vmatpush2.bf16.msra.mxu0 %v6924_v19 }
  0x78   :  { %1403 = vmatpush2.bf16.msra.mxu1 %v6927_v21  ;;  %1291 = vmatprep.subr.bf16.mxu0 %v6932_v22 }
  0x79   :  { %1404 = vmatprep.subr.bf16.mxu1 %v6935_v23 }
  0x7b   :  { %6205 = vmatmul.mubr.msk.bf16.gmra.mxu1 %vm186_vm0, %v148_v53  ;;  %1292 = vmatpush2.bf16.msra.mxu0 %v6930_v24 }
  0x7c   :  { %462 = vmatprep.mubr.bf16.mxu1 %v11552_v0  ;;  %1405 = vmatpush2.bf16.msra.mxu1 %v6933_v25 }
  0x7d   :  { %6193 = vmatmul.mubr.msk.bf16.gmra.mxu0 %vm186_vm0, %v148_v53  ;;  %1487 = vmatprep.subr.bf16.mxu0 %v11552_v0 }
  0x7e   :  { %313 = vmatprep.mubr.bf16.mxu0 %v11552_v0  ;;  %1995 = vmatprep.subr.bf16.mxu1 %v6939_v26 }
  0x83   :  { %6206 = vmatmul.mubr.msk.bf16.gmra.mxu1 %vm186_vm0, %v149_v54 }
  0x85   :  { %6194 = vmatmul.mubr.msk.bf16.gmra.mxu0 %vm186_vm0, %v149_v54 }
  0xbc   :  { %v8725_v10 = vpop.permute.xlu0 %6813 }
  0xbd   :  { %11606 = vst [vmem:[#allocation18_spill] sm:$0xff] %v8725_v10  ;;  %v8733_v18 = vpop.permute.xlu1 %6823 }
  0xbe   :  { %11607 = vst [vmem:[#allocation19_spill] sm:$0xff] %v8733_v18 }
  0xc0   :  { %v8738_v25 = vpop.permute.xlu0 %6818 }
  0xc1   :  { %11608 = vst [vmem:[#allocation20_spill] sm:$0xff] %v8738_v25 }
 0x10b   :  { %v394_v34 = vpop.f32.mrf.mxu1 }
 0x10c   :  { %v395_v35 = vadd.f32 %v394_v34, %v8694_v32  ;;  %v8701_v40 = vpop.f32.mrf.mxu0  ;;  %v8744_v34 = vrot.slane %v154_v17, %v8691_v31 }
 0x10d   :  { %v396_v36 = vpop.f32.mrf.mxu1 }
 0x10e   :  { %v6207_v37 = vmul.f32 -1.442695, %v395_v35  ;;  %v397_v38 = vadd.f32 %v396_v36, %v8697_v33  ;;  %v8704_v44 = vpop.f32.mrf.mxu0  ;;  %v11536_v35 = vunpack.i.h.bf16 %v8725_v10 }
 0x10f   :  { %v398_v39 = vpop.f32.mrf.mxu1 }
 0x110   :  { %7248 = vpow2.f32 %v6207_v37  ;;  %v6208_v41 = vmul.f32 -1.442695, %v397_v38  ;;  %v399_v42 = vadd.f32 %v398_v39, %v8694_v32  ;;  %v8707_v48 = vpop.f32.mrf.mxu0 }
 0x111   :  { %v400_v43 = vpop.f32.mrf.mxu1 }
 0x112   :  { %7250 = vpow2.f32 %v6208_v41  ;;  %v6209_v45 = vmul.f32 -1.442695, %v399_v42  ;;  %v401_v46 = vadd.f32 %v400_v43, %v8697_v33  ;;  %v8710_v52 = vpop.f32.mrf.mxu0  ;;  %v8750_v41 = vpop.permute.xlu1 %6828 }
 0x113   :  { %v404_v47 = vpop.f32.mrf.mxu1  ;;  %11609 = vst [vmem:[#allocation21_spill] sm:$0xff] %v8750_v41 }
 0x114   :  { %7252 = vpow2.f32 %v6209_v45  ;;  %v6210_v49 = vmul.f32 -1.442695, %v401_v46  ;;  %v405_v50 = vadd.f32 %v404_v47, %v8694_v32  ;;  %v11551_v45 = vunpack.i.l.bf16 %v8725_v10 }
 0x115   :  { %v406_v51 = vpop.f32.mrf.mxu1  ;;  %v8713_v56 = vpop.f32.mrf.mxu0  ;;  %v11549_v46 = vunpack.i.h.bf16 %v8738_v25  ;;  %v11550_v47 = vunpack.i.l.bf16 %v8738_v25 }
 0x116   :  { %7254 = vpow2.f32 %v6210_v49  ;;  %v6211_v53 = vmul.f32 -1.442695, %v405_v50  ;;  %v407_v54 = vadd.f32 %v406_v51, %v8697_v33 }
 0x117   :  { %v408_v55 = vpop.f32.mrf.mxu1  ;;  %v8716_v60 = vpop.f32.mrf.mxu0 }
 0x118   :  { %7256 = vpow2.f32 %v6211_v53  ;;  %v6212_v57 = vmul.f32 -1.442695, %v407_v54  ;;  %v409_v58 = vadd.f32 %v408_v55, %v8694_v32 }
 0x119   :  { %v410_v59 = vpop.f32.mrf.mxu1  ;;  %v8719_v1 = vpop.f32.mrf.mxu0 }
 0x11a   :  { %7258 = vpow2.f32 %v6212_v57  ;;  %v6213_v61 = vmul.f32 -1.442695, %v409_v58  ;;  %v411_v62 = vadd.f32 %v410_v59, %v8697_v33  ;;  %v11547_v58 = vunpack.i.h.bf16 %v8733_v18 }
 0x11b   :  { %v414_v63 = vpop.f32.mrf.mxu1  ;;  %v8722_v6 = vpop.f32.mrf.mxu0  ;;  %v11548_v59 = vunpack.i.l.bf16 %v8733_v18 }
 0x11c   :  { %7260 = vpow2.f32 %v6213_v61  ;;  %v6214_v2 = vmul.f32 -1.442695, %v411_v62  ;;  %v415_v3 = vadd.f32 %v414_v63, %v8694_v32  ;;  %v11546_v61 = vunpack.i.l.bf16 %v8750_v41 }
 0x11d   :  { %v7249_v4 = vpop.eup %7248  ;;  %v416_v5 = vpop.f32.mrf.mxu1 }
 0x11e   :  { %v601_v7 = vadd.f32 1.0, %v7249_v4  ;;  %7262 = vpow2.f32 %v6214_v2  ;;  %v6215_v8 = vmul.f32 -1.442695, %v415_v3  ;;  %v417_v9 = vadd.f32 %v416_v5, %v8697_v33  ;;  %v8727_v13 = vpop.f32.mrf.mxu0 }
 0x11f   :  { %v7251_v11 = vpop.eup %7250  ;;  %v418_v12 = vpop.f32.mrf.mxu1  ;;  %v8766_v4 = vadd.f32 %v8701_v40, %v8741_v27  ;;  %v248_v5 = vadd.f32 %v8704_v44, %v8744_v34  ;;  %v252_v40 = vadd.f32 %v8710_v52, %v8744_v34  ;;  %v8781_v44 = vadd.f32 %v8713_v56, %v8741_v27 }
 0x120   :  { %7264 = vrcp.f32 %v601_v7  ;;  %v602_v14 = vadd.f32 1.0, %v7251_v11  ;;  %v6216_v15 = vmul.f32 -1.442695, %v417_v9  ;;  %v419_v16 = vadd.f32 %v418_v12, %v8694_v32  ;;  %v8735_v21 = vpop.f32.mrf.mxu0 }
 0x121   :  { %v7253_v19 = vpop.eup %7252  ;;  %7266 = vpow2.f32 %v6215_v8  ;;  %v420_v20 = vpop.f32.mrf.mxu1  ;;  %v8772_v7 = vadd.f32 %v8707_v48, %v8741_v27  ;;  %v8785_v48 = vadd.f32 %v8716_v60, %v8744_v34  ;;  %v474_v52 = vmax.f32 %v248_v5, 0.0 }
 0x122   :  { %7268 = vrcp.f32 %v602_v14  ;;  %v603_v22 = vadd.f32 1.0, %v7253_v19  ;;  %v6217_v23 = vmul.f32 -1.442695, %v419_v16  ;;  %v421_v24 = vadd.f32 %v420_v20, %v8697_v33  ;;  %v8747_v36 = vpop.f32.mrf.mxu0 }
 0x123   :  { %v7255_v26 = vpop.eup %7254  ;;  %7270 = vpow2.f32 %v6216_v15  ;;  %v424_v30 = vpop.f32.mrf.mxu1  ;;  %v8793_v56 = vadd.f32 %v8719_v1, %v8741_v27  ;;  %v8807_v5 = vadd.f32 %v8722_v6, %v8744_v34  ;;  %v8818_v6 = vadd.f32 %v8735_v21, %v8744_v34 }
 0x124   :  { %7272 = vrcp.f32 %v603_v22  ;;  %v604_v37 = vadd.f32 1.0, %v7255_v26  ;;  %v6218_v38 = vmul.f32 -1.442695, %v421_v24  ;;  %v425_v39 = vadd.f32 %v424_v30, %v8694_v32  ;;  %v8755_v49 = vpop.f32.mrf.mxu0 }
 0x125   :  { %v7257_v42 = vpop.eup %7256  ;;  %7274 = vpow2.f32 %v6217_v23  ;;  %v426_v43 = vpop.f32.mrf.mxu1  ;;  %v473_v24 = vmax.f32 %v8766_v4, 0.0  ;;  %v479_v4 = vmax.f32 %v8793_v56, 0.0 }
 0x126   :  { %7276 = vrcp.f32 %v604_v37  ;;  %v605_v50 = vadd.f32 1.0, %v7257_v42  ;;  %v6219_v51 = vmul.f32 -1.442695, %v425_v39  ;;  %v427_v53 = vadd.f32 %v426_v43, %v8697_v33  ;;  %v8758_v57 = vpop.f32.mrf.mxu0 }
 0x127   :  { %v7259_v54 = vpop.eup %7258  ;;  %7278 = vpow2.f32 %v6218_v38  ;;  %v428_v55 = vpop.f32.mrf.mxu1  ;;  %v475_v37 = vmax.f32 %v8772_v7, 0.0 }
 0x128   :  { %7280 = vrcp.f32 %v605_v50  ;;  %v606_v62 = vadd.f32 1.0, %v7259_v54  ;;  %v6220_v63 = vmul.f32 -1.442695, %v427_v53  ;;  %v429_v2 = vadd.f32 %v428_v55, %v8694_v32  ;;  %v8774_v9 = vpop.f32.mrf.mxu0 }
 0x129   :  { %v7261_v3 = vpop.eup %7260  ;;  %7282 = vpow2.f32 %v6219_v51  ;;  %v430_v8 = vpop.f32.mrf.mxu1  ;;  %v476_v50 = vmax.f32 %v252_v40, 0.0  ;;  %v477_v51 = vmax.f32 %v8781_v44, 0.0  ;;  %v478_v55 = vmax.f32 %v8785_v48, 0.0 }
 0x12a   :  { %7284 = vrcp.f32 %v606_v62  ;;  %v607_v11 = vadd.f32 1.0, %v7261_v3  ;;  %v6221_v12 = vmul.f32 -1.442695, %v429_v2  ;;  %v431_v14 = vadd.f32 %v430_v8, %v8697_v33  ;;  %v8787_v17 = vpop.f32.mrf.mxu0 }
 0x12b   :  { %v7263_v15 = vpop.eup %7262  ;;  %7286 = vpow2.f32 %v6220_v63  ;;  %v434_v16 = vpop.f32.mrf.mxu1 }
 0x12c   :  { %7288 = vrcp.f32 %v607_v11  ;;  %v608_v19 = vadd.f32 1.0, %v7263_v15  ;;  %v6222_v20 = vmul.f32 -1.442695, %v431_v14  ;;  %v435_v22 = vadd.f32 %v434_v16, %v8694_v32  ;;  %v8795_v30 = vpop.f32.mrf.mxu0 }
 0x12d   :  { %v7265_v23 = vpop.eup %7264  ;;  %7290 = vpow2.f32 %v6221_v12  ;;  %v436_v26 = vpop.f32.mrf.mxu1  ;;  %v8813_v15 = vadd.f32 %v8727_v13, %v8741_v27 }
 0x12e   :  { %v7267_v60 = vpop.eup %7266  ;;  %7292 = vrcp.f32 %v608_v19  ;;  %v6223_v38 = vmul.f32 -1.442695, %v435_v22  ;;  %v437_v39 = vadd.f32 %v436_v26, %v8697_v33  ;;  %v8800_v54 = vpop.f32.mrf.mxu0 }
 0x12f   :  { %v7269_v42 = vpop.eup %7268  ;;  %v609_v43 = vadd.f32 1.0, %v7267_v60  ;;  %7294 = vpow2.f32 %v6222_v20  ;;  %v438_v53 = vpop.f32.mrf.mxu1 }
 0x130   :  { %v7271_v1 = vpop.eup %7270  ;;  %7296 = vpow2.f32 %v6223_v38  ;;  %v6224_v62 = vmul.f32 -1.442695, %v437_v39  ;;  %v439_v63 = vadd.f32 %v438_v53, %v8694_v32  ;;  %v8809_v8 = vpop.f32.mrf.mxu0  ;;  %v698_v12 = vmul.f32 %v7269_v42, %v474_v52 }
 0x131   :  { %v7273_v2 = vpop.eup %7272  ;;  %7298 = vrcp.f32 %v609_v43  ;;  %v610_v3 = vadd.f32 1.0, %v7271_v1  ;;  %v440_v7 = vpop.f32.mrf.mxu1  ;;  %v697_v42 = vmul.f32 %v7265_v23, %v473_v24  ;;  %v480_v24 = vmax.f32 %v8807_v5, 0.0 }
 0x132   :  { %v7275_v11 = vpop.eup %7274  ;;  %7300 = vpow2.f32 %v6224_v62  ;;  %v6225_v14 = vmul.f32 -1.442695, %v439_v63  ;;  %v441_v19 = vadd.f32 %v440_v7, %v8697_v33  ;;  %v8820_v22 = vpop.f32.mrf.mxu0  ;;  %v699_v52 = vmul.f32 %v7273_v2, %v475_v37 }
 0x133   :  { %v7277_v40 = vpop.eup %7276  ;;  %7302 = vrcp.f32 %v610_v3  ;;  %v611_v16 = vadd.f32 1.0, %v7275_v11  ;;  %v444_v20 = vpop.f32.mrf.mxu1  ;;  %v793_v21 = vsel %vm186_vm0, %v698_v12, %v11551_v45  ;;  %v6936_v11 = vld [vmem:[%s11522_s5 + $0x128] ss:$20 sps:$4 sm:$0xff]   ;;  %v6937_v12 = vld [vmem:[#allocation7 + $0x118] ss:$20 sps:$4 sm:$0xff]   ;;  %v481_v5 = vmax.f32 %v8813_v15, 0.0 }
 0x134   :  { %v7279_v26 = vpop.eup %7278  ;;  %v700_v60 = vmul.f32 %v7277_v40, %v476_v50  ;;  %7304 = vpow2.f32 %v6225_v14  ;;  %v445_v38 = vadd.f32 %v444_v20, %v8694_v32  ;;  %v6226_v43 = vmul.f32 -1.442695, %v441_v19  ;;  %v8825_v1 = vpop.f32.mrf.mxu0 }
 0x135   :  { %v8823_v13 = vpop.eup %7280  ;;  %7306 = vrcp.f32 %v611_v16  ;;  %v612_v39 = vadd.f32 1.0, %v7279_v26  ;;  %v446_v53 = vpop.f32.mrf.mxu1  ;;  %v8842_v16 = vpack.c.bf16 %v699_v52, %v697_v42  ;;  %v6943_v26 = vld [vmem:[#allocation7 + $0xf4] ss:$20 sps:$4 sm:$0xff]  }
 0x136   :  { %v7283_v62 = vpop.eup %7282  ;;  %v794_v37 = vsel %vm186_vm0, %v700_v60, %v11536_v35  ;;  %v6227_v50 = vmul.f32 -1.442695, %v445_v38  ;;  %v447_v63 = vadd.f32 %v446_v53, %v8697_v33  ;;  %v8840_v14 = vpop.f32.mrf.mxu0 }
 0x137   :  { %v7285_v2 = vpop.eup %7284  ;;  %7308 = vrcp.f32 %v612_v39  ;;  %v613_v3 = vadd.f32 1.0, %v7283_v62  ;;  %v8834_v23 = vpack.c.bf16 %v794_v37, %v793_v21  ;;  %v448_v7 = vpop.f32.mrf.mxu1  ;;  %v482_v39 = vmax.f32 %v8818_v6, 0.0 }
 0x138   :  { %v7287_v40 = vpop.eup %7286  ;;  %7310 = vpow2.f32 %v6226_v43  ;;  %v6228_v19 = vmul.f32 -1.442695, %v447_v63  ;;  %v449_v20 = vadd.f32 %v448_v7, %v8694_v32  ;;  %v702_v42 = vmul.f32 %v7285_v2, %v478_v55  ;;  %v8867_v2 = vpop.f32.mrf.mxu0 }
 0x139   :  { %v7289_v60 = vpop.eup %7288  ;;  %7312 = vrcp.f32 %v613_v3  ;;  %v614_v38 = vadd.f32 1.0, %v7287_v40  ;;  %v450_v53 = vpop.f32.mrf.mxu1  ;;  %6299 = vmatprep.mubr.msk.bf16.mxu0 %vm1236_vm1, %v8834_v23  ;;  %6307 = vmatprep.mubr.msk.bf16.mxu1 %vm1236_vm1, %v8834_v23  ;;  %v8855_v43 = vadd.f32 %v8747_v36, %v8741_v27  ;;  %v8861_v63 = vadd.f32 %v8755_v49, %v8744_v34  ;;  %v6940_v36 = vld [vmem:[%s11522_s5 + $0x100] ss:$20 sps:$4 sm:$0xff]  }
 0x13a   :  { %v7291_v52 = vpop.eup %7290  ;;  %7314 = vpow2.f32 %v6227_v50  ;;  %v6229_v62 = vmul.f32 -1.442695, %v449_v20  ;;  %1294 = vmatmul.mubr.bf16.vlgmr.msra.gmra.mxu0 %v8842_v16  ;;  %1407 = vmatmul.mubr.bf16.vlgmr.msra.gmra.mxu1 %v8842_v16  ;;  %v451_v48 = vadd.f32 %v450_v53, %v8697_v33  ;;  %v6941_v50 = vld [vmem:[#allocation7 + $0xf0] ss:$20 sps:$4 sm:$0xff]   ;;  %v703_v7 = vmul.f32 %v7289_v60, %v479_v4  ;;  %v6944_v60 = vld [vmem:[%s11522_s5 + $0xd8] ss:$20 sps:$4 sm:$0xff]  }
 0x13b   :  { %v7293_v21 = vpop.eup %7292  ;;  %7316 = vrcp.f32 %v614_v38  ;;  %v615_v37 = vadd.f32 1.0, %v7291_v52  ;;  %1488 = vmatpush1.bf16.msra.mxu0 %v6936_v11  ;;  %v454_v55 = vpop.f32.mrf.mxu1  ;;  %1996 = vmatpush1.bf16.msra.mxu1 %v6937_v12  ;;  %v6947_v11 = vld [vmem:[#allocation7 + $0xcc] ss:$20 sps:$4 sm:$0xff]   ;;  %v701_v38 = vmul.f32 %v8823_v13, %v477_v51  ;;  %v795_v4 = vsel %vm186_vm0, %v702_v42, %v11550_v47  ;;  %v6945_v42 = vld [vmem:[#allocation7 + $0xc8] ss:$20 sps:$4 sm:$0xff]  }
 0x13c   :  { %v7295_v3 = vpop.eup %7294  ;;  %v704_v40 = vmul.f32 %v7293_v21, %v480_v24  ;;  %7318 = vpow2.f32 %v6228_v19  ;;  %v455_v49 = vadd.f32 %v454_v55, %v8694_v32  ;;  %1489 = vmatprep.subr.bf16.mxu0 %v11552_v0  ;;  %1997 = vmatprep.subr.bf16.mxu1 %v6943_v26  ;;  %v6230_v53 = vmul.f32 -1.442695, %v451_v48  ;;  %v8890_v21 = vpop.f32.mrf.mxu0 }
 0x13d   :  { %v7297_v12 = vpop.eup %7296  ;;  %7320 = vrcp.f32 %v615_v37  ;;  %v616_v20 = vadd.f32 1.0, %v7295_v3  ;;  %v456_v52 = vpop.f32.mrf.mxu1  ;;  %v8892_v48 = vpack.c.bf16 %v703_v7, %v701_v38  ;;  %v6951_v3 = vld [vmem:[#allocation7 + $0xa4] ss:$20 sps:$4 sm:$0xff]   ;;  %v9345_v47 = vsub.s32 3, %v8682_v28 }
 0x13e   :  { %v8876_v35 = vpop.eup %7298  ;;  %v617_v56 = vadd.f32 1.0, %v7297_v12  ;;  %v796_v24 = vsel %vm186_vm0, %v704_v40, %v11549_v46  ;;  %7322 = vpow2.f32 %v6229_v62  ;;  %v6231_v44 = vmul.f32 -1.442695, %v455_v49 }
 0x13f   :  { %v7301_v19 = vpop.eup %7300  ;;  %7324 = vrcp.f32 %v616_v20  ;;  %v8884_v26 = vpack.c.bf16 %v796_v24, %v795_v4  ;;  %v457_v51 = vadd.f32 %v456_v52, %v8697_v33  ;;  %v458_v13 = vpop.f32.mrf.mxu1  ;;  %1490 = vmatpush1.bf16.msra.mxu0 %v6940_v36  ;;  %1998 = vmatpush1.bf16.msra.mxu1 %v6941_v50  ;;  %v483_v50 = vmax.f32 %v8855_v43, 0.0  ;;  %v6949_v4 = vld [vmem:[#allocation7 + $0xa0] ss:$20 sps:$4 sm:$0xff]   ;;  %11620 = vst [vmem:[#allocation32_spill] sm:$0xff] %v9345_v47 }
 0x140   :  { %v7303_v37 = vpop.eup %7302  ;;  %7326 = vrcp.f32 %v617_v56  ;;  %v618_v62 = vadd.f32 1.0, %v7301_v19  ;;  %v459_v55 = vadd.f32 %v458_v13, %v8694_v32  ;;  %1491 = vmatprep.subr.bf16.mxu0 %v11552_v0  ;;  %1999 = vmatprep.subr.bf16.mxu1 %v6947_v11  ;;  %v484_v40 = vmax.f32 %v8861_v63, 0.0  ;;  %v6948_v56 = vld [vmem:[%s11522_s5 + $0xb0] ss:$20 sps:$4 sm:$0xff]   ;;  %v8916_v24 = vpop.f32.mrf.mxu0 }
 0x141   :  { %v7305_v36 = vpop.eup %7304  ;;  %7328 = vpow2.f32 %v6230_v53  ;;  %v6232_v49 = vmul.f32 -1.442695, %v457_v51  ;;  %v460_v12 = vpop.f32.mrf.mxu1  ;;  %6300 = vmatprep.mubr.msk.bf16.mxu0 %vm1236_vm1, %v8884_v26  ;;  %6308 = vmatprep.mubr.msk.bf16.mxu1 %vm1236_vm1, %v8884_v26  ;;  %v706_v43 = vmul.f32 %v7303_v37, %v482_v39  ;;  %v8909_v63 = vadd.f32 %v8758_v57, %v8741_v27 }
 0x142   :  { %v7307_v7 = vpop.eup %7306  ;;  %7330 = vrcp.f32 %v618_v62  ;;  %v619_v20 = vadd.f32 1.0, %v7305_v36  ;;  %v6233_v38 = vmul.f32 -1.442695, %v459_v55  ;;  %v461_v11 = vadd.f32 %v460_v12, %v8697_v33  ;;  %1304 = vmatmul.mubr.bf16.gmra.mxu0 %v8892_v48  ;;  %1417 = vmatmul.mubr.bf16.gmra.mxu1 %v8892_v48 }
 0x143   :  { %7332 = vpow2.f32 %v6231_v44  ;;  %v278_v53 = vadd.f32 %v8774_v9, %v8744_v34  ;;  %v464_v52 = vpop.f32.mrf.mxu1  ;;  %1492 = vmatpush1.bf16.msra.mxu0 %v6944_v60  ;;  %2000 = vmatpush1.bf16.msra.mxu1 %v6945_v42  ;;  %v8920_v57 = vadd.f32 %v8787_v17, %v8741_v27  ;;  %v6955_v9 = vld [vmem:[#allocation7 + $0x7c] ss:$20 sps:$4 sm:$0xff]   ;;  %v707_v51 = vmul.f32 %v7307_v7, %v483_v50 }
 0x144   :  { %v7309_v6 = vpop.eup %7308  ;;  %7334 = vrcp.f32 %v619_v20  ;;  %v6234_v39 = vmul.f32 -1.442695, %v461_v11  ;;  %v465_v19 = vadd.f32 %v464_v52, %v8694_v32  ;;  %1493 = vmatprep.subr.bf16.mxu0 %v11552_v0  ;;  %2001 = vmatprep.subr.bf16.mxu1 %v6951_v3  ;;  %v282_v60 = vadd.f32 %v8795_v30, %v8744_v34  ;;  %v6953_v20 = vld [vmem:[#allocation7 + $0x78] ss:$20 sps:$4 sm:$0xff]  }
 0x145   :  { %v7311_v44 = vpop.eup %7310  ;;  %v708_v13 = vmul.f32 %v7309_v6, %v484_v40  ;;  %7336 = vpow2.f32 %v6232_v49  ;;  %v466_v42 = vpop.f32.mrf.mxu1  ;;  %v705_v3 = vmul.f32 %v8876_v35, %v481_v5  ;;  %v797_v50 = vsel %vm186_vm0, %v706_v43, %v11548_v59  ;;  %v6952_v5 = vld [vmem:[%s11522_s5 + $0x88] ss:$20 sps:$4 sm:$0xff]  }
 0x146   :  { %v8926_v37 = vpop.eup %7312  ;;  %v620_v62 = vadd.f32 1.0, %v7311_v44  ;;  %7338 = vpow2.f32 %v6233_v38  ;;  %v6235_v17 = vmul.f32 -1.442695, %v465_v19  ;;  %v467_v55 = vadd.f32 %v466_v42, %v8697_v33  ;;  %v8938_v49 = vpop.f32.mrf.mxu0  ;;  %v6959_v6 = vld [vmem:[#allocation7 + $0x54] ss:$20 sps:$4 sm:$0xff]  }
 0x147   :  { %v7315_v36 = vpop.eup %7314  ;;  %v798_v30 = vsel %vm186_vm0, %v708_v13, %v11547_v58  ;;  %7340 = vpow2.f32 %v6234_v39  ;;  %v468_v40 = vpop.f32.mrf.mxu1  ;;  %1494 = vmatpush1.bf16.msra.mxu0 %v6948_v56  ;;  %2002 = vmatpush1.bf16.msra.mxu1 %v6949_v4  ;;  %v11545_v35 = vunpack.i.h.bf16 %v8750_v41  ;;  %v8947_v11 = vpack.c.bf16 %v707_v51, %v705_v3 }
 0x148   :  { %v7317_v12 = vpop.eup %7316  ;;  %7342 = vrcp.f32 %v620_v62  ;;  %v8940_v7 = vpack.c.bf16 %v798_v30, %v797_v50  ;;  %v6236_v15 = vmul.f32 -1.442695, %v467_v55  ;;  %1495 = vmatprep.subr.bf16.mxu0 %v11552_v0  ;;  %2003 = vmatprep.subr.bf16.mxu1 %v6955_v9  ;;  %v485_v43 = vmax.f32 %v8909_v63, 0.0  ;;  %v8959_v51 = vpop.f32.mrf.mxu0  ;;  %v6963_v30 = vld [vmem:[#allocation7 + $0x2c] ss:$20 sps:$4 sm:$0xff]  }
 0x149   :  { %v7319_v38 = vpop.eup %7318  ;;  %v486_v52 = vmax.f32 %v278_v53, 0.0  ;;  %v469_v56 = vadd.f32 %v468_v40, %v8694_v32  ;;  %v470_v4 = vpop.f32.mrf.mxu1  ;;  %v487_v44 = vmax.f32 %v8920_v57, 0.0  ;;  %7344 = vpow2.f32 %v6235_v17 }
 0x14a   :  { %v7321_v39 = vpop.eup %7320  ;;  %v622_v19 = vadd.f32 1.0, %v7319_v38  ;;  %v471_v13 = vadd.f32 %v470_v4, %v8697_v33  ;;  %6301 = vmatprep.mubr.msk.bf16.mxu0 %vm1236_vm1, %v8940_v7  ;;  %6309 = vmatprep.mubr.msk.bf16.mxu1 %vm1236_vm1, %v8940_v7  ;;  %v488_v53 = vmax.f32 %v282_v60, 0.0  ;;  %7346 = vpow2.f32 %v6236_v15  ;;  %v6956_v33 = vld [vmem:[%s11522_s5 + $0x60] ss:$20 sps:$4 sm:$0xff]   ;;  %v6957_v60 = vld [vmem:[#allocation7 + $0x50] ss:$20 sps:$4 sm:$0xff]   ;;  %v8988_v4 = vpop.permute.xlu0 %6833 }
 0x14b   :  { %v7323_v9 = vpop.eup %7322  ;;  %v710_v63 = vmul.f32 %v7317_v12, %v486_v52  ;;  %v6237_v32 = vmul.f32 -1.442695, %v469_v56  ;;  %1314 = vmatmul.mubr.bf16.gmra.mxu0 %v8947_v11  ;;  %1427 = vmatmul.mubr.bf16.gmra.mxu1 %v8947_v11  ;;  %v621_v42 = vadd.f32 1.0, %v7315_v36  ;;  %v711_v3 = vmul.f32 %v7321_v39, %v487_v44  ;;  %v8980_v56 = vpop.f32.mrf.mxu0  ;;  %11610 = vst [vmem:[#allocation22_spill] sm:$0xff] %v8988_v4  ;;  %v6961_v39 = vld [vmem:[#allocation7 + $0x28] ss:$20 sps:$4 sm:$0xff]  }
 0x14c   :  { %v7325_v57 = vpop.eup %7324  ;;  %7348 = vrcp.f32 %v622_v19  ;;  %v623_v62 = vadd.f32 1.0, %v7323_v9  ;;  %v6238_v17 = vmul.f32 -1.442695, %v471_v13  ;;  %1496 = vmatpush1.bf16.msra.mxu0 %v6952_v5  ;;  %2004 = vmatpush1.bf16.msra.mxu1 %v6953_v20  ;;  %v709_v12 = vmul.f32 %v8926_v37, %v485_v43 }
 0x14d   :  { %v8964_v55 = vpop.eup %7326  ;;  %v712_v50 = vmul.f32 %v7325_v57, %v488_v53  ;;  %7350 = vpow2.f32 %v6237_v32  ;;  %1497 = vmatprep.subr.bf16.mxu0 %v11552_v0  ;;  %2005 = vmatprep.subr.bf16.mxu1 %v6959_v6  ;;  %v8970_v36 = vadd.f32 %v8800_v54, %v8741_v27  ;;  %v288_v15 = vadd.f32 %v8809_v8, %v8744_v34  ;;  %v6960_v6 = vld [vmem:[%s11522_s5 + $0x38] ss:$20 sps:$4 sm:$0xff]   ;;  %v9005_v57 = vpop.f32.mrf.mxu0 }
 0x14e   :  { %v7329_v40 = vpop.eup %7328  ;;  %7352 = vrcp.f32 %v623_v62  ;;  %v799_v38 = vsel %vm186_vm0, %v710_v63, %v11546_v61  ;;  %v290_v8 = vadd.f32 %v8820_v22, %v8741_v27  ;;  %v292_v43 = vadd.f32 %v8825_v1, %v8744_v34  ;;  %v6967_v22 = vld [vmem:[#allocation7 + $0x4] ss:$20 sps:$4 sm:$0xff]  }
 0x14f   :  { %v7331_v5 = vpop.eup %7330  ;;  %v624_v20 = vadd.f32 1.0, %v7329_v40  ;;  %v800_v52 = vsel %vm186_vm0, %v712_v50, %v11545_v35  ;;  %7354 = vpow2.f32 %v6238_v17  ;;  %v8993_v44 = vpack.c.bf16 %v711_v3, %v709_v12 }
 0x150   :  { %v7333_v37 = vpop.eup %7332  ;;  %7356 = vrcp.f32 %v621_v42  ;;  %v8982_v54 = vpack.c.bf16 %v800_v52, %v799_v38  ;;  %1498 = vmatpush1.bf16.msra.mxu0 %v6956_v33  ;;  %2006 = vmatpush1.bf16.msra.mxu1 %v6957_v60  ;;  %v490_v9 = vmax.f32 %v288_v15, 0.0  ;;  %v489_v53 = vmax.f32 %v8970_v36, 0.0  ;;  %v6964_v42 = vld [vmem:[%s11522_s5 + $0x10] ss:$20 sps:$4 sm:$0xff]  }
 0x151   :  { %v7335_v19 = vpop.eup %7334  ;;  %7358 = vrcp.f32 %v624_v20  ;;  %1499 = vmatprep.subr.bf16.mxu0 %v11552_v0  ;;  %2007 = vmatprep.subr.bf16.mxu1 %v6963_v30  ;;  %v11543_v32 = vunpack.i.h.bf16 %v8988_v4  ;;  %v11544_v33 = vunpack.i.l.bf16 %v8988_v4  ;;  %v491_v3 = vmax.f32 %v290_v8, 0.0  ;;  %v6965_v30 = vld [vmem:[#allocation7] ss:$20 sps:$4 sm:$0xff]   ;;  %v6971_v15 = vld [vmem:[#allocation7 + $0x1bc] ss:$20 sps:$4 sm:$0xff]  }
 0x152   :  { %v7337_v13 = vpop.eup %7336  ;;  %6302 = vmatprep.mubr.msk.bf16.mxu0 %vm1236_vm1, %v8982_v54  ;;  %6310 = vmatprep.mubr.msk.bf16.mxu1 %vm1236_vm1, %v8982_v54  ;;  %v714_v60 = vmul.f32 %v7331_v5, %v490_v9  ;;  %v492_v50 = vmax.f32 %v292_v43, 0.0  ;;  %v625_v12 = vadd.f32 1.0, %v7333_v37  ;;  %v9013_v5 = vadd.f32 %v8840_v14, %v8741_v27  ;;  %v9019_v43 = vpop.f32.mrf.mxu0  ;;  %v6968_v9 = vld [vmem:[%s11522_s5 + $0x1c8] ss:$20 sps:$4 sm:$0xff]  }
 0x153   :  { %v7339_v1 = vpop.eup %7338  ;;  %v626_v63 = vadd.f32 1.0, %v7337_v13  ;;  %1324 = vmatmul.mubr.bf16.gmra.mxu0 %v8993_v44  ;;  %1437 = vmatmul.mubr.bf16.gmra.mxu1 %v8993_v44  ;;  %v715_v20 = vmul.f32 %v7335_v19, %v491_v3  ;;  %v298_v8 = vadd.f32 %v8867_v2, %v8744_v34  ;;  %v300_v37 = vadd.f32 %v8890_v21, %v8741_v27 }
 0x154   :  { %v7341_v62 = vpop.eup %7340  ;;  %v627_v17 = vadd.f32 1.0, %v7339_v1  ;;  %1500 = vmatpush1.bf16.msra.mxu0 %v6960_v6  ;;  %2008 = vmatpush1.bf16.msra.mxu1 %v6961_v39  ;;  %v713_v39 = vmul.f32 %v8964_v55, %v489_v53  ;;  %v801_v19 = vsel %vm186_vm0, %v714_v60, %v11544_v33  ;;  %v302_v55 = vadd.f32 %v8916_v24, %v8744_v34  ;;  %v6969_v1 = vld [vmem:[#allocation7 + $0x1b8] ss:$20 sps:$4 sm:$0xff]   ;;  %v317_v24 = vpop.f32.mrf.mxu0 }
 0x155   :  { %v7343_v40 = vpop.eup %7342  ;;  %7360 = vrcp.f32 %v626_v63  ;;  %v628_v36 = vadd.f32 1.0, %v7341_v62  ;;  %1501 = vmatprep.subr.bf16.mxu0 %v11552_v0  ;;  %2009 = vmatprep.subr.bf16.mxu1 %v6967_v22  ;;  %v9028_v22 = vpop.permute.xlu1 %6838  ;;  %v494_v60 = vmax.f32 %v298_v8, 0.0 }
 0x156   :  { %7362 = vrcp.f32 %v627_v17  ;;  %v716_v38 = vmul.f32 %v7343_v40, %v492_v50  ;;  %v7345_v52 = vpop.eup %7344  ;;  %11611 = vst [vmem:[#allocation23_spill] sm:$0xff] %v9028_v22  ;;  %v9038_v53 = vpack.c.bf16 %v715_v20, %v713_v39  ;;  %v11542_v3 = vunpack.i.l.bf16 %v9028_v22 }
 0x157   :  { %7364 = vrcp.f32 %v628_v36  ;;  %v7347_v6 = vpop.eup %7346  ;;  %v495_v40 = vmax.f32 %v300_v37, 0.0  ;;  %v11541_v36 = vunpack.i.h.bf16 %v9028_v22  ;;  %v496_v39 = vmax.f32 %v302_v55, 0.0 }
 0x158   :  { %v802_v14 = vsel %vm186_vm0, %v716_v38, %v11543_v32  ;;  %1502 = vmatpush1.bf16.msra.mxu0 %v6964_v42  ;;  %2010 = vmatpush1.bf16.msra.mxu1 %v6965_v30  ;;  %7366 = vrcp.f32 %v625_v12  ;;  %v630_v21 = vadd.f32 1.0, %v7347_v6  ;;  %v6975_v42 = vld [vmem:[#allocation7 + $0x194] ss:$20 sps:$4 sm:$0xff]   ;;  %v493_v30 = vmax.f32 %v9013_v5, 0.0  ;;  %v6973_v5 = vld [vmem:[#allocation7 + $0x190] ss:$20 sps:$4 sm:$0xff]  }
 0x159   :  { %v7349_v2 = vpop.eup %7348  ;;  %v9030_v13 = vpack.c.bf16 %v802_v14, %v801_v19  ;;  %1511 = vmatprep.subr.bf16.mxu0 %v11552_v0  ;;  %2019 = vmatprep.subr.bf16.mxu1 %v6971_v15  ;;  %v308_v12 = vadd.f32 %v8959_v51, %v8744_v34  ;;  %v6972_v15 = vld [vmem:[%s11522_s5 + $0x1a0] ss:$20 sps:$4 sm:$0xff]   ;;  %v629_v38 = vadd.f32 1.0, %v7345_v52  ;;  %v319_v52 = vpop.f32.mrf.mxu0 }
 0x15a   :  { %v7351_v63 = vpop.eup %7350  ;;  %7368 = vrcp.f32 %v630_v21  ;;  %v718_v6 = vmul.f32 %v7349_v2, %v494_v60  ;;  %v6979_v51 = vld [vmem:[#allocation7 + $0x16c] ss:$20 sps:$4 sm:$0xff]   ;;  %v312_v21 = vadd.f32 %v9005_v57, %v8744_v34  ;;  %v306_v2 = vadd.f32 %v8938_v49, %v8741_v27  ;;  %v6977_v60 = vld [vmem:[#allocation7 + $0x168] ss:$20 sps:$4 sm:$0xff]  }
 0x15b   :  { %v7353_v62 = vpop.eup %7352  ;;  %v631_v17 = vadd.f32 1.0, %v7351_v63  ;;  %6303 = vmatprep.mubr.msk.bf16.mxu0 %vm1236_vm1, %v9030_v13  ;;  %6311 = vmatprep.mubr.msk.bf16.mxu1 %vm1236_vm1, %v9030_v13  ;;  %v9057_v63 = vpop.permute.xlu0 %6843  ;;  %v498_v55 = vmax.f32 %v308_v12, 0.0 }
 0x15c   :  { %v7355_v50 = vpop.eup %7354  ;;  %1334 = vmatmul.mubr.bf16.gmra.mxu0 %v9038_v53  ;;  %1447 = vmatmul.mubr.bf16.gmra.mxu1 %v9038_v53  ;;  %v719_v19 = vmul.f32 %v7353_v62, %v495_v40  ;;  %11612 = vst [vmem:[#allocation24_spill] sm:$0xff] %v9057_v63  ;;  %v11540_v49 = vunpack.i.l.bf16 %v9057_v63  ;;  %v500_v12 = vmax.f32 %v312_v21, 0.0 }
 0x15d   :  { %v7357_v20 = vpop.eup %7356  ;;  %v632_v8 = vadd.f32 1.0, %v7355_v50  ;;  %1512 = vmatpush2.bf16.msra.mxu0 %v6968_v9  ;;  %2020 = vmatpush2.bf16.msra.mxu1 %v6969_v1  ;;  %7370 = vrcp.f32 %v631_v17  ;;  %v310_v9 = vadd.f32 %v8980_v56, %v8741_v27  ;;  %v6976_v56 = vld [vmem:[%s11522_s5 + $0x178] ss:$20 sps:$4 sm:$0xff]  }
 0x15e   :  { %v7359_v37 = vpop.eup %7358  ;;  %1513 = vmatprep.subr.bf16.mxu0 %v11552_v0  ;;  %2021 = vmatprep.subr.bf16.mxu1 %v6975_v42  ;;  %v717_v1 = vmul.f32 %v7357_v20, %v493_v30  ;;  %v803_v42 = vsel %vm186_vm0, %v718_v6, %v11542_v3  ;;  %v321_v20 = vpop.f32.mrf.mxu0  ;;  %v497_v6 = vmax.f32 %v306_v2, 0.0 }
 0x15f   :  { %7372 = vrcp.f32 %v632_v8  ;;  %v720_v14 = vmul.f32 %v7359_v37, %v496_v39  ;;  %v499_v39 = vmax.f32 %v310_v9, 0.0  ;;  %v318_v37 = vadd.f32 %v317_v24, %v8744_v34  ;;  %v6980_v24 = vld [vmem:[%s11522_s5 + $0x150] ss:$20 sps:$4 sm:$0xff]  }
 0x160   :  { %7374 = vrcp.f32 %v629_v38  ;;  %v9076_v30 = vpack.c.bf16 %v719_v19, %v717_v1  ;;  %v6983_v38 = vld [vmem:[#allocation7 + $0x144] ss:$20 sps:$4 sm:$0xff]   ;;  %v322_v19 = vadd.f32 %v321_v20, %v8744_v34  ;;  %v6981_v34 = vld [vmem:[#allocation7 + $0x140] ss:$20 sps:$4 sm:$0xff]  }
 0x161   :  { %v804_v57 = vsel %vm186_vm0, %v720_v14, %v11541_v36  ;;  %1514 = vmatpush2.bf16.msra.mxu0 %v6972_v15  ;;  %2022 = vmatpush2.bf16.msra.mxu1 %v6973_v5  ;;  %v11539_v15 = vunpack.i.h.bf16 %v9057_v63  ;;  %v9326_v36 = vld [vmem:[%s11524_s7] sm:$0x1f] }
 0x162   :  { %v7361_v62 = vpop.eup %7360  ;;  %v9069_v17 = vpack.c.bf16 %v804_v57, %v803_v42  ;;  %1515 = vmatprep.subr.bf16.mxu0 %v11552_v0  ;;  %2023 = vmatprep.subr.bf16.mxu1 %v6979_v51  ;;  %v6986_v42 = vld [vmem:[#allocation7 + $0x124] ss:$20 sps:$4 sm:$0xff]   ;;  %v9338_v61 = vrot.slane %v9326_v36, %v8685_v29  ;;  %v9359_v41 = vrot.slane %v9326_v36, %v8691_v31 }
 0x163   :  { %v7363_v50 = vpop.eup %7362  ;;  %v722_v40 = vmul.f32 %v7361_v62, %v498_v55  ;;  %v9093_v55 = vpop.permute.xlu1 %6848  ;;  %v316_v62 = vadd.f32 %v9019_v43, %v8741_v27  ;;  %v9363_v18 = vrot.slane %v9326_v36, %v9345_v47 }
 0x164   :  { %v7365_v8 = vpop.eup %7364  ;;  %6304 = vmatprep.mubr.msk.bf16.mxu0 %vm1236_vm1, %v9069_v17  ;;  %6312 = vmatprep.mubr.msk.bf16.mxu1 %vm1236_vm1, %v9069_v17  ;;  %v723_v14 = vmul.f32 %v7363_v50, %v499_v39  ;;  %11613 = vst [vmem:[#allocation25_spill] sm:$0xff] %v9093_v55  ;;  %v11538_v50 = vunpack.i.l.bf16 %v9093_v55 }
 0x165   :  { %v724_v5 = vmul.f32 %v7365_v8, %v500_v12  ;;  %1344 = vmatmul.mubr.bf16.gmra.mxu0 %v9076_v30  ;;  %1457 = vmatmul.mubr.bf16.gmra.mxu1 %v9076_v30  ;;  %v7367_v51 = vpop.eup %7366  ;;  %v805_v21 = vsel %vm186_vm0, %v722_v40, %v11540_v49  ;;  %v11537_v8 = vunpack.i.h.bf16 %v9093_v55  ;;  %v9321_v49 = vsub.s32 2, %v8682_v28  ;;  %11624 = vst [vmem:[#allocation36_spill] sm:$0xff] %v9363_v18 }
 0x166   :  { %1516 = vmatpush2.bf16.msra.mxu0 %v6976_v56  ;;  %2024 = vmatpush2.bf16.msra.mxu1 %v6977_v60  ;;  %v721_v57 = vmul.f32 %v7367_v51, %v497_v6  ;;  %v502_v56 = vmax.f32 %v318_v37, 0.0  ;;  %v320_v60 = vadd.f32 %v319_v52, %v8741_v27  ;;  %v501_v27 = vmax.f32 %v316_v62, 0.0  ;;  %v6991_v62 = vld [vmem:[#allocation7 + $0xd0] ss:$20 sps:$4 sm:$0xff]  }
 0x167   :  { %v806_v2 = vsel %vm186_vm0, %v724_v5, %v11539_v15  ;;  %1517 = vmatprep.subr.bf16.mxu0 %v11552_v0  ;;  %2025 = vmatprep.subr.bf16.mxu1 %v6983_v38  ;;  %v7369_v9 = vpop.eup %7368  ;;  %v504_v38 = vmax.f32 %v322_v19, 0.0  ;;  %11616 = vst [vmem:[#allocation28_spill] sm:$0xff] %v9321_v49  ;;  %v9342_v58 = vrot.slane %v9326_v36, %v9321_v49 }
 0x168   :  { %v9099_v1 = vpack.c.bf16 %v806_v2, %v805_v21  ;;  %v9109_v12 = vpack.c.bf16 %v723_v14, %v721_v57  ;;  %v726_v20 = vmul.f32 %v7369_v9, %v502_v56  ;;  %v503_v52 = vmax.f32 %v320_v60, 0.0  ;;  %v6984_v2 = vld [vmem:[#allocation7 + $0x120] ss:$20 sps:$4 sm:$0xff]   ;;  %v6988_v9 = vld [vmem:[#allocation7 + $0xf8] ss:$20 sps:$4 sm:$0xff]  }
 0x169   :  { %v6994_v57 = vld [vmem:[#allocation7 + $0x100] ss:$20 sps:$4 sm:$0xff]   ;;  %v6998_v56 = vld [vmem:[#allocation7 + $0xd8] ss:$20 sps:$4 sm:$0xff]   ;;  %11619 = vst [vmem:[#allocation31_spill] sm:$0xff] %v9342_v58 }
 0x16a   :  { %6305 = vmatprep.mubr.msk.bf16.mxu0 %vm1236_vm1, %v9099_v1  ;;  %6313 = vmatprep.mubr.msk.bf16.mxu1 %vm1236_vm1, %v9099_v1  ;;  %v7371_v40 = vpop.eup %7370  ;;  %v807_v37 = vsel %vm186_vm0, %v726_v20, %v11538_v50  ;;  %v6997_v60 = vld [vmem:[#allocation7 + $0xac] ss:$20 sps:$4 sm:$0xff]   ;;  %v6999_v20 = vld [vmem:[#allocation7 + $0xb0] ss:$20 sps:$4 sm:$0xff]  }
 0x16b   :  { %1518 = vmatpush2.bf16.msra.mxu0 %v6980_v24  ;;  %2026 = vmatpush2.bf16.msra.mxu1 %v6981_v34  ;;  %v727_v5 = vmul.f32 %v7371_v40, %v503_v52  ;;  %v6987_v24 = vld [vmem:[#allocation7 + $0x128] ss:$20 sps:$4 sm:$0xff]  }
 0x16c   :  { %v7373_v43 = vpop.eup %7372  ;;  %2108 = vmatprep.subr.bf16.mxu0 %v6986_v42  ;;  %2221 = vmatprep.subr.bf16.mxu1 %v11552_v0  ;;  %v6990_v34 = vld [vmem:[#allocation7 + $0xfc] ss:$20 sps:$4 sm:$0xff]   ;;  %v6993_v42 = vld [vmem:[#allocation7 + $0xd4] ss:$20 sps:$4 sm:$0xff]  }
 0x16d   :  { %v728_v6 = vmul.f32 %v7373_v43, %v504_v38  ;;  %1354 = vmatmul.mubr.bf16.gmra.mxu0 %v9109_v12  ;;  %1467 = vmatmul.mubr.bf16.gmra.mxu1 %v9109_v12  ;;  %v7375_v39 = vpop.eup %7374  ;;  %v6995_v40 = vld [vmem:[#allocation7 + $0xa8] ss:$20 sps:$4 sm:$0xff]   ;;  %v7002_v38 = vld [vmem:[#allocation7 + $0x84] ss:$20 sps:$4 sm:$0xff]   ;;  %v7000_v43 = vld [vmem:[#allocation7 + $0x80] ss:$20 sps:$4 sm:$0xff]  }
 0x16e   :  { %v725_v14 = vmul.f32 %v7375_v39, %v501_v27  ;;  %v7006_v27 = vld [vmem:[#allocation7 + $0x88] ss:$20 sps:$4 sm:$0xff]   ;;  %v7010_v39 = vld [vmem:[#allocation7 + $0x60] ss:$20 sps:$4 sm:$0xff]  }
 0x16f   :  { %v808_v51 = vsel %vm186_vm0, %v728_v6, %v11537_v8  ;;  %v7005_v52 = vld [vmem:[#allocation7 + $0x5c] ss:$20 sps:$4 sm:$0xff]   ;;  %v7003_v6 = vld [vmem:[#allocation7 + $0x58] ss:$20 sps:$4 sm:$0xff]  }
 0x170   :  { %v9121_v19 = vpack.c.bf16 %v808_v51, %v807_v37  ;;  %v9127_v21 = vpack.c.bf16 %v727_v5, %v725_v14  ;;  %v7009_v5 = vld [vmem:[#allocation7 + $0x34] ss:$20 sps:$4 sm:$0xff]   ;;  %v7007_v37 = vld [vmem:[#allocation7 + $0x30] ss:$20 sps:$4 sm:$0xff]   ;;  %v7011_v51 = vld [vmem:[#allocation7 + $0x38] ss:$20 sps:$4 sm:$0xff]  }
 0x171   :  { %v7014_v14 = vld [vmem:[#allocation7 + $0xc] ss:$20 sps:$4 sm:$0xff]  }
 0x172   :  { %6306 = vmatprep.mubr.msk.bf16.mxu0 %vm1236_vm1, %v9121_v19  ;;  %6314 = vmatprep.mubr.msk.bf16.mxu1 %vm1236_vm1, %v9121_v19 }
 0x175   :  { %1364 = vmatmul.mubr.bf16.gmra.mxu0 %v9127_v21  ;;  %1477 = vmatmul.mubr.bf16.gmra.mxu1 %v9127_v21 }
 0x176   :  { %6315 = vmatprep.mubr.msk.bf16.mxu0 %vm1236_vm1, %v8834_v23  ;;  %6383 = vmatprep.mubr.msk.bf16.mxu1 %vm1236_vm1, %v8834_v23 }
 0x17d   :  { %1520 = vmatmul.mubr.bf16.vlgmr.msra.gmra.mxu0 %v8842_v16  ;;  %2028 = vmatmul.mubr.bf16.vlgmr.msra.gmra.mxu1 %v8842_v16 }
 0x17e   :  { %2109 = vmatpush1.bf16.msra.mxu0 %v6984_v2  ;;  %6316 = vmatprep.mubr.msk.bf16.mxu0 %vm1236_vm1, %v8884_v26  ;;  %v7012_v2 = vld [vmem:[#allocation7 + $0x8] ss:$20 sps:$4 sm:$0xff]  }
 0x17f   :  { %6384 = vmatprep.mubr.msk.bf16.mxu1 %vm1236_vm1, %v8884_v26  ;;  %2222 = vmatpush1.bf16.msra.mxu1 %v6987_v24  ;;  %v7018_v24 = vld [vmem:[#allocation7 + $0x10] ss:$20 sps:$4 sm:$0xff]  }
 0x180   :  { %2110 = vmatprep.subr.bf16.mxu0 %v6990_v34  ;;  %2223 = vmatprep.subr.bf16.mxu1 %v11552_v0  ;;  %v7017_v34 = vld [vmem:[#allocation7 + $0x1c4] ss:$20 sps:$4 sm:$0xff]  }
 0x182   :  { %2111 = vmatpush1.bf16.msra.mxu0 %v6988_v9  ;;  %v7015_v9 = vld [vmem:[#allocation7 + $0x1c0] ss:$20 sps:$4 sm:$0xff]  }
 0x183   :  { %2112 = vmatprep.subr.bf16.mxu0 %v6993_v42  ;;  %2224 = vmatpush1.bf16.msra.mxu1 %v6994_v57  ;;  %v7022_v42 = vld [vmem:[#allocation7 + $0x1c8] ss:$20 sps:$4 sm:$0xff]  }
 0x184   :  { %2225 = vmatprep.subr.bf16.mxu1 %v11552_v0  ;;  %v7021_v57 = vld [vmem:[#allocation7 + $0x19c] ss:$20 sps:$4 sm:$0xff]  }
 0x185   :  { %1528 = vmatmul.mubr.bf16.gmra.mxu0 %v8892_v48  ;;  %2038 = vmatmul.mubr.bf16.gmra.mxu1 %v8892_v48 }
 0x186   :  { %6317 = vmatprep.mubr.msk.bf16.mxu0 %vm1236_vm1, %v8940_v7  ;;  %6385 = vmatprep.mubr.msk.bf16.mxu1 %vm1236_vm1, %v8940_v7 }
 0x187   :  { %2113 = vmatpush1.bf16.msra.mxu0 %v6991_v62  ;;  %2226 = vmatpush1.bf16.msra.mxu1 %v6998_v56  ;;  %v7019_v62 = vld [vmem:[#allocation7 + $0x198] ss:$20 sps:$4 sm:$0xff]   ;;  %v7023_v56 = vld [vmem:[#allocation7 + $0x1a0] ss:$20 sps:$4 sm:$0xff]  }
 0x188   :  { %2114 = vmatprep.subr.bf16.mxu0 %v6997_v60  ;;  %2227 = vmatprep.subr.bf16.mxu1 %v11552_v0  ;;  %v7026_v60 = vld [vmem:[#allocation7 + $0x174] ss:$20 sps:$4 sm:$0xff]  }
 0x18b   :  { %2115 = vmatpush1.bf16.msra.mxu0 %v6995_v40  ;;  %2228 = vmatpush1.bf16.msra.mxu1 %v6999_v20  ;;  %v7024_v40 = vld [vmem:[#allocation7 + $0x170] ss:$20 sps:$4 sm:$0xff]   ;;  %v7027_v20 = vld [vmem:[#allocation7 + $0x178] ss:$20 sps:$4 sm:$0xff]  }
 0x18c   :  { %2116 = vmatprep.subr.bf16.mxu0 %v7002_v38  ;;  %2229 = vmatprep.subr.bf16.mxu1 %v11552_v0  ;;  %v7030_v38 = vld [vmem:[#allocation7 + $0x14c] ss:$20 sps:$4 sm:$0xff]  }
 0x18d   :  { %1536 = vmatmul.mubr.bf16.gmra.mxu0 %v8947_v11  ;;  %2048 = vmatmul.mubr.bf16.gmra.mxu1 %v8947_v11 }
 0x18e   :  { %6318 = vmatprep.mubr.msk.bf16.mxu0 %vm1236_vm1, %v8982_v54  ;;  %6386 = vmatprep.mubr.msk.bf16.mxu1 %vm1236_vm1, %v8982_v54 }
 0x18f   :  { %2117 = vmatpush1.bf16.msra.mxu0 %v7000_v43  ;;  %2230 = vmatpush1.bf16.msra.mxu1 %v7006_v27  ;;  %v7028_v43 = vld [vmem:[#allocation7 + $0x148] ss:$20 sps:$4 sm:$0xff]   ;;  %v7031_v27 = vld [vmem:[#allocation7 + $0x150] ss:$20 sps:$4 sm:$0xff]  }
 0x190   :  { %2118 = vmatprep.subr.bf16.mxu0 %v7005_v52  ;;  %2231 = vmatprep.subr.bf16.mxu1 %v11552_v0 }
 0x193   :  { %2119 = vmatpush1.bf16.msra.mxu0 %v7003_v6  ;;  %2232 = vmatpush1.bf16.msra.mxu1 %v7010_v39 }
 0x194   :  { %2120 = vmatprep.subr.bf16.mxu0 %v7009_v5  ;;  %2233 = vmatprep.subr.bf16.mxu1 %v11552_v0 }
 0x195   :  { %1544 = vmatmul.mubr.bf16.gmra.mxu0 %v8993_v44  ;;  %2058 = vmatmul.mubr.bf16.gmra.mxu1 %v8993_v44 }
 0x196   :  { %6319 = vmatprep.mubr.msk.bf16.mxu0 %vm1236_vm1, %v9030_v13  ;;  %6387 = vmatprep.mubr.msk.bf16.mxu1 %vm1236_vm1, %v9030_v13 }
 0x197   :  { %2121 = vmatpush1.bf16.msra.mxu0 %v7007_v37  ;;  %2234 = vmatpush1.bf16.msra.mxu1 %v7011_v51 }
 0x198   :  { %2122 = vmatprep.subr.bf16.mxu0 %v7014_v14  ;;  %2235 = vmatprep.subr.bf16.mxu1 %v11552_v0 }
 0x19b   :  { %2123 = vmatpush1.bf16.msra.mxu0 %v7012_v2  ;;  %2236 = vmatpush1.bf16.msra.mxu1 %v7018_v24 }
 0x19c   :  { %2132 = vmatprep.subr.bf16.mxu0 %v7017_v34  ;;  %2245 = vmatprep.subr.bf16.mxu1 %v11552_v0 }
 0x19d   :  { %1552 = vmatmul.mubr.bf16.gmra.mxu0 %v9038_v53  ;;  %2068 = vmatmul.mubr.bf16.gmra.mxu1 %v9038_v53 }
 0x19e   :  { %6320 = vmatprep.mubr.msk.bf16.mxu0 %vm1236_vm1, %v9069_v17  ;;  %6388 = vmatprep.mubr.msk.bf16.mxu1 %vm1236_vm1, %v9069_v17 }
 0x19f   :  { %2133 = vmatpush2.bf16.msra.mxu0 %v7015_v9  ;;  %2246 = vmatpush2.bf16.msra.mxu1 %v7022_v42 }
 0x1a0   :  { %2134 = vmatprep.subr.bf16.mxu0 %v7021_v57  ;;  %2247 = vmatprep.subr.bf16.mxu1 %v11552_v0 }
 0x1a3   :  { %2135 = vmatpush2.bf16.msra.mxu0 %v7019_v62  ;;  %2248 = vmatpush2.bf16.msra.mxu1 %v7023_v56 }
 0x1a4   :  { %2136 = vmatprep.subr.bf16.mxu0 %v7026_v60  ;;  %2249 = vmatprep.subr.bf16.mxu1 %v11552_v0 }
 0x1a5   :  { %1560 = vmatmul.mubr.bf16.gmra.mxu0 %v9076_v30  ;;  %2078 = vmatmul.mubr.bf16.gmra.mxu1 %v9076_v30 }
 0x1a6   :  { %6321 = vmatprep.mubr.msk.bf16.mxu0 %vm1236_vm1, %v9099_v1  ;;  %6389 = vmatprep.mubr.msk.bf16.mxu1 %vm1236_vm1, %v9099_v1 }
 0x1a7   :  { %2137 = vmatpush2.bf16.msra.mxu0 %v7024_v40  ;;  %2250 = vmatpush2.bf16.msra.mxu1 %v7027_v20 }
 0x1a8   :  { %2138 = vmatprep.subr.bf16.mxu0 %v7030_v38  ;;  %2251 = vmatprep.subr.bf16.mxu1 %v11552_v0 }
 0x1ab   :  { %2139 = vmatpush2.bf16.msra.mxu0 %v7028_v43  ;;  %2252 = vmatpush2.bf16.msra.mxu1 %v7031_v27 }
 0x1ad   :  { %1568 = vmatmul.mubr.bf16.gmra.mxu0 %v9109_v12  ;;  %2088 = vmatmul.mubr.bf16.gmra.mxu1 %v9109_v12 }
 0x1ae   :  { %6322 = vmatprep.mubr.msk.bf16.mxu0 %vm1236_vm1, %v9121_v19  ;;  %6390 = vmatprep.mubr.msk.bf16.mxu1 %vm1236_vm1, %v9121_v19 }
 0x1b5   :  { %1576 = vmatmul.mubr.bf16.gmra.mxu0 %v9127_v21  ;;  %2098 = vmatmul.mubr.bf16.gmra.mxu1 %v9127_v21 }
 0x1b6   :  { %6391 = vmatprep.mubr.msk.bf16.mxu0 %vm1236_vm1, %v8834_v23  ;;  %6399 = vmatprep.mubr.msk.bf16.mxu1 %vm1236_vm1, %v8834_v23 }
 0x1bd   :  { %2141 = vmatmul.mubr.bf16.vlgmr.msra.gmra.mxu0 %v8842_v16  ;;  %2254 = vmatmul.mubr.bf16.vlgmr.msra.gmra.mxu1 %v8842_v16 }
 0x1be   :  { %6392 = vmatprep.mubr.msk.bf16.mxu0 %vm1236_vm1, %v8884_v26  ;;  %6400 = vmatprep.mubr.msk.bf16.mxu1 %vm1236_vm1, %v8884_v26 }
 0x1c5   :  { %2151 = vmatmul.mubr.bf16.gmra.mxu0 %v8892_v48  ;;  %2262 = vmatmul.mubr.bf16.gmra.mxu1 %v8892_v48 }
 0x1c6   :  { %6393 = vmatprep.mubr.msk.bf16.mxu0 %vm1236_vm1, %v8940_v7  ;;  %6401 = vmatprep.mubr.msk.bf16.mxu1 %vm1236_vm1, %v8940_v7 }
 0x1cd   :  { %2161 = vmatmul.mubr.bf16.gmra.mxu0 %v8947_v11  ;;  %2270 = vmatmul.mubr.bf16.gmra.mxu1 %v8947_v11 }
 0x1ce   :  { %6394 = vmatprep.mubr.msk.bf16.mxu0 %vm1236_vm1, %v8982_v54  ;;  %6402 = vmatprep.mubr.msk.bf16.mxu1 %vm1236_vm1, %v8982_v54 }
 0x1d5   :  { %2171 = vmatmul.mubr.bf16.gmra.mxu0 %v8993_v44  ;;  %2278 = vmatmul.mubr.bf16.gmra.mxu1 %v8993_v44 }
 0x1d6   :  { %6395 = vmatprep.mubr.msk.bf16.mxu0 %vm1236_vm1, %v9030_v13  ;;  %6403 = vmatprep.mubr.msk.bf16.mxu1 %vm1236_vm1, %v9030_v13 }
 0x1dd   :  { %2181 = vmatmul.mubr.bf16.gmra.mxu0 %v9038_v53  ;;  %2286 = vmatmul.mubr.bf16.gmra.mxu1 %v9038_v53 }
 0x1de   :  { %6396 = vmatprep.mubr.msk.bf16.mxu0 %vm1236_vm1, %v9069_v17  ;;  %6404 = vmatprep.mubr.msk.bf16.mxu1 %vm1236_vm1, %v9069_v17 }
 0x1e5   :  { %2191 = vmatmul.mubr.bf16.gmra.mxu0 %v9076_v30  ;;  %2294 = vmatmul.mubr.bf16.gmra.mxu1 %v9076_v30 }
 0x1e6   :  { %6397 = vmatprep.mubr.msk.bf16.mxu0 %vm1236_vm1, %v9099_v1  ;;  %6405 = vmatprep.mubr.msk.bf16.mxu1 %vm1236_vm1, %v9099_v1 }
 0x1ed   :  { %2201 = vmatmul.mubr.bf16.gmra.mxu0 %v9109_v12  ;;  %2302 = vmatmul.mubr.bf16.gmra.mxu1 %v9109_v12 }
 0x1ee   :  { %6398 = vmatprep.mubr.msk.bf16.mxu0 %vm1236_vm1, %v9121_v19  ;;  %6406 = vmatprep.mubr.msk.bf16.mxu1 %vm1236_vm1, %v9121_v19 }
 0x1f5   :  { %2211 = vmatmul.mubr.bf16.gmra.mxu0 %v9127_v21  ;;  %2310 = vmatmul.mubr.bf16.gmra.mxu1 %v9127_v21 }
 0x1f6   :  { %3266 = vmatprep.mubr.bf16.mxu0 %v11552_v0  ;;  %3487 = vmatprep.mubr.bf16.mxu1 %v11552_v0 }
 0x1fa   :  { %v9240_v23 = vpop.f32.mrf.mxu0  ;;  %v9242_v16 = vpop.f32.mrf.mxu1 }
 0x1fc   :  { %v9244_v26 = vpop.f32.mrf.mxu0  ;;  %v9246_v48 = vpop.f32.mrf.mxu1 }
 0x1fe   :  { %v9248_v7 = vpop.f32.mrf.mxu0  ;;  %v9250_v11 = vpop.f32.mrf.mxu1 }
 0x200   :  { %v9252_v54 = vpop.f32.mrf.mxu0  ;;  %v9254_v44 = vpop.f32.mrf.mxu1 }
 0x202   :  { %v9256_v13 = vpop.f32.mrf.mxu0  ;;  %v9258_v53 = vpop.f32.mrf.mxu1 }
 0x204   :  { %v9260_v17 = vpop.f32.mrf.mxu0  ;;  %v9262_v30 = vpop.f32.mrf.mxu1 }
 0x206   :  { %v9264_v1 = vpop.f32.mrf.mxu0  ;;  %v9266_v12 = vpop.f32.mrf.mxu1 }
 0x208   :  { %v9268_v19 = vpop.f32.mrf.mxu0  ;;  %v9270_v21 = vpop.f32.mrf.mxu1 }
 0x20b   :  { %v9272_v52 = vpop.f32.mrf.mxu0  ;;  %v9274_v6 = vpop.f32.mrf.mxu1 }
 0x20d   :  { %v9276_v39 = vpop.f32.mrf.mxu0  ;;  %v9278_v5 = vpop.f32.mrf.mxu1 }
 0x20f   :  { %v9280_v37 = vpop.f32.mrf.mxu0  ;;  %v9282_v51 = vpop.f32.mrf.mxu1 }
 0x211   :  { %v9284_v14 = vpop.f32.mrf.mxu0  ;;  %v9286_v2 = vpop.f32.mrf.mxu1 }
 0x213   :  { %v9288_v24 = vpop.f32.mrf.mxu0  ;;  %v9290_v34 = vpop.f32.mrf.mxu1 }
 0x215   :  { %v9292_v9 = vpop.f32.mrf.mxu0  ;;  %v9294_v42 = vpop.f32.mrf.mxu1 }
 0x217   :  { %v9296_v57 = vpop.f32.mrf.mxu0  ;;  %v9298_v62 = vpop.f32.mrf.mxu1 }
 0x219   :  { %v9300_v56 = vpop.f32.mrf.mxu0  ;;  %v9302_v60 = vpop.f32.mrf.mxu1 }
 0x21c   :  { %v9304_v40 = vpop.f32.mrf.mxu0  ;;  %v9306_v20 = vpop.f32.mrf.mxu1 }
 0x21e   :  { %v9308_v38 = vpop.f32.mrf.mxu0  ;;  %v9310_v43 = vpop.f32.mrf.mxu1 }
 0x220   :  { %v9312_v27 = vpop.f32.mrf.mxu0  ;;  %v9314_v8 = vpop.f32.mrf.mxu1 }
 0x222   :  { %v9316_v50 = vpop.f32.mrf.mxu0  ;;  %v9318_v15 = vpop.f32.mrf.mxu1 }
 0x223   :  { %11614 = vst [vmem:[#allocation26_spill] sm:$0xff] %v9316_v50  ;;  %11615 = vst [vmem:[#allocation27_spill] sm:$0xff] %v9318_v15 }
 0x225   :  { %v9328_v3 = vpop.f32.mrf.mxu0  ;;  %v9330_v32 = vpop.f32.mrf.mxu1 }
 0x226   :  { %11617 = vst [vmem:[#allocation29_spill] sm:$0xff] %v9330_v32 }
 0x227   :  { %v9332_v33 = vpop.f32.mrf.mxu0  ;;  %v9334_v35 = vpop.f32.mrf.mxu1 }
 0x228   :  { %11618 = vst [vmem:[#allocation30_spill] sm:$0xff] %v9334_v35 }
 0x229   :  { %v1349_v59 = vpop.f32.mrf.mxu0  ;;  %v1462_v46 = vpop.f32.mrf.mxu1 }
 0x22a   :  { %v9348_v45 = vadd.f32 %v1349_v59, %v9338_v61  ;;  %v9351_v0 = vadd.f32 %v1462_v46, %v9342_v58 }
 0x22b   :  { %v9353_v55 = vpop.f32.mrf.mxu0  ;;  %v9355_v63 = vpop.f32.mrf.mxu1 }
 0x22c   :  { %11621 = vst [vmem:[#allocation33_spill] sm:$0xff] %v9348_v45  ;;  %11622 = vst [vmem:[#allocation34_spill] sm:$0xff] %v9351_v0 }
 0x22d   :  { %11623 = vst [vmem:[#allocation35_spill] sm:$0xff] %v9355_v63  ;;  %v1355_v22 = vpop.f32.mrf.mxu0  ;;  %v1468_v4 = vpop.f32.mrf.mxu1 }
 0x22e   :  { %v9366_v59 = vadd.f32 %v1355_v22, %v9338_v61  ;;  %v9369_v46 = vadd.f32 %v1468_v4, %v9342_v58 }
 0x22f   :  { %v1357_v25 = vpop.f32.mrf.mxu0  ;;  %v1470_v10 = vpop.f32.mrf.mxu1 }
 0x230   :  { %11625 = vst [vmem:[#allocation37_spill] sm:$0xff] %v9366_v59  ;;  %11626 = vst [vmem:[#allocation38_spill] sm:$0xff] %v9369_v46  ;;  %v9372_v63 = vadd.f32 %v1357_v25, %v9359_v41  ;;  %v9375_v0 = vadd.f32 %v1470_v10, %v9363_v18 }
 0x231   :  { %v1359_v35 = vpop.f32.mrf.mxu0  ;;  %v1472_v32 = vpop.f32.mrf.mxu1 }
 0x232   :  { %11627 = vst [vmem:[#allocation39_spill] sm:$0xff] %v9372_v63  ;;  %11628 = vst [vmem:[#allocation40_spill] sm:$0xff] %v9375_v0  ;;  %v9378_v15 = vadd.f32 %v1359_v35, %v9338_v61  ;;  %v9381_v50 = vadd.f32 %v1472_v32, %v9342_v58  ;;  %v9396_v35 = vld [vmem:[%s11525_s8] sm:$0x1f] }
 0x233   :  { %v9383_v22 = vpop.f32.mrf.mxu0  ;;  %v9385_v4 = vpop.f32.mrf.mxu1 }
 0x234   :  { %11629 = vst [vmem:[#allocation41_spill] sm:$0xff] %v9378_v15  ;;  %11630 = vst [vmem:[#allocation42_spill] sm:$0xff] %v9381_v50 }
 0x235   :  { %11631 = vst [vmem:[#allocation43_spill] sm:$0xff] %v9383_v22  ;;  %11632 = vst [vmem:[#allocation44_spill] sm:$0xff] %v9385_v4  ;;  %v1365_v46 = vpop.f32.mrf.mxu0  ;;  %v1478_v59 = vpop.f32.mrf.mxu1 }
 0x236   :  { %v9388_v25 = vadd.f32 %v1365_v46, %v9338_v61  ;;  %v9391_v10 = vadd.f32 %v1478_v59, %v9342_v58 }
 0x237   :  { %v1367_v0 = vpop.f32.mrf.mxu0  ;;  %v1480_v63 = vpop.f32.mrf.mxu1 }
 0x238   :  { %11633 = vst [vmem:[#allocation45_spill] sm:$0xff] %v9388_v25  ;;  %11634 = vst [vmem:[#allocation46_spill] sm:$0xff] %v9391_v10  ;;  %v9399_v32 = vadd.f32 %v1367_v0, %v9359_v41  ;;  %v9402_v4 = vadd.f32 %v1480_v63, %v9363_v18  ;;  %v9412_v10 = vrot.slane %v9396_v35, %v8685_v29 }
 0x239   :  { %v1369_v50 = vpop.f32.mrf.mxu0  ;;  %v1482_v15 = vpop.f32.mrf.mxu1  ;;  %v9420_v0 = vrot.slane %v9396_v35, %v8691_v31  ;;  %v9431_v31 = vadd.f32 %v9240_v23, %v9338_v61 }
 0x23a   :  { %11635 = vst [vmem:[#allocation47_spill] sm:$0xff] %v9399_v32  ;;  %11636 = vst [vmem:[#allocation48_spill] sm:$0xff] %v9402_v4  ;;  %v9405_v46 = vadd.f32 %v1369_v50, %v9338_v61  ;;  %v9408_v59 = vadd.f32 %v1482_v15, %v9342_v58 }
 0x23b   :  { %v9414_v25 = vpop.f32.mrf.mxu0  ;;  %v9416_v22 = vpop.f32.mrf.mxu1 }
 0x23c   :  { %11637 = vst [vmem:[#allocation49_spill] sm:$0xff] %v9405_v46  ;;  %11638 = vst [vmem:[#allocation50_spill] sm:$0xff] %v9408_v59 }
 0x23d   :  { %11639 = vst [vmem:[#allocation51_spill] sm:$0xff] %v9414_v25  ;;  %11640 = vst [vmem:[#allocation52_spill] sm:$0xff] %v9416_v22  ;;  %v9422_v63 = vpop.f32.mrf.mxu0  ;;  %v2029_v4 = vpop.f32.mrf.mxu1 }
 0x23e   :  { %11641 = vst [vmem:[#allocation53_spill] sm:$0xff] %v9422_v63  ;;  %v2030_v50 = vadd.f32 %v2029_v4, %v9412_v10  ;;  %v9435_v63 = vadd.f32 %v9242_v16, %v9342_v58  ;;  %v9438_v4 = vsub.s32 4, %v8682_v28  ;;  %v9489_v28 = vadd.f32 %v9256_v13, %v9338_v61 }
 0x23f   :  { %v1523_v46 = vpop.f32.mrf.mxu0  ;;  %v2031_v15 = vpop.f32.mrf.mxu1  ;;  %v9504_v13 = vadd.f32 %v9262_v30, %v9363_v18 }
 0x240   :  { %v6407_v59 = vmul.f32 -1.442695, %v2030_v50  ;;  %v2032_v32 = vadd.f32 %v2031_v15, %v9420_v0  ;;  %11643 = vst [vmem:[#allocation55_spill] sm:$0xff] %v9435_v63  ;;  %11644 = vst [vmem:[#allocation56_spill] sm:$0xff] %v9438_v4 }
 0x241   :  { %v9426_v29 = vpop.f32.mrf.mxu0  ;;  %v2033_v45 = vpop.f32.mrf.mxu1  ;;  %11649 = vst [vmem:[#allocation61_spill] sm:$0xff] %v9504_v13 }
 0x242   :  { %11642 = vst [vmem:[#allocation54_spill] sm:$0xff] %v9426_v29  ;;  %7376 = vpow2.f32 %v6407_v59  ;;  %v6408_v25 = vmul.f32 -1.442695, %v2032_v32  ;;  %v2034_v22 = vadd.f32 %v2033_v45, %v9412_v10  ;;  %v9443_v45 = vadd.f32 %v9244_v26, %v9359_v41 }
 0x243   :  { %v1526_v46 = vpop.f32.mrf.mxu0  ;;  %v2035_v50 = vpop.f32.mrf.mxu1  ;;  %v9456_v26 = vadd.f32 %v9246_v48, %v9363_v18  ;;  %v9472_v48 = vrot.slane %v9396_v35, %v9438_v4 }
 0x244   :  { %7378 = vpow2.f32 %v6408_v25  ;;  %v6412_v15 = vmul.f32 -1.442695, %v2034_v22  ;;  %v2036_v59 = vadd.f32 %v2035_v50, %v9420_v0  ;;  %v9452_v22 = vrot.slane %v9326_v36, %v9438_v4 }
 0x245   :  { %v9445_v32 = vpop.f32.mrf.mxu0  ;;  %v2039_v23 = vpop.f32.mrf.mxu1  ;;  %11646 = vst [vmem:[#allocation58_spill] sm:$0xff] %v9456_v26 }
 0x246   :  { %11645 = vst [vmem:[#allocation57_spill] sm:$0xff] %v9445_v32  ;;  %7380 = vpow2.f32 %v6412_v15  ;;  %v6413_v29 = vmul.f32 -1.442695, %v2036_v59  ;;  %v2040_v16 = vadd.f32 %v2039_v23, %v9412_v10  ;;  %v9462_v23 = vadd.f32 %v9248_v7, %v9338_v61 }
 0x247   :  { %v1531_v25 = vpop.f32.mrf.mxu0  ;;  %v2041_v50 = vpop.f32.mrf.mxu1  ;;  %v9485_v59 = vadd.f32 %v9254_v44, %v9363_v18 }
 0x248   :  { %7382 = vpow2.f32 %v6413_v29  ;;  %v6417_v32 = vmul.f32 -1.442695, %v2040_v16  ;;  %v2042_v15 = vadd.f32 %v2041_v50, %v9420_v0  ;;  %v9468_v25 = vrot.slane %v9396_v35, %v9321_v49 }
 0x249   :  { %v9464_v46 = vpop.f32.mrf.mxu0  ;;  %v2043_v36 = vpop.f32.mrf.mxu1  ;;  %v9476_v29 = vadd.f32 %v9250_v11, %v9342_v58  ;;  %v9481_v50 = vadd.f32 %v9252_v54, %v9359_v41  ;;  %v9493_v11 = vadd.f32 %v9258_v53, %v9342_v58  ;;  %v9526_v49 = vadd.f32 %v9266_v12, %v9342_v58 }
 0x24a   :  { %11647 = vst [vmem:[#allocation59_spill] sm:$0xff] %v9464_v46  ;;  %7384 = vpow2.f32 %v6417_v32  ;;  %v6418_v16 = vmul.f32 -1.442695, %v2042_v15  ;;  %v2044_v7 = vadd.f32 %v2043_v36, %v9412_v10  ;;  %v9497_v36 = vadd.f32 %v9260_v17, %v9359_v41 }
 0x24b   :  { %11648 = vst [vmem:[#allocation60_spill] sm:$0xff] %v9493_v11  ;;  %v1534_v32 = vpop.f32.mrf.mxu0  ;;  %v2045_v15 = vpop.f32.mrf.mxu1  ;;  %v9510_v46 = vrot.slane %v9396_v35, %v9345_v47  ;;  %11651 = vst [vmem:[#allocation63_spill] sm:$0xff] %v9526_v49  ;;  %v9542_v12 = vadd.f32 %v9272_v52, %v9338_v61 }
 0x24c   :  { %7386 = vpow2.f32 %v6418_v16  ;;  %v6422_v54 = vmul.f32 -1.442695, %v2044_v7  ;;  %v2046_v4 = vadd.f32 %v2045_v15, %v9420_v0 }
 0x24d   :  { %v9506_v53 = vpop.f32.mrf.mxu0  ;;  %v2049_v32 = vpop.f32.mrf.mxu1 }
 0x24e   :  { %11650 = vst [vmem:[#allocation62_spill] sm:$0xff] %v9506_v53  ;;  %7388 = vpow2.f32 %v6422_v54  ;;  %v6423_v16 = vmul.f32 -1.442695, %v2046_v4  ;;  %v2050_v7 = vadd.f32 %v2049_v32, %v9412_v10  ;;  %v9522_v32 = vadd.f32 %v9264_v1, %v9338_v61 }
 0x24f   :  { %v7377_v15 = vpop.eup %7376  ;;  %v1539_v26 = vpop.f32.mrf.mxu0  ;;  %v9538_v1 = vadd.f32 %v9270_v21, %v9363_v18 }
 0x250   :  { %v2051_v63 = vpop.f32.mrf.mxu1  ;;  %v2638_v47 = vadd.f32 1.0, %v7377_v15  ;;  %7390 = vpow2.f32 %v6423_v16  ;;  %v6427_v17 = vmul.f32 -1.442695, %v2050_v7  ;;  %v9533_v16 = vadd.f32 %v9268_v19, %v9359_v41 }
 0x251   :  { %v7379_v54 = vpop.eup %7378  ;;  %v2052_v53 = vadd.f32 %v2051_v63, %v9420_v0  ;;  %v9529_v26 = vpop.f32.mrf.mxu0  ;;  %v9546_v19 = vadd.f32 %v9274_v6, %v9342_v58 }
 0x252   :  { %11652 = vst [vmem:[#allocation64_spill] sm:$0xff] %v9529_v26  ;;  %v2053_v44 = vpop.f32.mrf.mxu1  ;;  %7392 = vrcp.f32 %v2638_v47  ;;  %v2639_v7 = vadd.f32 1.0, %v7379_v54 }
 0x253   :  { %v2054_v15 = vadd.f32 %v2053_v44, %v9412_v10  ;;  %v7381_v4 = vpop.eup %7380  ;;  %7394 = vpow2.f32 %v6427_v17  ;;  %v6428_v63 = vmul.f32 -1.442695, %v2052_v53  ;;  %v1542_v35 = vpop.f32.mrf.mxu0 }
 0x254   :  { %v2055_v30 = vpop.f32.mrf.mxu1  ;;  %7396 = vrcp.f32 %v2639_v7  ;;  %v2643_v47 = vadd.f32 1.0, %v7381_v4 }
 0x255   :  { %v6432_v44 = vmul.f32 -1.442695, %v2054_v15  ;;  %v7383_v54 = vpop.eup %7382  ;;  %7398 = vpow2.f32 %v6428_v63  ;;  %v2056_v52 = vadd.f32 %v2055_v30, %v9420_v0  ;;  %v9551_v13 = vpop.f32.mrf.mxu0 }
 0x256   :  { %11653 = vst [vmem:[#allocation65_spill] sm:$0xff] %v9551_v13  ;;  %v2059_v53 = vpop.f32.mrf.mxu1  ;;  %7400 = vrcp.f32 %v2643_v47  ;;  %v2644_v35 = vadd.f32 1.0, %v7383_v54  ;;  %v9560_v47 = vadd.f32 %v9276_v39, %v9359_v41  ;;  %v9564_v54 = vadd.f32 %v9278_v5, %v9363_v18 }
 0x257   :  { %v2060_v6 = vadd.f32 %v2059_v53, %v9412_v10  ;;  %v7385_v7 = vpop.eup %7384  ;;  %7402 = vpow2.f32 %v6432_v44  ;;  %v6433_v26 = vmul.f32 -1.442695, %v2056_v52  ;;  %v1547_v21 = vpop.f32.mrf.mxu0  ;;  %v9571_v53 = vadd.f32 %v9280_v37, %v9338_v61 }
 0x258   :  { %v2061_v63 = vpop.f32.mrf.mxu1  ;;  %7404 = vrcp.f32 %v2644_v35  ;;  %v2648_v13 = vadd.f32 1.0, %v7385_v7  ;;  %v9576_v7 = vadd.f32 %v9282_v51, %v9342_v58  ;;  %v9580_v5 = vadd.f32 %v9284_v14, %v9359_v41 }
 0x259   :  { %v6437_v49 = vmul.f32 -1.442695, %v2060_v6  ;;  %v7387_v11 = vpop.eup %7386  ;;  %7406 = vpow2.f32 %v6433_v26  ;;  %v2062_v44 = vadd.f32 %v2061_v63, %v9420_v0  ;;  %v9567_v52 = vpop.f32.mrf.mxu0  ;;  %v9584_v37 = vadd.f32 %v9286_v2, %v9363_v18 }
 0x25a   :  { %11654 = vst [vmem:[#allocation66_spill] sm:$0xff] %v9567_v52  ;;  %v2063_v21 = vpop.f32.mrf.mxu1  ;;  %7408 = vrcp.f32 %v2648_v13  ;;  %v2649_v35 = vadd.f32 1.0, %v7387_v11 }
 0x25b   :  { %v2064_v6 = vadd.f32 %v2063_v21, %v9412_v10  ;;  %v7389_v39 = vpop.eup %7388  ;;  %7410 = vpow2.f32 %v6437_v49  ;;  %v6438_v26 = vmul.f32 -1.442695, %v2062_v44  ;;  %v1550_v63 = vpop.f32.mrf.mxu0 }
 0x25c   :  { %v2065_v30 = vpop.f32.mrf.mxu1  ;;  %7412 = vrcp.f32 %v2649_v35  ;;  %v2653_v11 = vadd.f32 1.0, %v7389_v39 }
 0x25d   :  { %v6442_v13 = vmul.f32 -1.442695, %v2064_v6  ;;  %v7391_v21 = vpop.eup %7390  ;;  %7414 = vpow2.f32 %v6438_v26  ;;  %v2066_v14 = vadd.f32 %v2065_v30, %v9420_v0  ;;  %v9589_v17 = vpop.f32.mrf.mxu0 }
 0x25e   :  { %11655 = vst [vmem:[#allocation67_spill] sm:$0xff] %v9589_v17  ;;  %v2069_v49 = vpop.f32.mrf.mxu1  ;;  %7416 = vrcp.f32 %v2653_v11  ;;  %v2654_v63 = vadd.f32 1.0, %v7391_v21  ;;  %v9599_v21 = vadd.f32 %v9288_v24, %v9338_v61  ;;  %v9612_v24 = vadd.f32 %v9292_v9, %v9359_v41 }
 0x25f   :  { %v2070_v2 = vadd.f32 %v2069_v49, %v9412_v10  ;;  %v7393_v35 = vpop.eup %7392  ;;  %7418 = vpow2.f32 %v6442_v13  ;;  %v6443_v4 = vmul.f32 -1.442695, %v2066_v14  ;;  %v1555_v51 = vpop.f32.mrf.mxu0 }
 0x260   :  { %v2071_v26 = vpop.f32.mrf.mxu1  ;;  %v7395_v15 = vpop.eup %7394  ;;  %7420 = vrcp.f32 %v2654_v63  ;;  %v11657_v51 = vmax.f32 %v9431_v31, 0.0  ;;  %v9607_v63 = vadd.f32 %v9290_v34, %v9342_v58  ;;  %v11658_v31 = vmax.f32 %v9443_v45, 0.0 }
 0x261   :  { %v6447_v17 = vmul.f32 -1.442695, %v2070_v2  ;;  %v2072_v44 = vadd.f32 %v2071_v26, %v9420_v0  ;;  %v7397_v11 = vpop.eup %7396  ;;  %v2658_v49 = vadd.f32 1.0, %v7395_v15  ;;  %7422 = vpow2.f32 %v6443_v4  ;;  %v9601_v6 = vpop.f32.mrf.mxu0 }
 0x262   :  { %11656 = vst [vmem:[#allocation68_spill] sm:$0xff] %v9601_v6  ;;  %v2073_v13 = vpop.f32.mrf.mxu1  ;;  %v2878_v14 = vmul.f32 %v7393_v35, %v11657_v51  ;;  %v7399_v39 = vpop.eup %7398  ;;  %v2879_v35 = vmul.f32 %v7397_v11, %v11658_v31  ;;  %v9618_v34 = vadd.f32 %v9294_v42, %v9363_v18  ;;  %v11660_v45 = vmax.f32 %v9462_v23, 0.0 }
 0x263   :  { %7424 = vpow2.f32 %v6447_v17  ;;  %v6448_v2 = vmul.f32 -1.442695, %v2072_v44  ;;  %v2074_v26 = vadd.f32 %v2073_v13, %v9412_v10  ;;  %v7401_v30 = vpop.eup %7400  ;;  %v2659_v4 = vadd.f32 1.0, %v7399_v39  ;;  %v1558_v15 = vpop.f32.mrf.mxu0 }
 0x264   :  { %7426 = vrcp.f32 %v2658_v49  ;;  %v2075_v6 = vpop.f32.mrf.mxu1  ;;  %v7403_v51 = vpop.eup %7402  ;;  %v9625_v15 = vadd.f32 %v2879_v35, %v2878_v14  ;;  %v9629_v11 = vmul.f32 %v7401_v30, %v11660_v45 }
 0x265   :  { %7428 = vpow2.f32 %v6448_v2  ;;  %v6452_v17 = vmul.f32 -1.442695, %v2074_v26  ;;  %v2076_v44 = vadd.f32 %v2075_v6, %v9420_v0  ;;  %v9621_v13 = vpop.eup %7404  ;;  %v2663_v9 = vadd.f32 1.0, %v7403_v51  ;;  %v9623_v49 = vpop.f32.mrf.mxu0 }
 0x266   :  { %7430 = vrcp.f32 %v2659_v4  ;;  %11659 = vst [vmem:[#allocation69_spill] sm:$0xff] %v9623_v49  ;;  %v2079_v39 = vpop.f32.mrf.mxu1  ;;  %v7407_v31 = vpop.eup %7406 }
 0x267   :  { %7432 = vpow2.f32 %v6452_v17  ;;  %v6453_v2 = vmul.f32 -1.442695, %v2076_v44  ;;  %v2080_v6 = vadd.f32 %v2079_v39, %v9412_v10  ;;  %v7409_v26 = vpop.eup %7408  ;;  %v2664_v49 = vadd.f32 1.0, %v7407_v31  ;;  %v1563_v14 = vpop.f32.mrf.mxu0 }
 0x268   :  { %7434 = vrcp.f32 %v2663_v9  ;;  %v2081_v35 = vpop.f32.mrf.mxu1  ;;  %v7411_v52 = vpop.eup %7410  ;;  %v9639_v44 = vadd.f32 %v9296_v57, %v9338_v61  ;;  %v11661_v9 = vmax.f32 %v9489_v28, 0.0  ;;  %v9649_v57 = vadd.f32 %v9298_v62, %v9342_v58 }
 0x269   :  { %7436 = vpow2.f32 %v6453_v2  ;;  %v6457_v30 = vmul.f32 -1.442695, %v2080_v6  ;;  %v2082_v45 = vadd.f32 %v2081_v35, %v9420_v0  ;;  %v7413_v17 = vpop.eup %7412  ;;  %v2668_v39 = vadd.f32 1.0, %v7411_v52  ;;  %v1564_v4 = vpop.f32.mrf.mxu0 }
 0x26a   :  { %7438 = vrcp.f32 %v2664_v49  ;;  %v2083_v51 = vpop.f32.mrf.mxu1  ;;  %v2888_v31 = vmul.f32 %v7409_v26, %v11661_v9  ;;  %v7415_v14 = vpop.eup %7414  ;;  %v9644_v2 = vadd.f32 %v1564_v4, %v9452_v22  ;;  %11663 = vst [vmem:[#allocation71_spill] sm:$0xff] %v9649_v57  ;;  %v11664_v28 = vmax.f32 %v9497_v36, 0.0 }
 0x26b   :  { %7440 = vpow2.f32 %v6457_v30  ;;  %v6458_v42 = vmul.f32 -1.442695, %v2082_v45  ;;  %v2084_v6 = vadd.f32 %v2083_v51, %v9412_v10  ;;  %v7417_v35 = vpop.eup %7416  ;;  %v2669_v52 = vadd.f32 1.0, %v7415_v14  ;;  %v1566_v49 = vpop.f32.mrf.mxu0 }
 0x26c   :  { %11662 = vst [vmem:[#allocation70_spill] sm:$0xff] %v9644_v2  ;;  %7442 = vrcp.f32 %v2668_v39  ;;  %v2085_v23 = vpop.f32.mrf.mxu1  ;;  %v2889_v26 = vmul.f32 %v7413_v17, %v11664_v28  ;;  %v7419_v9 = vpop.eup %7418  ;;  %v9655_v30 = vadd.f32 %v9300_v56, %v9359_v41  ;;  %v11665_v36 = vmax.f32 %v9522_v32, 0.0 }
 0x26d   :  { %7444 = vpow2.f32 %v6458_v42  ;;  %v6462_v4 = vmul.f32 -1.442695, %v2084_v6  ;;  %v2086_v51 = vadd.f32 %v2085_v23, %v9420_v0  ;;  %v9658_v45 = vpop.eup %7420  ;;  %v2673_v62 = vadd.f32 1.0, %v7419_v9  ;;  %v1569_v39 = vpop.f32.mrf.mxu0 }
 0x26e   :  { %7446 = vrcp.f32 %v2669_v52  ;;  %v2089_v14 = vpop.f32.mrf.mxu1  ;;  %v9660_v49 = vadd.f32 %v2889_v26, %v2888_v31  ;;  %v9664_v17 = vmul.f32 %v7417_v35, %v11665_v36  ;;  %v7423_v28 = vpop.eup %7422  ;;  %v9667_v42 = vadd.f32 %v1569_v39, %v9452_v22 }
 0x26f   :  { %7448 = vpow2.f32 %v6462_v4  ;;  %v6463_v56 = vmul.f32 -1.442695, %v2086_v51  ;;  %v2090_v23 = vadd.f32 %v2089_v14, %v9412_v10  ;;  %v2674_v31 = vadd.f32 1.0, %v7423_v28  ;;  %v1571_v26 = vpop.f32.mrf.mxu0 }
 0x270   :  { %11666 = vst [vmem:[#allocation72_spill] sm:$0xff] %v9667_v42  ;;  %v7425_v6 = vpop.eup %7424  ;;  %7450 = vrcp.f32 %v2673_v62  ;;  %v2091_v2 = vpop.f32.mrf.mxu1  ;;  %v9674_v35 = vadd.f32 %v9302_v60, %v9363_v18  ;;  %v11668_v62 = vmax.f32 %v9542_v12, 0.0  ;;  %v11670_v12 = vmax.f32 %v9560_v47, 0.0 }
 0x271   :  { %v7427_v32 = vpop.eup %7426  ;;  %v2678_v4 = vadd.f32 1.0, %v7425_v6  ;;  %7452 = vpow2.f32 %v6463_v56  ;;  %v6467_v51 = vmul.f32 -1.442695, %v2090_v23  ;;  %v2092_v36 = vadd.f32 %v2091_v2, %v9420_v0  ;;  %v1572_v52 = vpop.f32.mrf.mxu0 }
 0x272   :  { %11667 = vst [vmem:[#allocation73_spill] sm:$0xff] %v9674_v35  ;;  %v7429_v39 = vpop.eup %7428  ;;  %7454 = vrcp.f32 %v2674_v31  ;;  %v2093_v9 = vpop.f32.mrf.mxu1  ;;  %v2898_v28 = vmul.f32 %v7427_v32, %v11668_v62  ;;  %v9681_v60 = vadd.f32 %v1572_v52, %v9452_v22  ;;  %v9686_v6 = vadd.f32 %v9304_v40, %v9338_v61 }
 0x273   :  { %v7431_v26 = vpop.eup %7430  ;;  %7456 = vrcp.f32 %v2678_v4  ;;  %v2679_v42 = vadd.f32 1.0, %v7429_v39  ;;  %v2094_v56 = vadd.f32 %v2093_v9, %v9412_v10  ;;  %v6468_v2 = vmul.f32 -1.442695, %v2092_v36  ;;  %v1574_v31 = vpop.f32.mrf.mxu0 }
 0x274   :  { %11669 = vst [vmem:[#allocation74_spill] sm:$0xff] %v9681_v60  ;;  %v7433_v23 = vpop.eup %7432  ;;  %7458 = vpow2.f32 %v6467_v51  ;;  %v2095_v14 = vpop.f32.mrf.mxu1  ;;  %v2899_v32 = vmul.f32 %v7431_v26, %v11670_v12  ;;  %v9692_v4 = vadd.f32 %v9306_v20, %v9342_v58  ;;  %v11672_v31 = vmax.f32 %v9571_v53, 0.0 }
 0x275   :  { %v7435_v62 = vpop.eup %7434  ;;  %7460 = vrcp.f32 %v2679_v42  ;;  %v2683_v52 = vadd.f32 1.0, %v7433_v23  ;;  %v6472_v9 = vmul.f32 -1.442695, %v2094_v56  ;;  %v2096_v40 = vadd.f32 %v2095_v14, %v9420_v0  ;;  %v1577_v60 = vpop.f32.mrf.mxu0 }
 0x276   :  { %11671 = vst [vmem:[#allocation75_spill] sm:$0xff] %v9692_v4  ;;  %v7437_v39 = vpop.eup %7436  ;;  %7462 = vpow2.f32 %v6468_v2  ;;  %v2099_v51 = vpop.f32.mrf.mxu1  ;;  %v9695_v36 = vadd.f32 %v2899_v32, %v2898_v28  ;;  %v9699_v47 = vmul.f32 %v7435_v62, %v11672_v31  ;;  %v9704_v42 = vadd.f32 %v1577_v60, %v9452_v22 }
 0x277   :  { %v9701_v26 = vpop.eup %7438  ;;  %7464 = vrcp.f32 %v2683_v52  ;;  %v2684_v20 = vadd.f32 1.0, %v7437_v39  ;;  %v2100_v56 = vadd.f32 %v2099_v51, %v9412_v10  ;;  %v6473_v28 = vmul.f32 -1.442695, %v2096_v40  ;;  %v1579_v12 = vpop.f32.mrf.mxu0 }
 0x278   :  { %11673 = vst [vmem:[#allocation76_spill] sm:$0xff] %v9704_v42  ;;  %v7441_v23 = vpop.eup %7440  ;;  %7466 = vpow2.f32 %v6472_v9  ;;  %v2101_v53 = vpop.f32.mrf.mxu1  ;;  %v9712_v60 = vadd.f32 %v9308_v38, %v9359_v41  ;;  %v11674_v9 = vmax.f32 %v9599_v21, 0.0  ;;  %v9723_v38 = vadd.f32 %v9310_v43, %v9363_v18 }
 0x279   :  { %v7443_v32 = vpop.eup %7442  ;;  %7468 = vrcp.f32 %v2684_v20  ;;  %v2688_v52 = vadd.f32 1.0, %v7441_v23  ;;  %v6477_v39 = vmul.f32 -1.442695, %v2100_v56  ;;  %v2102_v51 = vadd.f32 %v2101_v53, %v9420_v0  ;;  %v1580_v14 = vpop.f32.mrf.mxu0 }
 0x27a   :  { %v7445_v31 = vpop.eup %7444  ;;  %7470 = vpow2.f32 %v6473_v28  ;;  %v2103_v2 = vpop.f32.mrf.mxu1  ;;  %v2908_v40 = vmul.f32 %v7443_v32, %v11674_v9  ;;  %v9718_v20 = vadd.f32 %v1580_v14, %v9452_v22  ;;  %11676 = vst [vmem:[#allocation78_spill] sm:$0xff] %v9723_v38  ;;  %v11677_v21 = vmax.f32 %v9612_v24, 0.0 }
 0x27b   :  { %v7447_v12 = vpop.eup %7446  ;;  %7472 = vrcp.f32 %v2688_v52  ;;  %v2689_v42 = vadd.f32 1.0, %v7445_v31  ;;  %v2104_v56 = vadd.f32 %v2103_v2, %v9412_v10  ;;  %v6478_v28 = vmul.f32 -1.442695, %v2102_v51  ;;  %v1582_v53 = vpop.f32.mrf.mxu0 }
 0x27c   :  { %11675 = vst [vmem:[#allocation77_spill] sm:$0xff] %v9718_v20  ;;  %v7449_v23 = vpop.eup %7448  ;;  %7474 = vpow2.f32 %v6477_v39  ;;  %v2105_v62 = vpop.f32.mrf.mxu1  ;;  %v2909_v32 = vmul.f32 %v7447_v12, %v11677_v21  ;;  %v1340_v52 = vadd.f32 %v9312_v27, %v9338_v61  ;;  %v11678_v51 = vmax.f32 %v9639_v44, 0.0 }
 0x27d   :  { %v7451_v9 = vpop.eup %7450  ;;  %7476 = vrcp.f32 %v2689_v42  ;;  %v2693_v14 = vadd.f32 1.0, %v7449_v23  ;;  %v6482_v31 = vmul.f32 -1.442695, %v2104_v56  ;;  %v2106_v2 = vadd.f32 %v2105_v62, %v9420_v0  ;;  %v2142_v43 = vpop.f32.mrf.mxu0 }
 0x27e   :  { %v7453_v10 = vpop.eup %7452  ;;  %7478 = vpow2.f32 %v6478_v28  ;;  %v2255_v20 = vpop.f32.mrf.mxu1  ;;  %v9730_v39 = vadd.f32 %v2909_v32, %v2908_v40  ;;  %v9734_v53 = vmul.f32 %v7451_v9, %v11678_v51  ;;  %v2143_v27 = vadd.f32 %v2142_v43, %v9468_v25 }
 0x27f   :  { %v9736_v24 = vpop.eup %7454  ;;  %7480 = vrcp.f32 %v2693_v14  ;;  %v2694_v12 = vadd.f32 1.0, %v7453_v10  ;;  %v2256_v42 = vadd.f32 %v2255_v20, %v9472_v48  ;;  %v2359_v23 = vmax.f32 %v9712_v60, 0.0  ;;  %v2144_v44 = vpop.f32.mrf.mxu0 }
 0x280   :  { %v7457_v56 = vpop.eup %7456  ;;  %v9743_v0 = vadd.f32 %v9314_v8, %v9342_v58  ;;  %7482 = vpow2.f32 %v6482_v31  ;;  %v6483_v62 = vmul.f32 -1.442695, %v2106_v2  ;;  %v2257_v40 = vpop.f32.mrf.mxu1  ;;  %v6409_v21 = vmul.f32 -1.442695, %v2143_v27 }
 0x281   :  { %v7459_v28 = vpop.eup %7458  ;;  %7484 = vrcp.f32 %v2694_v12  ;;  %v6411_v32 = vmul.f32 -1.442695, %v2256_v42  ;;  %v2145_v9 = vadd.f32 %v2144_v44, %v9510_v46  ;;  %v2363_v10 = vmax.f32 %v1340_v52, 0.0  ;;  %v2146_v43 = vpop.f32.mrf.mxu0 }
 0x282   :  { %11679 = vst [vmem:[#allocation79_spill] sm:$0xff] %v9743_v0  ;;  %v7461_v14 = vpop.eup %7460  ;;  %v2698_v20 = vadd.f32 1.0, %v7459_v28  ;;  %7486 = vpow2.f32 %v6483_v62  ;;  %v2258_v60 = vpop.f32.mrf.mxu1  ;;  %v11680_v51 = vmax.f32 %v9686_v6, 0.0  ;;  %v2147_v2 = vadd.f32 %v2146_v43, %v9468_v25 }
 0x283   :  { %v7463_v4 = vpop.eup %7462  ;;  %7488 = vpow2.f32 %v6409_v21  ;;  %v6410_v31 = vmul.f32 -1.442695, %v2145_v9  ;;  %v2259_v12 = vadd.f32 %v2258_v60, %v9472_v48  ;;  %v1346_v42 = vadd.f32 %v9328_v3, %v9338_v61  ;;  %v2148_v44 = vpop.f32.mrf.mxu0 }
 0x284   :  { %v2918_v8 = vmul.f32 %v7457_v56, %v11680_v51  ;;  %v7465_v27 = vpop.eup %7464  ;;  %7490 = vrcp.f32 %v2698_v20  ;;  %v2699_v52 = vadd.f32 1.0, %v7463_v4  ;;  %v2260_v62 = vpop.f32.mrf.mxu1  ;;  %v2919_v40 = vmul.f32 %v7461_v14, %v2359_v23  ;;  %v7032_v4 = vld [vmem:[%s11527_s10 + $0x70] ss:$8 sps:$4 sm:$0xff]  }
 0x285   :  { %v7467_v28 = vpop.eup %7466  ;;  %v1348_v6 = vadd.f32 %v9332_v33, %v9359_v41  ;;  %7492 = vpow2.f32 %v6411_v32  ;;  %v6414_v56 = vmul.f32 -1.442695, %v2147_v2  ;;  %v2149_v21 = vadd.f32 %v2148_v44, %v9510_v46  ;;  %v2152_v60 = vpop.f32.mrf.mxu0  ;;  %v7034_v33 = vld [vmem:[%s11527_s10 + $0x74] ss:$8 sps:$4 sm:$0xff]  }
 0x286   :  { %v9755_v9 = vpop.eup %7468  ;;  %7494 = vrcp.f32 %v2699_v52  ;;  %v2703_v43 = vadd.f32 1.0, %v7467_v28  ;;  %v2263_v51 = vpop.f32.mrf.mxu1  ;;  %v9757_v61 = vadd.f32 %v2919_v40, %v2918_v8  ;;  %v9759_v3 = vmul.f32 %v7465_v27, %v2363_v10  ;;  %v7037_v10 = vld [vmem:[%s11527_s10 + $0x64] ss:$8 sps:$4 sm:$0xff]   ;;  %3455 = vmatprep.subr.bf16.mxu1 %v7034_v33 }
 0x287   :  { %11681 = vst [vmem:[#allocation80_spill] sm:$0xff] %v9755_v9  ;;  %v7471_v23 = vpop.eup %7470  ;;  %7496 = vpow2.f32 %v6410_v31  ;;  %v6416_v14 = vmul.f32 -1.442695, %v2259_v12  ;;  %v2153_v20 = vadd.f32 %v2152_v60, %v9468_v25  ;;  %v2368_v2 = vmax.f32 %v1346_v42, 0.0  ;;  %v2154_v44 = vpop.f32.mrf.mxu0  ;;  %3456 = vmatpush1.bf16.msra.mxu1 %v7032_v4  ;;  %v7035_v42 = vld [vmem:[%s11527_s10 + $0x60] ss:$8 sps:$4 sm:$0xff]  }
 0x288   :  { %11682 = vst [vmem:[#allocation81_spill] sm:$0xff] %v9757_v61  ;;  %11683 = vst [vmem:[#allocation82_spill] sm:$0xff] %v9759_v3  ;;  %v7473_v8 = vpop.eup %7472  ;;  %v9774_v27 = vadd.f32 %v9353_v55, %v9359_v41  ;;  %7498 = vrcp.f32 %v2703_v43  ;;  %v2704_v52 = vadd.f32 1.0, %v7471_v23  ;;  %v2265_v62 = vpop.f32.mrf.mxu1  ;;  %v6415_v12 = vmul.f32 -1.442695, %v2149_v21  ;;  %3457 = vmatprep.subr.bf16.mxu1 %v7037_v10  ;;  %v11684_v4 = vld [vmem:[#allocation33_spill] sm:$0xff] }
 0x289   :  { %v7475_v40 = vpop.eup %7474  ;;  %7500 = vpow2.f32 %v6414_v56  ;;  %v2264_v28 = vadd.f32 %v2263_v51, %v9472_v48  ;;  %v2369_v55 = vmax.f32 %v1348_v6, 0.0  ;;  %v2156_v23 = vpop.f32.mrf.mxu0  ;;  %v2928_v62 = vmul.f32 %v7473_v8, %v2368_v2  ;;  %v7040_v56 = vld [vmem:[%s11527_s10 + $0x54] ss:$8 sps:$4 sm:$0xff]   ;;  %v7044_v21 = vld [vmem:[%s11526_s9 + $0x70] ss:$8 sps:$4 sm:$0xff]  }
 0x28a   :  { %v7477_v60 = vpop.eup %7476  ;;  %7502 = vrcp.f32 %v2704_v52  ;;  %v2708_v43 = vadd.f32 1.0, %v7475_v40  ;;  %v2266_v32 = vpop.f32.mrf.mxu1  ;;  %v2373_v33 = vmax.f32 %v11684_v4, 0.0  ;;  %v6419_v31 = vmul.f32 -1.442695, %v2153_v20  ;;  %v7046_v8 = vld [vmem:[%s11526_s9 + $0x74] ss:$8 sps:$4 sm:$0xff]  }
 0x28b   :  { %v7479_v51 = vpop.eup %7478  ;;  %7504 = vpow2.f32 %v6416_v14  ;;  %v2155_v6 = vadd.f32 %v2154_v44, %v9510_v46  ;;  %v2374_v2 = vmax.f32 %v9774_v27, 0.0  ;;  %v2158_v40 = vpop.f32.mrf.mxu0  ;;  %v2929_v38 = vmul.f32 %v7477_v60, %v2369_v55  ;;  %3458 = vmatpush1.bf16.msra.mxu1 %v7035_v42  ;;  %v7038_v20 = vld [vmem:[%s11527_s10 + $0x50] ss:$8 sps:$4 sm:$0xff]   ;;  %3234 = vmatprep.subr.bf16.mxu0 %v7046_v8  ;;  %v7052_v27 = vld [vmem:[%s11526_s9 + $0x64] ss:$8 sps:$4 sm:$0xff]  }
 0x28c   :  { %v7481_v10 = vpop.eup %7480  ;;  %7506 = vrcp.f32 %v2708_v43  ;;  %v2709_v52 = vadd.f32 1.0, %v7479_v51  ;;  %v2268_v0 = vpop.f32.mrf.mxu1  ;;  %v6421_v61 = vmul.f32 -1.442695, %v2264_v28  ;;  %v2157_v14 = vadd.f32 %v2156_v23, %v9468_v25  ;;  %3459 = vmatprep.subr.bf16.mxu1 %v7040_v56  ;;  %v7043_v28 = vld [vmem:[%s11527_s10 + $0x44] ss:$8 sps:$4 sm:$0xff]   ;;  %3235 = vmatpush1.bf16.msra.mxu0 %v7044_v21  ;;  %v11687_v8 = vld [vmem:[#allocation39_spill] sm:$0xff] }
 0x28d   :  { %v7483_v3 = vpop.eup %7482  ;;  %7508 = vpow2.f32 %v6415_v12  ;;  %v2162_v0 = vpop.f32.mrf.mxu0  ;;  %v9800_v55 = vadd.f32 %v2929_v38, %v2928_v62  ;;  %v2933_v12 = vmul.f32 %v7481_v10, %v2373_v33  ;;  %v7050_v42 = vld [vmem:[%s11526_s9 + $0x60] ss:$8 sps:$4 sm:$0xff]   ;;  %3236 = vmatprep.subr.bf16.mxu0 %v7052_v27  ;;  %v7058_v38 = vld [vmem:[%s11526_s9 + $0x54] ss:$8 sps:$4 sm:$0xff]   ;;  %v2267_v21 = vadd.f32 %v2266_v32, %v9472_v48 }
 0x28e   :  { %v7485_v44 = vpop.eup %7484  ;;  %7510 = vrcp.f32 %v2709_v52  ;;  %v2713_v43 = vadd.f32 1.0, %v7483_v3  ;;  %v2271_v60 = vpop.f32.mrf.mxu1  ;;  %v11686_v51 = vld [vmem:[#allocation37_spill] sm:$0xff]  ;;  %v2379_v3 = vmax.f32 %v11687_v8, 0.0  ;;  %v6420_v52 = vmul.f32 -1.442695, %v2155_v6 }
 0x28f   :  { %11685 = vst [vmem:[#allocation33_spill] sm:$0xff] %v9800_v55  ;;  %v7487_v23 = vpop.eup %7486  ;;  %v2378_v4 = vmax.f32 %v11686_v51, 0.0  ;;  %7512 = vpow2.f32 %v6419_v31  ;;  %v9814_v33 = vpop.f32.mrf.mxu0  ;;  %v2934_v55 = vmul.f32 %v7485_v44, %v2374_v2  ;;  %v11688_v51 = vld [vmem:[#allocation43_spill] sm:$0xff]  ;;  %v6424_v6 = vmul.f32 -1.442695, %v2157_v14  ;;  %3460 = vmatpush1.bf16.msra.mxu1 %v7038_v20 }
 0x290   :  { %v7489_v62 = vpop.eup %7488  ;;  %7514 = vrcp.f32 %v2713_v43  ;;  %v2714_v56 = vadd.f32 1.0, %v7487_v23  ;;  %v2273_v10 = vpop.f32.mrf.mxu1  ;;  %v9818_v8 = vadd.f32 %v11688_v51, %v9359_v41  ;;  %v7041_v27 = vld [vmem:[%s11527_s10 + $0x40] ss:$8 sps:$4 sm:$0xff]   ;;  %v2159_v32 = vadd.f32 %v2158_v40, %v9510_v46  ;;  %3461 = vmatprep.subr.bf16.mxu1 %v7043_v28  ;;  %3237 = vmatpush1.bf16.msra.mxu0 %v7050_v42  ;;  %v7056_v14 = vld [vmem:[%s11526_s9 + $0x50] ss:$8 sps:$4 sm:$0xff]  }
 0x291   :  { %v7491_v9 = vpop.eup %7490  ;;  %v2640_v31 = vadd.f32 1.0, %v7489_v62  ;;  %7516 = vpow2.f32 %v6421_v61  ;;  %v9824_v23 = vpop.f32.mrf.mxu0  ;;  %v9828_v44 = vadd.f32 %v2934_v55, %v2933_v12  ;;  %v7049_v61 = vld [vmem:[%s11527_s10 + $0x34] ss:$8 sps:$4 sm:$0xff]   ;;  %3238 = vmatprep.subr.bf16.mxu0 %v7058_v38  ;;  %v6426_v28 = vmul.f32 -1.442695, %v2267_v21 }
 0x292   :  { %v7493_v43 = vpop.eup %7492  ;;  %7518 = vrcp.f32 %v2714_v56  ;;  %v9826_v2 = vpop.f32.mrf.mxu1  ;;  %v2938_v10 = vmul.f32 %v7491_v9, %v2378_v4  ;;  %v11690_v40 = vld [vmem:[#allocation26_spill] sm:$0xff]  ;;  %v11692_v56 = vld [vmem:[#allocation41_spill] sm:$0xff]  ;;  %v2163_v42 = vadd.f32 %v2162_v0, %v9468_v25  ;;  %v2384_v58 = vmax.f32 %v9818_v8, 0.0 }
 0x293   :  { %11689 = vst [vmem:[#allocation37_spill] sm:$0xff] %v9828_v44  ;;  %v7495_v20 = vpop.eup %7494  ;;  %v9838_v62 = vadd.f32 %v11690_v40, %v9359_v41  ;;  %v2383_v51 = vmax.f32 %v11692_v56, 0.0  ;;  %7520 = vrcp.f32 %v2640_v31  ;;  %v2642_v55 = vadd.f32 1.0, %v7493_v43  ;;  %v7061_v9 = vld [vmem:[%s11526_s9 + $0x44] ss:$8 sps:$4 sm:$0xff]   ;;  %v9845_v4 = vpop.f32.mrf.mxu0  ;;  %3462 = vmatpush1.bf16.msra.mxu1 %v7041_v27 }
 0x294   :  { %v7497_v12 = vpop.eup %7496  ;;  %7522 = vpow2.f32 %v6420_v52  ;;  %v2276_v44 = vpop.f32.mrf.mxu1  ;;  %v2939_v35 = vmul.f32 %v7495_v20, %v2379_v3  ;;  %v2272_v38 = vadd.f32 %v2271_v60, %v9472_v48  ;;  %v7047_v43 = vld [vmem:[%s11527_s10 + $0x30] ss:$8 sps:$4 sm:$0xff]   ;;  %v6425_v21 = vmul.f32 -1.442695, %v2159_v32  ;;  %3463 = vmatprep.subr.bf16.mxu1 %v7049_v61  ;;  %v7055_v60 = vld [vmem:[%s11527_s10 + $0x24] ss:$8 sps:$4 sm:$0xff]   ;;  %3239 = vmatpush1.bf16.msra.mxu0 %v7056_v14 }
 0x295   :  { %11691 = vst [vmem:[#allocation39_spill] sm:$0xff] %v9838_v62  ;;  %v7499_v40 = vpop.eup %7498  ;;  %7524 = vrcp.f32 %v2642_v55  ;;  %v2641_v31 = vadd.f32 1.0, %v7497_v12  ;;  %v9852_v0 = vpop.f32.mrf.mxu0  ;;  %v7059_v8 = vld [vmem:[%s11526_s9 + $0x40] ss:$8 sps:$4 sm:$0xff]   ;;  %v11695_v20 = vld [vmem:[#allocation51_spill] sm:$0xff]  ;;  %3240 = vmatprep.subr.bf16.mxu0 %v7061_v9 }
 0x296   :  { %v7501_v52 = vpop.eup %7500  ;;  %7526 = vpow2.f32 %v6424_v6  ;;  %v9854_v56 = vpop.f32.mrf.mxu1  ;;  %v9856_v3 = vadd.f32 %v2939_v35, %v2938_v10  ;;  %v2943_v44 = vmul.f32 %v7499_v40, %v2383_v51  ;;  %v11694_v6 = vld [vmem:[#allocation45_spill] sm:$0xff]  ;;  %v9867_v55 = vadd.f32 %v11695_v20, %v9359_v41  ;;  %v7067_v10 = vld [vmem:[%s11526_s9 + $0x34] ss:$8 sps:$4 sm:$0xff]  }
 0x297   :  { %v7503_v27 = vpop.eup %7502  ;;  %v2388_v32 = vmax.f32 %v11694_v6, 0.0  ;;  %7528 = vrcp.f32 %v2641_v31  ;;  %v2645_v35 = vadd.f32 1.0, %v7501_v52  ;;  %v6429_v14 = vmul.f32 -1.442695, %v2163_v42  ;;  %v9874_v12 = vpop.f32.mrf.mxu0  ;;  %v11696_v41 = vld [vmem:[#allocation47_spill] sm:$0xff]  ;;  %3464 = vmatpush1.bf16.msra.mxu1 %v7047_v43 }
 0x298   :  { %11693 = vst [vmem:[#allocation43_spill] sm:$0xff] %v9856_v3  ;;  %v7505_v61 = vpop.eup %7504  ;;  %7530 = vpow2.f32 %v6426_v28  ;;  %v2165_v51 = vadd.f32 %v9814_v33, %v9510_v46  ;;  %v2281_v40 = vpop.f32.mrf.mxu1  ;;  %v2944_v6 = vmul.f32 %v7503_v27, %v2384_v58  ;;  %v2389_v20 = vmax.f32 %v11696_v41, 0.0  ;;  %v7053_v52 = vld [vmem:[%s11527_s10 + $0x20] ss:$8 sps:$4 sm:$0xff]   ;;  %3465 = vmatprep.subr.bf16.mxu1 %v7055_v60  ;;  %3241 = vmatpush1.bf16.msra.mxu0 %v7059_v8  ;;  %v7065_v43 = vld [vmem:[%s11526_s9 + $0x30] ss:$8 sps:$4 sm:$0xff]  }
 0x299   :  { %v7507_v3 = vpop.eup %7506  ;;  %7532 = vrcp.f32 %v2645_v35  ;;  %v2647_v31 = vadd.f32 1.0, %v7505_v61  ;;  %v6431_v9 = vmul.f32 -1.442695, %v2272_v38  ;;  %v2167_v33 = vadd.f32 %v9824_v23, %v9468_v25  ;;  %v9882_v42 = vpop.f32.mrf.mxu0  ;;  %v7064_v38 = vld [vmem:[%s11527_s10 + $0x14] ss:$8 sps:$4 sm:$0xff]   ;;  %v11698_v35 = vld [vmem:[#allocation49_spill] sm:$0xff]  ;;  %3242 = vmatprep.subr.bf16.mxu0 %v7067_v10 }
 0x29a   :  { %v7509_v28 = vpop.eup %7508  ;;  %7534 = vpow2.f32 %v6425_v21  ;;  %v9884_v40 = vpop.f32.mrf.mxu1  ;;  %v9886_v58 = vadd.f32 %v2944_v6, %v2943_v44  ;;  %v2948_v27 = vmul.f32 %v7507_v3, %v2388_v32  ;;  %v2393_v23 = vmax.f32 %v11698_v35, 0.0  ;;  %v7070_v3 = vld [vmem:[%s11526_s9 + $0x24] ss:$8 sps:$4 sm:$0xff]  }
 0x29b   :  { %v7511_v21 = vpop.eup %7510  ;;  %7536 = vrcp.f32 %v2647_v31  ;;  %v2646_v61 = vadd.f32 1.0, %v7509_v28  ;;  %v2275_v44 = vadd.f32 %v9826_v2, %v9472_v48  ;;  %v2394_v8 = vmax.f32 %v9867_v55, 0.0  ;;  %v9901_v6 = vpop.f32.mrf.mxu0  ;;  %v11699_v31 = vld [vmem:[#allocation53_spill] sm:$0xff]  ;;  %3466 = vmatpush1.bf16.msra.mxu1 %v7053_v52  ;;  %v7062_v55 = vld [vmem:[%s11527_s10 + $0x10] ss:$8 sps:$4 sm:$0xff]  }
 0x29c   :  { %11697 = vst [vmem:[#allocation26_spill] sm:$0xff] %v9886_v58  ;;  %v7513_v60 = vpop.eup %7512  ;;  %7538 = vpow2.f32 %v6429_v14  ;;  %v6430_v32 = vmul.f32 -1.442695, %v2165_v51  ;;  %v2284_v41 = vpop.f32.mrf.mxu1  ;;  %v2949_v58 = vmul.f32 %v7511_v21, %v2389_v20  ;;  %v9905_v28 = vadd.f32 %v11699_v31, %v9452_v22  ;;  %3467 = vmatprep.subr.bf16.mxu1 %v7064_v38  ;;  %3243 = vmatpush1.bf16.msra.mxu0 %v7065_v43 }
 0x29d   :  { %v7515_v35 = vpop.eup %7514  ;;  %7540 = vrcp.f32 %v2646_v61  ;;  %v2650_v2 = vadd.f32 1.0, %v7513_v60  ;;  %v2169_v10 = vadd.f32 %v9845_v4, %v9510_v46  ;;  %v6434_v51 = vmul.f32 -1.442695, %v2167_v33  ;;  %v9912_v41 = vpop.f32.mrf.mxu0  ;;  %v7068_v4 = vld [vmem:[%s11526_s9 + $0x20] ss:$8 sps:$4 sm:$0xff]   ;;  %3244 = vmatprep.subr.bf16.mxu0 %v7070_v3 }
 0x29e   :  { %v7517_v14 = vpop.eup %7516  ;;  %7542 = vpow2.f32 %v6431_v9  ;;  %v9914_v20 = vpop.f32.mrf.mxu1  ;;  %v9916_v21 = vadd.f32 %v2949_v58, %v2948_v27  ;;  %v2953_v31 = vmul.f32 %v7515_v35, %v2393_v23  ;;  %v6436_v60 = vmul.f32 -1.442695, %v2275_v44  ;;  %v11701_v58 = vld [vmem:[#allocation54_spill] sm:$0xff] }
 0x29f   :  { %v7519_v52 = vpop.eup %7518  ;;  %7544 = vrcp.f32 %v2650_v2  ;;  %v2652_v61 = vadd.f32 1.0, %v7517_v14  ;;  %v2173_v9 = vadd.f32 %v9852_v0, %v9468_v25  ;;  %v9926_v27 = vadd.f32 %v11701_v58, %v9452_v22  ;;  %v9928_v38 = vpop.f32.mrf.mxu0  ;;  %3468 = vmatpush1.bf16.msra.mxu1 %v7062_v55 }
 0x2a0   :  { %11700 = vst [vmem:[#allocation41_spill] sm:$0xff] %v9916_v21  ;;  %v7521_v33 = vpop.eup %7520  ;;  %7546 = vpow2.f32 %v6430_v32  ;;  %v2289_v43 = vpop.f32.mrf.mxu1  ;;  %v2954_v23 = vmul.f32 %v7519_v52, %v2394_v8  ;;  %v2322_v2 = vmax.f32 %v9905_v28, 0.0  ;;  %v6435_v44 = vmul.f32 -1.442695, %v2169_v10  ;;  %v11702_v32 = vld [vmem:[#allocation55_spill] sm:$0xff]  ;;  %3245 = vmatpush1.bf16.msra.mxu0 %v7068_v4  ;;  %v11708_v4 = vld [vmem:[#allocation58_spill] sm:$0xff] }
 0x2a1   :  { %v7523_v35 = vpop.eup %7522  ;;  %7548 = vrcp.f32 %v2652_v61  ;;  %v2280_v0 = vadd.f32 %v9854_v56, %v9472_v48  ;;  %v9933_v57 = vpop.f32.mrf.mxu0  ;;  %v11703_v21 = vmax.f32 %v11702_v32, 0.0  ;;  %v11705_v10 = vld [vmem:[#allocation27_spill] sm:$0xff]  ;;  %v6439_v56 = vmul.f32 -1.442695, %v2173_v9 }
 0x2a2   :  { %v7525_v3 = vpop.eup %7524  ;;  %v2651_v14 = vadd.f32 1.0, %v7523_v35  ;;  %7550 = vpow2.f32 %v6434_v51  ;;  %v9935_v58 = vpop.f32.mrf.mxu1  ;;  %v9939_v8 = vadd.f32 %v2954_v23, %v2953_v31  ;;  %v9943_v52 = vadd.f32 %v11705_v10, %v9363_v18  ;;  %v7071_v51 = vld [vmem:[%s11527_s10] ss:$8 sps:$4 sm:$0xff]   ;;  %v7076_v9 = vld [vmem:[%s11526_s9 + $0x14] ss:$8 sps:$4 sm:$0xff]  }
 0x2a3   :  { %v2880_v43 = vmul.f32 %v7521_v33, %v11703_v21  ;;  %v7527_v28 = vpop.eup %7526  ;;  %7552 = vpow2.f32 %v6436_v60  ;;  %v2175_v55 = vadd.f32 %v9874_v12, %v9510_v46  ;;  %v7073_v21 = vld [vmem:[%s11527_s10 + $0x4] ss:$8 sps:$4 sm:$0xff]   ;;  %v7074_v12 = vld [vmem:[%s11526_s9 + $0x10] ss:$8 sps:$4 sm:$0xff]   ;;  %v6441_v10 = vmul.f32 -1.442695, %v2280_v0  ;;  %3246 = vmatprep.subr.bf16.mxu0 %v7076_v9 }
 0x2a4   :  { %11704 = vst [vmem:[#allocation45_spill] sm:$0xff] %v9939_v8  ;;  %11706 = vst [vmem:[#allocation51_spill] sm:$0xff] %v9943_v52  ;;  %v7529_v31 = vpop.eup %7528  ;;  %7554 = vrcp.f32 %v2651_v14  ;;  %v2655_v61 = vadd.f32 1.0, %v7527_v28  ;;  %v2292_v33 = vpop.f32.mrf.mxu1  ;;  %v11707_v35 = vld [vmem:[#allocation57_spill] sm:$0xff]  ;;  %v2177_v14 = vadd.f32 %v9882_v42, %v9468_v25  ;;  %3469 = vmatprep.subr.bf16.mxu1 %v7073_v21  ;;  %v11709_v8 = vmax.f32 %v11708_v4, 0.0  ;;  %3247 = vmatpush1.bf16.msra.mxu0 %v7074_v12 }
 0x2a5   :  { %v2974_v60 = vadd.f32 %v9625_v15, %v2880_v43  ;;  %v7531_v23 = vpop.eup %7530  ;;  %v9963_v32 = vadd.f32 %v11707_v35, %v9452_v22  ;;  %7556 = vpow2.f32 %v6435_v44  ;;  %v9967_v28 = vpop.f32.mrf.mxu0  ;;  %v11710_v52 = vmax.f32 %v9481_v50, 0.0  ;;  %3470 = vmatpush1.bf16.msra.mxu1 %v7071_v51  ;;  %v7077_v51 = vld [vmem:[%s11526_s9] ss:$8 sps:$4 sm:$0xff]  }
 0x2a6   :  { %v7533_v15 = vpop.eup %7532  ;;  %7558 = vrcp.f32 %v2655_v61  ;;  %v2657_v43 = vadd.f32 1.0, %v7531_v23  ;;  %v9969_v33 = vpop.f32.mrf.mxu1  ;;  %v2881_v18 = vmul.f32 %v7529_v31, %v11709_v8  ;;  %v6440_v42 = vmul.f32 -1.442695, %v2175_v55 }
 0x2a7   :  { %v2884_v35 = vmul.f32 %v9621_v13, %v11710_v52  ;;  %v7535_v44 = vpop.eup %7534  ;;  %7560 = vpow2.f32 %v6439_v56  ;;  %v2283_v0 = vadd.f32 %v9884_v40, %v9472_v48  ;;  %v2882_v21 = vmul.f32 %v7525_v3, %v2322_v2  ;;  %v11712_v13 = vld [vmem:[#allocation59_spill] sm:$0xff]  ;;  %v9986_v55 = vpop.f32.mrf.mxu0 }
 0x2a8   :  { %v7537_v61 = vpop.eup %7536  ;;  %7562 = vrcp.f32 %v2657_v43  ;;  %v2656_v23 = vadd.f32 1.0, %v7535_v44  ;;  %v2297_v62 = vpop.f32.mrf.mxu1  ;;  %v2990_v4 = vadd.f32 %v2974_v60, %v2881_v18  ;;  %v11711_v8 = vmax.f32 %v9476_v29, 0.0  ;;  %v7079_v60 = vld [vmem:[%s11526_s9 + $0x4] ss:$8 sps:$4 sm:$0xff]  }
 0x2a9   :  { %v7539_v31 = vpop.eup %7538  ;;  %v9982_v52 = vadd.f32 %v11712_v13, %v9452_v22  ;;  %7564 = vpow2.f32 %v6441_v10  ;;  %v6444_v56 = vmul.f32 -1.442695, %v2177_v14  ;;  %v2179_v40 = vadd.f32 %v9901_v6, %v9510_v46  ;;  %3248 = vmatprep.subr.bf16.mxu0 %v7079_v60 }
 0x2aa   :  { %v2885_v50 = vmul.f32 %v7533_v15, %v11711_v8  ;;  %v7541_v2 = vpop.eup %7540  ;;  %7566 = vrcp.f32 %v2656_v23  ;;  %v2660_v3 = vadd.f32 1.0, %v7539_v31  ;;  %v9988_v62 = vadd.f32 %v2990_v4, %v2882_v21  ;;  %v9990_v18 = vpop.f32.mrf.mxu1  ;;  %3249 = vmatpush1.bf16.msra.mxu0 %v7077_v51 }
 0x2ab   :  { %v2959_v29 = vadd.f32 %v2884_v35, %v9629_v11  ;;  %v7543_v6 = vpop.eup %7542  ;;  %7568 = vpow2.f32 %v6440_v42  ;;  %v6446_v12 = vmul.f32 -1.442695, %v2283_v0  ;;  %v2183_v9 = vadd.f32 %v9912_v41, %v9468_v25  ;;  %v10011_v8 = vpop.f32.mrf.mxu0 }
 0x2ac   :  { %v2288_v10 = vadd.f32 %v9914_v20, %v9472_v48  ;;  %v7545_v14 = vpop.eup %7544  ;;  %7570 = vrcp.f32 %v2660_v3  ;;  %v2662_v11 = vadd.f32 1.0, %v7543_v6  ;;  %3022 = vrot.lane.b32.xlu0 %v9988_v62, %s8283_s22  ;;  %v2300_v15 = vpop.f32.mrf.mxu1  ;;  %v11713_v43 = vmax.f32 %v9485_v59, 0.0 }
 0x2ad   :  { %v2975_v44 = vadd.f32 %v2959_v29, %v2885_v50  ;;  %v7547_v42 = vpop.eup %7546  ;;  %7572 = vpow2.f32 %v6444_v56  ;;  %v6445_v0 = vmul.f32 -1.442695, %v2179_v40  ;;  %v2185_v41 = vadd.f32 %v9928_v38, %v9510_v46  ;;  %v11715_v50 = vld [vmem:[#allocation60_spill] sm:$0xff] }
 0x2ae   :  { %v2886_v35 = vmul.f32 %v7541_v2, %v11713_v43  ;;  %v11714_v20 = vmax.f32 %v9926_v27, 0.0  ;;  %v7549_v23 = vpop.eup %7548  ;;  %7574 = vrcp.f32 %v2662_v11  ;;  %v2661_v4 = vadd.f32 1.0, %v7547_v42  ;;  %v10013_v59 = vpop.f32.mrf.mxu1 }
 0x2af   :  { %v11716_v13 = vmax.f32 %v11715_v50, 0.0  ;;  %v7551_v56 = vpop.eup %7550  ;;  %v2332_v40 = vmax.f32 %v9963_v32, 0.0  ;;  %v2337_v38 = vmax.f32 %v9982_v52, 0.0  ;;  %7576 = vpow2.f32 %v6446_v12  ;;  %v11720_v50 = vld [vmem:[#allocation63_spill] sm:$0xff] }
 0x2b0   :  { %v2887_v21 = vmul.f32 %v7537_v61, %v11714_v20  ;;  %v2991_v31 = vadd.f32 %v2975_v44, %v2886_v35  ;;  %v11717_v27 = vmax.f32 %v9533_v16, 0.0  ;;  %v7553_v3 = vpop.eup %7552  ;;  %7578 = vrcp.f32 %v2661_v4  ;;  %v2305_v6 = vpop.f32.mrf.mxu1 }
 0x2b1   :  { %v2890_v2 = vmul.f32 %v7545_v14, %v11716_v13  ;;  %v2665_v29 = vadd.f32 1.0, %v7551_v56  ;;  %v6449_v51 = vmul.f32 -1.442695, %v2183_v9  ;;  %v7555_v11 = vpop.eup %7554  ;;  %v2667_v15 = vadd.f32 1.0, %v7553_v3  ;;  %v10026_v16 = vpop.f32.mrf.mxu0 }
 0x2b2   :  { %v2894_v61 = vmul.f32 %v9658_v45, %v11717_v27  ;;  %v10022_v60 = vadd.f32 %v2991_v31, %v2887_v21  ;;  %7580 = vpow2.f32 %v6445_v0  ;;  %v6451_v14 = vmul.f32 -1.442695, %v2288_v10  ;;  %v7557_v32 = vpop.eup %7556  ;;  %v11718_v45 = vld [vmem:[#allocation61_spill] sm:$0xff]  ;;  %v10033_v42 = vpop.f32.mrf.mxu1 }
 0x2b3   :  { %v6450_v43 = vmul.f32 -1.442695, %v2185_v41  ;;  %7582 = vrcp.f32 %v2665_v29  ;;  %v2187_v12 = vadd.f32 %v9933_v57, %v9468_v25  ;;  %v11719_v9 = vmax.f32 %v11718_v45, 0.0  ;;  %v7559_v0 = vpop.eup %7558  ;;  %v2198_v6 = vpop.f32.mrf.mxu0 }
 0x2b4   :  { %3024 = vrot.lane.b32.xlu1 %v10022_v60, %s8283_s22  ;;  %v2976_v44 = vadd.f32 %v9660_v49, %v2890_v2  ;;  %7584 = vrcp.f32 %v2667_v15  ;;  %v2666_v10 = vadd.f32 1.0, %v7557_v32  ;;  %v2291_v41 = vadd.f32 %v9935_v58, %v9472_v48  ;;  %v7561_v20 = vpop.eup %7560  ;;  %v2308_v31 = vpop.f32.mrf.mxu1  ;;  %v11722_v2 = vld [vmem:[#allocation62_spill] sm:$0xff] }
 0x2b5   :  { %v2891_v35 = vmul.f32 %v7555_v11, %v11719_v9  ;;  %v2189_v57 = vadd.f32 %v9967_v28, %v9510_v46  ;;  %7586 = vpow2.f32 %v6449_v51  ;;  %v2892_v21 = vmul.f32 %v7549_v23, %v2332_v40  ;;  %v7563_v49 = vpop.eup %7562 }
 0x2b6   :  { %v11721_v13 = vmax.f32 %v11720_v50, 0.0  ;;  %v10043_v27 = vadd.f32 %v11722_v2, %v9452_v22  ;;  %7588 = vrcp.f32 %v2666_v10  ;;  %v2670_v3 = vadd.f32 1.0, %v7561_v20  ;;  %v7565_v29 = vpop.eup %7564  ;;  %v10048_v23 = vpop.f32.mrf.mxu1 }
 0x2b7   :  { %v2992_v4 = vadd.f32 %v2976_v44, %v2891_v35  ;;  %v2961_v58 = vadd.f32 %v2894_v61, %v9664_v17  ;;  %7590 = vpow2.f32 %v6451_v14  ;;  %v6454_v28 = vmul.f32 -1.442695, %v2187_v12  ;;  %v7567_v15 = vpop.eup %7566 }
 0x2b8   :  { %v2895_v56 = vmul.f32 %v7559_v0, %v11721_v13  ;;  %v11723_v40 = vmax.f32 %v9580_v5, 0.0  ;;  %7592 = vrcp.f32 %v2670_v3  ;;  %v2672_v32 = vadd.f32 1.0, %v7565_v29  ;;  %v7569_v35 = vpop.eup %7568  ;;  %v2313_v5 = vpop.f32.mrf.mxu1 }
 0x2b9   :  { %v10046_v51 = vadd.f32 %v2992_v4, %v2892_v21  ;;  %v6456_v45 = vmul.f32 -1.442695, %v2291_v41  ;;  %7594 = vpow2.f32 %v6450_v43  ;;  %v6455_v17 = vmul.f32 -1.442695, %v2189_v57  ;;  %v7571_v44 = vpop.eup %7570  ;;  %v2202_v41 = vpop.f32.mrf.mxu0 }
 0x2ba   :  { %v2904_v11 = vmul.f32 %v9701_v26, %v11723_v40  ;;  %v2977_v9 = vadd.f32 %v2961_v58, %v2895_v56  ;;  %v2193_v61 = vadd.f32 %v9986_v55, %v9468_v25  ;;  %v11724_v14 = vmax.f32 %v9538_v1, 0.0  ;;  %v7573_v10 = vpop.eup %7572  ;;  %v10067_v21 = vpop.f32.mrf.mxu1 }
 0x2bb   :  { %3026 = vrot.lane.b32.xlu0 %v10046_v51, %s8283_s22  ;;  %7596 = vrcp.f32 %v2672_v32  ;;  %v2671_v26 = vadd.f32 1.0, %v7569_v35  ;;  %v2296_v0 = vadd.f32 %v9969_v33, %v9472_v48  ;;  %v2195_v43 = vadd.f32 %v10011_v8, %v9510_v46  ;;  %v7575_v4 = vpop.eup %7574  ;;  %v11726_v33 = vld [vmem:[#allocation64_spill] sm:$0xff]  ;;  %v2204_v40 = vpop.f32.mrf.mxu0 }
 0x2bc   :  { %v2896_v12 = vmul.f32 %v7567_v15, %v11724_v14  ;;  %7598 = vpow2.f32 %v6454_v28  ;;  %v2897_v55 = vmul.f32 %v7563_v49, %v2337_v38  ;;  %v11725_v1 = vmax.f32 %v9546_v19, 0.0  ;;  %v7577_v13 = vpop.eup %7576  ;;  %v2316_v38 = vpop.f32.mrf.mxu1 }
 0x2bd   :  { %v2342_v31 = vmax.f32 %v10043_v27, 0.0  ;;  %v1541_v50 = vadd.f32 %v11726_v33, %v9452_v22  ;;  %7600 = vrcp.f32 %v2671_v26  ;;  %v2675_v8 = vadd.f32 1.0, %v7573_v10  ;;  %v7579_v19 = vpop.eup %7578 }
 0x2be   :  { %v2993_v57 = vadd.f32 %v2977_v9, %v2896_v12  ;;  %v2900_v20 = vmul.f32 %v7571_v44, %v11725_v1  ;;  %7602 = vpow2.f32 %v6456_v45  ;;  %v6459_v56 = vmul.f32 -1.442695, %v2193_v61 }
 0x2bf   :  { %7604 = vrcp.f32 %v2675_v8  ;;  %v2677_v49 = vadd.f32 1.0, %v7577_v13  ;;  %v2197_v3 = vadd.f32 %v10026_v16, %v9468_v25  ;;  %v2963_v27 = vadd.f32 %v2904_v11, %v9699_v47  ;;  %v7581_v58 = vpop.eup %7580 }
 0x2c0   :  { %v10072_v2 = vadd.f32 %v2993_v57, %v2897_v55  ;;  %v2978_v52 = vadd.f32 %v9695_v36, %v2900_v20  ;;  %7606 = vpow2.f32 %v6455_v17  ;;  %v6461_v29 = vmul.f32 -1.442695, %v2296_v0  ;;  %v7583_v32 = vpop.eup %7582 }
 0x2c1   :  { %v6460_v28 = vmul.f32 -1.442695, %v2195_v43  ;;  %v11727_v15 = vmax.f32 %v9564_v54, 0.0  ;;  %7608 = vrcp.f32 %v2677_v49  ;;  %v2676_v45 = vadd.f32 1.0, %v7581_v58  ;;  %v7585_v47 = vpop.eup %7584  ;;  %v11729_v54 = vld [vmem:[#allocation65_spill] sm:$0xff] }
 0x2c2   :  { %3028 = vrot.lane.b32.xlu1 %v10072_v2, %s8283_s22  ;;  %v2299_v9 = vadd.f32 %v9990_v18, %v9472_v48  ;;  %v2199_v16 = vadd.f32 %v2198_v6, %v9510_v46  ;;  %7610 = vpow2.f32 %v6459_v56  ;;  %v2902_v11 = vmul.f32 %v7575_v4, %v2342_v31  ;;  %v7587_v14 = vpop.eup %7586  ;;  %v2206_v18 = vpop.f32.mrf.mxu0 }
 0x2c3   :  { %v2901_v36 = vmul.f32 %v7579_v19, %v11727_v15  ;;  %v11728_v17 = vmax.f32 %v9576_v7, 0.0  ;;  %v2347_v12 = vmax.f32 %v1541_v50, 0.0  ;;  %v1546_v5 = vadd.f32 %v11729_v54, %v9452_v22  ;;  %v7589_v26 = vpop.eup %7588  ;;  %v11733_v15 = vld [vmem:[#allocation66_spill] sm:$0xff] }
 0x2c4   :  { %7612 = vrcp.f32 %v2676_v45  ;;  %v6464_v44 = vmul.f32 -1.442695, %v2197_v3  ;;  %v2680_v0 = vadd.f32 1.0, %v7587_v14  ;;  %v7591_v10 = vpop.eup %7590  ;;  %v6466_v55 = vmul.f32 -1.442695, %v2299_v9  ;;  %v2208_v19 = vpop.f32.mrf.mxu0 }
 0x2c5   :  { %v2994_v35 = vadd.f32 %v2978_v52, %v2901_v36  ;;  %v2905_v61 = vmul.f32 %v7583_v32, %v11728_v17  ;;  %7614 = vpow2.f32 %v6461_v29  ;;  %v2203_v7 = vadd.f32 %v2202_v41, %v9468_v25  ;;  %v7593_v20 = vpop.eup %7592 }
 0x2c6   :  { %7616 = vpow2.f32 %v6460_v28  ;;  %v11730_v57 = vmax.f32 %v9584_v37, 0.0  ;;  %v2682_v4 = vadd.f32 1.0, %v7591_v10  ;;  %v6465_v31 = vmul.f32 -1.442695, %v2199_v16  ;;  %v7595_v50 = vpop.eup %7594 }
 0x2c7   :  { %v10089_v43 = vadd.f32 %v2994_v35, %v2902_v11  ;;  %v2979_v6 = vadd.f32 %v2963_v27, %v2905_v61  ;;  %7618 = vrcp.f32 %v2680_v0  ;;  %v2304_v33 = vadd.f32 %v10013_v59, %v9472_v48  ;;  %v2212_v11 = vpop.f32.mrf.mxu0  ;;  %v11738_v0 = vld [vmem:[#allocation29_spill] sm:$0xff] }
 0x2c8   :  { %v2906_v1 = vmul.f32 %v7589_v26, %v11730_v57  ;;  %7620 = vpow2.f32 %v6464_v44  ;;  %v2907_v8 = vmul.f32 %v7585_v47, %v2347_v12  ;;  %v11731_v56 = vmax.f32 %v9607_v63, 0.0  ;;  %v7597_v52 = vpop.eup %7596  ;;  %v11735_v12 = vld [vmem:[#allocation71_spill] sm:$0xff] }
 0x2c9   :  { %3030 = vrot.lane.b32.xlu0 %v10089_v43, %s8283_s22  ;;  %7622 = vrcp.f32 %v2682_v4  ;;  %v2681_v37 = vadd.f32 1.0, %v7595_v50  ;;  %v2205_v38 = vadd.f32 %v2204_v40, %v9510_v46  ;;  %v11732_v49 = vmax.f32 %v9655_v30, 0.0  ;;  %v7599_v3 = vpop.eup %7598  ;;  %v11737_v26 = vld [vmem:[#allocation31_spill] sm:$0xff] }
 0x2ca   :  { %v2995_v13 = vadd.f32 %v2979_v6, %v2906_v1  ;;  %v2910_v41 = vmul.f32 %v7593_v20, %v11731_v56  ;;  %7624 = vpow2.f32 %v6466_v55  ;;  %v6469_v27 = vmul.f32 -1.442695, %v2203_v7  ;;  %v7601_v28 = vpop.eup %7600  ;;  %v11739_v50 = vld [vmem:[#allocation67_spill] sm:$0xff] }
 0x2cb   :  { %v2914_v59 = vmul.f32 %v9736_v24, %v11732_v49  ;;  %v2352_v63 = vmax.f32 %v1546_v5, 0.0  ;;  %v1549_v36 = vadd.f32 %v11733_v15, %v9452_v22  ;;  %7626 = vrcp.f32 %v2681_v37  ;;  %v7603_v40 = vpop.eup %7602  ;;  %v11744_v37 = vld [vmem:[#allocation80_spill] sm:$0xff] }
 0x2cc   :  { %v10104_v58 = vadd.f32 %v2995_v13, %v2907_v8  ;;  %v2980_v29 = vadd.f32 %v9730_v39, %v2910_v41  ;;  %v2685_v32 = vadd.f32 1.0, %v7599_v3  ;;  %7628 = vpow2.f32 %v6465_v31  ;;  %v7605_v16 = vpop.eup %7604  ;;  %v2214_v31 = vpop.f32.mrf.mxu0  ;;  %v11742_v41 = vld [vmem:[#allocation39_spill] sm:$0xff] }
 0x2cd   :  { %v6471_v45 = vmul.f32 -1.442695, %v2304_v33  ;;  %v2207_v30 = vadd.f32 %v2206_v18, %v9468_v25  ;;  %v11734_v24 = vmax.f32 %v9618_v34, 0.0  ;;  %v2687_v39 = vadd.f32 1.0, %v7603_v40  ;;  %v7607_v17 = vpop.eup %7606 }
 0x2ce   :  { %3032 = vrot.lane.b32.xlu1 %v10104_v58, %s8283_s22  ;;  %7630 = vrcp.f32 %v2685_v32  ;;  %v6470_v47 = vmul.f32 -1.442695, %v2205_v38  ;;  %v2965_v35 = vadd.f32 %v2914_v59, %v9734_v53  ;;  %v2912_v61 = vmul.f32 %v7597_v52, %v2352_v63  ;;  %v7609_v44 = vpop.eup %7608  ;;  %v2216_v40 = vpop.f32.mrf.mxu0 }
 0x2cf   :  { %v2911_v9 = vmul.f32 %v7601_v28, %v11734_v24  ;;  %7632 = vpow2.f32 %v6469_v27  ;;  %v11736_v54 = vmax.f32 %v11735_v12, 0.0  ;;  %v10119_v18 = vadd.f32 %v11738_v0, %v11737_v26  ;;  %v7611_v10 = vpop.eup %7610 }
 0x2d0   :  { %7634 = vrcp.f32 %v2687_v39  ;;  %v2686_v34 = vadd.f32 1.0, %v7607_v17  ;;  %v2307_v6 = vadd.f32 %v10033_v42, %v9472_v48  ;;  %v6474_v53 = vmul.f32 -1.442695, %v2207_v30  ;;  %v11740_v42 = vld [vmem:[#allocation73_spill] sm:$0xff] }
 0x2d1   :  { %v2996_v14 = vadd.f32 %v2980_v29, %v2911_v9  ;;  %v2915_v5 = vmul.f32 %v7605_v16, %v11736_v54  ;;  %7636 = vpow2.f32 %v6471_v45  ;;  %v7613_v57 = vpop.eup %7612  ;;  %v2357_v1 = vmax.f32 %v1549_v36, 0.0  ;;  %v11745_v45 = vld [vmem:[#allocation75_spill] sm:$0xff] }
 0x2d2   :  { %7638 = vrcp.f32 %v2686_v34  ;;  %v2690_v20 = vadd.f32 1.0, %v7611_v10  ;;  %v2209_v4 = vadd.f32 %v2208_v19, %v9510_v46  ;;  %v7615_v33 = vpop.eup %7614  ;;  %v1554_v8 = vadd.f32 %v11739_v50, %v9452_v22  ;;  %v2218_v10 = vpop.f32.mrf.mxu0 }
 0x2d3   :  { %v10123_v55 = vadd.f32 %v2996_v14, %v2912_v61  ;;  %v2981_v7 = vadd.f32 %v2965_v35, %v2915_v5  ;;  %7640 = vpow2.f32 %v6470_v47  ;;  %v11741_v13 = vmax.f32 %v11740_v42, 0.0  ;;  %v7617_v49 = vpop.eup %7616  ;;  %v11747_v61 = vld [vmem:[#allocation81_spill] sm:$0xff]  ;;  %v11752_v42 = vld [vmem:[#allocation79_spill] sm:$0xff] }
 0x2d4   :  { %v11743_v52 = vmax.f32 %v11742_v41, 0.0  ;;  %7642 = vrcp.f32 %v2690_v20  ;;  %v2692_v59 = vadd.f32 1.0, %v7615_v33  ;;  %v6476_v19 = vmul.f32 -1.442695, %v2307_v6  ;;  %v7619_v27 = vpop.eup %7618 }
 0x2d5   :  { %3034 = vrot.lane.b32.xlu0 %v10123_v55, %s8283_s22  ;;  %v2916_v56 = vmul.f32 %v7613_v57, %v11741_v13  ;;  %v2213_v3 = vadd.f32 %v2212_v11, %v9468_v25  ;;  %v2691_v29 = vadd.f32 1.0, %v7617_v49  ;;  %7644 = vpow2.f32 %v6474_v53  ;;  %v7621_v15 = vpop.eup %7620  ;;  %v11750_v53 = vld [vmem:[#allocation78_spill] sm:$0xff] }
 0x2d6   :  { %v2924_v38 = vmul.f32 %v11744_v37, %v11743_v52  ;;  %v2917_v28 = vmul.f32 %v7609_v44, %v2357_v1  ;;  %7646 = vrcp.f32 %v2692_v59  ;;  %v6475_v36 = vmul.f32 -1.442695, %v2209_v4  ;;  %v7623_v9 = vpop.eup %7622  ;;  %v11749_v44 = vld [vmem:[#allocation82_spill] sm:$0xff] }
 0x2d7   :  { %v2997_v63 = vadd.f32 %v2981_v7, %v2916_v56  ;;  %v2312_v32 = vadd.f32 %v10048_v23, %v9472_v48  ;;  %v11746_v30 = vmax.f32 %v11745_v45, 0.0  ;;  %7648 = vrcp.f32 %v2691_v29  ;;  %v7625_v11 = vpop.eup %7624  ;;  %v11748_v23 = vld [vmem:[#allocation68_spill] sm:$0xff]  ;;  %v11756_v29 = vld [vmem:[#allocation30_spill] sm:$0xff]  ;;  %v11757_v45 = vld [vmem:[#allocation69_spill] sm:$0xff] }
 0x2d8   :  { %v2695_v16 = vadd.f32 1.0, %v7621_v15  ;;  %v2215_v39 = vadd.f32 %v2214_v31, %v9510_v46  ;;  %v2362_v35 = vmax.f32 %v1554_v8, 0.0  ;;  %7650 = vpow2.f32 %v6476_v19  ;;  %v7627_v12 = vpop.eup %7626 }
 0x2d9   :  { %v2920_v24 = vmul.f32 %v7619_v27, %v11746_v30  ;;  %v10141_v47 = vadd.f32 %v2997_v63, %v2917_v28  ;;  %v6479_v17 = vmul.f32 -1.442695, %v2213_v3  ;;  %v1557_v54 = vadd.f32 %v11748_v23, %v9452_v22  ;;  %v7629_v0 = vpop.eup %7628  ;;  %v11755_v27 = vld [vmem:[#allocation36_spill] sm:$0xff] }
 0x2da   :  { %7652 = vrcp.f32 %v2695_v16  ;;  %v2697_v5 = vadd.f32 1.0, %v7625_v11  ;;  %v2967_v26 = vadd.f32 %v2924_v38, %v11749_v44  ;;  %v6481_v34 = vmul.f32 -1.442695, %v2312_v32 }
 0x2db   :  { %v2982_v14 = vadd.f32 %v11747_v61, %v2920_v24  ;;  %3036 = vrot.lane.b32.xlu1 %v10141_v47, %s8283_s22  ;;  %7654 = vpow2.f32 %v6475_v36  ;;  %v2217_v6 = vadd.f32 %v2216_v40, %v9468_v25  ;;  %v11751_v7 = vmax.f32 %v11750_v53, 0.0  ;;  %v7631_v1 = vpop.eup %7630  ;;  %v11754_v25 = vld [vmem:[#allocation51_spill] sm:$0xff] }
 0x2dc   :  { %7656 = vrcp.f32 %v2697_v5  ;;  %v2696_v20 = vadd.f32 1.0, %v7629_v0  ;;  %v6480_v4 = vmul.f32 -1.442695, %v2215_v39  ;;  %v2315_v31 = vadd.f32 %v10067_v21, %v9472_v48  ;;  %v7633_v33 = vpop.eup %7632  ;;  %v11759_v5 = vld [vmem:[#allocation33_spill] sm:$0xff] }
 0x2dd   :  { %v2921_v57 = vmul.f32 %v7627_v12, %v11751_v7  ;;  %7658 = vpow2.f32 %v6479_v17  ;;  %v2922_v50 = vmul.f32 %v7623_v9, %v2362_v35  ;;  %v11753_v13 = vmax.f32 %v11752_v42, 0.0  ;;  %v7635_v41 = vpop.eup %7634  ;;  %v11758_v12 = vld [vmem:[#allocation34_spill] sm:$0xff] }
 0x2de   :  { %v2366_v52 = vmax.f32 %v11754_v25, 0.0  ;;  %7660 = vrcp.f32 %v2696_v20  ;;  %v2700_v37 = vadd.f32 1.0, %v7633_v33  ;;  %v2219_v38 = vadd.f32 %v2218_v10, %v9510_v46  ;;  %v7637_v49 = vpop.eup %7636 }
 0x2df   :  { %v2998_v8 = vadd.f32 %v2982_v14, %v2921_v57  ;;  %v2925_v56 = vmul.f32 %v7631_v1, %v11753_v13  ;;  %7662 = vpow2.f32 %v6481_v34  ;;  %v6484_v59 = vmul.f32 -1.442695, %v2217_v6  ;;  %v7639_v21 = vpop.eup %7638  ;;  %v11761_v57 = vld [vmem:[#allocation70_spill] sm:$0xff] }
 0x2e0   :  { %v2370_v3 = vmax.f32 %v10119_v18, 0.0  ;;  %v1461_v28 = vadd.f32 %v11756_v29, %v11755_v27  ;;  %7664 = vrcp.f32 %v2700_v37  ;;  %v2702_v63 = vadd.f32 1.0, %v7637_v49  ;;  %v7641_v15 = vpop.eup %7640  ;;  %v11763_v49 = vld [vmem:[#allocation38_spill] sm:$0xff] }
 0x2e1   :  { %v10158_v19 = vadd.f32 %v2998_v8, %v2922_v50  ;;  %v2983_v48 = vadd.f32 %v2967_v26, %v2925_v56  ;;  %v2367_v36 = vmax.f32 %v1557_v54, 0.0  ;;  %7666 = vpow2.f32 %v6480_v4  ;;  %v7643_v40 = vpop.eup %7642  ;;  %v11760_v26 = vld [vmem:[#allocation35_spill] sm:$0xff] }
 0x2e2   :  { %v6486_v32 = vmul.f32 -1.442695, %v2315_v31  ;;  %v2926_v46 = vmul.f32 %v7639_v21, %v2366_v52  ;;  %v1562_v30 = vadd.f32 %v11757_v45, %v9452_v22  ;;  %7668 = vrcp.f32 %v2702_v63  ;;  %v7645_v9 = vpop.eup %7644  ;;  %v11765_v45 = vld [vmem:[#allocation40_spill] sm:$0xff] }
 0x2e3   :  { %3038 = vrot.lane.b32.xlu0 %v10158_v19, %s8283_s22  ;;  %v2701_v24 = vadd.f32 1.0, %v7641_v15  ;;  %v6485_v18 = vmul.f32 -1.442695, %v2219_v38  ;;  %7670 = vpow2.f32 %v6484_v59  ;;  %v2927_v16 = vmul.f32 %v7635_v41, %v2367_v36  ;;  %v7647_v35 = vpop.eup %7646  ;;  %v11762_v41 = vld [vmem:[#allocation37_spill] sm:$0xff] }
 0x2e4   :  { %v2999_v39 = vadd.f32 %v2983_v48, %v2926_v46  ;;  %v2930_v11 = vmul.f32 %v7643_v40, %v2370_v3  ;;  %v2371_v17 = vmax.f32 %v1461_v28, 0.0  ;;  %v2705_v61 = vadd.f32 1.0, %v7645_v9  ;;  %v7649_v14 = vpop.eup %7648  ;;  %v11764_v28 = vld [vmem:[#allocation72_spill] sm:$0xff]  ;;  %v11766_v9 = vld [vmem:[#allocation43_spill] sm:$0xff] }
 0x2e5   :  { %7672 = vrcp.f32 %v2701_v24  ;;  %v2375_v23 = vmax.f32 %v11758_v12, 0.0  ;;  %v7651_v44 = vpop.eup %7650  ;;  %v1465_v0 = vadd.f32 %v11760_v26, %v11755_v27  ;;  %v2372_v34 = vmax.f32 %v1562_v30, 0.0 }
 0x2e6   :  { %7674 = vpow2.f32 %v6486_v32  ;;  %v10168_v54 = vadd.f32 %v2999_v39, %v2927_v16  ;;  %v2984_v22 = vadd.f32 %v11759_v5, %v2930_v11  ;;  %v2931_v6 = vmul.f32 %v7649_v14, %v2371_v17  ;;  %v11767_v17 = vld [vmem:[#allocation42_spill] sm:$0xff] }
 0x2e7   :  { %7676 = vrcp.f32 %v2705_v61  ;;  %v7653_v10 = vpop.eup %7652  ;;  %v2707_v53 = vadd.f32 1.0, %v7651_v44  ;;  %v2377_v1 = vmax.f32 %v11761_v57, 0.0  ;;  %v2932_v20 = vmul.f32 %v7647_v35, %v2372_v34  ;;  %v11769_v34 = vld [vmem:[#allocation74_spill] sm:$0xff] }
 0x2e8   :  { %7678 = vpow2.f32 %v6485_v18  ;;  %3040 = vrot.lane.b32.xlu1 %v10168_v54, %s8283_s22  ;;  %v7655_v7 = vpop.eup %7654  ;;  %v3000_v4 = vadd.f32 %v2984_v22, %v2931_v6  ;;  %v2935_v31 = vmul.f32 %v7653_v10, %v2375_v23  ;;  %v2376_v42 = vmax.f32 %v1465_v0, 0.0  ;;  %v11768_v23 = vld [vmem:[#allocation44_spill] sm:$0xff]  ;;  %v11770_v57 = vld [vmem:[#allocation26_spill] sm:$0xff] }
 0x2e9   :  { %v7657_v33 = vpop.eup %7656  ;;  %7680 = vrcp.f32 %v2707_v53  ;;  %v2706_v50 = vadd.f32 1.0, %v7655_v7  ;;  %v2380_v59 = vmax.f32 %v11763_v49, 0.0  ;;  %v2382_v63 = vmax.f32 %v11764_v28, 0.0  ;;  %v11775_v28 = vld [vmem:[#allocation50_spill] sm:$0xff] }
 0x2ea   :  { %v7659_v8 = vpop.eup %7658  ;;  %v10176_v13 = vadd.f32 %v3000_v4, %v2932_v20  ;;  %v2937_v56 = vmul.f32 %v7657_v33, %v2377_v1  ;;  %v2985_v25 = vadd.f32 %v11762_v41, %v2935_v31  ;;  %v2381_v30 = vmax.f32 %v11765_v45, 0.0  ;;  %v11771_v33 = vld [vmem:[#allocation46_spill] sm:$0xff] }
 0x2eb   :  { %v7661_v52 = vpop.eup %7660  ;;  %7682 = vrcp.f32 %v2706_v50  ;;  %v2710_v37 = vadd.f32 1.0, %v7659_v8  ;;  %v2385_v61 = vmax.f32 %v11767_v17, 0.0  ;;  %v1475_v5 = vadd.f32 %v11768_v23, %v11755_v27 }
 0x2ec   :  { %v7663_v38 = vpop.eup %7662  ;;  %3042 = vrot.lane.b32.xlu0 %v10176_v13, %s8283_s22  ;;  %v2936_v48 = vmul.f32 %v7661_v52, %v2376_v42  ;;  %v2387_v6 = vmax.f32 %v11769_v34, 0.0  ;;  %v2390_v50 = vmax.f32 %v11771_v33, 0.0  ;;  %v7091_v33 = vld [vmem:[#allocation8 + $0xfc] ss:$20 sps:$4 sm:$0xff]  }
 0x2ed   :  { %v7665_v21 = vpop.eup %7664  ;;  %7684 = vrcp.f32 %v2710_v37  ;;  %v2712_v3 = vadd.f32 1.0, %v7663_v38  ;;  %v2386_v20 = vmax.f32 %v1475_v5, 0.0  ;;  %v11773_v38 = vld [vmem:[#allocation48_spill] sm:$0xff] }
 0x2ee   :  { %v7667_v29 = vpop.eup %7666  ;;  %v3001_v15 = vadd.f32 %v2985_v25, %v2936_v48  ;;  %v2940_v36 = vmul.f32 %v7665_v21, %v2380_v59  ;;  %v2391_v49 = vmax.f32 %v11773_v38, 0.0  ;;  %v11774_v21 = vld [vmem:[#allocation41_spill] sm:$0xff] }
 0x2ef   :  { %v7669_v32 = vpop.eup %7668  ;;  %7686 = vrcp.f32 %v2712_v3  ;;  %v2711_v46 = vadd.f32 1.0, %v7667_v29 }
 0x2f0   :  { %v7671_v40 = vpop.eup %7670  ;;  %v10184_v24 = vadd.f32 %v3001_v15, %v2937_v56  ;;  %v2942_v18 = vmul.f32 %v7669_v32, %v2382_v63  ;;  %v2986_v16 = vadd.f32 %v11766_v9, %v2940_v36  ;;  %v11772_v56 = vld [vmem:[#allocation76_spill] sm:$0xff]  ;;  %v2395_v63 = vmax.f32 %v11775_v28, 0.0 }
 0x2f1   :  { %7688 = vrcp.f32 %v2711_v46  ;;  %v2715_v11 = vadd.f32 1.0, %v7671_v40  ;;  %v2392_v41 = vmax.f32 %v11772_v56, 0.0  ;;  %v11776_v15 = vld [vmem:[#allocation52_spill] sm:$0xff]  ;;  %v11777_v40 = vld [vmem:[#allocation77_spill] sm:$0xff] }
 0x2f2   :  { %v7673_v39 = vpop.eup %7672  ;;  %3044 = vrot.lane.b32.xlu1 %v10184_v24, %s8283_s22  ;;  %v1485_v36 = vadd.f32 %v11776_v15, %v11755_v27  ;;  %v2397_v45 = vmax.f32 %v11777_v40, 0.0  ;;  %v7097_v56 = vld [vmem:[#allocation8 + $0xd4] ss:$20 sps:$4 sm:$0xff]  }
 0x2f3   :  { %v7675_v35 = vpop.eup %7674  ;;  %v2941_v14 = vmul.f32 %v7673_v39, %v2381_v30  ;;  %7690 = vrcp.f32 %v2715_v11  ;;  %v7098_v28 = vld [vmem:[#allocation8 + $0xa0] ss:$20 sps:$4 sm:$0xff]  }
 0x2f4   :  { %v7677_v12 = vpop.eup %7676  ;;  %v2717_v22 = vadd.f32 1.0, %v7675_v35  ;;  %v11778_v35 = vld [vmem:[#allocation45_spill] sm:$0xff] }
 0x2f5   :  { %v7679_v44 = vpop.eup %7678  ;;  %v3002_v26 = vadd.f32 %v2986_v16, %v2941_v14  ;;  %v2945_v0 = vmul.f32 %v7677_v12, %v2385_v61  ;;  %v2396_v16 = vmax.f32 %v1485_v36, 0.0  ;;  %v7082_v14 = vld [vmem:[#allocation8 + $0x11c] ss:$20 sps:$4 sm:$0xff]   ;;  %v7085_v12 = vld [vmem:[#allocation8 + $0x124] ss:$20 sps:$4 sm:$0xff]  }
 0x2f6   :  { %7692 = vrcp.f32 %v2717_v22  ;;  %v2716_v10 = vadd.f32 1.0, %v7679_v44  ;;  %v7681_v53 = vpop.eup %7680  ;;  %4291 = vmatprep.subr.bf16.mxu0 %v7082_v14  ;;  %4404 = vmatprep.subr.bf16.mxu1 %v7085_v12 }
 0x2f7   :  { %v10193_v7 = vadd.f32 %v3002_v26, %v2942_v18  ;;  %v2987_v1 = vadd.f32 %v11770_v57, %v2945_v0  ;;  %v2947_v4 = vmul.f32 %v7681_v53, %v2387_v6 }
 0x2f8   :  { %7694 = vrcp.f32 %v2716_v10  ;;  %v7683_v31 = vpop.eup %7682 }
 0x2f9   :  { %3046 = vrot.lane.b32.xlu0 %v10193_v7, %s8283_s22  ;;  %v2946_v8 = vmul.f32 %v7683_v31, %v2386_v20  ;;  %v7080_v20 = vld [vmem:[#allocation8 + $0x118] ss:$20 sps:$4 sm:$0xff]   ;;  %v7088_v31 = vld [vmem:[#allocation8 + $0xf4] ss:$20 sps:$4 sm:$0xff]  }
 0x2fa   :  { %v7685_v42 = vpop.eup %7684 }
 0x2fb   :  { %v3003_v25 = vadd.f32 %v2987_v1, %v2946_v8  ;;  %v2950_v52 = vmul.f32 %v7685_v42, %v2390_v50  ;;  %v7089_v8 = vld [vmem:[#allocation8 + $0xf8] ss:$20 sps:$4 sm:$0xff]  }
 0x2fc   :  { %v7687_v37 = vpop.eup %7686  ;;  %v7094_v42 = vld [vmem:[#allocation8 + $0xcc] ss:$20 sps:$4 sm:$0xff]  }
 0x2fd   :  { %v10201_v59 = vadd.f32 %v3003_v25, %v2947_v4  ;;  %v2952_v48 = vmul.f32 %v7687_v37, %v2392_v41  ;;  %v2988_v3 = vadd.f32 %v11774_v21, %v2950_v52  ;;  %v7083_v4 = vld [vmem:[#allocation8 + $0x120] ss:$20 sps:$4 sm:$0xff]   ;;  %v7092_v37 = vld [vmem:[#allocation8 + $0xc8] ss:$20 sps:$4 sm:$0xff]  }
 0x2fe   :  { %v7689_v29 = vpop.eup %7688 }
 0x2ff   :  { %3048 = vrot.lane.b32.xlu1 %v10201_v59, %s8283_s22  ;;  %v2951_v32 = vmul.f32 %v7689_v29, %v2391_v49  ;;  %v7100_v49 = vld [vmem:[#allocation8 + $0xa4] ss:$20 sps:$4 sm:$0xff]  }
 0x300   :  { %v7691_v46 = vpop.eup %7690 }
 0x301   :  { %v3004_v30 = vadd.f32 %v2988_v3, %v2951_v32  ;;  %v2955_v18 = vmul.f32 %v7691_v46, %v2395_v63 }
 0x303   :  { %v7693_v9 = vpop.eup %7692  ;;  %v10210_v39 = vadd.f32 %v3004_v30, %v2952_v48  ;;  %v2989_v17 = vadd.f32 %v11778_v35, %v2955_v18 }
 0x304   :  { %v2957_v11 = vmul.f32 %v7693_v9, %v2397_v45 }
 0x305   :  { %v7695_v61 = vpop.eup %7694  ;;  %3050 = vrot.lane.b32.xlu0 %v10210_v39, %s8283_s22 }
 0x306   :  { %v2956_v27 = vmul.f32 %v7695_v61, %v2396_v16 }
 0x308   :  { %v3005_v23 = vadd.f32 %v2989_v17, %v2956_v27 }
 0x30a   :  { %v10215_v5 = vadd.f32 %v3005_v23, %v2957_v11 }
 0x30c   :  { %3052 = vrot.lane.b32.xlu1 %v10215_v5, %s8283_s22 }
 0x31e   :  { %v3023_v22 = vpop.permute.xlu0 %3022 }
 0x31f   :  { %v3054_v44 = vadd.f32 %v3023_v22, %v9988_v62  ;;  %v11779_v62 = vmov 0  }
 0x321   :  { %v3086_v0 = vmul.f32 0.01, %v3054_v44  ;;  %vm3070_vm2 = vcmp.ge.f32.partialorder %v3054_v44, 0.0 }
 0x323   :  { %v3102_v10 = vsel %vm3070_vm2, %v3054_v44, %v3086_v0 }
 0x326   :  { %v3025_v26 = vpop.permute.xlu1 %3024 }
 0x327   :  { %v3055_v34 = vadd.f32 %v3025_v26, %v10022_v60  ;;  %v7086_v60 = vld [vmem:[#allocation8 + $0xf0] ss:$20 sps:$4 sm:$0xff]  }
 0x329   :  { %vm3071_vm3 = vcmp.ge.f32.partialorder %v3055_v34, 0.0  ;;  %v3087_v6 = vmul.f32 0.01, %v3055_v34 }
 0x32b   :  { %v3103_v53 = vsel %vm3071_vm3, %v3055_v34, %v3087_v6 }
 0x32c   :  { %v3118_v57 = vpack.c.bf16 %v3103_v53, %v3102_v10 }
 0x32d   :  { %v3027_v1 = vpop.permute.xlu0 %3026 }
 0x32e   :  { %3267 = vmatmul.mubr.bf16.vlgmr.msra.gmra.mxu0 %v3118_v57  ;;  %3488 = vmatmul.mubr.bf16.vlgmr.msra.gmra.mxu1 %v3118_v57  ;;  %v3056_v50 = vadd.f32 %v3027_v1, %v10046_v51  ;;  %v7095_v51 = vld [vmem:[#allocation8 + $0xd0] ss:$20 sps:$4 sm:$0xff]  }
 0x32f   :  { %3276 = vmatprep.mubr.bf16.mxu0 %v11779_v62  ;;  %3497 = vmatprep.mubr.bf16.mxu1 %v11779_v62 }
 0x330   :  { %4292 = vmatpush1.bf16.msra.mxu0 %v7080_v20  ;;  %4405 = vmatpush1.bf16.msra.mxu1 %v7083_v4  ;;  %v3088_v25 = vmul.f32 0.01, %v3056_v50  ;;  %vm3072_vm4 = vcmp.ge.f32.partialorder %v3056_v50, 0.0 }
 0x331   :  { %4293 = vmatprep.subr.bf16.mxu0 %v7088_v31  ;;  %4406 = vmatprep.subr.bf16.mxu1 %v7091_v33 }
 0x332   :  { %v3104_v48 = vsel %vm3072_vm4, %v3056_v50, %v3088_v25 }
 0x334   :  { %v3029_v41 = vpop.permute.xlu1 %3028  ;;  %4294 = vmatpush1.bf16.msra.mxu0 %v7086_v60  ;;  %4407 = vmatpush1.bf16.msra.mxu1 %v7089_v8 }
 0x335   :  { %v3057_v52 = vadd.f32 %v3029_v41, %v10072_v2  ;;  %4295 = vmatprep.subr.bf16.mxu0 %v7094_v42  ;;  %4408 = vmatprep.subr.bf16.mxu1 %v7097_v56 }
 0x337   :  { %vm3073_vm5 = vcmp.ge.f32.partialorder %v3057_v52, 0.0  ;;  %v3089_v38 = vmul.f32 0.01, %v3057_v52 }
 0x338   :  { %4296 = vmatpush1.bf16.msra.mxu0 %v7092_v37  ;;  %4409 = vmatpush1.bf16.msra.mxu1 %v7095_v51  ;;  %v7101_v51 = vld [vmem:[#allocation8 + $0xa8] ss:$20 sps:$4 sm:$0xff]  }
 0x339   :  { %v3105_v21 = vsel %vm3073_vm5, %v3057_v52, %v3089_v38  ;;  %4297 = vmatprep.subr.bf16.mxu0 %v7100_v49  ;;  %v7103_v38 = vld [vmem:[#allocation8 + $0xac] ss:$20 sps:$4 sm:$0xff]  }
 0x33a   :  { %v3119_v3 = vpack.c.bf16 %v3105_v21, %v3104_v48  ;;  %v7104_v49 = vld [vmem:[#allocation8 + $0x78] ss:$20 sps:$4 sm:$0xff]   ;;  %4410 = vmatprep.subr.bf16.mxu1 %v7103_v38  ;;  %v7107_v48 = vld [vmem:[#allocation8 + $0x80] ss:$20 sps:$4 sm:$0xff]  }
 0x33b   :  { %v3031_v29 = vpop.permute.xlu0 %3030  ;;  %v7109_v21 = vld [vmem:[#allocation8 + $0x84] ss:$20 sps:$4 sm:$0xff]  }
 0x33c   :  { %v3058_v2 = vadd.f32 %v3031_v29, %v10089_v43  ;;  %3277 = vmatmul.mubr.bf16.gmra.mxu0 %v3119_v3  ;;  %3498 = vmatmul.mubr.bf16.gmra.mxu1 %v3119_v3  ;;  %v7110_v3 = vld [vmem:[#allocation8 + $0x50] ss:$20 sps:$4 sm:$0xff]  }
 0x33d   :  { %3286 = vmatprep.mubr.bf16.mxu0 %v11779_v62  ;;  %3507 = vmatprep.mubr.bf16.mxu1 %v11779_v62  ;;  %v7115_v29 = vld [vmem:[#allocation8 + $0x5c] ss:$20 sps:$4 sm:$0xff]  }
 0x33e   :  { %4298 = vmatpush1.bf16.msra.mxu0 %v7098_v28  ;;  %v3090_v15 = vmul.f32 0.01, %v3058_v2  ;;  %vm3074_vm6 = vcmp.ge.f32.partialorder %v3058_v2, 0.0  ;;  %4411 = vmatpush1.bf16.msra.mxu1 %v7101_v51  ;;  %v7113_v28 = vld [vmem:[#allocation8 + $0x58] ss:$20 sps:$4 sm:$0xff]  }
 0x33f   :  { %4412 = vmatprep.subr.bf16.mxu1 %v7109_v21 }
 0x340   :  { %v3033_v63 = vpop.permute.xlu1 %3032  ;;  %v3106_v46 = vsel %vm3074_vm6, %v3058_v2, %v3090_v15  ;;  %v7118_v2 = vld [vmem:[#allocation8 + $0x2c] ss:$20 sps:$4 sm:$0xff]   ;;  %v7116_v15 = vld [vmem:[#allocation8 + $0x28] ss:$20 sps:$4 sm:$0xff]  }
 0x341   :  { %v3059_v36 = vadd.f32 %v3033_v63, %v10104_v58  ;;  %v7121_v63 = vld [vmem:[#allocation8 + $0x34] ss:$20 sps:$4 sm:$0xff]  }
 0x342   :  { %4413 = vmatpush1.bf16.msra.mxu1 %v7107_v48 }
 0x343   :  { %vm3075_vm7 = vcmp.ge.f32.partialorder %v3059_v36, 0.0  ;;  %v3091_v32 = vmul.f32 0.01, %v3059_v36  ;;  %4414 = vmatprep.subr.bf16.mxu1 %v7115_v29 }
 0x345   :  { %v3107_v40 = vsel %vm3075_vm7, %v3059_v36, %v3091_v32  ;;  %v7119_v36 = vld [vmem:[#allocation8 + $0x30] ss:$20 sps:$4 sm:$0xff]  }
 0x346   :  { %v3120_v45 = vpack.c.bf16 %v3107_v40, %v3106_v46  ;;  %4415 = vmatpush1.bf16.msra.mxu1 %v7113_v28  ;;  %v7124_v32 = vld [vmem:[#allocation8 + $0x4] ss:$20 sps:$4 sm:$0xff]   ;;  %v7127_v46 = vld [vmem:[#allocation8 + $0xc] ss:$20 sps:$4 sm:$0xff]  }
 0x347   :  { %v3035_v30 = vpop.permute.xlu0 %3034  ;;  %4416 = vmatprep.subr.bf16.mxu1 %v7121_v63  ;;  %v7122_v40 = vld [vmem:[#allocation8] ss:$20 sps:$4 sm:$0xff]  }
 0x348   :  { %3287 = vmatmul.mubr.bf16.gmra.mxu0 %v3120_v45  ;;  %3508 = vmatmul.mubr.bf16.gmra.mxu1 %v3120_v45  ;;  %v3060_v43 = vadd.f32 %v3035_v30, %v10123_v55  ;;  %v7125_v45 = vld [vmem:[#allocation8 + $0x8] ss:$20 sps:$4 sm:$0xff]  }
 0x349   :  { %3296 = vmatprep.mubr.bf16.mxu0 %v11779_v62  ;;  %3517 = vmatprep.mubr.bf16.mxu1 %v11779_v62  ;;  %v7130_v30 = vld [vmem:[#allocation8 + $0x1bc] ss:$20 sps:$4 sm:$0xff]  }
 0x34a   :  { %v3092_v9 = vmul.f32 0.01, %v3060_v43  ;;  %vm3076_vm8 = vcmp.ge.f32.partialorder %v3060_v43, 0.0  ;;  %4417 = vmatpush1.bf16.msra.mxu1 %v7119_v36 }
 0x34b   :  { %4418 = vmatprep.subr.bf16.mxu1 %v7127_v46 }
 0x34c   :  { %v3108_v11 = vsel %vm3076_vm8, %v3060_v43, %v3092_v9  ;;  %v7133_v43 = vld [vmem:[#allocation8 + $0x1c4] ss:$20 sps:$4 sm:$0xff]   ;;  %v7131_v9 = vld [vmem:[#allocation8 + $0x1c0] ss:$20 sps:$4 sm:$0xff]  }
 0x34d   :  { %v3037_v18 = vpop.permute.xlu1 %3036 }
 0x34e   :  { %v3061_v16 = vadd.f32 %v3037_v18, %v10141_v47  ;;  %4419 = vmatpush1.bf16.msra.mxu1 %v7125_v45  ;;  %v7128_v18 = vld [vmem:[#allocation8 + $0x1b8] ss:$20 sps:$4 sm:$0xff]  }
 0x34f   :  { %4428 = vmatprep.subr.bf16.mxu1 %v7133_v43 }
 0x350   :  { %vm3077_vm9 = vcmp.ge.f32.partialorder %v3061_v16, 0.0  ;;  %v3093_v58 = vmul.f32 0.01, %v3061_v16 }
 0x352   :  { %v3109_v35 = vsel %vm3077_vm9, %v3061_v16, %v3093_v58  ;;  %4429 = vmatpush2.bf16.msra.mxu1 %v7131_v9  ;;  %v7136_v16 = vld [vmem:[#allocation8 + $0x194] ss:$20 sps:$4 sm:$0xff]   ;;  %v7139_v58 = vld [vmem:[#allocation8 + $0x19c] ss:$20 sps:$4 sm:$0xff]  }
 0x353   :  { %v3121_v17 = vpack.c.bf16 %v3109_v35, %v3108_v11  ;;  %v7134_v11 = vld [vmem:[#allocation8 + $0x190] ss:$20 sps:$4 sm:$0xff]   ;;  %v7137_v35 = vld [vmem:[#allocation8 + $0x198] ss:$20 sps:$4 sm:$0xff]   ;;  %4430 = vmatprep.subr.bf16.mxu1 %v7139_v58 }
 0x355   :  { %v3039_v61 = vpop.permute.xlu0 %3038  ;;  %3297 = vmatmul.mubr.bf16.gmra.mxu0 %v3121_v17  ;;  %3518 = vmatmul.mubr.bf16.gmra.mxu1 %v3121_v17  ;;  %v7142_v17 = vld [vmem:[#allocation8 + $0x16c] ss:$20 sps:$4 sm:$0xff]  }
 0x356   :  { %3306 = vmatprep.mubr.bf16.mxu0 %v11779_v62  ;;  %3527 = vmatprep.mubr.bf16.mxu1 %v11779_v62  ;;  %v3062_v55 = vadd.f32 %v3039_v61, %v10158_v19  ;;  %v7145_v61 = vld [vmem:[#allocation8 + $0x174] ss:$20 sps:$4 sm:$0xff]  }
 0x357   :  { %4431 = vmatpush2.bf16.msra.mxu1 %v7137_v35 }
 0x358   :  { %v3094_v14 = vmul.f32 0.01, %v3062_v55  ;;  %vm3078_vm10 = vcmp.ge.f32.partialorder %v3062_v55, 0.0  ;;  %4432 = vmatprep.subr.bf16.mxu1 %v7145_v61 }
 0x35a   :  { %v3041_v27 = vpop.permute.xlu1 %3040  ;;  %v3110_v23 = vsel %vm3078_vm10, %v3062_v55, %v3094_v14  ;;  %v7140_v55 = vld [vmem:[#allocation8 + $0x168] ss:$20 sps:$4 sm:$0xff]   ;;  %v7148_v14 = vld [vmem:[#allocation8 + $0x144] ss:$20 sps:$4 sm:$0xff]  }
 0x35b   :  { %v3063_v12 = vadd.f32 %v3041_v27, %v10168_v54  ;;  %v7143_v27 = vld [vmem:[#allocation8 + $0x170] ss:$20 sps:$4 sm:$0xff]  }
 0x35c   :  { %4433 = vmatpush2.bf16.msra.mxu1 %v7143_v27 }
 0x35d   :  { %vm3079_vm11 = vcmp.ge.f32.partialorder %v3063_v12, 0.0  ;;  %v3095_v47 = vmul.f32 0.01, %v3063_v12 }
 0x35e   :  { %v3043_v44 = vpop.permute.xlu0 %3042 }
 0x35f   :  { %v3111_v22 = vsel %vm3079_vm11, %v3063_v12, %v3095_v47  ;;  %v3064_v0 = vadd.f32 %v3043_v44, %v10176_v13  ;;  %v7151_v12 = vld [vmem:[#allocation8 + $0x14c] ss:$20 sps:$4 sm:$0xff]  }
 0x360   :  { %v3122_v26 = vpack.c.bf16 %v3111_v22, %v3110_v23  ;;  %v7146_v47 = vld [vmem:[#allocation8 + $0x140] ss:$20 sps:$4 sm:$0xff]   ;;  %v7149_v23 = vld [vmem:[#allocation8 + $0x148] ss:$20 sps:$4 sm:$0xff]   ;;  %4434 = vmatprep.subr.bf16.mxu1 %v7151_v12 }
 0x361   :  { %v3096_v34 = vmul.f32 0.01, %v3064_v0  ;;  %vm3080_vm12 = vcmp.ge.f32.partialorder %v3064_v0, 0.0  ;;  %4435 = vmatpush2.bf16.msra.mxu1 %v7149_v23  ;;  %v7155_v22 = vld [vmem:[#allocation10 + $0x11c] ss:$20 sps:$4 sm:$0xff]  }
 0x362   :  { %3307 = vmatmul.mubr.bf16.gmra.mxu0 %v3122_v26  ;;  %3528 = vmatmul.mubr.bf16.gmra.mxu1 %v3122_v26  ;;  %v3363_v44 = vld [vmem:[%s11529_s12] sm:$0x3] }
 0x363   :  { %3316 = vmatprep.mubr.bf16.mxu0 %v11779_v62  ;;  %3537 = vmatprep.mubr.bf16.mxu1 %v11779_v62  ;;  %v3112_v10 = vsel %vm3080_vm12, %v3064_v0, %v3096_v34  ;;  %v11780_v26 = vld [vmem:[#allocation16_spill] sm:$0xff] }
 0x364   :  { %v3045_v19 = vpop.permute.xlu1 %3044  ;;  %5025 = vmatprep.subr.bf16.mxu1 %v7155_v22  ;;  %v10254_v0 = vrot.slane %v3363_v44, %v11780_v26 }
 0x365   :  { %v3065_v6 = vadd.f32 %v3045_v19, %v10184_v24  ;;  %v11781_v19 = vld [vmem:[#allocation17_spill] sm:$0xff] }
 0x366   :  { %v10257_v34 = vrot.slane %v3363_v44, %v11781_v19 }
 0x367   :  { %vm3081_vm13 = vcmp.ge.f32.partialorder %v3065_v6, 0.0  ;;  %v3097_v54 = vmul.f32 0.01, %v3065_v6 }
 0x369   :  { %v3113_v53 = vsel %vm3081_vm13, %v3065_v6, %v3097_v54 }
 0x36a   :  { %v3123_v57 = vpack.c.bf16 %v3113_v53, %v3112_v10 }
 0x36b   :  { %v3047_v1 = vpop.permute.xlu0 %3046 }
 0x36c   :  { %3317 = vmatmul.mubr.bf16.gmra.mxu0 %v3123_v57  ;;  %3538 = vmatmul.mubr.bf16.gmra.mxu1 %v3123_v57  ;;  %v3066_v13 = vadd.f32 %v3047_v1, %v10193_v7 }
 0x36d   :  { %3326 = vmatprep.mubr.bf16.mxu0 %v11779_v62  ;;  %3547 = vmatprep.mubr.bf16.mxu1 %v11779_v62 }
 0x36e   :  { %v3098_v4 = vmul.f32 0.01, %v3066_v13  ;;  %vm3082_vm14 = vcmp.ge.f32.partialorder %v3066_v13, 0.0 }
 0x370   :  { %v3114_v33 = vsel %vm3082_vm14, %v3066_v13, %v3098_v4 }
 0x371   :  { %v3049_v20 = vpop.permute.xlu1 %3048 }
 0x372   :  { %v3067_v31 = vadd.f32 %v3049_v20, %v10201_v59 }
 0x374   :  { %vm3083_vm15 = vcmp.ge.f32.partialorder %v3067_v31, 0.0  ;;  %v3099_v24 = vmul.f32 0.01, %v3067_v31 }
 0x376   :  { %v3115_v50 = vsel %vm3083_vm15, %v3067_v31, %v3099_v24 }
 0x377   :  { %v3124_v60 = vpack.c.bf16 %v3115_v50, %v3114_v33  ;;  %v3051_v8 = vpop.permute.xlu0 %3050 }
 0x378   :  { %v3068_v42 = vadd.f32 %v3051_v8, %v10210_v39  ;;  %v7106_v39 = vld [vmem:[#allocation8 + $0x7c] ss:$20 sps:$4 sm:$0xff]  }
 0x379   :  { %3327 = vmatmul.mubr.bf16.gmra.mxu0 %v3124_v60  ;;  %3548 = vmatmul.mubr.bf16.gmra.mxu1 %v3124_v60 }
 0x37a   :  { %3336 = vmatprep.mubr.bf16.mxu0 %v11779_v62  ;;  %3557 = vmatprep.mubr.bf16.mxu1 %v11779_v62  ;;  %v3100_v56 = vmul.f32 0.01, %v3068_v42  ;;  %vm3084_vm2 = vcmp.ge.f32.partialorder %v3068_v42, 0.0 }
 0x37b   :  { %4299 = vmatprep.subr.bf16.mxu0 %v7106_v39 }
 0x37c   :  { %v3116_v25 = vsel %vm3084_vm2, %v3068_v42, %v3100_v56  ;;  %4300 = vmatpush1.bf16.msra.mxu0 %v7104_v49 }
 0x37e   :  { %v3053_v7 = vpop.permute.xlu1 %3052 }
 0x37f   :  { %v3069_v41 = vadd.f32 %v3053_v7, %v10215_v5  ;;  %v7112_v5 = vld [vmem:[#allocation8 + $0x54] ss:$20 sps:$4 sm:$0xff]  }
 0x380   :  { %4301 = vmatprep.subr.bf16.mxu0 %v7112_v5 }
 0x381   :  { %vm3085_vm3 = vcmp.ge.f32.partialorder %v3069_v41, 0.0  ;;  %v3101_v59 = vmul.f32 0.01, %v3069_v41  ;;  %4302 = vmatpush1.bf16.msra.mxu0 %v7110_v3 }
 0x382   :  { %4303 = vmatprep.subr.bf16.mxu0 %v7118_v2 }
 0x383   :  { %v3117_v52 = vsel %vm3085_vm3, %v3069_v41, %v3101_v59 }
 0x384   :  { %v3125_v37 = vpack.c.bf16 %v3117_v52, %v3116_v25 }
 0x385   :  { %4304 = vmatpush1.bf16.msra.mxu0 %v7116_v15 }
 0x386   :  { %3337 = vmatmul.mubr.bf16.gmra.mxu0 %v3125_v37  ;;  %3558 = vmatmul.mubr.bf16.gmra.mxu1 %v3125_v37 }
 0x387   :  { %4305 = vmatprep.subr.bf16.mxu0 %v7124_v32 }
 0x389   :  { %4306 = vmatpush1.bf16.msra.mxu0 %v7122_v40 }
 0x38a   :  { %4315 = vmatprep.subr.bf16.mxu0 %v7130_v30 }
 0x38d   :  { %4316 = vmatpush2.bf16.msra.mxu0 %v7128_v18 }
 0x38e   :  { %4317 = vmatprep.subr.bf16.mxu0 %v7136_v16 }
 0x391   :  { %4318 = vmatpush2.bf16.msra.mxu0 %v7134_v11  ;;  %v3142_v11 = vld [vmem:[%s11528_s11] sm:$0x3] }
 0x392   :  { %4319 = vmatprep.subr.bf16.mxu0 %v7142_v17  ;;  %v10292_v17 = vrot.slane %v3142_v11, %v11781_v19  ;;  %v10298_v22 = vrot.slane %v3142_v11, %v11780_v26 }
 0x395   :  { %4320 = vmatpush2.bf16.msra.mxu0 %v7140_v55 }
 0x396   :  { %4321 = vmatprep.subr.bf16.mxu0 %v7148_v14 }
 0x399   :  { %4322 = vmatpush2.bf16.msra.mxu0 %v7146_v47 }
 0x39a   :  { %4517 = vmatprep.subr.bf16.mxu0 %v11779_v62 }
 0x3ee   :  { %v10259_v6 = vpop.f32.mrf.mxu0  ;;  %v3489_v54 = vpop.f32.mrf.mxu1 }
 0x3ef   :  { %v3490_v10 = vadd.f32 %v3489_v54, %v10254_v0 }
 0x3f0   :  { %v10262_v53 = vpop.f32.mrf.mxu0  ;;  %v3491_v57 = vpop.f32.mrf.mxu1 }
 0x3f1   :  { %v6519_v1 = vmul.f32 -1.442695, %v3490_v10  ;;  %v3492_v13 = vadd.f32 %v3491_v57, %v10257_v34  ;;  %v3271_v54 = vadd.f32 %v10262_v53, %v10292_v17 }
 0x3f2   :  { %v10265_v20 = vpop.f32.mrf.mxu0  ;;  %v3493_v4 = vpop.f32.mrf.mxu1 }
 0x3f3   :  { %7696 = vpow2.f32 %v6519_v1  ;;  %v6520_v31 = vmul.f32 -1.442695, %v3492_v13  ;;  %v3494_v24 = vadd.f32 %v3493_v4, %v10254_v0  ;;  %v3273_v1 = vadd.f32 %v10265_v20, %v10298_v22 }
 0x3f4   :  { %v3495_v33 = vpop.f32.mrf.mxu1  ;;  %v10269_v8 = vpop.f32.mrf.mxu0 }
 0x3f5   :  { %7698 = vpow2.f32 %v6520_v31  ;;  %v3496_v50 = vadd.f32 %v3495_v33, %v10257_v34  ;;  %v6521_v60 = vmul.f32 -1.442695, %v3494_v24  ;;  %v3275_v4 = vadd.f32 %v10269_v8, %v10292_v17 }
 0x3f7   :  { %v6522_v42 = vmul.f32 -1.442695, %v3496_v50  ;;  %7700 = vpow2.f32 %v6521_v60  ;;  %v3269_v50 = vadd.f32 %v10259_v6, %v10298_v22 }
 0x3f9   :  { %7702 = vpow2.f32 %v6522_v42 }
 0x3fc   :  { %v10271_v7 = vpop.f32.mrf.mxu0  ;;  %v3499_v56 = vpop.f32.mrf.mxu1 }
 0x3fd   :  { %v3500_v41 = vadd.f32 %v3499_v56, %v10254_v0  ;;  %v3569_v56 = vmax.f32 %v3271_v54, 0.0 }
 0x3fe   :  { %v10274_v59 = vpop.f32.mrf.mxu0  ;;  %v3501_v25 = vpop.f32.mrf.mxu1 }
 0x3ff   :  { %v6523_v52 = vmul.f32 -1.442695, %v3500_v41  ;;  %v3502_v37 = vadd.f32 %v3501_v25, %v10257_v34 }
 0x400   :  { %v3503_v51 = vpop.f32.mrf.mxu1  ;;  %v10277_v49 = vpop.f32.mrf.mxu0 }
 0x401   :  { %v6524_v38 = vmul.f32 -1.442695, %v3502_v37  ;;  %v7697_v39 = vpop.eup %7696  ;;  %7704 = vpow2.f32 %v6523_v52  ;;  %v3504_v48 = vadd.f32 %v3503_v51, %v10254_v0  ;;  %v3570_v52 = vmax.f32 %v3273_v1, 0.0 }
 0x402   :  { %v3505_v21 = vpop.f32.mrf.mxu1  ;;  %v7699_v3 = vpop.eup %7698  ;;  %v3696_v28 = vadd.f32 1.0, %v7697_v39  ;;  %v3281_v1 = vadd.f32 %v10274_v59, %v10292_v17 }
 0x403   :  { %7706 = vpow2.f32 %v6524_v38  ;;  %v6525_v5 = vmul.f32 -1.442695, %v3504_v48  ;;  %v3506_v29 = vadd.f32 %v3505_v21, %v10257_v34  ;;  %v3697_v2 = vadd.f32 1.0, %v7699_v3  ;;  %v10281_v63 = vpop.f32.mrf.mxu0 }
 0x404   :  { %v7701_v36 = vpop.eup %7700  ;;  %v3571_v38 = vmax.f32 %v3275_v4, 0.0  ;;  %v3568_v21 = vmax.f32 %v3269_v50, 0.0  ;;  %v3285_v59 = vadd.f32 %v10281_v63, %v10292_v17  ;;  %v7156_v50 = vld [vmem:[#allocation8 + $0x100] ss:$20 sps:$4 sm:$0xff]   ;;  %v3573_v63 = vmax.f32 %v3281_v1, 0.0 }
 0x405   :  { %7708 = vpow2.f32 %v6525_v5  ;;  %v6526_v15 = vmul.f32 -1.442695, %v3506_v29  ;;  %v3698_v40 = vadd.f32 1.0, %v7701_v36  ;;  %v7164_v1 = vld [vmem:[#allocation8 + $0xb0] ss:$20 sps:$4 sm:$0xff]  }
 0x406   :  { %7710 = vrcp.f32 %v3697_v2  ;;  %v7703_v46 = vpop.eup %7702 }
 0x407   :  { %7712 = vpow2.f32 %v6526_v15  ;;  %v3699_v30 = vadd.f32 1.0, %v7703_v46 }
 0x408   :  { %v3509_v32 = vpop.f32.mrf.mxu1  ;;  %7714 = vrcp.f32 %v3696_v28  ;;  %v10284_v43 = vpop.f32.mrf.mxu0 }
 0x409   :  { %v3510_v45 = vadd.f32 %v3509_v32, %v10254_v0  ;;  %7716 = vrcp.f32 %v3698_v40 }
 0x40a   :  { %v3511_v18 = vpop.f32.mrf.mxu1  ;;  %7718 = vrcp.f32 %v3699_v30  ;;  %v10294_v61 = vpop.f32.mrf.mxu0 }
 0x40b   :  { %v6527_v9 = vmul.f32 -1.442695, %v3510_v45  ;;  %v3512_v16 = vadd.f32 %v3511_v18, %v10257_v34  ;;  %v11782_v18 = vld [vmem:[#allocation18_spill] sm:$0xff] }
 0x40c   :  { %v3513_v58 = vpop.f32.mrf.mxu1  ;;  %v10302_v57 = vpop.f32.mrf.mxu0 }
 0x40d   :  { %7720 = vpow2.f32 %v6527_v9  ;;  %v3514_v35 = vadd.f32 %v3513_v58, %v10254_v0  ;;  %v6528_v55 = vmul.f32 -1.442695, %v3512_v16  ;;  %v11783_v9 = vunpack.i.l.bf16 %v11782_v18 }
 0x40e   :  { %v3515_v27 = vpop.f32.mrf.mxu1  ;;  %v7705_v47 = vpop.eup %7704  ;;  %v11784_v58 = vunpack.i.h.bf16 %v11782_v18 }
 0x40f   :  { %v6529_v14 = vmul.f32 -1.442695, %v3514_v35  ;;  %v3516_v12 = vadd.f32 %v3515_v27, %v10257_v34  ;;  %7722 = vpow2.f32 %v6528_v55  ;;  %v3700_v31 = vadd.f32 1.0, %v7705_v47  ;;  %v10311_v41 = vpop.f32.mrf.mxu0  ;;  %v7152_v27 = vld [vmem:[#allocation8 + $0x128] ss:$20 sps:$4 sm:$0xff]  }
 0x410   :  { %v7707_v23 = vpop.eup %7706 }
 0x411   :  { %7724 = vpow2.f32 %v6529_v14  ;;  %v6530_v44 = vmul.f32 -1.442695, %v3516_v12  ;;  %v3701_v10 = vadd.f32 1.0, %v7707_v23  ;;  %v7153_v14 = vld [vmem:[#allocation10 + $0x118] ss:$20 sps:$4 sm:$0xff]  }
 0x412   :  { %v7709_v13 = vpop.eup %7708 }
 0x413   :  { %7726 = vpow2.f32 %v6530_v44  ;;  %v7711_v33 = vpop.eup %7710  ;;  %v3702_v60 = vadd.f32 1.0, %v7709_v13 }
 0x414   :  { %7728 = vrcp.f32 %v3701_v10  ;;  %v7713_v42 = vpop.eup %7712  ;;  %v3793_v51 = vmul.f32 %v7711_v33, %v3569_v56  ;;  %v7159_v10 = vld [vmem:[#allocation10 + $0xf4] ss:$20 sps:$4 sm:$0xff]  }
 0x415   :  { %v3519_v24 = vpop.f32.mrf.mxu1  ;;  %v7715_v25 = vpop.eup %7714  ;;  %7730 = vrcp.f32 %v3702_v60  ;;  %v3703_v37 = vadd.f32 1.0, %v7713_v42  ;;  %v7157_v60 = vld [vmem:[#allocation10 + $0xf0] ss:$20 sps:$4 sm:$0xff]   ;;  %v3279_v42 = vadd.f32 %v10271_v7, %v10298_v22  ;;  %v3575_v7 = vmax.f32 %v3285_v59, 0.0 }
 0x416   :  { %v3520_v53 = vadd.f32 %v3519_v24, %v10254_v0  ;;  %v7717_v8 = vpop.eup %7716  ;;  %7732 = vrcp.f32 %v3700_v31  ;;  %v10315_v2 = vpop.f32.mrf.mxu0  ;;  %v3792_v45 = vmul.f32 %v7715_v25, %v3568_v21  ;;  %v3824_v16 = vsel %vm186_vm0, %v3793_v51, %v11783_v9  ;;  %v7161_v21 = vld [vmem:[#allocation10 + $0xc8] ss:$20 sps:$4 sm:$0xff]  }
 0x417   :  { %v3521_v20 = vpop.f32.mrf.mxu1  ;;  %v7719_v48 = vpop.eup %7718  ;;  %7734 = vrcp.f32 %v3703_v37  ;;  %v3794_v32 = vmul.f32 %v7717_v8, %v3570_v52  ;;  %v3283_v31 = vadd.f32 %v10277_v49, %v10298_v22  ;;  %v7163_v49 = vld [vmem:[#allocation10 + $0xcc] ss:$20 sps:$4 sm:$0xff]  }
 0x418   :  { %v3522_v39 = vadd.f32 %v3521_v20, %v10257_v34  ;;  %v6531_v3 = vmul.f32 -1.442695, %v3520_v53  ;;  %v3795_v28 = vmul.f32 %v7719_v48, %v3571_v38  ;;  %v10326_v23 = vpop.f32.mrf.mxu0  ;;  %v7160_v48 = vld [vmem:[#allocation8 + $0xd8] ss:$20 sps:$4 sm:$0xff]  }
 0x419   :  { %v3523_v6 = vpop.f32.mrf.mxu1  ;;  %v10328_v54 = vpack.c.bf16 %v3794_v32, %v3792_v45  ;;  %v3291_v45 = vadd.f32 %v10294_v61, %v10292_v17  ;;  %v3293_v61 = vadd.f32 %v10302_v57, %v10298_v22 }
 0x41a   :  { %v3524_v5 = vadd.f32 %v3523_v6, %v10254_v0  ;;  %v7721_v29 = vpop.eup %7720  ;;  %v6532_v15 = vmul.f32 -1.442695, %v3522_v39  ;;  %v3825_v11 = vsel %vm186_vm0, %v3795_v28, %v11784_v58  ;;  %v10344_v56 = vpop.f32.mrf.mxu0  ;;  %v3574_v39 = vmax.f32 %v3283_v31, 0.0  ;;  %v11785_v58 = vld [vmem:[#allocation20_spill] sm:$0xff] }
 0x41b   :  { %v3525_v36 = vpop.f32.mrf.mxu1  ;;  %v3704_v46 = vadd.f32 1.0, %v7721_v29  ;;  %v10324_v55 = vpack.c.bf16 %v3825_v11, %v3824_v16  ;;  %v11786_v11 = vunpack.i.l.bf16 %v11785_v58  ;;  %v3295_v31 = vadd.f32 %v10311_v41, %v10292_v17 }
 0x41c   :  { %v6533_v40 = vmul.f32 -1.442695, %v3524_v5  ;;  %7736 = vpow2.f32 %v6532_v15  ;;  %v3526_v30 = vadd.f32 %v3525_v36, %v10257_v34  ;;  %v7723_v35 = vpop.eup %7722  ;;  %v3572_v5 = vmax.f32 %v3279_v42, 0.0  ;;  %v10349_v29 = vpop.f32.mrf.mxu0  ;;  %v7167_v15 = vld [vmem:[#allocation10 + $0xa4] ss:$20 sps:$4 sm:$0xff]  }
 0x41d   :  { %7738 = vpow2.f32 %v6531_v3  ;;  %v3705_v47 = vadd.f32 1.0, %v7723_v35  ;;  %6611 = vmatprep.mubr.msk.bf16.mxu0 %vm1236_vm1, %v10324_v55  ;;  %6619 = vmatprep.mubr.msk.bf16.mxu1 %vm1236_vm1, %v10324_v55 }
 0x41e   :  { %v7725_v12 = vpop.eup %7724  ;;  %7740 = vpow2.f32 %v6533_v40  ;;  %v6534_v44 = vmul.f32 -1.442695, %v3526_v30  ;;  %4324 = vmatmul.mubr.bf16.vlgmr.msra.gmra.mxu0 %v10328_v54  ;;  %4437 = vmatmul.mubr.bf16.vlgmr.msra.gmra.mxu1 %v10328_v54 }
 0x41f   :  { %7742 = vrcp.f32 %v3704_v46  ;;  %v3706_v13 = vadd.f32 1.0, %v7725_v12  ;;  %4518 = vmatpush1.bf16.msra.mxu0 %v7152_v27  ;;  %5026 = vmatpush1.bf16.msra.mxu1 %v7153_v14  ;;  %v11787_v27 = vunpack.i.h.bf16 %v11785_v58 }
 0x420   :  { %v7727_v4 = vpop.eup %7726  ;;  %7744 = vrcp.f32 %v3705_v47  ;;  %4519 = vmatprep.subr.bf16.mxu0 %v11779_v62  ;;  %5027 = vmatprep.subr.bf16.mxu1 %v7159_v10 }
 0x421   :  { %7746 = vrcp.f32 %v3706_v13  ;;  %v3707_v24 = vadd.f32 1.0, %v7727_v4  ;;  %v7729_v53 = vpop.eup %7728  ;;  %v7165_v13 = vld [vmem:[#allocation10 + $0xa0] ss:$20 sps:$4 sm:$0xff]  }
 0x422   :  { %v3529_v33 = vpop.f32.mrf.mxu1  ;;  %7748 = vpow2.f32 %v6534_v44  ;;  %v7731_v52 = vpop.eup %7730  ;;  %v3797_v38 = vmul.f32 %v7729_v53, %v3573_v63 }
 0x423   :  { %v3530_v20 = vadd.f32 %v3529_v33, %v10254_v0  ;;  %7750 = vrcp.f32 %v3707_v24  ;;  %v7733_v51 = vpop.eup %7732  ;;  %4520 = vmatpush1.bf16.msra.mxu0 %v7156_v50  ;;  %5028 = vmatpush1.bf16.msra.mxu1 %v7157_v60  ;;  %v3798_v40 = vmul.f32 %v7731_v52, %v3574_v39  ;;  %v10364_v44 = vpop.f32.mrf.mxu0  ;;  %v7171_v33 = vld [vmem:[#allocation10 + $0x7c] ss:$20 sps:$4 sm:$0xff]   ;;  %v3289_v50 = vadd.f32 %v10284_v43, %v10298_v22 }
 0x424   :  { %v3531_v25 = vpop.f32.mrf.mxu1  ;;  %v7735_v3 = vpop.eup %7734  ;;  %4521 = vmatprep.subr.bf16.mxu0 %v11779_v62  ;;  %5029 = vmatprep.subr.bf16.mxu1 %v7163_v49  ;;  %v3796_v30 = vmul.f32 %v7733_v51, %v3572_v5  ;;  %v3826_v35 = vsel %vm186_vm0, %v3797_v38, %v11786_v11  ;;  %v7168_v52 = vld [vmem:[#allocation8 + $0x88] ss:$20 sps:$4 sm:$0xff]   ;;  %v3578_v38 = vmax.f32 %v3293_v61, 0.0  ;;  %v3579_v39 = vmax.f32 %v3295_v31, 0.0  ;;  %v7172_v61 = vld [vmem:[#allocation8 + $0x60] ss:$20 sps:$4 sm:$0xff]  }
 0x425   :  { %v6535_v37 = vmul.f32 -1.442695, %v3530_v20  ;;  %v3532_v8 = vadd.f32 %v3531_v25, %v10257_v34  ;;  %v3799_v36 = vmul.f32 %v7735_v3, %v3575_v7  ;;  %v3577_v20 = vmax.f32 %v3291_v45, 0.0  ;;  %v10382_v43 = vpop.f32.mrf.mxu0  ;;  %v7179_v31 = vld [vmem:[#allocation10 + $0x2c] ss:$20 sps:$4 sm:$0xff]  }
 0x426   :  { %v3533_v6 = vpop.f32.mrf.mxu1  ;;  %v10371_v24 = vpack.c.bf16 %v3798_v40, %v3796_v30 }
 0x427   :  { %v6536_v28 = vmul.f32 -1.442695, %v3532_v8  ;;  %7752 = vpow2.f32 %v6535_v37  ;;  %v3534_v32 = vadd.f32 %v3533_v6, %v10254_v0  ;;  %v3827_v14 = vsel %vm186_vm0, %v3799_v36, %v11787_v27  ;;  %4522 = vmatpush1.bf16.msra.mxu0 %v7160_v48  ;;  %5030 = vmatpush1.bf16.msra.mxu1 %v7161_v21  ;;  %v7169_v37 = vld [vmem:[#allocation10 + $0x78] ss:$20 sps:$4 sm:$0xff]   ;;  %v7175_v6 = vld [vmem:[#allocation10 + $0x54] ss:$20 sps:$4 sm:$0xff]  }
 0x428   :  { %v3535_v46 = vpop.f32.mrf.mxu1  ;;  %v10366_v10 = vpack.c.bf16 %v3827_v14, %v3826_v35  ;;  %4523 = vmatprep.subr.bf16.mxu0 %v11779_v62  ;;  %5031 = vmatprep.subr.bf16.mxu1 %v7167_v15  ;;  %v3576_v21 = vmax.f32 %v3289_v50, 0.0  ;;  %v3301_v50 = vadd.f32 %v10326_v23, %v10292_v17  ;;  %v3305_v23 = vadd.f32 %v10349_v29, %v10292_v17  ;;  %v7181_v29 = vld [vmem:[#allocation10] ss:$20 sps:$4 sm:$0xff]  }
 0x429   :  { %7754 = vpow2.f32 %v6536_v28  ;;  %v7737_v18 = vpop.eup %7736  ;;  %v6537_v9 = vmul.f32 -1.442695, %v3534_v32  ;;  %v3536_v16 = vadd.f32 %v3535_v46, %v10257_v34  ;;  %v10386_v46 = vpop.f32.mrf.mxu0 }
 0x42a   :  { %v7739_v12 = vpop.eup %7738  ;;  %v3709_v47 = vadd.f32 1.0, %v7737_v18  ;;  %6612 = vmatprep.mubr.msk.bf16.mxu0 %vm1236_vm1, %v10366_v10  ;;  %6620 = vmatprep.mubr.msk.bf16.mxu1 %vm1236_vm1, %v10366_v10 }
 0x42b   :  { %v7741_v4 = vpop.eup %7740  ;;  %7756 = vpow2.f32 %v6537_v9  ;;  %v6538_v59 = vmul.f32 -1.442695, %v3536_v16  ;;  %v3708_v41 = vadd.f32 1.0, %v7739_v12  ;;  %4334 = vmatmul.mubr.bf16.gmra.mxu0 %v10371_v24  ;;  %4447 = vmatmul.mubr.bf16.gmra.mxu1 %v10371_v24  ;;  %v11788_v9 = vld [vmem:[#allocation19_spill] sm:$0xff] }
 0x42c   :  { %v7743_v57 = vpop.eup %7742  ;;  %v3710_v60 = vadd.f32 1.0, %v7741_v4  ;;  %v3539_v53 = vpop.f32.mrf.mxu1  ;;  %4524 = vmatpush1.bf16.msra.mxu0 %v7164_v1  ;;  %5032 = vmatpush1.bf16.msra.mxu1 %v7165_v13  ;;  %v11789_v16 = vunpack.i.l.bf16 %v11788_v9  ;;  %v11790_v11 = vunpack.i.h.bf16 %v11788_v9 }
 0x42d   :  { %v7745_v42 = vpop.eup %7744  ;;  %7758 = vpow2.f32 %v6538_v59  ;;  %v3540_v49 = vadd.f32 %v3539_v53, %v10254_v0  ;;  %4525 = vmatprep.subr.bf16.mxu0 %v11779_v62  ;;  %5033 = vmatprep.subr.bf16.mxu1 %v7171_v33  ;;  %v3800_v30 = vmul.f32 %v7743_v57, %v3576_v21  ;;  %v10401_v33 = vpop.f32.mrf.mxu0  ;;  %v7176_v53 = vld [vmem:[#allocation8 + $0x38] ss:$20 sps:$4 sm:$0xff]  }
 0x42e   :  { %v7747_v63 = vpop.eup %7746  ;;  %7760 = vrcp.f32 %v3709_v47  ;;  %v3541_v25 = vpop.f32.mrf.mxu1  ;;  %v3801_v51 = vmul.f32 %v7745_v42, %v3577_v20  ;;  %v7173_v47 = vld [vmem:[#allocation10 + $0x50] ss:$20 sps:$4 sm:$0xff]   ;;  %v7177_v42 = vld [vmem:[#allocation10 + $0x28] ss:$20 sps:$4 sm:$0xff]  }
 0x42f   :  { %v7749_v8 = vpop.eup %7748  ;;  %v3542_v7 = vadd.f32 %v3541_v25, %v10257_v34  ;;  %7762 = vrcp.f32 %v3710_v60  ;;  %v6539_v5 = vmul.f32 -1.442695, %v3540_v49  ;;  %v3802_v32 = vmul.f32 %v7747_v63, %v3578_v38  ;;  %v7183_v49 = vld [vmem:[#allocation10 + $0x4] ss:$20 sps:$4 sm:$0xff]  }
 0x430   :  { %v7751_v48 = vpop.eup %7750  ;;  %v3711_v3 = vadd.f32 1.0, %v7749_v8  ;;  %v3543_v28 = vpop.f32.mrf.mxu1  ;;  %7764 = vrcp.f32 %v3708_v41  ;;  %4526 = vmatpush1.bf16.msra.mxu0 %v7168_v52  ;;  %5034 = vmatpush1.bf16.msra.mxu1 %v7169_v37  ;;  %v3828_v58 = vsel %vm186_vm0, %v3801_v51, %v11789_v16  ;;  %v3303_v25 = vadd.f32 %v10344_v56, %v10298_v22 }
 0x431   :  { %v3803_v15 = vmul.f32 %v7751_v48, %v3579_v39  ;;  %v6540_v36 = vmul.f32 -1.442695, %v3542_v7  ;;  %v3544_v40 = vadd.f32 %v3543_v28, %v10254_v0  ;;  %4527 = vmatprep.subr.bf16.mxu0 %v11779_v62  ;;  %5035 = vmatprep.subr.bf16.mxu1 %v7175_v6  ;;  %v10399_v4 = vpack.c.bf16 %v3802_v32, %v3800_v30  ;;  %v10416_v52 = vpop.f32.mrf.mxu0  ;;  %v7180_v7 = vld [vmem:[#allocation8 + $0x10] ss:$20 sps:$4 sm:$0xff]  }
 0x432   :  { %7766 = vrcp.f32 %v3711_v3  ;;  %v3545_v45 = vpop.f32.mrf.mxu1  ;;  %v3299_v51 = vadd.f32 %v10315_v2, %v10298_v22  ;;  %v3581_v6 = vmax.f32 %v3301_v50, 0.0 }
 0x433   :  { %7768 = vpow2.f32 %v6540_v36  ;;  %v3546_v18 = vadd.f32 %v3545_v45, %v10257_v34  ;;  %v3829_v35 = vsel %vm186_vm0, %v3803_v15, %v11790_v11  ;;  %v6541_v14 = vmul.f32 -1.442695, %v3544_v40  ;;  %v10423_v32 = vpop.f32.mrf.mxu0 }
 0x434   :  { %v7753_v27 = vpop.eup %7752  ;;  %7770 = vpow2.f32 %v6539_v5  ;;  %v10397_v12 = vpack.c.bf16 %v3829_v35, %v3828_v58  ;;  %4528 = vmatpush1.bf16.msra.mxu0 %v7172_v61  ;;  %5036 = vmatpush1.bf16.msra.mxu1 %v7173_v47  ;;  %v7187_v5 = vld [vmem:[#allocation10 + $0x1bc] ss:$20 sps:$4 sm:$0xff]   ;;  %v3582_v15 = vmax.f32 %v3303_v25, 0.0  ;;  %v3583_v36 = vmax.f32 %v3305_v23, 0.0 }
 0x435   :  { %v6542_v13 = vmul.f32 -1.442695, %v3546_v18  ;;  %7772 = vpow2.f32 %v6541_v14  ;;  %v3712_v60 = vadd.f32 1.0, %v7753_v27  ;;  %4529 = vmatprep.subr.bf16.mxu0 %v11779_v62  ;;  %5037 = vmatprep.subr.bf16.mxu1 %v7179_v31  ;;  %v3580_v16 = vmax.f32 %v3299_v51, 0.0  ;;  %v7184_v35 = vld [vmem:[#allocation8 + $0x1c8] ss:$20 sps:$4 sm:$0xff]  }
 0x436   :  { %v7755_v1 = vpop.eup %7754  ;;  %6613 = vmatprep.mubr.msk.bf16.mxu0 %vm1236_vm1, %v10397_v12  ;;  %6621 = vmatprep.mubr.msk.bf16.mxu1 %vm1236_vm1, %v10397_v12  ;;  %v7185_v27 = vld [vmem:[#allocation10 + $0x1b8] ss:$20 sps:$4 sm:$0xff]  }
 0x437   :  { %v3713_v59 = vadd.f32 1.0, %v7755_v1  ;;  %4344 = vmatmul.mubr.bf16.gmra.mxu0 %v10399_v4  ;;  %4457 = vmatmul.mubr.bf16.gmra.mxu1 %v10399_v4  ;;  %v11791_v31 = vld [vmem:[#allocation21_spill] sm:$0xff] }
 0x438   :  { %v7757_v57 = vpop.eup %7756  ;;  %4530 = vmatpush1.bf16.msra.mxu0 %v7176_v53  ;;  %5038 = vmatpush1.bf16.msra.mxu1 %v7177_v42  ;;  %v11793_v50 = vunpack.i.h.bf16 %v11791_v31  ;;  %v3311_v42 = vadd.f32 %v10382_v43, %v10292_v17  ;;  %v3315_v43 = vadd.f32 %v10401_v33, %v10292_v17 }
 0x439   :  { %7774 = vrcp.f32 %v3713_v59  ;;  %v3714_v20 = vadd.f32 1.0, %v7757_v57  ;;  %v3549_v41 = vpop.f32.mrf.mxu1  ;;  %4531 = vmatprep.subr.bf16.mxu0 %v11779_v62  ;;  %5039 = vmatprep.subr.bf16.mxu1 %v7183_v49  ;;  %v11792_v59 = vunpack.i.l.bf16 %v11791_v31  ;;  %v7191_v49 = vld [vmem:[#allocation10 + $0x194] ss:$20 sps:$4 sm:$0xff]  }
 0x43a   :  { %7776 = vpow2.f32 %v6542_v13  ;;  %v7759_v63 = vpop.eup %7758  ;;  %v3550_v37 = vadd.f32 %v3549_v41, %v10254_v0  ;;  %v10428_v13 = vpop.f32.mrf.mxu0  ;;  %v3585_v33 = vmax.f32 %v3311_v42, 0.0 }
 0x43b   :  { %v7761_v8 = vpop.eup %7760  ;;  %7778 = vrcp.f32 %v3714_v20  ;;  %v3715_v38 = vadd.f32 1.0, %v7759_v63  ;;  %v3551_v39 = vpop.f32.mrf.mxu1 }
 0x43c   :  { %7780 = vrcp.f32 %v3712_v60  ;;  %v6543_v48 = vmul.f32 -1.442695, %v3550_v37  ;;  %v3552_v56 = vadd.f32 %v3551_v39, %v10257_v34  ;;  %v7763_v21 = vpop.eup %7762  ;;  %v3805_v28 = vmul.f32 %v7761_v8, %v3581_v6  ;;  %4532 = vmatpush1.bf16.msra.mxu0 %v7180_v7  ;;  %5040 = vmatpush1.bf16.msra.mxu1 %v7181_v29  ;;  %v7188_v37 = vld [vmem:[#allocation8 + $0x1a0] ss:$20 sps:$4 sm:$0xff]   ;;  %v7189_v8 = vld [vmem:[#allocation10 + $0x190] ss:$20 sps:$4 sm:$0xff]   ;;  %v10452_v29 = vpop.f32.mrf.mxu0 }
 0x43d   :  { %7782 = vrcp.f32 %v3715_v38  ;;  %v3553_v3 = vpop.f32.mrf.mxu1  ;;  %v7765_v2 = vpop.eup %7764  ;;  %v3806_v11 = vmul.f32 %v7763_v21, %v3582_v15  ;;  %4541 = vmatprep.subr.bf16.mxu0 %v11779_v62  ;;  %5049 = vmatprep.subr.bf16.mxu1 %v7187_v5  ;;  %v3313_v38 = vadd.f32 %v10386_v46, %v10298_v22  ;;  %v7195_v6 = vld [vmem:[#allocation10 + $0x16c] ss:$20 sps:$4 sm:$0xff]   ;;  %v7193_v15 = vld [vmem:[#allocation10 + $0x168] ss:$20 sps:$4 sm:$0xff]  }
 0x43e   :  { %v6544_v40 = vmul.f32 -1.442695, %v3552_v56  ;;  %7784 = vpow2.f32 %v6543_v48  ;;  %v3554_v30 = vadd.f32 %v3553_v3, %v10254_v0  ;;  %v3830_v57 = vsel %vm186_vm0, %v3805_v28, %v11792_v59  ;;  %v7192_v28 = vld [vmem:[#allocation8 + $0x178] ss:$20 sps:$4 sm:$0xff]  }
 0x43f   :  { %v7767_v45 = vpop.eup %7766  ;;  %v3555_v18 = vpop.f32.mrf.mxu1  ;;  %v3804_v53 = vmul.f32 %v7765_v2, %v3580_v16  ;;  %v3309_v56 = vadd.f32 %v10364_v44, %v10298_v22 }
 0x440   :  { %v7769_v9 = vpop.eup %7768  ;;  %v3807_v58 = vmul.f32 %v7767_v45, %v3583_v36  ;;  %7786 = vpow2.f32 %v6544_v40  ;;  %v6545_v47 = vmul.f32 -1.442695, %v3554_v30  ;;  %v3556_v1 = vadd.f32 %v3555_v18, %v10257_v34  ;;  %4542 = vmatpush2.bf16.msra.mxu0 %v7184_v35  ;;  %5050 = vmatpush2.bf16.msra.mxu1 %v7185_v27 }
 0x441   :  { %v7771_v14 = vpop.eup %7770  ;;  %v3717_v61 = vadd.f32 1.0, %v7769_v9  ;;  %v10440_v23 = vpack.c.bf16 %v3806_v11, %v3804_v53  ;;  %4543 = vmatprep.subr.bf16.mxu0 %v11779_v62  ;;  %5051 = vmatprep.subr.bf16.mxu1 %v7191_v49  ;;  %v3586_v45 = vmax.f32 %v3313_v38, 0.0  ;;  %v3587_v30 = vmax.f32 %v3315_v43, 0.0  ;;  %v7199_v9 = vld [vmem:[#allocation10 + $0x144] ss:$20 sps:$4 sm:$0xff]   ;;  %v10460_v11 = vpop.f32.mrf.mxu0 }
 0x442   :  { %v3831_v60 = vsel %vm186_vm0, %v3807_v58, %v11793_v50  ;;  %v6546_v20 = vmul.f32 -1.442695, %v3556_v1  ;;  %v7773_v63 = vpop.eup %7772  ;;  %v3716_v25 = vadd.f32 1.0, %v7771_v14  ;;  %v3584_v58 = vmax.f32 %v3309_v56, 0.0 }
 0x443   :  { %7788 = vrcp.f32 %v3717_v61  ;;  %v10438_v41 = vpack.c.bf16 %v3831_v60, %v3830_v57  ;;  %v3718_v39 = vadd.f32 1.0, %v7773_v63  ;;  %v11794_v60 = vld [vmem:[#allocation22_spill] sm:$0xff]  ;;  %v3330_v63 = vpop.f32.mrf.mxu0 }
 0x444   :  { %7790 = vpow2.f32 %v6545_v47  ;;  %4544 = vmatpush2.bf16.msra.mxu0 %v7188_v37  ;;  %5052 = vmatpush2.bf16.msra.mxu1 %v7189_v8  ;;  %v11795_v53 = vunpack.i.l.bf16 %v11794_v60  ;;  %v7196_v8 = vld [vmem:[#allocation8 + $0x150] ss:$20 sps:$4 sm:$0xff]  }
 0x445   :  { %7792 = vpow2.f32 %v6546_v20  ;;  %6614 = vmatprep.mubr.msk.bf16.mxu0 %vm1236_vm1, %v10438_v41  ;;  %6622 = vmatprep.mubr.msk.bf16.mxu1 %vm1236_vm1, %v10438_v41  ;;  %v11796_v20 = vunpack.i.h.bf16 %v11794_v60 }
 0x446   :  { %v7775_v51 = vpop.eup %7774  ;;  %v3559_v7 = vpop.f32.mrf.mxu1  ;;  %4354 = vmatmul.mubr.bf16.gmra.mxu0 %v10440_v23  ;;  %4467 = vmatmul.mubr.bf16.gmra.mxu1 %v10440_v23  ;;  %7794 = vrcp.f32 %v3718_v39  ;;  %v7202_v39 = vld [vmem:[#allocation10 + $0x124] ss:$20 sps:$4 sm:$0xff]  }
 0x447   :  { %v7777_v48 = vpop.eup %7776  ;;  %v3560_v46 = vadd.f32 %v3559_v7, %v10254_v0  ;;  %7796 = vrcp.f32 %v3716_v25  ;;  %v3809_v40 = vmul.f32 %v7775_v51, %v3585_v33  ;;  %4545 = vmatprep.subr.bf16.mxu0 %v11779_v62  ;;  %5053 = vmatprep.subr.bf16.mxu1 %v7195_v6  ;;  %v3323_v6 = vadd.f32 %v10428_v13, %v10298_v22 }
 0x448   :  { %v3719_v21 = vadd.f32 1.0, %v7777_v48  ;;  %v3561_v3 = vpop.f32.mrf.mxu1  ;;  %v7779_v5 = vpop.eup %7778  ;;  %4546 = vmatpush2.bf16.msra.mxu0 %v7192_v28  ;;  %5054 = vmatpush2.bf16.msra.mxu1 %v7193_v15  ;;  %v3325_v48 = vadd.f32 %v10452_v29, %v10292_v17 }
 0x449   :  { %v6547_v2 = vmul.f32 -1.442695, %v3560_v46  ;;  %v3562_v44 = vadd.f32 %v3561_v3, %v10257_v34  ;;  %v7781_v36 = vpop.eup %7780  ;;  %v3810_v47 = vmul.f32 %v7779_v5, %v3586_v45  ;;  %v3832_v42 = vsel %vm186_vm0, %v3809_v40, %v11795_v53  ;;  %4547 = vmatprep.subr.bf16.mxu0 %v11779_v62  ;;  %5055 = vmatprep.subr.bf16.mxu1 %v7199_v9  ;;  %v3332_v46 = vpop.f32.mrf.mxu0  ;;  %v11797_v9 = vld [vmem:[#allocation23_spill] sm:$0xff] }
 0x44a   :  { %7798 = vrcp.f32 %v3719_v21  ;;  %v3563_v18 = vpop.f32.mrf.mxu1  ;;  %v7783_v16 = vpop.eup %7782  ;;  %v3808_v31 = vmul.f32 %v7781_v36, %v3584_v58  ;;  %v3319_v21 = vadd.f32 %v10416_v52, %v10298_v22  ;;  %v3591_v28 = vmax.f32 %v3325_v48, 0.0 }
 0x44b   :  { %v6548_v35 = vmul.f32 -1.442695, %v3562_v44  ;;  %v3811_v27 = vmul.f32 %v7783_v16, %v3587_v30  ;;  %7800 = vpow2.f32 %v6547_v2  ;;  %v3564_v14 = vadd.f32 %v3563_v18, %v10254_v0  ;;  %v7785_v1 = vpop.eup %7784  ;;  %v3334_v36 = vpop.f32.mrf.mxu0 }
 0x44c   :  { %v3565_v61 = vpop.f32.mrf.mxu1  ;;  %v3321_v0 = vadd.f32 %v10423_v32, %v10292_v17  ;;  %v3720_v51 = vadd.f32 1.0, %v7785_v1  ;;  %v10475_v43 = vpack.c.bf16 %v3810_v47, %v3808_v31  ;;  %4548 = vmatpush2.bf16.msra.mxu0 %v7196_v8  ;;  %v3590_v44 = vmax.f32 %v3323_v6, 0.0 }
 0x44d   :  { %7802 = vpow2.f32 %v6548_v35  ;;  %v7787_v59 = vpop.eup %7786  ;;  %v6549_v57 = vmul.f32 -1.442695, %v3564_v14  ;;  %v3566_v50 = vadd.f32 %v3565_v61, %v10257_v34  ;;  %v3833_v49 = vsel %vm186_vm0, %v3811_v27, %v11796_v20  ;;  %v7197_v34 = vld [vmem:[#allocation10 + $0x140] ss:$20 sps:$4 sm:$0xff]   ;;  %5138 = vmatprep.subr.bf16.mxu0 %v7202_v39  ;;  %v3338_v61 = vpop.f32.mrf.mxu0 }
 0x44e   :  { %v3721_v25 = vadd.f32 1.0, %v7787_v59  ;;  %v10473_v37 = vpack.c.bf16 %v3833_v49, %v3832_v42  ;;  %5056 = vmatpush2.bf16.msra.mxu1 %v7197_v34  ;;  %v3589_v3 = vmax.f32 %v3321_v0, 0.0  ;;  %v3588_v40 = vmax.f32 %v3319_v21, 0.0 }
 0x44f   :  { %7804 = vpow2.f32 %v6549_v57  ;;  %v6550_v38 = vmul.f32 -1.442695, %v3566_v50  ;;  %5251 = vmatprep.subr.bf16.mxu1 %v11779_v62  ;;  %v11798_v16 = vunpack.i.l.bf16 %v11797_v9  ;;  %v11799_v35 = vunpack.i.h.bf16 %v11797_v9  ;;  %v3340_v0 = vpop.f32.mrf.mxu0 }
 0x450   :  { %v7789_v7 = vpop.eup %7788  ;;  %7806 = vrcp.f32 %v3721_v25  ;;  %6615 = vmatprep.mubr.msk.bf16.mxu0 %vm1236_vm1, %v10473_v37  ;;  %6623 = vmatprep.mubr.msk.bf16.mxu1 %vm1236_vm1, %v10473_v37  ;;  %v3331_v31 = vadd.f32 %v3330_v63, %v10292_v17  ;;  %v3333_v53 = vadd.f32 %v3332_v46, %v10298_v22  ;;  %v3335_v42 = vadd.f32 %v3334_v36, %v10292_v17 }
 0x451   :  { %v7791_v32 = vpop.eup %7790  ;;  %7808 = vpow2.f32 %v6550_v38  ;;  %4364 = vmatmul.mubr.bf16.gmra.mxu0 %v10475_v43  ;;  %4477 = vmatmul.mubr.bf16.gmra.mxu1 %v10475_v43  ;;  %v3813_v2 = vmul.f32 %v7789_v7, %v3589_v3  ;;  %v3329_v63 = vadd.f32 %v10460_v11, %v10298_v22  ;;  %v3342_v6 = vpop.f32.mrf.mxu0 }
 0x452   :  { %v7793_v56 = vpop.eup %7792  ;;  %v3722_v33 = vadd.f32 1.0, %v7791_v32  ;;  %7810 = vrcp.f32 %v3720_v51  ;;  %v3593_v25 = vmax.f32 %v3331_v31, 0.0  ;;  %v3594_v39 = vmax.f32 %v3333_v53, 0.0  ;;  %v11803_v31 = vld [vmem:[#allocation25_spill] sm:$0xff] }
 0x453   :  { %v3723_v5 = vadd.f32 1.0, %v7793_v56  ;;  %v7795_v13 = vpop.eup %7794  ;;  %v3834_v58 = vsel %vm186_vm0, %v3813_v2, %v11798_v16  ;;  %v3595_v7 = vmax.f32 %v3335_v42, 0.0  ;;  %v3592_v48 = vmax.f32 %v3329_v63, 0.0  ;;  %v7200_v42 = vld [vmem:[#allocation10 + $0x120] ss:$20 sps:$4 sm:$0xff]  }
 0x454   :  { %7812 = vrcp.f32 %v3722_v33  ;;  %v7797_v29 = vpop.eup %7796  ;;  %v3814_v30 = vmul.f32 %v7795_v13, %v3590_v44  ;;  %v11800_v33 = vld [vmem:[#allocation24_spill] sm:$0xff]  ;;  %v3341_v44 = vadd.f32 %v3340_v0, %v10292_v17  ;;  %v7204_v0 = vld [vmem:[#allocation10 + $0xf8] ss:$20 sps:$4 sm:$0xff]   ;;  %v7209_v63 = vld [vmem:[#allocation10 + $0xd4] ss:$20 sps:$4 sm:$0xff]  }
 0x455   :  { %7814 = vrcp.f32 %v3723_v5  ;;  %v3812_v14 = vmul.f32 %v7797_v29, %v3588_v40  ;;  %v11801_v21 = vunpack.i.l.bf16 %v11800_v33  ;;  %v11802_v11 = vunpack.i.h.bf16 %v11800_v33  ;;  %v3344_v29 = vpop.f32.mrf.mxu0  ;;  %v7225_v33 = vld [vmem:[#allocation10 + $0x34] ss:$20 sps:$4 sm:$0xff]  }
 0x456   :  { %v3345_v36 = vadd.f32 %v3344_v29, %v10292_v17  ;;  %v7233_v29 = vld [vmem:[#allocation10 + $0x1c4] ss:$20 sps:$4 sm:$0xff]  }
 0x457   :  { %v7799_v15 = vpop.eup %7798  ;;  %v10499_v59 = vpack.c.bf16 %v3814_v30, %v3812_v14  ;;  %v3597_v30 = vmax.f32 %v3341_v44, 0.0  ;;  %v7231_v44 = vld [vmem:[#allocation10 + $0x1c0] ss:$20 sps:$4 sm:$0xff]  }
 0x458   :  { %v3815_v45 = vmul.f32 %v7799_v15, %v3591_v28  ;;  %v7801_v18 = vpop.eup %7800  ;;  %v3343_v15 = vadd.f32 %v3342_v6, %v10298_v22  ;;  %v7222_v6 = vld [vmem:[#allocation10 + $0x88] ss:$20 sps:$4 sm:$0xff]  }
 0x459   :  { %v3724_v50 = vadd.f32 1.0, %v7801_v18 }
 0x45a   :  { %v7803_v52 = vpop.eup %7802  ;;  %v3835_v27 = vsel %vm186_vm0, %v3815_v45, %v11799_v35  ;;  %v3339_v45 = vadd.f32 %v3338_v61, %v10298_v22  ;;  %v3598_v16 = vmax.f32 %v3343_v15, 0.0  ;;  %v7238_v15 = vld [vmem:[#allocation10 + $0x1c8] ss:$20 sps:$4 sm:$0xff]  }
 0x45b   :  { %v3725_v47 = vadd.f32 1.0, %v7803_v52  ;;  %v10496_v1 = vpack.c.bf16 %v3835_v27, %v3834_v58  ;;  %v3599_v58 = vmax.f32 %v3345_v36, 0.0  ;;  %v7237_v36 = vld [vmem:[#allocation10 + $0x19c] ss:$20 sps:$4 sm:$0xff]  }
 0x45c   :  { %v7805_v57 = vpop.eup %7804  ;;  %v3596_v27 = vmax.f32 %v3339_v45, 0.0  ;;  %v7239_v45 = vld [vmem:[#allocation10 + $0x1a0] ss:$20 sps:$4 sm:$0xff]  }
 0x45d   :  { %6616 = vmatprep.mubr.msk.bf16.mxu0 %vm1236_vm1, %v10496_v1  ;;  %6624 = vmatprep.mubr.msk.bf16.mxu1 %vm1236_vm1, %v10496_v1  ;;  %v7807_v60 = vpop.eup %7806  ;;  %7816 = vrcp.f32 %v3725_v47  ;;  %v3726_v20 = vadd.f32 1.0, %v7805_v57  ;;  %v11804_v57 = vunpack.i.l.bf16 %v11803_v31 }
 0x45e   :  { %4374 = vmatmul.mubr.bf16.gmra.mxu0 %v10499_v59  ;;  %4487 = vmatmul.mubr.bf16.gmra.mxu1 %v10499_v59  ;;  %v7809_v49 = vpop.eup %7808  ;;  %v3817_v38 = vmul.f32 %v7807_v60, %v3593_v25  ;;  %v7210_v25 = vld [vmem:[#allocation10 + $0x100] ss:$20 sps:$4 sm:$0xff]  }
 0x45f   :  { %7818 = vrcp.f32 %v3726_v20  ;;  %v3727_v8 = vadd.f32 1.0, %v7809_v49  ;;  %v7811_v34 = vpop.eup %7810  ;;  %v7203_v20 = vld [vmem:[#allocation10 + $0x128] ss:$20 sps:$4 sm:$0xff]  }
 0x460   :  { %7820 = vrcp.f32 %v3724_v50  ;;  %v3836_v3 = vsel %vm186_vm0, %v3817_v38, %v11801_v21  ;;  %v3816_v13 = vmul.f32 %v7811_v34, %v3592_v48  ;;  %v11805_v50 = vunpack.i.h.bf16 %v11803_v31  ;;  %v7206_v49 = vld [vmem:[#allocation10 + $0xfc] ss:$20 sps:$4 sm:$0xff]   ;;  %v7214_v34 = vld [vmem:[#allocation10 + $0xd8] ss:$20 sps:$4 sm:$0xff]  }
 0x461   :  { %v7813_v51 = vpop.eup %7812  ;;  %7822 = vrcp.f32 %v3727_v8  ;;  %v7207_v8 = vld [vmem:[#allocation10 + $0xd0] ss:$20 sps:$4 sm:$0xff]   ;;  %v7211_v38 = vld [vmem:[#allocation10 + $0xa8] ss:$20 sps:$4 sm:$0xff]  }
 0x462   :  { %v7815_v32 = vpop.eup %7814  ;;  %v3818_v46 = vmul.f32 %v7813_v51, %v3594_v39  ;;  %v7213_v51 = vld [vmem:[#allocation10 + $0xac] ss:$20 sps:$4 sm:$0xff]   ;;  %v7215_v39 = vld [vmem:[#allocation10 + $0xb0] ss:$20 sps:$4 sm:$0xff]  }
 0x463   :  { %v3819_v56 = vmul.f32 %v7815_v32, %v3595_v7  ;;  %v7218_v7 = vld [vmem:[#allocation10 + $0x84] ss:$20 sps:$4 sm:$0xff]   ;;  %v7216_v32 = vld [vmem:[#allocation10 + $0x80] ss:$20 sps:$4 sm:$0xff]   ;;  %v7221_v48 = vld [vmem:[#allocation10 + $0x5c] ss:$20 sps:$4 sm:$0xff]  }
 0x464   :  { %v10520_v28 = vpack.c.bf16 %v3818_v46, %v3816_v13  ;;  %v7226_v46 = vld [vmem:[#allocation10 + $0x60] ss:$20 sps:$4 sm:$0xff]   ;;  %v7223_v21 = vld [vmem:[#allocation10 + $0x30] ss:$20 sps:$4 sm:$0xff]  }
 0x465   :  { %v3837_v5 = vsel %vm186_vm0, %v3819_v56, %v11802_v11  ;;  %v7219_v56 = vld [vmem:[#allocation10 + $0x58] ss:$20 sps:$4 sm:$0xff]   ;;  %v7234_v13 = vld [vmem:[#allocation10 + $0x10] ss:$20 sps:$4 sm:$0xff]  }
 0x466   :  { %v10517_v2 = vpack.c.bf16 %v3837_v5, %v3836_v3  ;;  %v7227_v3 = vld [vmem:[#allocation10 + $0x38] ss:$20 sps:$4 sm:$0xff]   ;;  %v7228_v5 = vld [vmem:[#allocation10 + $0x8] ss:$20 sps:$4 sm:$0xff]  }
 0x467   :  { %v7230_v11 = vld [vmem:[#allocation10 + $0xc] ss:$20 sps:$4 sm:$0xff]  }
 0x468   :  { %6617 = vmatprep.mubr.msk.bf16.mxu0 %vm1236_vm1, %v10517_v2  ;;  %6625 = vmatprep.mubr.msk.bf16.mxu1 %vm1236_vm1, %v10517_v2 }
 0x469   :  { %4384 = vmatmul.mubr.bf16.gmra.mxu0 %v10520_v28  ;;  %4497 = vmatmul.mubr.bf16.gmra.mxu1 %v10520_v28 }
 0x46a   :  { %v7817_v40 = vpop.eup %7816 }
 0x46b   :  { %v3821_v9 = vmul.f32 %v7817_v40, %v3597_v30  ;;  %v7235_v40 = vld [vmem:[#allocation10 + $0x198] ss:$20 sps:$4 sm:$0xff]   ;;  %v7242_v30 = vld [vmem:[#allocation10 + $0x174] ss:$20 sps:$4 sm:$0xff]  }
 0x46c   :  { %v7819_v18 = vpop.eup %7818 }
 0x46d   :  { %v7821_v52 = vpop.eup %7820  ;;  %v3822_v47 = vmul.f32 %v7819_v18, %v3598_v16  ;;  %v3838_v17 = vsel %vm186_vm0, %v3821_v9, %v11804_v57  ;;  %v7240_v18 = vld [vmem:[#allocation10 + $0x170] ss:$20 sps:$4 sm:$0xff]   ;;  %v7246_v9 = vld [vmem:[#allocation10 + $0x14c] ss:$20 sps:$4 sm:$0xff]   ;;  %v7244_v16 = vld [vmem:[#allocation10 + $0x148] ss:$20 sps:$4 sm:$0xff]  }
 0x46e   :  { %v7823_v35 = vpop.eup %7822  ;;  %v3820_v53 = vmul.f32 %v7821_v52, %v3596_v27  ;;  %v7243_v52 = vld [vmem:[#allocation10 + $0x178] ss:$20 sps:$4 sm:$0xff]  }
 0x46f   :  { %v3823_v14 = vmul.f32 %v7823_v35, %v3599_v58  ;;  %v7247_v58 = vld [vmem:[#allocation10 + $0x150] ss:$20 sps:$4 sm:$0xff]  }
 0x470   :  { %v10539_v61 = vpack.c.bf16 %v3822_v47, %v3820_v53 }
 0x471   :  { %v3839_v60 = vsel %vm186_vm0, %v3823_v14, %v11805_v50 }
 0x472   :  { %v10537_v22 = vpack.c.bf16 %v3839_v60, %v3838_v17 }
 0x474   :  { %6618 = vmatprep.mubr.msk.bf16.mxu0 %vm1236_vm1, %v10537_v22  ;;  %6626 = vmatprep.mubr.msk.bf16.mxu1 %vm1236_vm1, %v10537_v22 }
 0x475   :  { %4394 = vmatmul.mubr.bf16.gmra.mxu0 %v10539_v61  ;;  %4507 = vmatmul.mubr.bf16.gmra.mxu1 %v10539_v61 }
 0x476   :  { %6627 = vmatprep.mubr.msk.bf16.mxu0 %vm1236_vm1, %v10324_v55  ;;  %6695 = vmatprep.mubr.msk.bf16.mxu1 %vm1236_vm1, %v10324_v55 }
 0x47d   :  { %4550 = vmatmul.mubr.bf16.vlgmr.msra.gmra.mxu0 %v10328_v54  ;;  %5058 = vmatmul.mubr.bf16.vlgmr.msra.gmra.mxu1 %v10328_v54 }
 0x47e   :  { %5139 = vmatpush1.bf16.msra.mxu0 %v7200_v42  ;;  %6628 = vmatprep.mubr.msk.bf16.mxu0 %vm1236_vm1, %v10366_v10 }
 0x47f   :  { %6696 = vmatprep.mubr.msk.bf16.mxu1 %vm1236_vm1, %v10366_v10  ;;  %5252 = vmatpush1.bf16.msra.mxu1 %v7203_v20 }
 0x480   :  { %5140 = vmatprep.subr.bf16.mxu0 %v7206_v49  ;;  %5253 = vmatprep.subr.bf16.mxu1 %v11779_v62 }
 0x482   :  { %5141 = vmatpush1.bf16.msra.mxu0 %v7204_v0 }
 0x483   :  { %5142 = vmatprep.subr.bf16.mxu0 %v7209_v63  ;;  %5254 = vmatpush1.bf16.msra.mxu1 %v7210_v25 }
 0x484   :  { %5255 = vmatprep.subr.bf16.mxu1 %v11779_v62 }
 0x485   :  { %4558 = vmatmul.mubr.bf16.gmra.mxu0 %v10371_v24  ;;  %5068 = vmatmul.mubr.bf16.gmra.mxu1 %v10371_v24 }
 0x486   :  { %6629 = vmatprep.mubr.msk.bf16.mxu0 %vm1236_vm1, %v10397_v12  ;;  %6697 = vmatprep.mubr.msk.bf16.mxu1 %vm1236_vm1, %v10397_v12 }
 0x487   :  { %5143 = vmatpush1.bf16.msra.mxu0 %v7207_v8  ;;  %5256 = vmatpush1.bf16.msra.mxu1 %v7214_v34 }
 0x488   :  { %5144 = vmatprep.subr.bf16.mxu0 %v7213_v51  ;;  %5257 = vmatprep.subr.bf16.mxu1 %v11779_v62 }
 0x48b   :  { %5145 = vmatpush1.bf16.msra.mxu0 %v7211_v38  ;;  %5258 = vmatpush1.bf16.msra.mxu1 %v7215_v39 }
 0x48c   :  { %5146 = vmatprep.subr.bf16.mxu0 %v7218_v7  ;;  %5259 = vmatprep.subr.bf16.mxu1 %v11779_v62 }
 0x48d   :  { %4566 = vmatmul.mubr.bf16.gmra.mxu0 %v10399_v4  ;;  %5078 = vmatmul.mubr.bf16.gmra.mxu1 %v10399_v4 }
 0x48e   :  { %6630 = vmatprep.mubr.msk.bf16.mxu0 %vm1236_vm1, %v10438_v41  ;;  %6698 = vmatprep.mubr.msk.bf16.mxu1 %vm1236_vm1, %v10438_v41 }
 0x48f   :  { %5147 = vmatpush1.bf16.msra.mxu0 %v7216_v32  ;;  %5260 = vmatpush1.bf16.msra.mxu1 %v7222_v6 }
 0x490   :  { %5148 = vmatprep.subr.bf16.mxu0 %v7221_v48  ;;  %5261 = vmatprep.subr.bf16.mxu1 %v11779_v62 }
 0x493   :  { %5149 = vmatpush1.bf16.msra.mxu0 %v7219_v56  ;;  %5262 = vmatpush1.bf16.msra.mxu1 %v7226_v46 }
 0x494   :  { %5150 = vmatprep.subr.bf16.mxu0 %v7225_v33  ;;  %5263 = vmatprep.subr.bf16.mxu1 %v11779_v62 }
 0x495   :  { %4574 = vmatmul.mubr.bf16.gmra.mxu0 %v10440_v23  ;;  %5088 = vmatmul.mubr.bf16.gmra.mxu1 %v10440_v23 }
 0x496   :  { %6631 = vmatprep.mubr.msk.bf16.mxu0 %vm1236_vm1, %v10473_v37  ;;  %6699 = vmatprep.mubr.msk.bf16.mxu1 %vm1236_vm1, %v10473_v37 }
 0x497   :  { %5151 = vmatpush1.bf16.msra.mxu0 %v7223_v21  ;;  %5264 = vmatpush1.bf16.msra.mxu1 %v7227_v3 }
 0x498   :  { %5152 = vmatprep.subr.bf16.mxu0 %v7230_v11  ;;  %5265 = vmatprep.subr.bf16.mxu1 %v11779_v62 }
 0x49b   :  { %5153 = vmatpush1.bf16.msra.mxu0 %v7228_v5  ;;  %5266 = vmatpush1.bf16.msra.mxu1 %v7234_v13 }
 0x49c   :  { %5162 = vmatprep.subr.bf16.mxu0 %v7233_v29  ;;  %5275 = vmatprep.subr.bf16.mxu1 %v11779_v62 }
 0x49d   :  { %4582 = vmatmul.mubr.bf16.gmra.mxu0 %v10475_v43  ;;  %5098 = vmatmul.mubr.bf16.gmra.mxu1 %v10475_v43 }
 0x49e   :  { %6632 = vmatprep.mubr.msk.bf16.mxu0 %vm1236_vm1, %v10496_v1  ;;  %6700 = vmatprep.mubr.msk.bf16.mxu1 %vm1236_vm1, %v10496_v1 }
 0x49f   :  { %5163 = vmatpush2.bf16.msra.mxu0 %v7231_v44  ;;  %5276 = vmatpush2.bf16.msra.mxu1 %v7238_v15 }
 0x4a0   :  { %5164 = vmatprep.subr.bf16.mxu0 %v7237_v36  ;;  %5277 = vmatprep.subr.bf16.mxu1 %v11779_v62 }
 0x4a3   :  { %5165 = vmatpush2.bf16.msra.mxu0 %v7235_v40  ;;  %5278 = vmatpush2.bf16.msra.mxu1 %v7239_v45 }
 0x4a4   :  { %5166 = vmatprep.subr.bf16.mxu0 %v7242_v30  ;;  %5279 = vmatprep.subr.bf16.mxu1 %v11779_v62 }
 0x4a5   :  { %4590 = vmatmul.mubr.bf16.gmra.mxu0 %v10499_v59  ;;  %5108 = vmatmul.mubr.bf16.gmra.mxu1 %v10499_v59 }
 0x4a6   :  { %6633 = vmatprep.mubr.msk.bf16.mxu0 %vm1236_vm1, %v10517_v2  ;;  %6701 = vmatprep.mubr.msk.bf16.mxu1 %vm1236_vm1, %v10517_v2 }
 0x4a7   :  { %5167 = vmatpush2.bf16.msra.mxu0 %v7240_v18  ;;  %5280 = vmatpush2.bf16.msra.mxu1 %v7243_v52 }
 0x4a8   :  { %5168 = vmatprep.subr.bf16.mxu0 %v7246_v9  ;;  %5281 = vmatprep.subr.bf16.mxu1 %v11779_v62 }
 0x4ab   :  { %5169 = vmatpush2.bf16.msra.mxu0 %v7244_v16  ;;  %5282 = vmatpush2.bf16.msra.mxu1 %v7247_v58  ;;  %v10777_v16 = vld [vmem:[%s11533_s16] sm:$0x1f] }
 0x4ad   :  { %4598 = vmatmul.mubr.bf16.gmra.mxu0 %v10520_v28  ;;  %5118 = vmatmul.mubr.bf16.gmra.mxu1 %v10520_v28 }
 0x4ae   :  { %6634 = vmatprep.mubr.msk.bf16.mxu0 %vm1236_vm1, %v10537_v22  ;;  %6702 = vmatprep.mubr.msk.bf16.mxu1 %vm1236_vm1, %v10537_v22 }
 0x4b5   :  { %4606 = vmatmul.mubr.bf16.gmra.mxu0 %v10539_v61  ;;  %5128 = vmatmul.mubr.bf16.gmra.mxu1 %v10539_v61 }
 0x4b6   :  { %6703 = vmatprep.mubr.msk.bf16.mxu0 %vm1236_vm1, %v10324_v55  ;;  %6711 = vmatprep.mubr.msk.bf16.mxu1 %vm1236_vm1, %v10324_v55 }
 0x4bd   :  { %5171 = vmatmul.mubr.bf16.vlgmr.msra.gmra.mxu0 %v10328_v54  ;;  %5284 = vmatmul.mubr.bf16.vlgmr.msra.gmra.mxu1 %v10328_v54 }
 0x4be   :  { %6704 = vmatprep.mubr.msk.bf16.mxu0 %vm1236_vm1, %v10366_v10  ;;  %6712 = vmatprep.mubr.msk.bf16.mxu1 %vm1236_vm1, %v10366_v10 }
 0x4c5   :  { %5181 = vmatmul.mubr.bf16.gmra.mxu0 %v10371_v24  ;;  %5292 = vmatmul.mubr.bf16.gmra.mxu1 %v10371_v24 }
 0x4c6   :  { %6705 = vmatprep.mubr.msk.bf16.mxu0 %vm1236_vm1, %v10397_v12  ;;  %6713 = vmatprep.mubr.msk.bf16.mxu1 %vm1236_vm1, %v10397_v12 }
 0x4cd   :  { %5191 = vmatmul.mubr.bf16.gmra.mxu0 %v10399_v4  ;;  %5300 = vmatmul.mubr.bf16.gmra.mxu1 %v10399_v4 }
 0x4ce   :  { %6706 = vmatprep.mubr.msk.bf16.mxu0 %vm1236_vm1, %v10438_v41  ;;  %6714 = vmatprep.mubr.msk.bf16.mxu1 %vm1236_vm1, %v10438_v41 }
 0x4d5   :  { %5201 = vmatmul.mubr.bf16.gmra.mxu0 %v10440_v23  ;;  %5308 = vmatmul.mubr.bf16.gmra.mxu1 %v10440_v23 }
 0x4d6   :  { %6707 = vmatprep.mubr.msk.bf16.mxu0 %vm1236_vm1, %v10473_v37  ;;  %6715 = vmatprep.mubr.msk.bf16.mxu1 %vm1236_vm1, %v10473_v37 }
 0x4dd   :  { %5211 = vmatmul.mubr.bf16.gmra.mxu0 %v10475_v43  ;;  %5316 = vmatmul.mubr.bf16.gmra.mxu1 %v10475_v43 }
 0x4de   :  { %6708 = vmatprep.mubr.msk.bf16.mxu0 %vm1236_vm1, %v10496_v1  ;;  %6716 = vmatprep.mubr.msk.bf16.mxu1 %vm1236_vm1, %v10496_v1  ;;  %v10640_v62 = vpop.f32.mrf.mxu0  ;;  %v10642_v55 = vpop.f32.mrf.mxu1 }
 0x4e0   :  { %v10644_v54 = vpop.f32.mrf.mxu0  ;;  %v10646_v10 = vpop.f32.mrf.mxu1 }
 0x4e2   :  { %v10650_v24 = vpop.f32.mrf.mxu0  ;;  %v10652_v12 = vpop.f32.mrf.mxu1 }
 0x4e4   :  { %v10658_v4 = vpop.f32.mrf.mxu0  ;;  %v10660_v41 = vpop.f32.mrf.mxu1 }
 0x4e5   :  { %5221 = vmatmul.mubr.bf16.gmra.mxu0 %v10499_v59  ;;  %5324 = vmatmul.mubr.bf16.gmra.mxu1 %v10499_v59 }
 0x4e6   :  { %6709 = vmatprep.mubr.msk.bf16.mxu0 %vm1236_vm1, %v10517_v2  ;;  %6717 = vmatprep.mubr.msk.bf16.mxu1 %vm1236_vm1, %v10517_v2 }
 0x4eb   :  { %v10664_v23 = vpop.f32.mrf.mxu0  ;;  %v10666_v37 = vpop.f32.mrf.mxu1 }
 0x4ed   :  { %5231 = vmatmul.mubr.bf16.gmra.mxu0 %v10520_v28  ;;  %5332 = vmatmul.mubr.bf16.gmra.mxu1 %v10520_v28  ;;  %v10672_v43 = vpop.f32.mrf.mxu0  ;;  %v10674_v1 = vpop.f32.mrf.mxu1 }
 0x4ee   :  { %6710 = vmatprep.mubr.msk.bf16.mxu0 %vm1236_vm1, %v10537_v22  ;;  %6718 = vmatprep.mubr.msk.bf16.mxu1 %vm1236_vm1, %v10537_v22 }
 0x4ef   :  { %v10676_v59 = vpop.f32.mrf.mxu0  ;;  %v10678_v2 = vpop.f32.mrf.mxu1 }
 0x4f1   :  { %v10680_v35 = vpop.f32.mrf.mxu0  ;;  %v10682_v28 = vpop.f32.mrf.mxu1 }
 0x4f5   :  { %5241 = vmatmul.mubr.bf16.gmra.mxu0 %v10539_v61  ;;  %5340 = vmatmul.mubr.bf16.gmra.mxu1 %v10539_v61 }
 0x4f7   :  { %v10686_v27 = vpop.f32.mrf.mxu0  ;;  %v10688_v14 = vpop.f32.mrf.mxu1 }
 0x4f9   :  { %v10690_v47 = vpop.f32.mrf.mxu0  ;;  %v10692_v31 = vpop.f32.mrf.mxu1 }
 0x4fb   :  { %v10694_v57 = vpop.f32.mrf.mxu0  ;;  %v10696_v17 = vpop.f32.mrf.mxu1 }
 0x4fd   :  { %v10698_v50 = vpop.f32.mrf.mxu0  ;;  %v10700_v60 = vpop.f32.mrf.mxu1 }
 0x506   :  { %v10702_v53 = vpop.f32.mrf.mxu0  ;;  %v10704_v22 = vpop.f32.mrf.mxu1 }
 0x508   :  { %v10706_v61 = vpop.f32.mrf.mxu0  ;;  %v10708_v42 = vpop.f32.mrf.mxu1 }
 0x50a   :  { %v10710_v20 = vpop.f32.mrf.mxu0  ;;  %v10712_v49 = vpop.f32.mrf.mxu1 }
 0x50c   :  { %v10714_v0 = vpop.f32.mrf.mxu0  ;;  %v10716_v63 = vpop.f32.mrf.mxu1 }
 0x50d   :  { %11806 = vst [vmem:[#allocation47_spill] sm:$0xff] %v10716_v63 }
 0x511   :  { %v10718_v25 = vpop.f32.mrf.mxu0  ;;  %v10720_v8 = vpop.f32.mrf.mxu1 }
 0x512   :  { %11807 = vst [vmem:[#allocation49_spill] sm:$0xff] %v10720_v8  ;;  %v11831_v8 = vld [vmem:[#allocation32_spill] sm:$0xff] }
 0x513   :  { %v10722_v34 = vpop.f32.mrf.mxu0  ;;  %v10724_v51 = vpop.f32.mrf.mxu1 }
 0x514   :  { %11808 = vst [vmem:[#allocation53_spill] sm:$0xff] %v10724_v51 }
 0x515   :  { %v10726_v38 = vpop.f32.mrf.mxu0  ;;  %v10728_v39 = vpop.f32.mrf.mxu1 }
 0x516   :  { %11809 = vst [vmem:[#allocation54_spill] sm:$0xff] %v10728_v39 }
 0x517   :  { %v10730_v7 = vpop.f32.mrf.mxu0  ;;  %v10732_v32 = vpop.f32.mrf.mxu1 }
 0x518   :  { %11810 = vst [vmem:[#allocation55_spill] sm:$0xff] %v10732_v32 }
 0x51e   :  { %v10734_v6 = vpop.f32.mrf.mxu0  ;;  %v10736_v48 = vpop.f32.mrf.mxu1 }
 0x51f   :  { %11811 = vst [vmem:[#allocation27_spill] sm:$0xff] %v10736_v48  ;;  %v11830_v48 = vld [vmem:[#allocation28_spill] sm:$0xff] }
 0x520   :  { %v10738_v56 = vpop.f32.mrf.mxu0  ;;  %v10740_v46 = vpop.f32.mrf.mxu1 }
 0x521   :  { %11812 = vst [vmem:[#allocation57_spill] sm:$0xff] %v10740_v46 }
 0x522   :  { %v10742_v33 = vpop.f32.mrf.mxu0  ;;  %v10744_v21 = vpop.f32.mrf.mxu1 }
 0x523   :  { %11813 = vst [vmem:[#allocation58_spill] sm:$0xff] %v10744_v21 }
 0x524   :  { %v10746_v3 = vpop.f32.mrf.mxu0  ;;  %v10748_v11 = vpop.f32.mrf.mxu1 }
 0x525   :  { %11814 = vst [vmem:[#allocation59_spill] sm:$0xff] %v10748_v11 }
 0x529   :  { %v10750_v5 = vpop.f32.mrf.mxu0  ;;  %v10752_v13 = vpop.f32.mrf.mxu1 }
 0x52a   :  { %11815 = vst [vmem:[#allocation60_spill] sm:$0xff] %v10752_v13  ;;  %v10796_v13 = vrot.slane %v10777_v16, %v11781_v19 }
 0x52b   :  { %v10754_v29 = vpop.f32.mrf.mxu0  ;;  %v10756_v44 = vpop.f32.mrf.mxu1 }
 0x52c   :  { %11816 = vst [vmem:[#allocation61_spill] sm:$0xff] %v10756_v44 }
 0x52d   :  { %v10758_v15 = vpop.f32.mrf.mxu0  ;;  %v10760_v36 = vpop.f32.mrf.mxu1 }
 0x52e   :  { %11817 = vst [vmem:[#allocation63_spill] sm:$0xff] %v10758_v15  ;;  %11818 = vst [vmem:[#allocation62_spill] sm:$0xff] %v10760_v36 }
 0x52f   :  { %v10762_v40 = vpop.f32.mrf.mxu0  ;;  %v10764_v45 = vpop.f32.mrf.mxu1 }
 0x530   :  { %11819 = vst [vmem:[#allocation64_spill] sm:$0xff] %v10762_v40  ;;  %11820 = vst [vmem:[#allocation65_spill] sm:$0xff] %v10764_v45  ;;  %v3928_v45 = vld [vmem:[%s11532_s15] sm:$0x1f]  ;;  %s8284_s15 = smov [#allocation11]  }
 0x531   :  { %v10799_v11 = vrot.slane %v3928_v45, %v11780_v26  ;;  %v10805_v32 = vrot.slane %v3928_v45, %v11830_v48  ;;  %v10808_v39 = vrot.slane %v3928_v45, %v11781_v19  ;;  %v10811_v63 = vrot.slane %v3928_v45, %v11831_v8  ;;  %s6169_s16 = sshll.u32 %s8284_s15, 4  ;;  %s6170_s16 = int_to_ptr.vmem [resolvable:$true] %s6169_s16 }
 0x532   :  { %s8244_s19 = scalar_lea.vmem %s6170_s16, 2048  ;;  %p8249_p12 = scmp.lt.s32.totalorder %s6170_s16, %s6170_s16 }
 0x533   :  { %p8245_p11 = scmp.ne.s32.totalorder %s6170_s16, %s8244_s19  ;;  %p8250_p13 = scmp.lt.s32.totalorder %s8244_s19, %s8244_s19 }
 0x535   :  { %v10766_v30 = vpop.f32.mrf.mxu0  ;;  %v10768_v18 = vpop.f32.mrf.mxu1  ;;  %p8251_p0 = por %p8250_p13, %p8249_p12 }
 0x536   :  { %11821 = vst [vmem:[#allocation66_spill] sm:$0xff] %v10766_v30  ;;  %11822 = vst [vmem:[#allocation71_spill] sm:$0xff] %v10768_v18  ;;  %v10788_v18 = vrot.slane %v10777_v16, %v11780_v26 }
 0x537   :  { %v10770_v52 = vpop.f32.mrf.mxu0  ;;  %v10772_v9 = vpop.f32.mrf.mxu1  ;;  %p8252_p1 = pnand %p8251_p0, %p8245_p11 }
 0x538   :  { %11823 = vst [vmem:[#allocation31_spill] sm:$0xff] %v10770_v52  ;;  %11824 = vst [vmem:[#allocation29_spill] sm:$0xff] %v10772_v9 }
 0x539   :  { %v10779_v58 = vpop.f32.mrf.mxu0  ;;  %v10781_v36 = vpop.f32.mrf.mxu1 }
 0x53a   :  { %11825 = vst [vmem:[#allocation67_spill] sm:$0xff] %v10779_v58  ;;  %11826 = vst [vmem:[#allocation73_spill] sm:$0xff] %v10781_v36 }
 0x53b   :  { %v10790_v44 = vpop.f32.mrf.mxu0  ;;  %v10792_v9 = vpop.f32.mrf.mxu1 }
 0x53c   :  { %11827 = vst [vmem:[#allocation39_spill] sm:$0xff] %v10790_v44  ;;  %11828 = vst [vmem:[#allocation80_spill] sm:$0xff] %v10792_v9 }
 0x53d   :  { %v10801_v36 = vpop.f32.mrf.mxu0  ;;  %v5059_v21 = vpop.f32.mrf.mxu1 }
 0x53e   :  { %11829 = vst [vmem:[#allocation75_spill] sm:$0xff] %v10801_v36  ;;  %v5060_v46 = vadd.f32 %v5059_v21, %v10788_v18  ;;  %v10816_v36 = vadd.f32 %v10640_v62, %v10799_v11  ;;  %v10831_v62 = vadd.f32 %v10646_v10, %v10811_v63 }
 0x53f   :  { %v4553_v51 = vpop.f32.mrf.mxu0  ;;  %v5061_v9 = vpop.f32.mrf.mxu1 }
 0x540   :  { %v6719_v44 = vmul.f32 -1.442695, %v5060_v46  ;;  %v5062_v26 = vadd.f32 %v5061_v9, %v10796_v13  ;;  %v10823_v51 = vadd.f32 %v10642_v55, %v10805_v32  ;;  %v10827_v46 = vadd.f32 %v10644_v54, %v10808_v39 }
 0x541   :  { %v10818_v58 = vpop.f32.mrf.mxu0  ;;  %v5063_v21 = vpop.f32.mrf.mxu1  ;;  %v10837_v55 = vadd.f32 %v10650_v24, %v10799_v11  ;;  %v10841_v54 = vadd.f32 %v10652_v12, %v10805_v32  ;;  %v10857_v12 = vadd.f32 %v10660_v41, %v10811_v63  ;;  %v10869_v41 = vadd.f32 %v10666_v37, %v10805_v32 }
 0x542   :  { %11832 = vst [vmem:[#allocation81_spill] sm:$0xff] %v10818_v58  ;;  %7824 = vpow2.f32 %v6719_v44  ;;  %v6720_v52 = vmul.f32 -1.442695, %v5062_v26  ;;  %v5064_v19 = vadd.f32 %v5063_v21, %v10788_v18  ;;  %v11833_v21 = vld [vmem:[#allocation56_spill] sm:$0xff]  ;;  %v10883_v37 = vadd.f32 %v10674_v1, %v10811_v63 }
 0x543   :  { %v4556_v9 = vpop.f32.mrf.mxu0  ;;  %v5065_v30 = vpop.f32.mrf.mxu1  ;;  %11835 = vst [vmem:[#allocation82_spill] sm:$0xff] %v10857_v12  ;;  %11836 = vst [vmem:[#allocation78_spill] sm:$0xff] %v10869_v41  ;;  %v10898_v1 = vadd.f32 %v10680_v35, %v10808_v39 }
 0x544   :  { %7826 = vpow2.f32 %v6720_v52  ;;  %v6724_v58 = vmul.f32 -1.442695, %v5064_v19  ;;  %v5066_v44 = vadd.f32 %v5065_v30, %v10796_v13  ;;  %v10844_v9 = vrot.slane %v3928_v45, %v11833_v21  ;;  %11838 = vst [vmem:[#allocation51_spill] sm:$0xff] %v10883_v37 }
 0x545   :  { %v10846_v40 = vpop.f32.mrf.mxu0  ;;  %v5069_v10 = vpop.f32.mrf.mxu1  ;;  %v10850_v52 = vadd.f32 %v10658_v4, %v10808_v39  ;;  %v10861_v45 = vadd.f32 %v10664_v23, %v10799_v11  ;;  %v10873_v23 = vadd.f32 %v10672_v43, %v10808_v39  ;;  %v10887_v43 = vadd.f32 %v10676_v59, %v10799_v11 }
 0x546   :  { %11834 = vst [vmem:[#allocation68_spill] sm:$0xff] %v10846_v40  ;;  %7828 = vpow2.f32 %v6724_v58  ;;  %v6725_v30 = vmul.f32 -1.442695, %v5066_v44  ;;  %v5070_v19 = vadd.f32 %v5069_v10, %v10788_v18  ;;  %v10902_v59 = vadd.f32 %v10682_v28, %v10811_v63 }
 0x547   :  { %v4561_v40 = vpop.f32.mrf.mxu0  ;;  %v5071_v15 = vpop.f32.mrf.mxu1  ;;  %v10915_v28 = vadd.f32 %v10688_v14, %v10805_v32  ;;  %v10926_v14 = vadd.f32 %v10692_v31, %v10811_v63 }
 0x548   :  { %7830 = vpow2.f32 %v6725_v30  ;;  %v6729_v58 = vmul.f32 -1.442695, %v5070_v19  ;;  %v5072_v44 = vadd.f32 %v5071_v15, %v10796_v13  ;;  %11839 = vst [vmem:[#allocation36_spill] sm:$0xff] %v10902_v59  ;;  %v10919_v30 = vadd.f32 %v10690_v47, %v10808_v39 }
 0x549   :  { %v10875_v40 = vpop.f32.mrf.mxu0  ;;  %v5073_v26 = vpop.f32.mrf.mxu1 }
 0x54a   :  { %11837 = vst [vmem:[#allocation79_spill] sm:$0xff] %v10875_v40  ;;  %7832 = vpow2.f32 %v6729_v58  ;;  %v6730_v19 = vmul.f32 -1.442695, %v5072_v44  ;;  %v5074_v15 = vadd.f32 %v5073_v26, %v10788_v18  ;;  %v10891_v58 = vadd.f32 %v10678_v2, %v10805_v32 }
 0x54b   :  { %v4564_v10 = vpop.f32.mrf.mxu0  ;;  %v5075_v40 = vpop.f32.mrf.mxu1 }
 0x54c   :  { %7834 = vpow2.f32 %v6730_v19  ;;  %v6734_v26 = vmul.f32 -1.442695, %v5074_v15  ;;  %v5076_v44 = vadd.f32 %v5075_v40, %v10796_v13  ;;  %v10908_v19 = vadd.f32 %v10686_v27, %v10799_v11 }
 0x54d   :  { %v10904_v10 = vpop.f32.mrf.mxu0  ;;  %v5079_v2 = vpop.f32.mrf.mxu1 }
 0x54e   :  { %11840 = vst [vmem:[#allocation30_spill] sm:$0xff] %v10904_v10  ;;  %7836 = vpow2.f32 %v6734_v26  ;;  %v6735_v40 = vmul.f32 -1.442695, %v5076_v44  ;;  %v5080_v15 = vadd.f32 %v5079_v2, %v10788_v18 }
 0x54f   :  { %v7825_v4 = vpop.eup %7824  ;;  %v4569_v10 = vpop.f32.mrf.mxu0 }
 0x550   :  { %v5081_v27 = vpop.f32.mrf.mxu1  ;;  %v5668_v44 = vadd.f32 1.0, %v7825_v4  ;;  %7838 = vpow2.f32 %v6735_v40  ;;  %v6739_v2 = vmul.f32 -1.442695, %v5080_v15 }
 0x551   :  { %v7827_v41 = vpop.eup %7826  ;;  %v5082_v37 = vadd.f32 %v5081_v27, %v10796_v13  ;;  %v10929_v47 = vpop.f32.mrf.mxu0  ;;  %v10937_v27 = vadd.f32 %v10694_v57, %v10799_v11 }
 0x552   :  { %11841 = vst [vmem:[#allocation69_spill] sm:$0xff] %v10929_v47  ;;  %v5083_v10 = vpop.f32.mrf.mxu1  ;;  %7840 = vrcp.f32 %v5668_v44  ;;  %v5669_v4 = vadd.f32 1.0, %v7827_v41  ;;  %v10958_v41 = vrot.slane %v10777_v16, %v11833_v21  ;;  %v10971_v21 = vadd.f32 %v10702_v53, %v10799_v11 }
 0x553   :  { %v5084_v40 = vadd.f32 %v5083_v10, %v10788_v18  ;;  %v7829_v15 = vpop.eup %7828  ;;  %7842 = vpow2.f32 %v6739_v2  ;;  %v6740_v24 = vmul.f32 -1.442695, %v5082_v37  ;;  %v4572_v31 = vpop.f32.mrf.mxu0  ;;  %v10942_v10 = vadd.f32 %v10696_v17, %v10805_v32 }
 0x554   :  { %v5085_v59 = vpop.f32.mrf.mxu1  ;;  %7844 = vrcp.f32 %v5669_v4  ;;  %v5673_v47 = vadd.f32 1.0, %v7829_v15  ;;  %v10950_v4 = vrot.slane %v10777_v16, %v11830_v48  ;;  %v10954_v15 = vadd.f32 %v10698_v50, %v10808_v39 }
 0x555   :  { %v6744_v12 = vmul.f32 -1.442695, %v5084_v40  ;;  %v7831_v44 = vpop.eup %7830  ;;  %7846 = vpow2.f32 %v6740_v24  ;;  %v5086_v2 = vadd.f32 %v5085_v59, %v10796_v13  ;;  %v10945_v37 = vpop.f32.mrf.mxu0  ;;  %v10964_v50 = vadd.f32 %v10700_v60, %v10811_v63 }
 0x556   :  { %11842 = vst [vmem:[#allocation34_spill] sm:$0xff] %v10945_v37  ;;  %v5089_v31 = vpop.f32.mrf.mxu1  ;;  %7848 = vrcp.f32 %v5673_v47  ;;  %v5674_v26 = vadd.f32 1.0, %v7831_v44  ;;  %v10977_v60 = vadd.f32 %v10704_v22, %v10805_v32 }
 0x557   :  { %v5090_v57 = vadd.f32 %v5089_v31, %v10788_v18  ;;  %v7833_v40 = vpop.eup %7832  ;;  %7850 = vpow2.f32 %v6744_v12  ;;  %v6745_v17 = vmul.f32 -1.442695, %v5086_v2  ;;  %v4577_v24 = vpop.f32.mrf.mxu0  ;;  %11843 = vst [vmem:[#allocation33_spill] sm:$0xff] %v10964_v50 }
 0x558   :  { %v5091_v59 = vpop.f32.mrf.mxu1  ;;  %7852 = vrcp.f32 %v5674_v26  ;;  %v5678_v44 = vadd.f32 1.0, %v7833_v40  ;;  %11845 = vst [vmem:[#allocation70_spill] sm:$0xff] %v10977_v60 }
 0x559   :  { %v6749_v31 = vmul.f32 -1.442695, %v5090_v57  ;;  %v7835_v48 = vpop.eup %7834  ;;  %7854 = vpow2.f32 %v6745_v17  ;;  %v5092_v12 = vadd.f32 %v5091_v59, %v10796_v13  ;;  %v10967_v2 = vpop.f32.mrf.mxu0 }
 0x55a   :  { %11844 = vst [vmem:[#allocation35_spill] sm:$0xff] %v10967_v2  ;;  %v5093_v24 = vpop.f32.mrf.mxu1  ;;  %7856 = vrcp.f32 %v5678_v44  ;;  %v5679_v26 = vadd.f32 1.0, %v7835_v48  ;;  %v10981_v2 = vadd.f32 %v10706_v61, %v10808_v39 }
 0x55b   :  { %v5094_v57 = vadd.f32 %v5093_v24, %v10788_v18  ;;  %v7837_v40 = vpop.eup %7836  ;;  %7858 = vpow2.f32 %v6749_v31  ;;  %v6750_v17 = vmul.f32 -1.442695, %v5092_v12  ;;  %v4580_v59 = vpop.f32.mrf.mxu0  ;;  %v10989_v31 = vrot.slane %v10777_v16, %v11831_v8 }
 0x55c   :  { %v5095_v47 = vpop.f32.mrf.mxu1  ;;  %7860 = vrcp.f32 %v5679_v26  ;;  %v5683_v53 = vadd.f32 1.0, %v7837_v40 }
 0x55d   :  { %v6754_v44 = vmul.f32 -1.442695, %v5094_v57  ;;  %v7839_v48 = vpop.eup %7838  ;;  %7862 = vpow2.f32 %v6750_v17  ;;  %v5096_v35 = vadd.f32 %v5095_v47, %v10796_v13  ;;  %v10985_v37 = vpop.f32.mrf.mxu0  ;;  %v10996_v17 = vadd.f32 %v10708_v42, %v10811_v63 }
 0x55e   :  { %11846 = vst [vmem:[#allocation37_spill] sm:$0xff] %v10985_v37  ;;  %v5099_v22 = vpop.f32.mrf.mxu1  ;;  %7864 = vrcp.f32 %v5683_v53  ;;  %v5684_v61 = vadd.f32 1.0, %v7839_v48 }
 0x55f   :  { %v5100_v26 = vadd.f32 %v5099_v22, %v10788_v18  ;;  %v7841_v57 = vpop.eup %7840  ;;  %7866 = vpow2.f32 %v6754_v44  ;;  %v6755_v47 = vmul.f32 -1.442695, %v5096_v35  ;;  %v4585_v59 = vpop.f32.mrf.mxu0  ;;  %v11002_v22 = vadd.f32 %v10710_v20, %v10799_v11 }
 0x560   :  { %v5101_v24 = vpop.f32.mrf.mxu1  ;;  %v7843_v37 = vpop.eup %7842  ;;  %7868 = vrcp.f32 %v5684_v61  ;;  %v11848_v35 = vmax.f32 %v10816_v36, 0.0  ;;  %v11010_v61 = vadd.f32 %v10712_v49, %v10805_v32  ;;  %v11015_v20 = vadd.f32 %v10714_v0, %v10808_v39 }
 0x561   :  { %v6759_v16 = vmul.f32 -1.442695, %v5100_v26  ;;  %v5102_v53 = vadd.f32 %v5101_v24, %v10796_v13  ;;  %v7845_v48 = vpop.eup %7844  ;;  %v5688_v40 = vadd.f32 1.0, %v7843_v37  ;;  %7870 = vpow2.f32 %v6755_v47  ;;  %v11004_v42 = vpop.f32.mrf.mxu0 }
 0x562   :  { %11847 = vst [vmem:[#allocation38_spill] sm:$0xff] %v11004_v42  ;;  %v5103_v44 = vpop.f32.mrf.mxu1  ;;  %v5908_v59 = vmul.f32 %v7841_v57, %v11848_v35  ;;  %v7847_v12 = vpop.eup %7846  ;;  %v11849_v36 = vmax.f32 %v10827_v46, 0.0  ;;  %v11021_v49 = vadd.f32 %v10718_v25, %v10799_v11  ;;  %v11851_v46 = vmax.f32 %v10837_v55, 0.0 }
 0x563   :  { %7872 = vpow2.f32 %v6759_v16  ;;  %v6760_v24 = vmul.f32 -1.442695, %v5102_v53  ;;  %v5104_v26 = vadd.f32 %v5103_v44, %v10788_v18  ;;  %v7849_v8 = vpop.eup %7848  ;;  %v5689_v37 = vadd.f32 1.0, %v7847_v12  ;;  %v4588_v47 = vpop.f32.mrf.mxu0 }
 0x564   :  { %7874 = vrcp.f32 %v5688_v40  ;;  %v5105_v42 = vpop.f32.mrf.mxu1  ;;  %v5909_v57 = vmul.f32 %v7845_v48, %v11849_v36  ;;  %v7851_v35 = vpop.eup %7850  ;;  %v5913_v48 = vmul.f32 %v7849_v8, %v11851_v46 }
 0x565   :  { %7876 = vpow2.f32 %v6760_v24  ;;  %v6764_v16 = vmul.f32 -1.442695, %v5104_v26  ;;  %v5106_v53 = vadd.f32 %v5105_v42, %v10796_v13  ;;  %v7853_v44 = vpop.eup %7852  ;;  %v5693_v0 = vadd.f32 1.0, %v7851_v35  ;;  %v11024_v60 = vpop.f32.mrf.mxu0 }
 0x566   :  { %7878 = vrcp.f32 %v5689_v37  ;;  %11850 = vst [vmem:[#allocation72_spill] sm:$0xff] %v11024_v60  ;;  %v5109_v12 = vpop.f32.mrf.mxu1  ;;  %v11026_v40 = vadd.f32 %v5909_v57, %v5908_v59  ;;  %v7855_v47 = vpop.eup %7854  ;;  %v11852_v59 = vmax.f32 %v10850_v52, 0.0 }
 0x567   :  { %7880 = vpow2.f32 %v6764_v16  ;;  %v6765_v25 = vmul.f32 -1.442695, %v5106_v53  ;;  %v5110_v24 = vadd.f32 %v5109_v12, %v10788_v18  ;;  %v7857_v26 = vpop.eup %7856  ;;  %v5694_v37 = vadd.f32 1.0, %v7855_v47  ;;  %v4593_v35 = vpop.f32.mrf.mxu0 }
 0x568   :  { %7882 = vrcp.f32 %v5693_v0  ;;  %v5111_v60 = vpop.f32.mrf.mxu1  ;;  %v5914_v57 = vmul.f32 %v7853_v44, %v11852_v59  ;;  %v7859_v50 = vpop.eup %7858  ;;  %v11853_v0 = vmax.f32 %v10861_v45, 0.0  ;;  %v11854_v45 = vmax.f32 %v10873_v23, 0.0 }
 0x569   :  { %7884 = vpow2.f32 %v6765_v25  ;;  %v6769_v8 = vmul.f32 -1.442695, %v5110_v24  ;;  %v5112_v16 = vadd.f32 %v5111_v60, %v10796_v13  ;;  %v7861_v53 = vpop.eup %7860  ;;  %v5698_v12 = vadd.f32 1.0, %v7859_v50  ;;  %v4594_v46 = vpop.f32.mrf.mxu0 }
 0x56a   :  { %7886 = vrcp.f32 %v5694_v37  ;;  %v5113_v36 = vpop.f32.mrf.mxu1  ;;  %v11037_v42 = vadd.f32 %v5914_v57, %v5913_v48  ;;  %v5918_v47 = vmul.f32 %v7857_v26, %v11853_v0  ;;  %v7863_v35 = vpop.eup %7862  ;;  %v11042_v44 = vadd.f32 %v4594_v46, %v10844_v9 }
 0x56b   :  { %7888 = vpow2.f32 %v6769_v8  ;;  %v6770_v52 = vmul.f32 -1.442695, %v5112_v16  ;;  %v5114_v25 = vadd.f32 %v5113_v36, %v10788_v18  ;;  %v7865_v24 = vpop.eup %7864  ;;  %v11047_v60 = vadd.f32 %v10722_v34, %v10808_v39  ;;  %v4596_v48 = vpop.f32.mrf.mxu0 }
 0x56c   :  { %7890 = vrcp.f32 %v5698_v12  ;;  %v5699_v50 = vadd.f32 1.0, %v7863_v35  ;;  %v5115_v37 = vpop.f32.mrf.mxu1  ;;  %v5919_v26 = vmul.f32 %v7861_v53, %v11854_v45  ;;  %v7867_v59 = vpop.eup %7866  ;;  %v11053_v57 = vadd.f32 %v10726_v38, %v10799_v11 }
 0x56d   :  { %7892 = vpow2.f32 %v6770_v52  ;;  %v6774_v8 = vmul.f32 -1.442695, %v5114_v25  ;;  %v5116_v36 = vadd.f32 %v5115_v37, %v10796_v13  ;;  %v7869_v16 = vpop.eup %7868  ;;  %v5703_v34 = vadd.f32 1.0, %v7867_v59  ;;  %v4599_v46 = vpop.f32.mrf.mxu0 }
 0x56e   :  { %7894 = vrcp.f32 %v5699_v50  ;;  %v5119_v12 = vpop.f32.mrf.mxu1  ;;  %v11056_v0 = vadd.f32 %v5919_v26, %v5918_v47  ;;  %v11855_v35 = vmax.f32 %v10887_v43, 0.0  ;;  %v7871_v53 = vpop.eup %7870  ;;  %v11061_v38 = vadd.f32 %v4599_v46, %v10844_v9 }
 0x56f   :  { %7896 = vpow2.f32 %v6774_v8  ;;  %v6775_v48 = vmul.f32 -1.442695, %v5116_v36  ;;  %v5120_v52 = vadd.f32 %v5119_v12, %v10788_v18  ;;  %v5704_v50 = vadd.f32 1.0, %v7871_v53  ;;  %v4601_v45 = vpop.f32.mrf.mxu0 }
 0x570   :  { %v5923_v23 = vmul.f32 %v7865_v24, %v11855_v35  ;;  %v7873_v25 = vpop.eup %7872  ;;  %7898 = vrcp.f32 %v5703_v34  ;;  %v5121_v59 = vpop.f32.mrf.mxu1  ;;  %v11856_v47 = vmax.f32 %v10898_v1, 0.0  ;;  %v11857_v34 = vmax.f32 %v10908_v19, 0.0 }
 0x571   :  { %v7875_v43 = vpop.eup %7874  ;;  %v5708_v8 = vadd.f32 1.0, %v7873_v25  ;;  %7900 = vpow2.f32 %v6775_v48  ;;  %v6779_v36 = vmul.f32 -1.442695, %v5120_v52  ;;  %v5122_v12 = vadd.f32 %v5121_v59, %v10796_v13  ;;  %v4602_v35 = vpop.f32.mrf.mxu0 }
 0x572   :  { %v5924_v26 = vmul.f32 %v7869_v16, %v11856_v47  ;;  %v7877_v46 = vpop.eup %7876  ;;  %7902 = vrcp.f32 %v5704_v50  ;;  %v5123_v55 = vpop.f32.mrf.mxu1  ;;  %v5928_v53 = vmul.f32 %v7875_v43, %v11857_v34  ;;  %v11074_v16 = vadd.f32 %v4602_v35, %v10844_v9 }
 0x573   :  { %v7879_v45 = vpop.eup %7878  ;;  %7904 = vrcp.f32 %v5708_v8  ;;  %v5709_v1 = vadd.f32 1.0, %v7877_v46  ;;  %v5124_v48 = vadd.f32 %v5123_v55, %v10788_v18  ;;  %v11079_v25 = vadd.f32 %v10730_v7, %v10808_v39 }
 0x574   :  { %v11069_v37 = vadd.f32 %v5924_v26, %v5923_v23  ;;  %11858 = vst [vmem:[#allocation40_spill] sm:$0xff] %v11074_v16  ;;  %v7881_v52 = vpop.eup %7880  ;;  %7906 = vpow2.f32 %v6779_v36  ;;  %v6780_v50 = vmul.f32 -1.442695, %v5122_v12  ;;  %v4604_v23 = vpop.f32.mrf.mxu0  ;;  %v11859_v19 = vmax.f32 %v10919_v30, 0.0 }
 0x575   :  { %v5125_v59 = vpop.f32.mrf.mxu1  ;;  %v7883_v26 = vpop.eup %7882  ;;  %v11085_v43 = vadd.f32 %v10734_v6, %v10799_v11  ;;  %7908 = vrcp.f32 %v5709_v1  ;;  %v5713_v8 = vadd.f32 1.0, %v7881_v52  ;;  %v6784_v55 = vmul.f32 -1.442695, %v5124_v48 }
 0x576   :  { %v5929_v47 = vmul.f32 %v7879_v45, %v11859_v19  ;;  %v7885_v46 = vpop.eup %7884  ;;  %7910 = vpow2.f32 %v6780_v50  ;;  %v5126_v7 = vadd.f32 %v5125_v59, %v10796_v13  ;;  %v4607_v35 = vpop.f32.mrf.mxu0  ;;  %v11860_v34 = vmax.f32 %v10937_v27, 0.0 }
 0x577   :  { %v5129_v36 = vpop.f32.mrf.mxu1  ;;  %v7887_v45 = vpop.eup %7886  ;;  %7912 = vrcp.f32 %v5713_v8  ;;  %v5714_v23 = vadd.f32 1.0, %v7885_v46  ;;  %v11093_v6 = vadd.f32 %v4607_v35, %v10844_v9 }
 0x578   :  { %v11088_v12 = vadd.f32 %v5929_v47, %v5928_v53  ;;  %v5933_v30 = vmul.f32 %v7883_v26, %v11860_v34  ;;  %v5130_v1 = vadd.f32 %v5129_v36, %v10788_v18  ;;  %v7889_v48 = vpop.eup %7888  ;;  %7914 = vpow2.f32 %v6784_v55  ;;  %v4609_v59 = vpop.f32.mrf.mxu0 }
 0x579   :  { %11861 = vst [vmem:[#allocation43_spill] sm:$0xff] %v11093_v6  ;;  %v6785_v50 = vmul.f32 -1.442695, %v5126_v7  ;;  %v5131_v19 = vpop.f32.mrf.mxu1  ;;  %v11862_v53 = vmax.f32 %v10954_v15, 0.0  ;;  %v7891_v27 = vpop.eup %7890  ;;  %v5398_v26 = vmax.f32 %v11085_v43, 0.0  ;;  %7916 = vrcp.f32 %v5714_v23 }
 0x57a   :  { %v5718_v8 = vadd.f32 1.0, %v7889_v48  ;;  %v6789_v46 = vmul.f32 -1.442695, %v5130_v1  ;;  %v7893_v35 = vpop.eup %7892  ;;  %v5132_v36 = vadd.f32 %v5131_v19, %v10796_v13  ;;  %v4610_v34 = vpop.f32.mrf.mxu0  ;;  %v11863_v55 = vmax.f32 %v10971_v21, 0.0 }
 0x57b   :  { %v5934_v47 = vmul.f32 %v7887_v45, %v11862_v53  ;;  %7918 = vpow2.f32 %v6785_v50  ;;  %v5133_v24 = vpop.f32.mrf.mxu1  ;;  %v7895_v59 = vpop.eup %7894  ;;  %v5719_v15 = vadd.f32 1.0, %v7893_v35  ;;  %v11106_v45 = vadd.f32 %v4610_v34, %v10844_v9 }
 0x57c   :  { %v5938_v7 = vmul.f32 %v7891_v27, %v11863_v55  ;;  %7920 = vrcp.f32 %v5718_v8  ;;  %v5134_v23 = vadd.f32 %v5133_v24, %v10788_v18  ;;  %v7897_v1 = vpop.eup %7896  ;;  %v11111_v48 = vadd.f32 %v10738_v56, %v10808_v39 }
 0x57d   :  { %v11101_v52 = vadd.f32 %v5934_v47, %v5933_v30  ;;  %11864 = vst [vmem:[#allocation42_spill] sm:$0xff] %v11106_v45  ;;  %7922 = vpow2.f32 %v6789_v46  ;;  %v6790_v50 = vmul.f32 -1.442695, %v5132_v36  ;;  %v4612_v30 = vpop.f32.mrf.mxu0  ;;  %v5135_v19 = vpop.f32.mrf.mxu1  ;;  %v11865_v21 = vmax.f32 %v10981_v2, 0.0 }
 0x57e   :  { %v7899_v47 = vpop.eup %7898  ;;  %v11117_v27 = vadd.f32 %v10742_v33, %v10799_v11  ;;  %7924 = vrcp.f32 %v5719_v15  ;;  %v5723_v8 = vadd.f32 1.0, %v7897_v1  ;;  %v6794_v18 = vmul.f32 -1.442695, %v5134_v23 }
 0x57f   :  { %v5939_v53 = vmul.f32 %v7895_v59, %v11865_v21  ;;  %v7901_v24 = vpop.eup %7900  ;;  %7926 = vpow2.f32 %v6790_v50  ;;  %v5136_v56 = vadd.f32 %v5135_v19, %v10796_v13  ;;  %v5172_v35 = vpop.f32.mrf.mxu0  ;;  %v11866_v34 = vmax.f32 %v11002_v22, 0.0 }
 0x580   :  { %v5285_v46 = vpop.f32.mrf.mxu1  ;;  %v7903_v55 = vpop.eup %7902  ;;  %7928 = vrcp.f32 %v5723_v8  ;;  %v5724_v59 = vadd.f32 1.0, %v7901_v24  ;;  %v5173_v33 = vadd.f32 %v5172_v35, %v10950_v4  ;;  %v11128_v23 = vadd.f32 %v10746_v3, %v10808_v39 }
 0x581   :  { %v11120_v36 = vadd.f32 %v5939_v53, %v5938_v7  ;;  %v5943_v2 = vmul.f32 %v7899_v47, %v11866_v34  ;;  %v5286_v15 = vadd.f32 %v5285_v46, %v10958_v41  ;;  %v7905_v1 = vpop.eup %7904  ;;  %7930 = vpow2.f32 %v6794_v18  ;;  %v5174_v50 = vpop.f32.mrf.mxu0 }
 0x582   :  { %v6795_v13 = vmul.f32 -1.442695, %v5136_v56  ;;  %v5287_v7 = vpop.f32.mrf.mxu1  ;;  %v11867_v30 = vmax.f32 %v11015_v20, 0.0  ;;  %v7907_v19 = vpop.eup %7906  ;;  %7932 = vrcp.f32 %v5724_v59  ;;  %v6721_v21 = vmul.f32 -1.442695, %v5173_v33 }
 0x583   :  { %v6723_v53 = vmul.f32 -1.442695, %v5286_v15  ;;  %v5175_v47 = vadd.f32 %v5174_v50, %v10989_v31  ;;  %v7909_v8 = vpop.eup %7908  ;;  %v5728_v24 = vadd.f32 1.0, %v7907_v19  ;;  %v5176_v35 = vpop.f32.mrf.mxu0  ;;  %v11868_v18 = vmax.f32 %v11021_v49, 0.0 }
 0x584   :  { %v5944_v22 = vmul.f32 %v7903_v55, %v11867_v30  ;;  %7934 = vpow2.f32 %v6795_v13  ;;  %v5288_v46 = vpop.f32.mrf.mxu1  ;;  %v7911_v34 = vpop.eup %7910  ;;  %v5177_v55 = vadd.f32 %v5176_v35, %v10950_v4  ;;  %v5399_v15 = vmax.f32 %v11111_v48, 0.0 }
 0x585   :  { %v5948_v56 = vmul.f32 %v7905_v1, %v11868_v18  ;;  %7936 = vpow2.f32 %v6721_v21  ;;  %v6722_v20 = vmul.f32 -1.442695, %v5175_v47  ;;  %v5289_v59 = vadd.f32 %v5288_v46, %v10958_v41  ;;  %v7913_v33 = vpop.eup %7912  ;;  %v5178_v13 = vpop.f32.mrf.mxu0 }
 0x586   :  { %v11133_v3 = vadd.f32 %v5944_v22, %v5943_v2  ;;  %7938 = vrcp.f32 %v5728_v24  ;;  %v5729_v50 = vadd.f32 1.0, %v7911_v34  ;;  %v5290_v7 = vpop.f32.mrf.mxu1  ;;  %v11869_v2 = vmax.f32 %v11047_v60, 0.0  ;;  %v7915_v22 = vpop.eup %7914 }
 0x587   :  { %v5403_v49 = vmax.f32 %v11117_v27, 0.0  ;;  %7940 = vpow2.f32 %v6723_v53  ;;  %v6726_v1 = vmul.f32 -1.442695, %v5177_v55  ;;  %v5179_v19 = vadd.f32 %v5178_v13, %v10989_v31  ;;  %v7917_v21 = vpop.eup %7916  ;;  %v5182_v35 = vpop.f32.mrf.mxu0 }
 0x588   :  { %v5949_v30 = vmul.f32 %v7909_v8, %v11869_v2  ;;  %7942 = vrcp.f32 %v5729_v50  ;;  %v5733_v47 = vadd.f32 1.0, %v7915_v22  ;;  %v5293_v46 = vpop.f32.mrf.mxu1  ;;  %v11870_v24 = vmax.f32 %v11053_v57, 0.0  ;;  %v7919_v34 = vpop.eup %7918 }
 0x589   :  { %v5404_v60 = vmax.f32 %v11128_v23, 0.0  ;;  %7944 = vpow2.f32 %v6722_v20  ;;  %v6728_v8 = vmul.f32 -1.442695, %v5289_v59  ;;  %v5183_v27 = vadd.f32 %v5182_v35, %v10950_v4  ;;  %v7921_v53 = vpop.eup %7920  ;;  %v5184_v13 = vpop.f32.mrf.mxu0  ;;  %v11872_v35 = vld [vmem:[#allocation63_spill] sm:$0xff] }
 0x58a   :  { %v11144_v48 = vadd.f32 %v5949_v30, %v5948_v56  ;;  %v5953_v18 = vmul.f32 %v7913_v33, %v11870_v24  ;;  %v11152_v55 = vadd.f32 %v10750_v5, %v10799_v11  ;;  %7946 = vrcp.f32 %v5733_v47  ;;  %v5295_v56 = vpop.f32.mrf.mxu1  ;;  %v7923_v33 = vpop.eup %7922 }
 0x58b   :  { %v5734_v50 = vadd.f32 1.0, %v7919_v34  ;;  %v11871_v7 = vmax.f32 %v11079_v25, 0.0  ;;  %v11158_v23 = vadd.f32 %v10754_v29, %v10808_v39  ;;  %7948 = vpow2.f32 %v6726_v1  ;;  %v7925_v2 = vpop.eup %7924  ;;  %v5186_v30 = vpop.f32.mrf.mxu0 }
 0x58c   :  { %v6727_v20 = vmul.f32 -1.442695, %v5179_v19  ;;  %v5294_v59 = vadd.f32 %v5293_v46, %v10958_v41  ;;  %v5738_v5 = vadd.f32 1.0, %v7923_v33  ;;  %v5296_v22 = vpop.f32.mrf.mxu1  ;;  %v5958_v25 = vmul.f32 %v7921_v53, %v5398_v26 }
 0x58d   :  { %v5954_v57 = vmul.f32 %v7917_v21, %v11871_v7  ;;  %7950 = vrcp.f32 %v5734_v50  ;;  %v7927_v21 = vpop.eup %7926  ;;  %v11167_v24 = vadd.f32 %v11872_v35, %v10799_v11  ;;  %v6731_v29 = vmul.f32 -1.442695, %v5183_v27  ;;  %v5188_v50 = vpop.f32.mrf.mxu0 }
 0x58e   :  { %7952 = vpow2.f32 %v6728_v8  ;;  %v5185_v1 = vadd.f32 %v5184_v13, %v10989_v31  ;;  %v7929_v19 = vpop.eup %7928  ;;  %v5408_v46 = vmax.f32 %v11152_v55, 0.0  ;;  %v5739_v34 = vadd.f32 1.0, %v7927_v21 }
 0x58f   :  { %v11161_v47 = vadd.f32 %v5954_v57, %v5953_v18  ;;  %7954 = vrcp.f32 %v5738_v5  ;;  %v5298_v18 = vpop.f32.mrf.mxu1  ;;  %v5959_v56 = vmul.f32 %v7925_v2, %v5399_v15  ;;  %v7931_v7 = vpop.eup %7930  ;;  %v5409_v43 = vmax.f32 %v11158_v23, 0.0  ;;  %v11873_v15 = vld [vmem:[#allocation64_spill] sm:$0xff] }
 0x590   :  { %7956 = vpow2.f32 %v6727_v20  ;;  %v6733_v26 = vmul.f32 -1.442695, %v5294_v59  ;;  %v5187_v53 = vadd.f32 %v5186_v30, %v10950_v4  ;;  %v7933_v57 = vpop.eup %7932  ;;  %v5743_v8 = vadd.f32 1.0, %v7931_v7  ;;  %v5192_v27 = vpop.f32.mrf.mxu0 }
 0x591   :  { %7958 = vrcp.f32 %v5739_v34  ;;  %v5301_v13 = vpop.f32.mrf.mxu1  ;;  %v11173_v33 = vadd.f32 %v5959_v56, %v5958_v25  ;;  %v5963_v55 = vmul.f32 %v7929_v19, %v5403_v49  ;;  %v7935_v5 = vpop.eup %7934  ;;  %v5413_v21 = vmax.f32 %v11167_v24, 0.0  ;;  %v11874_v25 = vld [vmem:[#allocation66_spill] sm:$0xff] }
 0x592   :  { %v4392_v2 = vadd.f32 %v11873_v15, %v10808_v39  ;;  %7960 = vpow2.f32 %v6731_v29  ;;  %v6732_v23 = vmul.f32 -1.442695, %v5185_v1  ;;  %v7937_v20 = vpop.eup %7936  ;;  %v5744_v59 = vadd.f32 1.0, %v7935_v5  ;;  %v5194_v35 = vpop.f32.mrf.mxu0 }
 0x593   :  { %7962 = vrcp.f32 %v5743_v8  ;;  %v5297_v30 = vadd.f32 %v5296_v22, %v10958_v41  ;;  %v5303_v34 = vpop.f32.mrf.mxu1  ;;  %v5964_v18 = vmul.f32 %v7933_v57, %v5404_v60  ;;  %v7939_v7 = vpop.eup %7938  ;;  %v4396_v49 = vadd.f32 %v11874_v25, %v10799_v11  ;;  %v11875_v60 = vld [vmem:[#allocation31_spill] sm:$0xff] }
 0x594   :  { %v5670_v19 = vadd.f32 1.0, %v7937_v20  ;;  %7964 = vpow2.f32 %v6733_v26  ;;  %v6736_v24 = vmul.f32 -1.442695, %v5187_v53  ;;  %v7941_v56 = vpop.eup %7940  ;;  %v5189_v29 = vadd.f32 %v5188_v50, %v10989_v31  ;;  %v5196_v1 = vpop.f32.mrf.mxu0 }
 0x595   :  { %7966 = vrcp.f32 %v5744_v59  ;;  %v5304_v15 = vpop.f32.mrf.mxu1  ;;  %v11182_v8 = vadd.f32 %v5964_v18, %v5963_v55  ;;  %v5968_v5 = vmul.f32 %v7939_v7, %v5408_v46  ;;  %v7943_v22 = vpop.eup %7942  ;;  %v5414_v45 = vmax.f32 %v4392_v2, 0.0 }
 0x596   :  { %v4398_v57 = vadd.f32 %v11875_v60, %v10808_v39  ;;  %7968 = vrcp.f32 %v5670_v19  ;;  %v5672_v34 = vadd.f32 1.0, %v7941_v56  ;;  %v7945_v25 = vpop.eup %7944  ;;  %v6738_v26 = vmul.f32 -1.442695, %v5297_v30  ;;  %v5198_v20 = vpop.f32.mrf.mxu0  ;;  %v11876_v60 = vld [vmem:[#allocation67_spill] sm:$0xff] }
 0x597   :  { %7970 = vpow2.f32 %v6732_v23  ;;  %v5193_v53 = vadd.f32 %v5192_v27, %v10950_v4  ;;  %v5306_v59 = vpop.f32.mrf.mxu1  ;;  %v5969_v50 = vmul.f32 %v7943_v22, %v5409_v43  ;;  %v7947_v6 = vpop.eup %7946  ;;  %v5418_v16 = vmax.f32 %v4396_v49, 0.0 }
 0x598   :  { %7972 = vrcp.f32 %v5672_v34  ;;  %v5671_v55 = vadd.f32 1.0, %v7945_v25  ;;  %v5302_v46 = vadd.f32 %v5301_v13, %v10958_v41  ;;  %v7949_v2 = vpop.eup %7948  ;;  %v6737_v18 = vmul.f32 -1.442695, %v5189_v29  ;;  %v5202_v7 = vpop.f32.mrf.mxu0 }
 0x599   :  { %7974 = vpow2.f32 %v6736_v24  ;;  %v11188_v19 = vpop.f32.mrf.mxu1  ;;  %v11190_v56 = vadd.f32 %v5969_v50, %v5968_v5  ;;  %v5973_v23 = vmul.f32 %v7947_v6, %v5413_v21  ;;  %v5419_v27 = vmax.f32 %v4398_v57, 0.0  ;;  %v11877_v5 = vld [vmem:[#allocation39_spill] sm:$0xff] }
 0x59a   :  { %v7951_v30 = vpop.eup %7950  ;;  %v4400_v43 = vadd.f32 %v11876_v60, %v10799_v11  ;;  %7976 = vrcp.f32 %v5671_v55  ;;  %v5675_v49 = vadd.f32 1.0, %v7949_v2  ;;  %v6741_v34 = vmul.f32 -1.442695, %v5193_v53  ;;  %v11195_v24 = vpop.f32.mrf.mxu0 }
 0x59b   :  { %v7953_v22 = vpop.eup %7952  ;;  %7978 = vpow2.f32 %v6738_v26  ;;  %v5195_v13 = vadd.f32 %v5194_v35, %v10989_v31  ;;  %v5311_v29 = vpop.f32.mrf.mxu1  ;;  %v5974_v25 = vmul.f32 %v7951_v30, %v5414_v45  ;;  %v4402_v6 = vadd.f32 %v11877_v5, %v10808_v39  ;;  %v11879_v45 = vld [vmem:[#allocation47_spill] sm:$0xff] }
 0x59c   :  { %v7955_v59 = vpop.eup %7954  ;;  %7980 = vrcp.f32 %v5675_v49  ;;  %v5677_v21 = vadd.f32 1.0, %v7953_v22  ;;  %v6743_v57 = vmul.f32 -1.442695, %v5302_v46  ;;  %v5197_v11 = vadd.f32 %v5196_v1, %v10950_v4  ;;  %v11200_v55 = vpop.f32.mrf.mxu0 }
 0x59d   :  { %v7957_v50 = vpop.eup %7956  ;;  %7982 = vpow2.f32 %v6737_v18  ;;  %v11202_v26 = vpop.f32.mrf.mxu1  ;;  %v11204_v35 = vadd.f32 %v5974_v25, %v5973_v23  ;;  %v5978_v53 = vmul.f32 %v7955_v59, %v5418_v16  ;;  %v11208_v30 = vadd.f32 %v11879_v45, %v10811_v63 }
 0x59e   :  { %v7959_v2 = vpop.eup %7958  ;;  %7984 = vrcp.f32 %v5677_v21  ;;  %v5676_v39 = vadd.f32 1.0, %v7957_v50  ;;  %v5305_v46 = vadd.f32 %v5304_v15, %v10958_v41  ;;  %v5423_v18 = vmax.f32 %v4400_v43, 0.0  ;;  %v11211_v49 = vpop.f32.mrf.mxu0 }
 0x59f   :  { %11878 = vst [vmem:[#allocation44_spill] sm:$0xff] %v11204_v35  ;;  %v7961_v60 = vpop.eup %7960  ;;  %7986 = vpow2.f32 %v6741_v34  ;;  %v6742_v1 = vmul.f32 -1.442695, %v5195_v13  ;;  %v5314_v22 = vpop.f32.mrf.mxu1  ;;  %v5979_v29 = vmul.f32 %v7959_v2, %v5419_v27  ;;  %v5424_v25 = vmax.f32 %v4402_v6, 0.0 }
 0x5a0   :  { %v7963_v23 = vpop.eup %7962  ;;  %7988 = vrcp.f32 %v5676_v39  ;;  %v5680_v16 = vadd.f32 1.0, %v7961_v60  ;;  %v5199_v59 = vadd.f32 %v5198_v20, %v10989_v31  ;;  %v6746_v21 = vmul.f32 -1.442695, %v5197_v11  ;;  %v11214_v50 = vpop.f32.mrf.mxu0  ;;  %v11881_v20 = vld [vmem:[#allocation75_spill] sm:$0xff] }
 0x5a1   :  { %v7965_v5 = vpop.eup %7964  ;;  %7990 = vpow2.f32 %v6743_v57  ;;  %v11216_v15 = vpop.f32.mrf.mxu1  ;;  %v11218_v43 = vadd.f32 %v5979_v29, %v5978_v53  ;;  %v5983_v34 = vmul.f32 %v7963_v23, %v5423_v18  ;;  %v6748_v27 = vmul.f32 -1.442695, %v5305_v46 }
 0x5a2   :  { %v7967_v13 = vpop.eup %7966  ;;  %7992 = vrcp.f32 %v5680_v16  ;;  %v5682_v45 = vadd.f32 1.0, %v7965_v5  ;;  %v5203_v6 = vadd.f32 %v5202_v7, %v10950_v4  ;;  %v4552_v57 = vadd.f32 %v11881_v20, %v10844_v9  ;;  %v11224_v11 = vpop.f32.mrf.mxu0 }
 0x5a3   :  { %11880 = vst [vmem:[#allocation74_spill] sm:$0xff] %v11218_v43  ;;  %v7969_v2 = vpop.eup %7968  ;;  %7994 = vpow2.f32 %v6742_v1  ;;  %v5319_v60 = vpop.f32.mrf.mxu1  ;;  %v5984_v22 = vmul.f32 %v7967_v13, %v5424_v25  ;;  %v6747_v29 = vmul.f32 -1.442695, %v5199_v59  ;;  %v5310_v46 = vadd.f32 %v11188_v19, %v10958_v41 }
 0x5a4   :  { %v7971_v53 = vpop.eup %7970  ;;  %7996 = vrcp.f32 %v5682_v45  ;;  %v11229_v16 = vpop.f32.mrf.mxu0  ;;  %v11882_v1 = vmax.f32 %v10823_v51, 0.0  ;;  %v6751_v59 = vmul.f32 -1.442695, %v5203_v6  ;;  %v5205_v19 = vadd.f32 %v11195_v24, %v10989_v31  ;;  %v11884_v51 = vld [vmem:[#allocation81_spill] sm:$0xff] }
 0x5a5   :  { %v7973_v7 = vpop.eup %7972  ;;  %v5681_v23 = vadd.f32 1.0, %v7971_v53  ;;  %7998 = vpow2.f32 %v6746_v21  ;;  %v11231_v5 = vpop.f32.mrf.mxu1  ;;  %v11235_v60 = vadd.f32 %v5984_v22, %v5983_v34  ;;  %v5352_v53 = vmax.f32 %v4552_v57, 0.0  ;;  %v11885_v22 = vld [vmem:[#allocation49_spill] sm:$0xff] }
 0x5a6   :  { %v5910_v20 = vmul.f32 %v7969_v2, %v11882_v1  ;;  %v7975_v25 = vpop.eup %7974  ;;  %8000 = vpow2.f32 %v6748_v27  ;;  %v4555_v34 = vadd.f32 %v11884_v51, %v10844_v9  ;;  %v6753_v2 = vmul.f32 -1.442695, %v5310_v46 }
 0x5a7   :  { %11883 = vst [vmem:[#allocation26_spill] sm:$0xff] %v11235_v60  ;;  %v7977_v45 = vpop.eup %7976  ;;  %8002 = vrcp.f32 %v5681_v23  ;;  %v5685_v21 = vadd.f32 1.0, %v7975_v25  ;;  %v5322_v18 = vpop.f32.mrf.mxu1  ;;  %v5207_v27 = vadd.f32 %v11200_v55, %v10950_v4  ;;  %v11247_v24 = vadd.f32 %v11885_v22, %v10805_v32 }
 0x5a8   :  { %v6004_v39 = vadd.f32 %v11026_v40, %v5910_v20  ;;  %v7979_v43 = vpop.eup %7978  ;;  %8004 = vpow2.f32 %v6747_v29  ;;  %v11249_v23 = vpop.f32.mrf.mxu0  ;;  %v11886_v40 = vmax.f32 %v10831_v62, 0.0  ;;  %v6752_v29 = vmul.f32 -1.442695, %v5205_v19 }
 0x5a9   :  { %v7981_v6 = vpop.eup %7980  ;;  %8006 = vrcp.f32 %v5685_v21  ;;  %v5687_v57 = vadd.f32 1.0, %v7979_v43  ;;  %v11251_v18 = vpop.f32.mrf.mxu1  ;;  %v5313_v55 = vadd.f32 %v11202_v26, %v10958_v41  ;;  %v5912_v46 = vmul.f32 %v7973_v7, %v5352_v53 }
 0x5aa   :  { %v5911_v1 = vmul.f32 %v7977_v45, %v11886_v40  ;;  %v7983_v20 = vpop.eup %7982  ;;  %8008 = vpow2.f32 %v6751_v59  ;;  %v11887_v43 = vmax.f32 %v10841_v54, 0.0  ;;  %v5357_v35 = vmax.f32 %v4555_v34, 0.0  ;;  %v11888_v45 = vld [vmem:[#allocation68_spill] sm:$0xff]  ;;  %v11263_v53 = vpop.f32.mrf.mxu0  ;;  %v11889_v40 = vld [vmem:[#allocation82_spill] sm:$0xff] }
 0x5ab   :  { %v7985_v25 = vpop.eup %7984  ;;  %8010 = vrcp.f32 %v5687_v57  ;;  %v5686_v51 = vadd.f32 1.0, %v7983_v20  ;;  %v5327_v22 = vpop.f32.mrf.mxu1  ;;  %v6756_v62 = vmul.f32 -1.442695, %v5207_v27  ;;  %v5209_v59 = vadd.f32 %v11211_v49, %v10989_v31 }
 0x5ac   :  { %v6020_v21 = vadd.f32 %v6004_v39, %v5911_v1  ;;  %v5915_v13 = vmul.f32 %v7981_v6, %v11887_v43  ;;  %v7987_v60 = vpop.eup %7986  ;;  %8012 = vpow2.f32 %v6753_v2  ;;  %v4560_v26 = vadd.f32 %v11888_v45, %v10844_v9 }
 0x5ad   :  { %v7989_v19 = vpop.eup %7988  ;;  %8014 = vrcp.f32 %v5686_v51  ;;  %v5690_v7 = vadd.f32 1.0, %v7987_v60  ;;  %v11267_v39 = vpop.f32.mrf.mxu1  ;;  %v6758_v34 = vmul.f32 -1.442695, %v5313_v55  ;;  %v5213_v2 = vadd.f32 %v11214_v50, %v10950_v4 }
 0x5ae   :  { %v11265_v57 = vadd.f32 %v6020_v21, %v5912_v46  ;;  %v7991_v54 = vpop.eup %7990  ;;  %8016 = vpow2.f32 %v6752_v29  ;;  %v5318_v49 = vadd.f32 %v11216_v15, %v10958_v41  ;;  %v11890_v1 = vmax.f32 %v11889_v40, 0.0  ;;  %v11280_v21 = vpop.f32.mrf.mxu0 }
 0x5af   :  { %v7993_v27 = vpop.eup %7992  ;;  %8018 = vrcp.f32 %v5690_v7  ;;  %v5692_v6 = vadd.f32 1.0, %v7991_v54  ;;  %v5330_v60 = vpop.f32.mrf.mxu1  ;;  %v6005_v46 = vadd.f32 %v11037_v42, %v5915_v13  ;;  %v6757_v55 = vmul.f32 -1.442695, %v5209_v59  ;;  %v11891_v7 = vld [vmem:[#allocation78_spill] sm:$0xff] }
 0x5b0   :  { %6052 = vrot.lane.b32.xlu0 %v11265_v57, %s8283_s22  ;;  %v5916_v20 = vmul.f32 %v7989_v19, %v11890_v1  ;;  %v7995_v29 = vpop.eup %7994  ;;  %8020 = vpow2.f32 %v6756_v62  ;;  %v5215_v50 = vadd.f32 %v11224_v11, %v10989_v31  ;;  %v5917_v51 = vmul.f32 %v7985_v25, %v5357_v35  ;;  %v11893_v62 = vld [vmem:[#allocation79_spill] sm:$0xff] }
 0x5b1   :  { %v7997_v15 = vpop.eup %7996  ;;  %8022 = vrcp.f32 %v5692_v6  ;;  %v5691_v22 = vadd.f32 1.0, %v7995_v29  ;;  %v11282_v45 = vpop.f32.mrf.mxu1  ;;  %v11892_v54 = vmax.f32 %v11891_v7, 0.0  ;;  %v5390_v42 = vmax.f32 %v11247_v24, 0.0  ;;  %v11918_v24 = vld [vmem:[#allocation38_spill] sm:$0xff] }
 0x5b2   :  { %v6021_v43 = vadd.f32 %v6005_v46, %v5916_v20  ;;  %v7999_v60 = vpop.eup %7998  ;;  %v5362_v13 = vmax.f32 %v4560_v26, 0.0  ;;  %v11289_v59 = vadd.f32 %v11893_v62, %v10844_v9  ;;  %8024 = vpow2.f32 %v6758_v34  ;;  %v11295_v7 = vpop.f32.mrf.mxu0  ;;  %v11894_v34 = vld [vmem:[#allocation51_spill] sm:$0xff] }
 0x5b3   :  { %v5920_v19 = vmul.f32 %v7993_v27, %v11892_v54  ;;  %v8001_v35 = vpop.eup %8000  ;;  %8026 = vrcp.f32 %v5691_v22  ;;  %v5695_v11 = vadd.f32 1.0, %v7999_v60  ;;  %v6761_v25 = vmul.f32 -1.442695, %v5213_v2  ;;  %v5335_v40 = vpop.f32.mrf.mxu1 }
 0x5b4   :  { %v11291_v6 = vadd.f32 %v6021_v43, %v5917_v51  ;;  %v8003_v1 = vpop.eup %8002  ;;  %v5697_v20 = vadd.f32 1.0, %v8001_v35  ;;  %8028 = vpow2.f32 %v6757_v55  ;;  %v6763_v27 = vmul.f32 -1.442695, %v5318_v49 }
 0x5b5   :  { %v6762_v46 = vmul.f32 -1.442695, %v5215_v50  ;;  %v8005_v29 = vpop.eup %8004  ;;  %8030 = vrcp.f32 %v5695_v11  ;;  %v5217_v26 = vadd.f32 %v11229_v16, %v10950_v4  ;;  %v11895_v2 = vmax.f32 %v11894_v34, 0.0  ;;  %v11302_v43 = vpop.f32.mrf.mxu1 }
 0x5b6   :  { %6054 = vrot.lane.b32.xlu1 %v11291_v6, %s8283_s22  ;;  %v6006_v22 = vadd.f32 %v11056_v0, %v5920_v19  ;;  %v8007_v55 = vpop.eup %8006  ;;  %8032 = vrcp.f32 %v5697_v20  ;;  %v5696_v49 = vadd.f32 1.0, %v8005_v29  ;;  %v5321_v50 = vadd.f32 %v11231_v5, %v10958_v41  ;;  %v11897_v19 = vld [vmem:[#allocation53_spill] sm:$0xff] }
 0x5b7   :  { %v5921_v51 = vmul.f32 %v8003_v1, %v11895_v2  ;;  %v5219_v16 = vadd.f32 %v11249_v23, %v10989_v31  ;;  %v8009_v54 = vpop.eup %8008  ;;  %8034 = vpow2.f32 %v6761_v25  ;;  %v5922_v60 = vmul.f32 %v7997_v15, %v5362_v13  ;;  %v5338_v35 = vpop.f32.mrf.mxu1  ;;  %v11898_v23 = vld [vmem:[#allocation30_spill] sm:$0xff] }
 0x5b8   :  { %v11896_v11 = vmax.f32 %v10891_v58, 0.0  ;;  %v8011_v0 = vpop.eup %8010  ;;  %v11312_v1 = vadd.f32 %v11897_v19, %v10811_v63  ;;  %v5367_v20 = vmax.f32 %v11289_v59, 0.0  ;;  %8036 = vrcp.f32 %v5696_v49  ;;  %v5228_v13 = vpop.f32.mrf.mxu0 }
 0x5b9   :  { %v6022_v62 = vadd.f32 %v6006_v22, %v5921_v51  ;;  %v5700_v5 = vadd.f32 1.0, %v8009_v54  ;;  %v8013_v29 = vpop.eup %8012  ;;  %v4568_v34 = vadd.f32 %v11898_v23, %v10844_v9  ;;  %8038 = vpow2.f32 %v6763_v27  ;;  %v11319_v58 = vpop.f32.mrf.mxu1  ;;  %v11899_v27 = vld [vmem:[#allocation36_spill] sm:$0xff] }
 0x5ba   :  { %v5925_v40 = vmul.f32 %v8007_v55, %v11896_v11  ;;  %v6766_v15 = vmul.f32 -1.442695, %v5217_v26  ;;  %v8015_v2 = vpop.eup %8014  ;;  %v5702_v51 = vadd.f32 1.0, %v8013_v29  ;;  %v6768_v22 = vmul.f32 -1.442695, %v5321_v50 }
 0x5bb   :  { %v11317_v25 = vadd.f32 %v6022_v62, %v5922_v60  ;;  %8040 = vrcp.f32 %v5700_v5  ;;  %v8017_v59 = vpop.eup %8016  ;;  %v6767_v49 = vmul.f32 -1.442695, %v5219_v16  ;;  %v5223_v54 = vadd.f32 %v11263_v53, %v10950_v4  ;;  %v5343_v62 = vpop.f32.mrf.mxu1 }
 0x5bc   :  { %v6007_v55 = vadd.f32 %v11069_v37, %v5925_v40  ;;  %8042 = vpow2.f32 %v6762_v46  ;;  %v11900_v26 = vmax.f32 %v11899_v27, 0.0  ;;  %v8019_v35 = vpop.eup %8018  ;;  %v5701_v11 = vadd.f32 1.0, %v8017_v59  ;;  %v5232_v16 = vpop.f32.mrf.mxu0 }
 0x5bd   :  { %6056 = vrot.lane.b32.xlu0 %v11317_v25, %s8283_s22  ;;  %8044 = vrcp.f32 %v5702_v51  ;;  %v5326_v50 = vadd.f32 %v11251_v18, %v10958_v41  ;;  %v5225_v37 = vadd.f32 %v11280_v21, %v10989_v31  ;;  %v8021_v46 = vpop.eup %8020  ;;  %v5927_v53 = vmul.f32 %v8011_v0, %v5367_v20  ;;  %v11334_v29 = vpop.f32.mrf.mxu1 }
 0x5be   :  { %v5926_v60 = vmul.f32 %v8015_v2, %v11900_v26  ;;  %8046 = vpow2.f32 %v6766_v15  ;;  %v11901_v19 = vmax.f32 %v10915_v28, 0.0  ;;  %v8023_v23 = vpop.eup %8022  ;;  %v5391_v2 = vmax.f32 %v11312_v1, 0.0  ;;  %v11902_v28 = vld [vmem:[#allocation69_spill] sm:$0xff] }
 0x5bf   :  { %v5372_v51 = vmax.f32 %v4568_v34, 0.0  ;;  %8048 = vrcp.f32 %v5701_v11  ;;  %v5705_v59 = vadd.f32 1.0, %v8021_v46  ;;  %v8025_v18 = vpop.eup %8024  ;;  %v6771_v27 = vmul.f32 -1.442695, %v5223_v54  ;;  %v5346_v0 = vpop.f32.mrf.mxu1 }
 0x5c0   :  { %v6023_v40 = vadd.f32 %v6007_v55, %v5926_v60  ;;  %v5930_v5 = vmul.f32 %v8019_v35, %v11901_v19  ;;  %8050 = vpow2.f32 %v6768_v22  ;;  %v8027_v20 = vpop.eup %8026  ;;  %v4571_v55 = vadd.f32 %v11902_v28, %v10844_v9  ;;  %v5234_v22 = vpop.f32.mrf.mxu0 }
 0x5c1   :  { %8052 = vrcp.f32 %v5705_v59  ;;  %v5707_v26 = vadd.f32 1.0, %v8025_v18  ;;  %v5227_v60 = vadd.f32 %v11295_v7, %v10950_v4  ;;  %v8029_v34 = vpop.eup %8028  ;;  %v6773_v62 = vmul.f32 -1.442695, %v5326_v50 }
 0x5c2   :  { %v11337_v21 = vadd.f32 %v6023_v40, %v5927_v53  ;;  %v6008_v15 = vadd.f32 %v11088_v12, %v5930_v5  ;;  %8054 = vpow2.f32 %v6767_v49  ;;  %v6772_v35 = vmul.f32 -1.442695, %v5225_v37  ;;  %v8031_v11 = vpop.eup %8030 }
 0x5c3   :  { %v11903_v12 = vmax.f32 %v10926_v14, 0.0  ;;  %8056 = vrcp.f32 %v5707_v26  ;;  %v5706_v46 = vadd.f32 1.0, %v8029_v34  ;;  %v5329_v53 = vadd.f32 %v11267_v39, %v10958_v41  ;;  %v8033_v7 = vpop.eup %8032  ;;  %v11905_v14 = vld [vmem:[#allocation34_spill] sm:$0xff]  ;;  %v5236_v39 = vpop.f32.mrf.mxu0 }
 0x5c4   :  { %6058 = vrot.lane.b32.xlu1 %v11337_v21, %s8283_s22  ;;  %v5229_v40 = vadd.f32 %v5228_v13, %v10989_v31  ;;  %8058 = vpow2.f32 %v6771_v27  ;;  %v5932_v49 = vmul.f32 %v8023_v23, %v5372_v51  ;;  %v11904_v37 = vmax.f32 %v10942_v10, 0.0  ;;  %v8035_v5 = vpop.eup %8034  ;;  %v11906_v27 = vld [vmem:[#allocation33_spill] sm:$0xff] }
 0x5c5   :  { %v5931_v54 = vmul.f32 %v8027_v20, %v11903_v12  ;;  %v5377_v59 = vmax.f32 %v4571_v55, 0.0  ;;  %v4576_v18 = vadd.f32 %v11905_v14, %v10844_v9  ;;  %8060 = vrcp.f32 %v5706_v46  ;;  %v8037_v20 = vpop.eup %8036 }
 0x5c6   :  { %v5935_v19 = vmul.f32 %v8031_v11, %v11904_v37  ;;  %v6776_v0 = vmul.f32 -1.442695, %v5227_v60  ;;  %v5710_v28 = vadd.f32 1.0, %v8035_v5  ;;  %8062 = vpow2.f32 %v6773_v62  ;;  %v8039_v23 = vpop.eup %8038  ;;  %v11908_v11 = vld [vmem:[#allocation70_spill] sm:$0xff] }
 0x5c7   :  { %v6024_v50 = vadd.f32 %v6008_v15, %v5931_v54  ;;  %8064 = vpow2.f32 %v6772_v35  ;;  %v6778_v51 = vmul.f32 -1.442695, %v5329_v53  ;;  %v5233_v10 = vadd.f32 %v5232_v16, %v10950_v4 }
 0x5c8   :  { %v6009_v13 = vadd.f32 %v11101_v52, %v5935_v19  ;;  %v11907_v15 = vmax.f32 %v11906_v27, 0.0  ;;  %v8041_v34 = vpop.eup %8040  ;;  %8066 = vrcp.f32 %v5710_v28  ;;  %v5712_v12 = vadd.f32 1.0, %v8039_v23 }
 0x5c9   :  { %v11355_v26 = vadd.f32 %v6024_v50, %v5932_v49  ;;  %v6777_v60 = vmul.f32 -1.442695, %v5229_v40  ;;  %v5334_v62 = vadd.f32 %v11282_v45, %v10958_v41  ;;  %v8043_v54 = vpop.eup %8042  ;;  %8068 = vpow2.f32 %v6776_v0  ;;  %v11910_v49 = vld [vmem:[#allocation54_spill] sm:$0xff]  ;;  %v5238_v45 = vpop.f32.mrf.mxu0  ;;  %v11911_v0 = vld [vmem:[#allocation55_spill] sm:$0xff] }
 0x5ca   :  { %v5936_v55 = vmul.f32 %v8037_v20, %v11907_v15  ;;  %v5937_v52 = vmul.f32 %v8033_v7, %v5377_v59  ;;  %v11909_v46 = vmax.f32 %v11908_v11, 0.0  ;;  %v8045_v53 = vpop.eup %8044  ;;  %v11369_v50 = vadd.f32 %v11910_v49, %v10805_v32  ;;  %v11913_v15 = vld [vmem:[#allocation35_spill] sm:$0xff] }
 0x5cb   :  { %6060 = vrot.lane.b32.xlu0 %v11355_v26, %s8283_s22  ;;  %8070 = vrcp.f32 %v5712_v12  ;;  %v5711_v40 = vadd.f32 1.0, %v8043_v54  ;;  %v5235_v37 = vadd.f32 %v5234_v22, %v10989_v31  ;;  %v8047_v19 = vpop.eup %8046  ;;  %v6781_v5 = vmul.f32 -1.442695, %v5233_v10  ;;  %v5242_v12 = vpop.f32.mrf.mxu0 }
 0x5cc   :  { %v6025_v35 = vadd.f32 %v6009_v13, %v5936_v55  ;;  %v5940_v16 = vmul.f32 %v8041_v34, %v11909_v46  ;;  %8072 = vpow2.f32 %v6778_v51  ;;  %v8049_v59 = vpop.eup %8048  ;;  %v11377_v20 = vadd.f32 %v11911_v0, %v10811_v63 }
 0x5cd   :  { %v5382_v28 = vmax.f32 %v4576_v18, 0.0  ;;  %8074 = vrcp.f32 %v5711_v40  ;;  %v5715_v13 = vadd.f32 1.0, %v8047_v19  ;;  %v8051_v23 = vpop.eup %8050  ;;  %v6783_v27 = vmul.f32 -1.442695, %v5334_v62 }
 0x5ce   :  { %v11372_v14 = vadd.f32 %v6025_v35, %v5937_v52  ;;  %v6010_v7 = vadd.f32 %v11120_v36, %v5940_v16  ;;  %8076 = vpow2.f32 %v6777_v60  ;;  %v5237_v22 = vadd.f32 %v5236_v39, %v10950_v4  ;;  %v8053_v36 = vpop.eup %8052 }
 0x5cf   :  { %v11912_v51 = vmax.f32 %v10996_v17, 0.0  ;;  %v4579_v55 = vadd.f32 %v11913_v15, %v10844_v9  ;;  %8078 = vrcp.f32 %v5715_v13  ;;  %v5717_v34 = vadd.f32 1.0, %v8051_v23  ;;  %v8055_v54 = vpop.eup %8054 }
 0x5d0   :  { %6062 = vrot.lane.b32.xlu1 %v11372_v14, %s8283_s22  ;;  %v6782_v18 = vmul.f32 -1.442695, %v5235_v37  ;;  %8080 = vpow2.f32 %v6781_v5  ;;  %v5942_v60 = vmul.f32 %v8045_v53, %v5382_v28  ;;  %v11914_v39 = vmax.f32 %v11010_v61, 0.0  ;;  %v8057_v35 = vpop.eup %8056  ;;  %v11915_v28 = vld [vmem:[#allocation37_spill] sm:$0xff] }
 0x5d1   :  { %v5941_v10 = vmul.f32 %v8049_v59, %v11912_v51  ;;  %v5395_v11 = vmax.f32 %v11369_v50, 0.0  ;;  %8082 = vrcp.f32 %v5717_v34  ;;  %v5716_v17 = vadd.f32 1.0, %v8055_v54  ;;  %v8059_v16 = vpop.eup %8058  ;;  %v11920_v50 = vld [vmem:[#allocation58_spill] sm:$0xff] }
 0x5d2   :  { %v5945_v52 = vmul.f32 %v8053_v36, %v11914_v39  ;;  %v5337_v46 = vadd.f32 %v11302_v43, %v10958_v41  ;;  %8084 = vpow2.f32 %v6783_v27  ;;  %v6786_v49 = vmul.f32 -1.442695, %v5237_v22  ;;  %v8061_v53 = vpop.eup %8060 }
 0x5d3   :  { %v6026_v62 = vadd.f32 %v6010_v7, %v5941_v10  ;;  %v5396_v19 = vmax.f32 %v11377_v20, 0.0  ;;  %8086 = vrcp.f32 %v5716_v17  ;;  %v5720_v61 = vadd.f32 1.0, %v8059_v16  ;;  %v5244_v7 = vpop.f32.mrf.mxu0  ;;  %v8063_v59 = vpop.eup %8062 }
 0x5d4   :  { %v6011_v37 = vadd.f32 %v11133_v3, %v5945_v52  ;;  %v5239_v5 = vadd.f32 %v5238_v45, %v10989_v31  ;;  %v5387_v0 = vmax.f32 %v4579_v55, 0.0  ;;  %v4584_v43 = vadd.f32 %v11915_v28, %v10844_v9  ;;  %v8065_v23 = vpop.eup %8064 }
 0x5d5   :  { %v11391_v40 = vadd.f32 %v6026_v62, %v5942_v60  ;;  %8088 = vpow2.f32 %v6782_v18  ;;  %v11916_v13 = vmax.f32 %v11208_v30, 0.0  ;;  %v5722_v27 = vadd.f32 1.0, %v8063_v59  ;;  %v8067_v45 = vpop.eup %8066  ;;  %v5246_v54 = vpop.f32.mrf.mxu0 }
 0x5d6   :  { %8090 = vrcp.f32 %v5720_v61  ;;  %v6788_v22 = vmul.f32 -1.442695, %v5337_v46  ;;  %v5243_v51 = vadd.f32 %v5242_v12, %v10950_v4  ;;  %v5721_v10 = vadd.f32 1.0, %v8065_v23  ;;  %v8069_v55 = vpop.eup %8068 }
 0x5d7   :  { %6064 = vrot.lane.b32.xlu0 %v11391_v40, %s8283_s22  ;;  %v5946_v3 = vmul.f32 %v8061_v53, %v11916_v13  ;;  %8092 = vpow2.f32 %v6786_v49  ;;  %v5947_v36 = vmul.f32 %v8057_v35, %v5387_v0  ;;  %v6787_v34 = vmul.f32 -1.442695, %v5239_v5  ;;  %v11917_v35 = vld [vmem:[#allocation27_spill] sm:$0xff] }
 0x5d8   :  { %8094 = vrcp.f32 %v5722_v27  ;;  %v5342_v18 = vadd.f32 %v11319_v58, %v10958_v41  ;;  %v5950_v30 = vmul.f32 %v8067_v45, %v5390_v42  ;;  %v8071_v60 = vpop.eup %8070  ;;  %v5725_v62 = vadd.f32 1.0, %v8069_v55 }
 0x5d9   :  { %v6027_v15 = vadd.f32 %v6011_v37, %v5946_v3  ;;  %8096 = vrcp.f32 %v5721_v10  ;;  %v5245_v12 = vadd.f32 %v5244_v7, %v10989_v31  ;;  %v8073_v52 = vpop.eup %8072  ;;  %v4489_v17 = vadd.f32 %v11917_v35, %v10805_v32  ;;  %v5248_v7 = vpop.f32.mrf.mxu0 }
 0x5da   :  { %8098 = vpow2.f32 %v6788_v22  ;;  %v6791_v46 = vmul.f32 -1.442695, %v5243_v51  ;;  %v6012_v16 = vadd.f32 %v11144_v48, %v5950_v30  ;;  %v8075_v58 = vpop.eup %8074  ;;  %v5392_v49 = vmax.f32 %v4584_v43, 0.0  ;;  %v11921_v30 = vld [vmem:[#allocation72_spill] sm:$0xff] }
 0x5db   :  { %v11408_v39 = vadd.f32 %v6027_v15, %v5947_v36  ;;  %v4587_v42 = vadd.f32 %v11918_v24, %v10844_v9  ;;  %8100 = vrcp.f32 %v5725_v62  ;;  %v5727_v37 = vadd.f32 1.0, %v8073_v52  ;;  %v8077_v53 = vpop.eup %8076  ;;  %v11919_v36 = vld [vmem:[#allocation57_spill] sm:$0xff] }
 0x5dc   :  { %8102 = vpow2.f32 %v6787_v34  ;;  %v6793_v61 = vmul.f32 -1.442695, %v5342_v18  ;;  %v5247_v5 = vadd.f32 %v5246_v54, %v10950_v4  ;;  %v5951_v59 = vmul.f32 %v8075_v58, %v5391_v2  ;;  %v8079_v48 = vpop.eup %8078 }
 0x5dd   :  { %6066 = vrot.lane.b32.xlu1 %v11408_v39, %s8283_s22  ;;  %8104 = vrcp.f32 %v5727_v37  ;;  %v5726_v0 = vadd.f32 1.0, %v8077_v53  ;;  %v6792_v28 = vmul.f32 -1.442695, %v5245_v12  ;;  %v5345_v43 = vadd.f32 %v11334_v29, %v10958_v41  ;;  %v8081_v13 = vpop.eup %8080  ;;  %v11922_v37 = vld [vmem:[#allocation59_spill] sm:$0xff] }
 0x5de   :  { %8106 = vpow2.f32 %v6791_v46  ;;  %v5952_v3 = vmul.f32 %v8071_v60, %v5392_v49  ;;  %v6028_v23 = vadd.f32 %v6012_v16, %v5951_v59  ;;  %v5955_v27 = vmul.f32 %v8079_v48, %v5395_v11  ;;  %v8083_v22 = vpop.eup %8082  ;;  %v11923_v59 = vld [vmem:[#allocation60_spill] sm:$0xff] }
 0x5df   :  { %v5400_v4 = vmax.f32 %v4489_v17, 0.0  ;;  %8108 = vrcp.f32 %v5726_v0  ;;  %v5730_v51 = vadd.f32 1.0, %v8081_v13  ;;  %v5249_v1 = vadd.f32 %v5248_v7, %v10989_v31  ;;  %v8085_v2 = vpop.eup %8084 }
 0x5e0   :  { %8110 = vpow2.f32 %v6793_v61  ;;  %v6796_v45 = vmul.f32 -1.442695, %v5247_v5  ;;  %v11425_v10 = vadd.f32 %v6028_v23, %v5952_v3  ;;  %v6013_v41 = vadd.f32 %v11161_v47, %v5955_v27  ;;  %v8087_v29 = vpop.eup %8086 }
 0x5e1   :  { %v4491_v15 = vadd.f32 %v11919_v36, %v10811_v63  ;;  %v4493_v11 = vadd.f32 %v11920_v50, %v10805_v32  ;;  %8112 = vrcp.f32 %v5730_v51  ;;  %v5732_v55 = vadd.f32 1.0, %v8085_v2 }
 0x5e2   :  { %v8089_v34 = vpop.eup %8088  ;;  %v5397_v18 = vmax.f32 %v4587_v42, 0.0  ;;  %8114 = vpow2.f32 %v6792_v28  ;;  %v6798_v31 = vmul.f32 -1.442695, %v5345_v43  ;;  %6068 = vrot.lane.b32.xlu0 %v11425_v10, %s8283_s22  ;;  %v5956_v54 = vmul.f32 %v8087_v29, %v5396_v19 }
 0x5e3   :  { %v8091_v47 = vpop.eup %8090  ;;  %v4592_v60 = vadd.f32 %v11921_v30, %v10844_v9  ;;  %8116 = vrcp.f32 %v5732_v55  ;;  %v5731_v62 = vadd.f32 1.0, %v8089_v34  ;;  %v6797_v12 = vmul.f32 -1.442695, %v5249_v1 }
 0x5e4   :  { %v8093_v52 = vpop.eup %8092  ;;  %8118 = vpow2.f32 %v6796_v45  ;;  %v5957_v35 = vmul.f32 %v8083_v22, %v5397_v18  ;;  %v6029_v17 = vadd.f32 %v6013_v41, %v5956_v54  ;;  %v5960_v46 = vmul.f32 %v8091_v47, %v5400_v4  ;;  %v11925_v18 = vld [vmem:[#allocation62_spill] sm:$0xff] }
 0x5e5   :  { %v8095_v16 = vpop.eup %8094  ;;  %v5401_v58 = vmax.f32 %v4491_v15, 0.0  ;;  %8120 = vrcp.f32 %v5731_v62  ;;  %v5735_v49 = vadd.f32 1.0, %v8093_v52  ;;  %v5405_v42 = vmax.f32 %v4493_v11, 0.0 }
 0x5e6   :  { %v8097_v24 = vpop.eup %8096  ;;  %8122 = vpow2.f32 %v6798_v31  ;;  %v11438_v20 = vadd.f32 %v6029_v17, %v5957_v35  ;;  %v6014_v19 = vadd.f32 %v11173_v33, %v5960_v46  ;;  %v4495_v53 = vadd.f32 %v11922_v37, %v10811_v63 }
 0x5e7   :  { %v8099_v9 = vpop.eup %8098  ;;  %v5402_v61 = vmax.f32 %v4592_v60, 0.0  ;;  %8124 = vrcp.f32 %v5735_v49  ;;  %v5961_v5 = vmul.f32 %v8097_v24, %v5401_v58  ;;  %v4499_v48 = vadd.f32 %v11923_v59, %v10805_v32 }
 0x5e8   :  { %v8101_v7 = vpop.eup %8100  ;;  %v5737_v0 = vadd.f32 1.0, %v8099_v9  ;;  %8126 = vpow2.f32 %v6797_v12  ;;  %6070 = vrot.lane.b32.xlu1 %v11438_v20, %s8283_s22  ;;  %v5407_v43 = vmax.f32 %v11042_v44, 0.0  ;;  %v5406_v4 = vmax.f32 %v4495_v53, 0.0  ;;  %v11924_v44 = vld [vmem:[#allocation61_spill] sm:$0xff] }
 0x5e9   :  { %v8103_v28 = vpop.eup %8102  ;;  %v5962_v33 = vmul.f32 %v8095_v16, %v5402_v61  ;;  %v6030_v13 = vadd.f32 %v6014_v19, %v5961_v5  ;;  %v5965_v3 = vmul.f32 %v8101_v7, %v5405_v42  ;;  %v5410_v36 = vmax.f32 %v4499_v48, 0.0  ;;  %v11926_v42 = vld [vmem:[#allocation65_spill] sm:$0xff]  ;;  %v11928_v7 = vld [vmem:[#allocation40_spill] sm:$0xff] }
 0x5ea   :  { %v8105_v23 = vpop.eup %8104  ;;  %8128 = vrcp.f32 %v5737_v0  ;;  %v5736_v27 = vadd.f32 1.0, %v8103_v28  ;;  %v4501_v15 = vadd.f32 %v11924_v44, %v10811_v63  ;;  %v4503_v31 = vadd.f32 %v11925_v18, %v10805_v32  ;;  %v11933_v18 = vld [vmem:[#allocation74_spill] sm:$0xff] }
 0x5eb   :  { %v8107_v22 = vpop.eup %8106  ;;  %v11448_v51 = vadd.f32 %v6030_v13, %v5962_v33  ;;  %v5967_v1 = vmul.f32 %v8105_v23, %v5407_v43  ;;  %v6015_v2 = vadd.f32 %v11182_v8, %v5965_v3  ;;  %v5412_v8 = vmax.f32 %v11061_v38, 0.0  ;;  %v11929_v43 = vld [vmem:[#allocation44_spill] sm:$0xff] }
 0x5ec   :  { %v8109_v45 = vpop.eup %8108  ;;  %8130 = vrcp.f32 %v5736_v27  ;;  %v5740_v41 = vadd.f32 1.0, %v8107_v22  ;;  %v5411_v12 = vmax.f32 %v4501_v15, 0.0  ;;  %v5415_v49 = vmax.f32 %v4503_v31, 0.0  ;;  %v11930_v22 = vld [vmem:[#allocation29_spill] sm:$0xff] }
 0x5ed   :  { %v8111_v29 = vpop.eup %8110  ;;  %6072 = vrot.lane.b32.xlu0 %v11448_v51, %s8283_s22  ;;  %v5966_v50 = vmul.f32 %v8109_v45, %v5406_v4  ;;  %v4505_v19 = vadd.f32 %v11926_v42, %v10811_v63  ;;  %v5417_v59 = vmax.f32 %v11928_v7, 0.0  ;;  %v4511_v4 = vadd.f32 %v11930_v22, %v10811_v63  ;;  %v11931_v45 = vld [vmem:[#allocation73_spill] sm:$0xff] }
 0x5ee   :  { %v8113_v11 = vpop.eup %8112  ;;  %8132 = vrcp.f32 %v5740_v41  ;;  %v5742_v55 = vadd.f32 1.0, %v8111_v29  ;;  %v4513_v41 = vadd.f32 %v11931_v45, %v10805_v32  ;;  %v11932_v29 = vld [vmem:[#allocation43_spill] sm:$0xff] }
 0x5ef   :  { %v8115_v34 = vpop.eup %8114  ;;  %v6031_v54 = vadd.f32 %v6015_v2, %v5966_v50  ;;  %v5970_v47 = vmul.f32 %v8113_v11, %v5410_v36  ;;  %v5416_v13 = vmax.f32 %v4505_v19, 0.0  ;;  %v5422_v36 = vmax.f32 %v11932_v29, 0.0 }
 0x5f0   :  { %v8117_v30 = vpop.eup %8116  ;;  %8134 = vrcp.f32 %v5742_v55  ;;  %v5741_v60 = vadd.f32 1.0, %v8115_v34  ;;  %v5421_v11 = vmax.f32 %v4511_v4, 0.0 }
 0x5f1   :  { %v8119_v62 = vpop.eup %8118  ;;  %v11458_v52 = vadd.f32 %v6031_v54, %v5967_v1  ;;  %v5972_v35 = vmul.f32 %v8117_v30, %v5412_v8  ;;  %v6016_v17 = vadd.f32 %v11190_v56, %v5970_v47  ;;  %v11927_v56 = vld [vmem:[#allocation71_spill] sm:$0xff]  ;;  %v5425_v54 = vmax.f32 %v4513_v41, 0.0  ;;  %v11934_v47 = vld [vmem:[#allocation80_spill] sm:$0xff] }
 0x5f2   :  { %v8121_v46 = vpop.eup %8120  ;;  %8136 = vrcp.f32 %v5741_v60  ;;  %v5745_v16 = vadd.f32 1.0, %v8119_v62  ;;  %v4509_v5 = vadd.f32 %v11927_v56, %v10805_v32  ;;  %v4515_v30 = vadd.f32 %v11934_v47, %v10811_v63  ;;  %v11935_v62 = vld [vmem:[#allocation42_spill] sm:$0xff] }
 0x5f3   :  { %v8123_v58 = vpop.eup %8122  ;;  %6074 = vrot.lane.b32.xlu1 %v11458_v52, %s8283_s22  ;;  %v5971_v38 = vmul.f32 %v8121_v46, %v5411_v12  ;;  %v5427_v12 = vmax.f32 %v11935_v62, 0.0 }
 0x5f4   :  { %v8125_v24 = vpop.eup %8124  ;;  %8138 = vrcp.f32 %v5745_v16  ;;  %v5747_v9 = vadd.f32 1.0, %v8123_v58  ;;  %v5420_v27 = vmax.f32 %v4509_v5, 0.0  ;;  %v5426_v16 = vmax.f32 %v4515_v30, 0.0 }
 0x5f5   :  { %v8127_v37 = vpop.eup %8126  ;;  %v6032_v53 = vadd.f32 %v6016_v17, %v5971_v38  ;;  %v5975_v61 = vmul.f32 %v8125_v24, %v5415_v49  ;;  %v11936_v38 = vld [vmem:[#allocation26_spill] sm:$0xff] }
 0x5f6   :  { %8140 = vrcp.f32 %v5747_v9  ;;  %v5746_v48 = vadd.f32 1.0, %v8127_v37 }
 0x5f7   :  { %v8129_v0 = vpop.eup %8128  ;;  %v11468_v28 = vadd.f32 %v6032_v53, %v5972_v35  ;;  %v6017_v33 = vadd.f32 %v11929_v43, %v5975_v61 }
 0x5f8   :  { %8142 = vrcp.f32 %v5746_v48  ;;  %v5977_v3 = vmul.f32 %v8129_v0, %v5417_v59 }
 0x5f9   :  { %v8131_v23 = vpop.eup %8130  ;;  %6076 = vrot.lane.b32.xlu0 %v11468_v28, %s8283_s22 }
 0x5fa   :  { %v5976_v1 = vmul.f32 %v8131_v23, %v5416_v13 }
 0x5fb   :  { %v8133_v2 = vpop.eup %8132 }
 0x5fc   :  { %v6033_v44 = vadd.f32 %v6017_v33, %v5976_v1  ;;  %v5980_v15 = vmul.f32 %v8133_v2, %v5420_v27 }
 0x5fd   :  { %v8135_v50 = vpop.eup %8134 }
 0x5fe   :  { %v11478_v55 = vadd.f32 %v6033_v44, %v5977_v3  ;;  %v5982_v34 = vmul.f32 %v8135_v50, %v5422_v36  ;;  %v6018_v31 = vadd.f32 %v11933_v18, %v5980_v15 }
 0x5ff   :  { %v8137_v8 = vpop.eup %8136 }
 0x600   :  { %6078 = vrot.lane.b32.xlu1 %v11478_v55, %s8283_s22  ;;  %v5981_v32 = vmul.f32 %v8137_v8, %v5421_v11 }
 0x601   :  { %v8139_v60 = vpop.eup %8138 }
 0x602   :  { %v6034_v35 = vadd.f32 %v6018_v31, %v5981_v32  ;;  %v5985_v17 = vmul.f32 %v8139_v60, %v5425_v54 }
 0x603   :  { %v8141_v46 = vpop.eup %8140 }
 0x604   :  { %v11486_v58 = vadd.f32 %v6034_v35, %v5982_v34  ;;  %v5987_v49 = vmul.f32 %v8141_v46, %v5427_v12  ;;  %v6019_v24 = vadd.f32 %v11936_v38, %v5985_v17 }
 0x605   :  { %v8143_v42 = vpop.eup %8142 }
 0x606   :  { %6080 = vrot.lane.b32.xlu0 %v11486_v58, %s8283_s22  ;;  %v5986_v63 = vmul.f32 %v8143_v42, %v5426_v16 }
 0x608   :  { %v6035_v19 = vadd.f32 %v6019_v24, %v5986_v63 }
 0x60a   :  { %v11491_v9 = vadd.f32 %v6035_v19, %v5987_v49 }
 0x60c   :  { %6082 = vrot.lane.b32.xlu1 %v11491_v9, %s8283_s22 }
 0x622   :  { %v6053_v37 = vpop.permute.xlu0 %6052 }
 0x623   :  { %v6084_v53 = vadd.f32 %v6053_v37, %v11265_v57 }
 0x625   :  { %vm6100_vm0 = vcmp.ge.f32.partialorder %v6084_v53, 0.0  ;;  %v6116_v61 = vmul.f32 0.01, %v6084_v53 }
 0x627   :  { %v6132_v56 = vsel %vm6100_vm0, %v6084_v53, %v6116_v61 }
 0x628   :  { %6148 = vst [vmem:[#allocation11] sm:$0xff] %v6132_v56  ;;  %v6055_v5 = vpop.permute.xlu1 %6054 }
 0x629   :  { %v6085_v7 = vadd.f32 %v6055_v5, %v11291_v6 }
 0x62b   :  { %vm6101_vm1 = vcmp.ge.f32.partialorder %v6085_v7, 0.0  ;;  %v6117_v59 = vmul.f32 0.01, %v6085_v7 }
 0x62d   :  { %v6133_v48 = vsel %vm6101_vm1, %v6085_v7, %v6117_v59 }
 0x62e   :  { %6149 = vst [vmem:[#allocation11 + $0x8] sm:$0xff] %v6133_v48 }
 0x62f   :  { %v6057_v0 = vpop.permute.xlu0 %6056 }
 0x630   :  { %v6086_v43 = vadd.f32 %v6057_v0, %v11317_v25 }
 0x632   :  { %vm6102_vm4 = vcmp.ge.f32.partialorder %v6086_v43, 0.0  ;;  %v6118_v33 = vmul.f32 0.01, %v6086_v43 }
 0x634   :  { %v6134_v13 = vsel %vm6102_vm4, %v6086_v43, %v6118_v33 }
 0x635   :  { %6150 = vst [vmem:[#allocation11 + $0x10] sm:$0xff] %v6134_v13 }
 0x636   :  { %v6059_v3 = vpop.permute.xlu1 %6058 }
 0x637   :  { %v6087_v57 = vadd.f32 %v6059_v3, %v11337_v21 }
 0x639   :  { %vm6103_vm5 = vcmp.ge.f32.partialorder %v6087_v57, 0.0  ;;  %v6119_v23 = vmul.f32 0.01, %v6087_v57 }
 0x63b   :  { %v6135_v27 = vsel %vm6103_vm5, %v6087_v57, %v6119_v23 }
 0x63c   :  { %6151 = vst [vmem:[#allocation11 + $0x18] sm:$0xff] %v6135_v27 }
 0x63d   :  { %v6061_v22 = vpop.permute.xlu0 %6060 }
 0x63e   :  { %v6088_v6 = vadd.f32 %v6061_v22, %v11355_v26 }
 0x640   :  { %vm6104_vm6 = vcmp.ge.f32.partialorder %v6088_v6, 0.0  ;;  %v6120_v4 = vmul.f32 0.01, %v6088_v6 }
 0x642   :  { %v6136_v1 = vsel %vm6104_vm6, %v6088_v6, %v6120_v4  ;;  %v6063_v2 = vpop.permute.xlu1 %6062 }
 0x643   :  { %6152 = vst [vmem:[#allocation11 + $0x20] sm:$0xff] %v6136_v1  ;;  %v6089_v25 = vadd.f32 %v6063_v2, %v11372_v14 }
 0x645   :  { %vm6105_vm7 = vcmp.ge.f32.partialorder %v6089_v25, 0.0  ;;  %v6121_v45 = vmul.f32 0.01, %v6089_v25 }
 0x647   :  { %v6137_v41 = vsel %vm6105_vm7, %v6089_v25, %v6121_v45 }
 0x648   :  { %6153 = vst [vmem:[#allocation11 + $0x28] sm:$0xff] %v6137_v41 }
 0x649   :  { %v6065_v29 = vpop.permute.xlu0 %6064 }
 0x64a   :  { %v6090_v21 = vadd.f32 %v6065_v29, %v11391_v40 }
 0x64c   :  { %vm6106_vm8 = vcmp.ge.f32.partialorder %v6090_v21, 0.0  ;;  %v6122_v36 = vmul.f32 0.01, %v6090_v21 }
 0x64e   :  { %v6138_v44 = vsel %vm6106_vm8, %v6090_v21, %v6122_v36 }
 0x64f   :  { %6154 = vst [vmem:[#allocation11 + $0x30] sm:$0xff] %v6138_v44  ;;  %v6067_v15 = vpop.permute.xlu1 %6066 }
 0x650   :  { %v6091_v26 = vadd.f32 %v6067_v15, %v11408_v39 }
 0x652   :  { %vm6107_vm9 = vcmp.ge.f32.partialorder %v6091_v26, 0.0  ;;  %v6123_v50 = vmul.f32 0.01, %v6091_v26 }
 0x654   :  { %v6139_v11 = vsel %vm6107_vm9, %v6091_v26, %v6123_v50  ;;  %v6069_v34 = vpop.permute.xlu0 %6068 }
 0x655   :  { %6155 = vst [vmem:[#allocation11 + $0x38] sm:$0xff] %v6139_v11  ;;  %v6092_v14 = vadd.f32 %v6069_v34, %v11425_v10 }
 0x657   :  { %vm6108_vm10 = vcmp.ge.f32.partialorder %v6092_v14, 0.0  ;;  %v6124_v18 = vmul.f32 0.01, %v6092_v14 }
 0x659   :  { %v6140_v31 = vsel %vm6108_vm10, %v6092_v14, %v6124_v18 }
 0x65a   :  { %6156 = vst [vmem:[#allocation11 + $0x40] sm:$0xff] %v6140_v31  ;;  %v6071_v8 = vpop.permute.xlu1 %6070 }
 0x65b   :  { %v6093_v40 = vadd.f32 %v6071_v8, %v11438_v20 }
 0x65d   :  { %vm6109_vm11 = vcmp.ge.f32.partialorder %v6093_v40, 0.0  ;;  %v6125_v54 = vmul.f32 0.01, %v6093_v40 }
 0x65f   :  { %v6141_v47 = vsel %vm6109_vm11, %v6093_v40, %v6125_v54  ;;  %v6073_v30 = vpop.permute.xlu0 %6072 }
 0x660   :  { %6157 = vst [vmem:[#allocation11 + $0x48] sm:$0xff] %v6141_v47  ;;  %v6094_v39 = vadd.f32 %v6073_v30, %v11448_v51 }
 0x662   :  { %vm6110_vm12 = vcmp.ge.f32.partialorder %v6094_v39, 0.0  ;;  %v6126_v32 = vmul.f32 0.01, %v6094_v39 }
 0x664   :  { %v6142_v60 = vsel %vm6110_vm12, %v6094_v39, %v6126_v32 }
 0x665   :  { %6158 = vst [vmem:[#allocation11 + $0x50] sm:$0xff] %v6142_v60  ;;  %v6075_v62 = vpop.permute.xlu1 %6074 }
 0x666   :  { %v6095_v10 = vadd.f32 %v6075_v62, %v11458_v52 }
 0x668   :  { %vm6111_vm13 = vcmp.ge.f32.partialorder %v6095_v10, 0.0  ;;  %v6127_v12 = vmul.f32 0.01, %v6095_v10 }
 0x66a   :  { %v6143_v35 = vsel %vm6111_vm13, %v6095_v10, %v6127_v12 }
 0x66b   :  { %6159 = vst [vmem:[#allocation11 + $0x58] sm:$0xff] %v6143_v35  ;;  %v6077_v17 = vpop.permute.xlu0 %6076 }
 0x66c   :  { %v6096_v20 = vadd.f32 %v6077_v17, %v11468_v28 }
 0x66e   :  { %vm6112_vm14 = vcmp.ge.f32.partialorder %v6096_v20, 0.0  ;;  %v6128_v46 = vmul.f32 0.01, %v6096_v20 }
 0x670   :  { %v6144_v16 = vsel %vm6112_vm14, %v6096_v20, %v6128_v46 }
 0x671   :  { %6160 = vst [vmem:[#allocation11 + $0x60] sm:$0xff] %v6144_v16 }
 0x672   :  { %v6079_v49 = vpop.permute.xlu1 %6078 }
 0x673   :  { %v6097_v51 = vadd.f32 %v6079_v49, %v11478_v55 }
 0x675   :  { %vm6113_vm15 = vcmp.ge.f32.partialorder %v6097_v51, 0.0  ;;  %v6129_v38 = vmul.f32 0.01, %v6097_v51 }
 0x677   :  { %v6145_v24 = vsel %vm6113_vm15, %v6097_v51, %v6129_v38 }
 0x678   :  { %6161 = vst [vmem:[#allocation11 + $0x68] sm:$0xff] %v6145_v24  ;;  %v6081_v42 = vpop.permute.xlu0 %6080 }
 0x679   :  { %v6098_v52 = vadd.f32 %v6081_v42, %v11486_v58 }
 0x67b   :  { %vm6114_vm2 = vcmp.ge.f32.partialorder %v6098_v52, 0.0  ;;  %v6130_v63 = vmul.f32 0.01, %v6098_v52 }
 0x67d   :  { %v6146_v19 = vsel %vm6114_vm2, %v6098_v52, %v6130_v63 }
 0x67e   :  { %6162 = vst [vmem:[#allocation11 + $0x70] sm:$0xff] %v6146_v19  ;;  %v6083_v37 = vpop.permute.xlu1 %6082 }
 0x67f   :  { %v6099_v28 = vadd.f32 %v6083_v37, %v11491_v9 }
 0x681   :  { %vm6115_vm3 = vcmp.ge.f32.partialorder %v6099_v28, 0.0  ;;  %v6131_v53 = vmul.f32 0.01, %v6099_v28 }
 0x683   :  { %v6147_v55 = vsel %vm6115_vm3, %v6099_v28, %v6131_v53 }
 0x684   :  { %6163 = vst [vmem:[#allocation11 + $0x78] sm:$0xff] %v6147_v55 }
 0x685   :  { %8255 = shalt.err (!%p8252_p1)
}
 0x686   :  { %6175 = dma.vmem_to_hbm [thread:$0]  %s6170_s16, 2048, %s11534_s17, [#allocation4], %s8273_s27, %s8273_s27, %s8274_s28  }
 0x687   :  { %8270 = dma.done.wait [#allocation4], 2048  }
 0x688   :  { %8271 = vsyncadd [#allocation4], 4294965248 }
 0x689   :  { %6179 = vsyncpa [#allocation3], 1 }
 0x68a   :  { %6180 = vsyncpa [#allocation6], 1 }
 0x68b   :  { %6181 = vsyncpa [#allocation9], 1 }
 0x68c   :  { %6182 = vsyncpa [#allocation4], 1 }

</bundles_post_ra>
